<compile_context>
chip_gen: v7x
topology: tpu7x:2x2x1
jax: 0.10.0
libtpu: 0.0.40
codegen_flags: <defaults>
</compile_context>

<pallas_src>
import functools

import numpy as np
import jax
import jax.numpy as jnp
from jax.experimental import pallas as pl
from jax.experimental.pallas import tpu as pltpu


# ----------------------------- config ("opt") -------------------------------
POSENC = True
POSENC_DEPTH = 8                       # L
BARF_C2F = (0.1, 0.5)                  # coarse-to-fine schedule
PROGRESS = 0.3                         # value of the learned `progress` parameter
HIDDEN = 256
INPUT_2D_DIM = 2 + 4 * POSENC_DEPTH if POSENC else 2   # = 34

_D_OUT_PAD = 128                       # lane-dense padded output (rgb = [:, :3])


def _round_up(x, m):
    return ((x + m - 1) // m) * m


# ------------------------ BARF coarse-to-fine weight -------------------------
def _barf_weight(depth, barf_c2f, progress):
    """Per-frequency weight (host-side numpy). Matches the PyTorch module."""
    if barf_c2f is None:
        return np.ones((depth,), np.float32)
    start, end = barf_c2f
    # TODO(synk): `progress` is treated as a host constant (the original module
    # reads it via .data); a traced/learned progress would need this weight
    # computed with jnp and passed as an extra kernel operand.
    if progress < start:
        alpha = 0.0
    elif progress < end:
        alpha = (progress - start) / (end - start) * depth
    else:
        alpha = float(depth)
    k = np.arange(depth, dtype=np.float32)
    return ((1.0 - np.cos(np.clip(alpha - k, 0.0, 1.0) * np.pi)) / 2.0).astype(np.float32)


# ------------------- fused-posenc constant table (5, d_in_pad) ---------------
def _encoding_constants(depth, barf_c2f, progress, posenc, d_in_pad):
    """Rows: [cvx, cvy, phase, colw, passv].

    In-kernel:  theta = x*cvx + y*cvy
                feat  = sin(theta + phase) * colw + theta * passv
    Column layout (matches the W0 row permutation in _pack_first_layer):
      0..L-1    sin(x*f_k)*w_k      L..2L-1   cos(x*f_k)*w_k
      2L..3L-1  sin(y*f_k)*w_k      3L..4L-1  cos(y*f_k)*w_k
      4L, 4L+1  raw x, y            rest      zero padding
    """
    cvx = np.zeros((d_in_pad,), np.float32)
    cvy = np.zeros((d_in_pad,), np.float32)
    phase = np.zeros((d_in_pad,), np.float32)
    colw = np.zeros((d_in_pad,), np.float32)
    passv = np.zeros((d_in_pad,), np.float32)
    if posenc:
        L = depth
        freq = (2.0 ** np.arange(L, dtype=np.float32)) * np.float32(np.pi)
        w = _barf_weight(L, barf_c2f, progress)
        cvx[0:L] = freq
        cvx[L:2 * L] = freq
        cvy[2 * L:3 * L] = freq
        cvy[3 * L:4 * L] = freq
        phase[L:2 * L] = np.float32(np.pi / 2.0)     # sin(t + pi/2) == cos(t)
        phase[3 * L:4 * L] = np.float32(np.pi / 2.0)
        colw[0:L] = w
        colw[L:2 * L] = w
        colw[2 * L:3 * L] = w
        colw[3 * L:4 * L] = w
        base = 4 * L
    else:
        base = 0
    cvx[base] = 1.0
    cvy[base + 1] = 1.0
    passv[base] = 1.0
    passv[base + 1] = 1.0
    return jnp.asarray(np.stack([cvx, cvy, phase, colw, passv]), jnp.float32)


def _pack_first_layer(w0, posenc, depth, d_in_pad):
    """Permute/zero-pad W0 rows so they match the kernel's feature column order."""
    H = w0.shape[1]
    w0p = jnp.zeros((d_in_pad, H), jnp.float32)
    if posenc:
        w0p = w0p.at[0:4 * depth].set(w0[2:2 + 4 * depth])   # enc rows (contiguous)
        w0p = w0p.at[4 * depth:4 * depth + 2].set(w0[0:2])   # raw x, y rows
    else:
        w0p = w0p.at[0:2].set(w0[0:2])
    return w0p


# ------------------------------ Pallas kernel --------------------------------
def _make_kernel(epi_dtype):
    def kernel(coord_ref, enc_ref,
               w0_ref, b0_ref, w1_ref, b1_ref, w2_ref, b2_ref,
               w3_ref, b3_ref, w4_ref, b4_ref, o_ref):
        coords = coord_ref[...]                      # (tm, 2) f32
        x = coords[:, 0:1]                           # (tm, 1)
        y = coords[:, 1:2]
        cvx = enc_ref[0:1, :]                        # (1, d_in_pad)
        cvy = enc_ref[1:2, :]
        phase = enc_ref[2:3, :]
        colw = enc_ref[3:4, :]
        passv = enc_ref[4:5, :]

        # Fused BARF positional encoding on the EUP (+ raw-coord passthrough).
        theta = x * cvx + y * cvy                    # (tm, d_in_pad) f32
        feat = jnp.sin(theta + phase) * colw + theta * passv
        h = feat.astype(jnp.bfloat16)

        # 4 x (Linear -> ReLU): bf16 MXU operands, f32 accumulation; epilogue
        # (bias + ReLU + cast) in epi_dtype (bf16 on v6e/v7x, f32 on v5e).
        for w_ref, b_ref in ((w0_ref, b0_ref), (w1_ref, b1_ref),
                             (w2_ref, b2_ref), (w3_ref, b3_ref)):
            acc = jnp.dot(h, w_ref[...], preferred_element_type=jnp.float32)
            h = jnp.maximum(acc.astype(epi_dtype) + b_ref[...], 0.0).astype(jnp.bfloat16)

        # Final Linear -> sigmoid, lane-dense bf16 store.
        acc = jnp.dot(h, w4_ref[...], preferred_element_type=jnp.float32) + b4_ref[...]
        o_ref[...] = jax.nn.sigmoid(acc).astype(o_ref.dtype)

    return kernel


# ------------------------------- tiling helpers ------------------------------
def _choose_row_tile(n, tm_req, *, min_steps=4, min_tile=512):
    """128-multiple row tile. Prefer >= min_steps grid steps (v7x: 2 TCs each keep
    >=2 steps of DMA/compute overlap) but never shrink below min_tile rows
    (per-step pipeline overhead ~0.35 us)."""
    n128 = _round_up(max(n, 1), 128)
    tm = min(_round_up(max(tm_req, 128), 128), n128)
    step_cap = (n128 // min_steps) // 128 * 128
    if step_cap >= min_tile:
        tm = min(tm, step_cap)
    return tm


def _supports_bf16_vpu():
    # v5e/v5p (and older) have no bf16 VALU: keep the per-layer epilogue in f32.
    try:
        kind = jax.devices()[0].device_kind.lower()
    except Exception:
        return True
    return not any(g in kind for g in ("v2", "v3", "v4", "v5"))


# ------------------------------ fused forward --------------------------------
def neural_image_function(coord_2d, params, *, posenc=POSENC, depth=POSENC_DEPTH,
                          barf_c2f=BARF_C2F, progress=PROGRESS,
                          tm=1024, bf16_epilogue=None):
    """coord_2d: [N, 2] float32. params: 5 x (W [in,out], b [1,out]). Returns [N, 3] f32."""
    N = coord_2d.shape[0]
    (w0, b0), (w1, b1), (w2, b2), (w3, b3), (w4, b4) = params
    H = w1.shape[0]
    D_out = w4.shape[1]
    d_in_pad = _round_up((4 * depth + 2) if posenc else 2, 64)

    if bf16_epilogue is None:
        bf16_epilogue = _supports_bf16_vpu()
    epi_dtype = jnp.bfloat16 if bf16_epilogue else jnp.float32

    tm_eff = _choose_row_tile(N, tm)
    n_pad = _round_up(max(N, 1), tm_eff)
    grid = (n_pad // tm_eff,)

    # TODO(synk): the (N, 2) coord array may be lane-padded by XLA's HBM layout;
    # packing coords lane-dense would shrink the input read further.
    coords = jnp.pad(coord_2d.astype(jnp.float32), ((0, n_pad - N), (0, 0)))
    enc_consts = _encoding_constants(depth, barf_c2f, progress, posenc, d_in_pad)

    # Weight packing / bf16 casts done once in the wrapper (not per grid step).
    w0p = _pack_first_layer(w0, posenc, depth, d_in_pad).astype(jnp.bfloat16)
    w1p = w1.astype(jnp.bfloat16)
    w2p = w2.astype(jnp.bfloat16)
    w3p = w3.astype(jnp.bfloat16)
    w4p = jnp.pad(w4, ((0, 0), (0, _D_OUT_PAD - D_out))).astype(jnp.bfloat16)
    b0p = b0.astype(epi_dtype)
    b1p = b1.astype(epi_dtype)
    b2p = b2.astype(epi_dtype)
    b3p = b3.astype(epi_dtype)
    b4p = jnp.pad(b4, ((0, 0), (0, _D_OUT_PAD - D_out))).astype(jnp.float32)

    def resident(shape):
        # Same full block every grid step -> stays VMEM-resident.
        # TODO(synk): pipeline_mode=pl.Buffered(1) would trim ~0.5 MiB of weight
        # double-buffering on v7x-sized VMEM; left at default for portability.
        return pl.BlockSpec(shape, lambda i: (0, 0))

    layer_flops = d_in_pad * H + 3 * H * H + H * _D_OUT_PAD
    cost = pl.CostEstimate(
        flops=2 * n_pad * layer_flops,
        transcendentals=n_pad * (d_in_pad + _D_OUT_PAD),          # sin + sigmoid
        bytes_accessed=(n_pad * 2 * 4                              # coords in
                        + n_pad * _D_OUT_PAD * 2                   # bf16 out
                        + 2 * layer_flops),                        # bf16 weights
    )

    out = pl.pallas_call(
        _make_kernel(epi_dtype),
        out_shape=jax.ShapeDtypeStruct((n_pad, _D_OUT_PAD), jnp.bfloat16),
        grid_spec=pltpu.PrefetchScalarGridSpec(
            num_scalar_prefetch=0,
            grid=grid,
            in_specs=[
                pl.BlockSpec((tm_eff, 2), lambda i: (i, 0)),       # coord tile
                resident(enc_consts.shape),
                resident(w0p.shape), resident(b0p.shape),
                resident(w1p.shape), resident(b1p.shape),
                resident(w2p.shape), resident(b2p.shape),
                resident(w3p.shape), resident(b3p.shape),
                resident(w4p.shape), resident(b4p.shape),
            ],
            out_specs=pl.BlockSpec((tm_eff, _D_OUT_PAD), lambda i: (i, 0)),
        ),
        compiler_params=pltpu.CompilerParams(
            dimension_semantics=("parallel",),
            vmem_limit_bytes=48 * 1024 * 1024,      # v7x-safe cap for large tm sweeps
        ),
        cost_estimate=cost,
    )(coords, enc_consts, w0p, b0p, w1p, b1p, w2p, b2p, w3p, b3p, w4p, b4p)

    return out[:N, :D_out].astype(jnp.float32)


# ----------------------- pure-JAX reference (un-fused) -----------------------
def positional_encoding(coord_2d, depth):
    freq = (2.0 ** jnp.arange(depth, dtype=jnp.float32)) * jnp.float32(np.pi)
    spectrum = coord_2d[..., None] * freq                        # [..., 2, L]
    enc = jnp.stack([jnp.sin(spectrum), jnp.cos(spectrum)], axis=-2)   # [..., 2, 2, L]
    return enc.reshape(*coord_2d.shape[:-1], -1)                 # [..., 4L]


def reference_forward(coord_2d, params, *, posenc=POSENC, depth=POSENC_DEPTH,
                      barf_c2f=BARF_C2F, progress=PROGRESS):
    if posenc:
        enc = positional_encoding(coord_2d, depth)
        if barf_c2f is not None:
            w = jnp.asarray(_barf_weight(depth, barf_c2f, progress))
            shape = enc.shape
            enc = (enc.reshape(-1, depth) * w).reshape(shape)
        feat = jnp.concatenate([coord_2d, enc], axis=-1)
    else:
        feat = coord_2d
    for li, (wt, bs) in enumerate(params):
        feat = feat @ wt + bs
        if li != len(params) - 1:
            feat = jnp.maximum(feat, 0.0)
    return jax.nn.sigmoid(feat)


# --------------------------- parameter construction --------------------------
def init_params(key):
    """Deterministic torch.nn.Linear-style init; layer 0 scaled per BARF."""
    dims = [(INPUT_2D_DIM, HIDDEN), (HIDDEN, HIDDEN), (HIDDEN, HIDDEN),
            (HIDDEN, HIDDEN), (HIDDEN, 3)]
    params = []
    for li, (k_in, k_out) in enumerate(dims):
        key, kw, kb = jax.random.split(key, 3)
        bound = 1.0 / np.sqrt(k_in)
        w = jax.random.uniform(kw, (k_in, k_out), jnp.float32, -bound, bound)
        b = jax.random.uniform(kb, (1, k_out), jnp.float32, -bound, bound)
        if BARF_C2F is not None and li == 0:
            scale = np.float32(np.sqrt(INPUT_2D_DIM / 2.0))
            w = w * scale
            b = b * scale
        params.append((w, b))
    return params


if __name__ == "__main__":
    key = jax.random.PRNGKey(0)
    key, kc = jax.random.split(key)

    # 16x16 image grid worth of (x, y) coordinates in [0, 1) -> N = 256 rows.
    N = 256
    coord_2d = jax.random.uniform(kc, (N, 2), jnp.float32)
    params = init_params(key)

    fwd = jax.jit(functools.partial(neural_image_function))
    rgb = jax.block_until_ready(fwd(coord_2d, params))

    ref = jax.block_until_ready(reference_forward(coord_2d, params))
    # bf16 matmul operands / epilogue / output store vs. pure-f32 reference:
    # post-sigmoid absolute error stays well below 5e-2.
    np.testing.assert_allclose(np.asarray(rgb), np.asarray(ref), rtol=0.0, atol=5e-2)

    assert rgb.shape == (N, 3) and rgb.dtype == jnp.float32
    print("KERNEL_OK")
</pallas_src>

<mosaic_0001>
module attributes {stable_mosaic.version = 11 : i64} {
  func.func @kernel(%arg0: i32, %arg1: memref<256x2xf32, #tpu.memory_space<vmem>>, %arg2: memref<5x64xf32, #tpu.memory_space<vmem>>, %arg3: memref<64x256xbf16, #tpu.memory_space<vmem>>, %arg4: memref<1x256xbf16, #tpu.memory_space<vmem>>, %arg5: memref<256x256xbf16, #tpu.memory_space<vmem>>, %arg6: memref<1x256xbf16, #tpu.memory_space<vmem>>, %arg7: memref<256x256xbf16, #tpu.memory_space<vmem>>, %arg8: memref<1x256xbf16, #tpu.memory_space<vmem>>, %arg9: memref<256x256xbf16, #tpu.memory_space<vmem>>, %arg10: memref<1x256xbf16, #tpu.memory_space<vmem>>, %arg11: memref<256x128xbf16, #tpu.memory_space<vmem>>, %arg12: memref<1x128xf32, #tpu.memory_space<vmem>>, %arg13: memref<256x128xbf16, #tpu.memory_space<vmem>>) attributes {dimension_semantics = [#tpu.dimension_semantics<parallel>], iteration_bounds = array<i64: 1>, scalar_prefetch = 0 : i64, scratch_operands = 0 : i64, tpu.core_type = #tpu.core_type<tc>, window_params = [{transform_indices = @transform_0, window_bounds = array<i64: 256, 2>}, {pipeline_mode = #tpu.pipeline_mode<synchronous>, transform_indices = @transform_1, window_bounds = array<i64: 5, 64>}, {pipeline_mode = #tpu.pipeline_mode<synchronous>, transform_indices = @transform_2, window_bounds = array<i64: 64, 256>}, {pipeline_mode = #tpu.pipeline_mode<synchronous>, transform_indices = @transform_3, window_bounds = array<i64: 1, 256>}, {pipeline_mode = #tpu.pipeline_mode<synchronous>, transform_indices = @transform_4, window_bounds = array<i64: 256, 256>}, {pipeline_mode = #tpu.pipeline_mode<synchronous>, transform_indices = @transform_5, window_bounds = array<i64: 1, 256>}, {pipeline_mode = #tpu.pipeline_mode<synchronous>, transform_indices = @transform_6, window_bounds = array<i64: 256, 256>}, {pipeline_mode = #tpu.pipeline_mode<synchronous>, transform_indices = @transform_7, window_bounds = array<i64: 1, 256>}, {pipeline_mode = #tpu.pipeline_mode<synchronous>, transform_indices = @transform_8, window_bounds = array<i64: 256, 256>}, {pipeline_mode = #tpu.pipeline_mode<synchronous>, transform_indices = @transform_9, window_bounds = array<i64: 1, 256>}, {pipeline_mode = #tpu.pipeline_mode<synchronous>, transform_indices = @transform_10, window_bounds = array<i64: 256, 128>}, {pipeline_mode = #tpu.pipeline_mode<synchronous>, transform_indices = @transform_11, window_bounds = array<i64: 1, 128>}, {transform_indices = @transform_12, window_bounds = array<i64: 256, 128>}]} {
    %c0 = arith.constant 0 : index
    %c0_0 = arith.constant 0 : index
    %0 = vector.load %arg1[%c0, %c0_0] : memref<256x2xf32, #tpu.memory_space<vmem>>, vector<256x2xf32>
    %1 = vector.extract_strided_slice %0 {offsets = [0, 0], sizes = [256, 1], strides = [1, 1]} : vector<256x2xf32> to vector<256x1xf32>
    %2 = vector.extract_strided_slice %0 {offsets = [0, 1], sizes = [256, 1], strides = [1, 1]} : vector<256x2xf32> to vector<256x1xf32>
    %c0_1 = arith.constant 0 : index
    %c0_2 = arith.constant 0 : index
    %3 = vector.load %arg2[%c0_1, %c0_2] : memref<5x64xf32, #tpu.memory_space<vmem>>, vector<1x64xf32>
    %c1 = arith.constant 1 : index
    %c0_3 = arith.constant 0 : index
    %4 = vector.load %arg2[%c1, %c0_3] : memref<5x64xf32, #tpu.memory_space<vmem>>, vector<1x64xf32>
    %c2 = arith.constant 2 : index
    %c0_4 = arith.constant 0 : index
    %5 = vector.load %arg2[%c2, %c0_4] : memref<5x64xf32, #tpu.memory_space<vmem>>, vector<1x64xf32>
    %c3 = arith.constant 3 : index
    %c0_5 = arith.constant 0 : index
    %6 = vector.load %arg2[%c3, %c0_5] : memref<5x64xf32, #tpu.memory_space<vmem>>, vector<1x64xf32>
    %c4 = arith.constant 4 : index
    %c0_6 = arith.constant 0 : index
    %7 = vector.load %arg2[%c4, %c0_6] : memref<5x64xf32, #tpu.memory_space<vmem>>, vector<1x64xf32>
    %8 = vector.broadcast %1 : vector<256x1xf32> to vector<256x64xf32>
    %9 = vector.broadcast %3 : vector<1x64xf32> to vector<256x64xf32>
    %10 = arith.mulf %8, %9 : vector<256x64xf32>
    %11 = vector.broadcast %2 : vector<256x1xf32> to vector<256x64xf32>
    %12 = vector.broadcast %4 : vector<1x64xf32> to vector<256x64xf32>
    %13 = arith.mulf %11, %12 : vector<256x64xf32>
    %14 = arith.addf %10, %13 : vector<256x64xf32>
    %15 = vector.broadcast %5 : vector<1x64xf32> to vector<256x64xf32>
    %16 = arith.addf %14, %15 : vector<256x64xf32>
    %17 = math.sin %16 : vector<256x64xf32>
    %18 = vector.broadcast %6 : vector<1x64xf32> to vector<256x64xf32>
    %19 = arith.mulf %17, %18 : vector<256x64xf32>
    %20 = vector.broadcast %7 : vector<1x64xf32> to vector<256x64xf32>
    %21 = arith.mulf %14, %20 : vector<256x64xf32>
    %22 = arith.addf %19, %21 : vector<256x64xf32>
    %23 = arith.truncf %22 : vector<256x64xf32> to vector<256x64xbf16>
    %c0_7 = arith.constant 0 : index
    %c0_8 = arith.constant 0 : index
    %24 = vector.load %arg3[%c0_7, %c0_8] : memref<64x256xbf16, #tpu.memory_space<vmem>>, vector<64x256xbf16>
    %cst = arith.constant dense<0.000000e+00> : vector<256x256xf32>
    %25 = tpu.matmul %23, %24, %cst {dimension_numbers = #tpu.dot_dimension_numbers<[1], [0], [0], [1], [0, 0, 1, 1], [], []>} : vector<256x64xbf16>, vector<64x256xbf16>, vector<256x256xf32> -> vector<256x256xf32>
    %26 = arith.truncf %25 : vector<256x256xf32> to vector<256x256xbf16>
    %c0_9 = arith.constant 0 : index
    %c0_10 = arith.constant 0 : index
    %27 = vector.load %arg4[%c0_9, %c0_10] : memref<1x256xbf16, #tpu.memory_space<vmem>>, vector<1x256xbf16>
    %28 = vector.broadcast %27 : vector<1x256xbf16> to vector<256x256xbf16>
    %29 = arith.addf %26, %28 : vector<256x256xbf16>
    %cst_11 = arith.constant 0.000000e+00 : bf16
    %30 = vector.broadcast %cst_11 : bf16 to vector<256x256xbf16>
    %31 = arith.maximumf %29, %30 : vector<256x256xbf16>
    %c0_12 = arith.constant 0 : index
    %c0_13 = arith.constant 0 : index
    %32 = vector.load %arg5[%c0_12, %c0_13] : memref<256x256xbf16, #tpu.memory_space<vmem>>, vector<256x256xbf16>
    %cst_14 = arith.constant dense<0.000000e+00> : vector<256x256xf32>
    %33 = tpu.matmul %31, %32, %cst_14 {dimension_numbers = #tpu.dot_dimension_numbers<[1], [0], [0], [1], [0, 0, 1, 1], [], []>} : vector<256x256xbf16>, vector<256x256xbf16>, vector<256x256xf32> -> vector<256x256xf32>
    %34 = arith.truncf %33 : vector<256x256xf32> to vector<256x256xbf16>
    %c0_15 = arith.constant 0 : index
    %c0_16 = arith.constant 0 : index
    %35 = vector.load %arg6[%c0_15, %c0_16] : memref<1x256xbf16, #tpu.memory_space<vmem>>, vector<1x256xbf16>
    %36 = vector.broadcast %35 : vector<1x256xbf16> to vector<256x256xbf16>
    %37 = arith.addf %34, %36 : vector<256x256xbf16>
    %cst_17 = arith.constant 0.000000e+00 : bf16
    %38 = vector.broadcast %cst_17 : bf16 to vector<256x256xbf16>
    %39 = arith.maximumf %37, %38 : vector<256x256xbf16>
    %c0_18 = arith.constant 0 : index
    %c0_19 = arith.constant 0 : index
    %40 = vector.load %arg7[%c0_18, %c0_19] : memref<256x256xbf16, #tpu.memory_space<vmem>>, vector<256x256xbf16>
    %cst_20 = arith.constant dense<0.000000e+00> : vector<256x256xf32>
    %41 = tpu.matmul %39, %40, %cst_20 {dimension_numbers = #tpu.dot_dimension_numbers<[1], [0], [0], [1], [0, 0, 1, 1], [], []>} : vector<256x256xbf16>, vector<256x256xbf16>, vector<256x256xf32> -> vector<256x256xf32>
    %42 = arith.truncf %41 : vector<256x256xf32> to vector<256x256xbf16>
    %c0_21 = arith.constant 0 : index
    %c0_22 = arith.constant 0 : index
    %43 = vector.load %arg8[%c0_21, %c0_22] : memref<1x256xbf16, #tpu.memory_space<vmem>>, vector<1x256xbf16>
    %44 = vector.broadcast %43 : vector<1x256xbf16> to vector<256x256xbf16>
    %45 = arith.addf %42, %44 : vector<256x256xbf16>
    %cst_23 = arith.constant 0.000000e+00 : bf16
    %46 = vector.broadcast %cst_23 : bf16 to vector<256x256xbf16>
    %47 = arith.maximumf %45, %46 : vector<256x256xbf16>
    %c0_24 = arith.constant 0 : index
    %c0_25 = arith.constant 0 : index
    %48 = vector.load %arg9[%c0_24, %c0_25] : memref<256x256xbf16, #tpu.memory_space<vmem>>, vector<256x256xbf16>
    %cst_26 = arith.constant dense<0.000000e+00> : vector<256x256xf32>
    %49 = tpu.matmul %47, %48, %cst_26 {dimension_numbers = #tpu.dot_dimension_numbers<[1], [0], [0], [1], [0, 0, 1, 1], [], []>} : vector<256x256xbf16>, vector<256x256xbf16>, vector<256x256xf32> -> vector<256x256xf32>
    %50 = arith.truncf %49 : vector<256x256xf32> to vector<256x256xbf16>
    %c0_27 = arith.constant 0 : index
    %c0_28 = arith.constant 0 : index
    %51 = vector.load %arg10[%c0_27, %c0_28] : memref<1x256xbf16, #tpu.memory_space<vmem>>, vector<1x256xbf16>
    %52 = vector.broadcast %51 : vector<1x256xbf16> to vector<256x256xbf16>
    %53 = arith.addf %50, %52 : vector<256x256xbf16>
    %cst_29 = arith.constant 0.000000e+00 : bf16
    %54 = vector.broadcast %cst_29 : bf16 to vector<256x256xbf16>
    %55 = arith.maximumf %53, %54 : vector<256x256xbf16>
    %c0_30 = arith.constant 0 : index
    %c0_31 = arith.constant 0 : index
    %56 = vector.load %arg11[%c0_30, %c0_31] : memref<256x128xbf16, #tpu.memory_space<vmem>>, vector<256x128xbf16>
    %cst_32 = arith.constant dense<0.000000e+00> : vector<256x128xf32>
    %57 = tpu.matmul %55, %56, %cst_32 {dimension_numbers = #tpu.dot_dimension_numbers<[1], [0], [0], [1], [0, 0, 1, 1], [], []>} : vector<256x256xbf16>, vector<256x128xbf16>, vector<256x128xf32> -> vector<256x128xf32>
    %c0_33 = arith.constant 0 : index
    %c0_34 = arith.constant 0 : index
    %58 = vector.load %arg12[%c0_33, %c0_34] : memref<1x128xf32, #tpu.memory_space<vmem>>, vector<1x128xf32>
    %59 = vector.broadcast %58 : vector<1x128xf32> to vector<256x128xf32>
    %60 = arith.addf %57, %59 : vector<256x128xf32>
    %61 = arith.negf %60 : vector<256x128xf32>
    %62 = math.exp %61 : vector<256x128xf32>
    %cst_35 = arith.constant 1.000000e+00 : f32
    %63 = vector.broadcast %cst_35 : f32 to vector<256x128xf32>
    %64 = arith.addf %63, %62 : vector<256x128xf32>
    %65 = arith.divf %63, %64 : vector<256x128xf32>
    %66 = arith.truncf %65 : vector<256x128xf32> to vector<256x128xbf16>
    %c0_36 = arith.constant 0 : index
    %c0_37 = arith.constant 0 : index
    %67 = vector.load %arg13[%c0_36, %c0_37] : memref<256x128xbf16, #tpu.memory_space<vmem>>, vector<256x128xbf16>
    tpu.vector_store %arg13[%c0_36, %c0_37], %66 {strides = array<i32>} : memref<256x128xbf16, #tpu.memory_space<vmem>>, vector<256x128xbf16>,
    return
  }
  func.func @transform_0(%arg0: i32) -> (i32, i32) {
    %c0_i32 = arith.constant 0 : i32
    %c0_i32_0 = arith.constant 0 : i32
    return %arg0, %c0_i32 : i32, i32
  }
  func.func @transform_1(%arg0: i32) -> (i32, i32) {
    %c0_i32 = arith.constant 0 : i32
    %c0_i32_0 = arith.constant 0 : i32
    %c0_i32_1 = arith.constant 0 : i32
    return %c0_i32, %c0_i32_0 : i32, i32
  }
  func.func @transform_2(%arg0: i32) -> (i32, i32) {
    %c0_i32 = arith.constant 0 : i32
    %c0_i32_0 = arith.constant 0 : i32
    %c0_i32_1 = arith.constant 0 : i32
    return %c0_i32, %c0_i32_0 : i32, i32
  }
  func.func @transform_3(%arg0: i32) -> (i32, i32) {
    %c0_i32 = arith.constant 0 : i32
    %c0_i32_0 = arith.constant 0 : i32
    %c0_i32_1 = arith.constant 0 : i32
    return %c0_i32, %c0_i32_0 : i32, i32
  }
  func.func @transform_4(%arg0: i32) -> (i32, i32) {
    %c0_i32 = arith.constant 0 : i32
    %c0_i32_0 = arith.constant 0 : i32
    %c0_i32_1 = arith.constant 0 : i32
    return %c0_i32, %c0_i32_0 : i32, i32
  }
  func.func @transform_5(%arg0: i32) -> (i32, i32) {
    %c0_i32 = arith.constant 0 : i32
    %c0_i32_0 = arith.constant 0 : i32
    %c0_i32_1 = arith.constant 0 : i32
    return %c0_i32, %c0_i32_0 : i32, i32
  }
  func.func @transform_6(%arg0: i32) -> (i32, i32) {
    %c0_i32 = arith.constant 0 : i32
    %c0_i32_0 = arith.constant 0 : i32
    %c0_i32_1 = arith.constant 0 : i32
    return %c0_i32, %c0_i32_0 : i32, i32
  }
  func.func @transform_7(%arg0: i32) -> (i32, i32) {
    %c0_i32 = arith.constant 0 : i32
    %c0_i32_0 = arith.constant 0 : i32
    %c0_i32_1 = arith.constant 0 : i32
    return %c0_i32, %c0_i32_0 : i32, i32
  }
  func.func @transform_8(%arg0: i32) -> (i32, i32) {
    %c0_i32 = arith.constant 0 : i32
    %c0_i32_0 = arith.constant 0 : i32
    %c0_i32_1 = arith.constant 0 : i32
    return %c0_i32, %c0_i32_0 : i32, i32
  }
  func.func @transform_9(%arg0: i32) -> (i32, i32) {
    %c0_i32 = arith.constant 0 : i32
    %c0_i32_0 = arith.constant 0 : i32
    %c0_i32_1 = arith.constant 0 : i32
    return %c0_i32, %c0_i32_0 : i32, i32
  }
  func.func @transform_10(%arg0: i32) -> (i32, i32) {
    %c0_i32 = arith.constant 0 : i32
    %c0_i32_0 = arith.constant 0 : i32
    %c0_i32_1 = arith.constant 0 : i32
    return %c0_i32, %c0_i32_0 : i32, i32
  }
  func.func @transform_11(%arg0: i32) -> (i32, i32) {
    %c0_i32 = arith.constant 0 : i32
    %c0_i32_0 = arith.constant 0 : i32
    %c0_i32_1 = arith.constant 0 : i32
    return %c0_i32, %c0_i32_0 : i32, i32
  }
  func.func @transform_12(%arg0: i32) -> (i32, i32) {
    %c0_i32 = arith.constant 0 : i32
    %c0_i32_0 = arith.constant 0 : i32
    return %arg0, %c0_i32 : i32, i32
  }
}

</mosaic_0001>

<bundles_post_ra>
// kernel: neural_image_function.1
= control target key start
LH: loop header
LB: loop body
LE: loop exit
PB: predicated region body
PF: predicated region fallthrough
CT: control target
= control target key end

     0   :  { %v7807_v0 = vmov 1   ;;  %v13132_v1 = vmov 0   ;;  %v13147_v63 = vmov 683565275   ;;  %s13119_s0 = inlined_call_operand.vmem [shape: f32[256,2], index: 0, kind: input, shape index: {}]   ;;  %s13120_s1 = inlined_call_operand.vmem [shape: f32[5,64], index: 1, kind: input, shape index: {}]   ;;  %s13121_s2 = inlined_call_operand.vmem [shape: bf16[64,256], index: 2, kind: input, shape index: {}]   ;;  %s13122_s4 = inlined_call_operand.vmem [shape: bf16[256,256], index: 4, kind: input, shape index: {}]   ;;  %s13123_s3 = inlined_call_operand.vmem [shape: bf16[1,256], index: 3, kind: input, shape index: {}]   ;;  %s13124_s6 = inlined_call_operand.vmem [shape: bf16[256,256], index: 6, kind: input, shape index: {}]   ;;  %s13125_s5 = inlined_call_operand.vmem [shape: bf16[1,256], index: 5, kind: input, shape index: {}]   ;;  %s13126_s8 = inlined_call_operand.vmem [shape: bf16[256,256], index: 8, kind: input, shape index: {}]   ;;  %s13127_s7 = inlined_call_operand.vmem [shape: bf16[1,256], index: 7, kind: input, shape index: {}]   ;;  %s13128_s10 = inlined_call_operand.vmem [shape: bf16[256,128], index: 10, kind: input, shape index: {}]   ;;  %s13129_s9 = inlined_call_operand.vmem [shape: bf16[1,256], index: 9, kind: input, shape index: {}]   ;;  %s13130_s11 = inlined_call_operand.vmem [shape: f32[1,128], index: 11, kind: input, shape index: {}]   ;;  %s13131_s12 = inlined_call_operand.vmem [shape: bf16[256,128], index: 12, kind: output, shape index: {}]  }
   0x1   :  { %7311 = vset.pattern.permute.xlu1 %v7807_v0  ;;  %7310 = vset.pattern.permute.xlu0 %v13132_v1  ;;  %v42_v2 = vld [vmem:[%s13119_s0] sm:$0xff]  ;;  %v43_v3 = vld [vmem:[%s13119_s0 + $0x8] sm:$0xff]  ;;  %v44_v4 = vld [vmem:[%s13119_s0 + $0x10] sm:$0xff] }
   0x2   :  { %276 = vperm.xlu1 %7311, %v42_v2   ;;  %81 = vperm.xlu0 %7310, %v42_v2   ;;  %v45_v5 = vld [vmem:[%s13119_s0 + $0x18] sm:$0xff]  ;;  %v48_v6 = vld [vmem:[%s13119_s0 + $0x30] sm:$0xff]  ;;  %v46_v7 = vld [vmem:[%s13119_s0 + $0x20] sm:$0xff] }
   0x3   :  { %4084 = vmatprep.mubr.bf16.mxu0 %v13132_v1  ;;  %4164 = vmatprep.mubr.bf16.mxu1 %v13132_v1  ;;  %v47_v8 = vld [vmem:[%s13119_s0 + $0x28] sm:$0xff]  ;;  %v49_v10 = vld [vmem:[%s13119_s0 + $0x38] sm:$0xff]  ;;  %v52_v11 = vld [vmem:[%s13119_s0 + $0x50] sm:$0xff] }
   0x4   :  { %v51_v9 = vld [vmem:[%s13119_s0 + $0x48] sm:$0xff]  ;;  %v50_v12 = vld [vmem:[%s13119_s0 + $0x40] sm:$0xff]  ;;  %v56_v13 = vld [vmem:[%s13119_s0 + $0x70] sm:$0xff] }
   0x5   :  { %v55_v14 = vld [vmem:[%s13119_s0 + $0x68] sm:$0xff]  ;;  %v53_v16 = vld [vmem:[%s13119_s0 + $0x58] sm:$0xff]  ;;  %v60_v17 = vld [vmem:[%s13119_s0 + $0x90] sm:$0xff] }
   0x6   :  { %280 = vperm.xlu1 %7311, %v43_v3   ;;  %86 = vperm.xlu0 %7310, %v43_v3   ;;  %v59_v15 = vld [vmem:[%s13119_s0 + $0x88] sm:$0xff]  ;;  %v54_v18 = vld [vmem:[%s13119_s0 + $0x60] sm:$0xff]  ;;  %v64_v19 = vld [vmem:[%s13119_s0 + $0xb0] sm:$0xff]  ;;  %v13139_v3 = vmov 2475754826  }
   0x7   :  { %v63_v20 = vld [vmem:[%s13119_s0 + $0xa8] sm:$0xff]  ;;  %v57_v21 = vld [vmem:[%s13119_s0 + $0x78] sm:$0xff]  ;;  %v68_v23 = vld [vmem:[%s13119_s0 + $0xd0] sm:$0xff] }
   0x8   :  { %v7966_v22 = vld [vmem:[%s13119_s0 + $0xc8] sm:$0xff]  ;;  %v58_v24 = vld [vmem:[%s13119_s0 + $0x80] sm:$0xff]  ;;  %v72_v26 = vld [vmem:[%s13119_s0 + $0xf0] sm:$0xff] }
   0x9   :  { %v7983_v25 = vld [vmem:[%s13119_s0 + $0xe8] sm:$0xff]  ;;  %v61_v27 = vld [vmem:[%s13119_s0 + $0x98] sm:$0xff]  ;;  %v62_v28 = vld [vmem:[%s13119_s0 + $0xa0] sm:$0xff] }
   0xa   :  { %7312 = vset.pattern.permute.xlu1 %v13132_v1  ;;  %91 = vperm.xlu0 %7310, %v44_v4   ;;  %v8004_v29 = vld [vmem:[%s13120_s1 + $0x1] ss:$0 sm:$0xff]  ;;  %v8009_v30 = vld [vmem:[%s13120_s1] ss:$0 sm:$0xff]  ;;  %v65_v31 = vld [vmem:[%s13119_s0 + $0xb8] sm:$0xff] }
   0xb   :  { %96 = vperm.xlu1 %7312, %v45_v5   ;;  %v8020_v36 = vld [vmem:[%s13120_s1 + $0x2] ss:$0 sm:$0xff] }
   0xc   :  { %v66_v47 = vld [vmem:[%s13119_s0 + $0xc0] sm:$0xff] }
   0xe   :  { %7313 = vset.pattern.permute.xlu0 %v7807_v0 }
   0xf   :  { %7314 = vset.pattern.permute.xlu1 %v7807_v0  ;;  %284 = vperm.xlu0 %7313, %v44_v4  }
  0x10   :  { %288 = vperm.xlu1 %7314, %v45_v5   ;;  %v13137_v5 = vmov 2131351028  }
  0x13   :  { %300 = vperm.xlu0 %7313, %v48_v6  }
  0x14   :  { %7315 = vset.pattern.permute.xlu1 %v13132_v1 }
  0x15   :  { %101 = vperm.xlu1 %7315, %v46_v7  }
  0x17   :  { %7318 = vset.pattern.permute.xlu0 %v13132_v1 }
  0x18   :  { %106 = vperm.xlu0 %7318, %v47_v8  }
  0x19   :  { %7316 = vset.pattern.permute.xlu1 %v7807_v0 }
  0x1a   :  { %292 = vperm.xlu1 %7316, %v46_v7  }
  0x1c   :  { %111 = vperm.xlu0 %7318, %v48_v6  }
  0x1e   :  { %296 = vperm.xlu1 %7316, %v47_v8  }
  0x20   :  { %126 = vperm.xlu0 %7318, %v51_v9  }
  0x22   :  { %7317 = vset.pattern.permute.xlu1 %v13132_v1 }
  0x23   :  { %116 = vperm.xlu1 %7317, %v49_v10  }
  0x24   :  { %131 = vperm.xlu0 %7318, %v52_v11  }
  0x27   :  { %7319 = vset.pattern.permute.xlu1 %v7807_v0 }
  0x28   :  { %304 = vperm.xlu1 %7319, %v49_v10   ;;  %7323 = vset.pattern.permute.xlu0 %v7807_v0  ;;  %v13145_v10 = vmov 2102212464  }
  0x29   :  { %316 = vperm.xlu0 %7323, %v52_v11  }
  0x2c   :  { %7320 = vset.pattern.permute.xlu1 %v13132_v1 }
  0x2d   :  { %121 = vperm.xlu1 %7320, %v50_v12   ;;  %332 = vperm.xlu0 %7323, %v56_v13  }
  0x31   :  { %7321 = vset.pattern.permute.xlu1 %v7807_v0  ;;  %7328 = vset.pattern.permute.xlu0 %v13132_v1 }
  0x32   :  { %308 = vperm.xlu1 %7321, %v50_v12   ;;  %146 = vperm.xlu0 %7328, %v55_v14  }
  0x36   :  { %312 = vperm.xlu1 %7321, %v51_v9   ;;  %151 = vperm.xlu0 %7328, %v56_v13   ;;  %v13143_v13 = vmov 920167782  }
  0x3a   :  { %7322 = vset.pattern.permute.xlu1 %v13132_v1  ;;  %166 = vperm.xlu0 %7328, %v59_v15  }
  0x3b   :  { %136 = vperm.xlu1 %7322, %v53_v16  }
  0x3e   :  { %171 = vperm.xlu0 %7328, %v60_v17  }
  0x3f   :  { %7324 = vset.pattern.permute.xlu1 %v7807_v0 }
  0x40   :  { %320 = vperm.xlu1 %7324, %v53_v16   ;;  %v13141_v16 = vmov 1326507024  }
  0x42   :  { %7333 = vset.pattern.permute.xlu0 %v7807_v0 }
  0x43   :  { %348 = vperm.xlu0 %7333, %v60_v17  }
  0x44   :  { %7325 = vset.pattern.permute.xlu1 %v13132_v1 }
  0x45   :  { %141 = vperm.xlu1 %7325, %v54_v18  }
  0x47   :  { %364 = vperm.xlu0 %7333, %v64_v19  }
  0x49   :  { %7326 = vset.pattern.permute.xlu1 %v7807_v0 }
  0x4a   :  { %324 = vperm.xlu1 %7326, %v54_v18  }
  0x4b   :  { %7338 = vset.pattern.permute.xlu0 %v13132_v1 }
  0x4c   :  { %186 = vperm.xlu0 %7338, %v63_v20  }
  0x4e   :  { %328 = vperm.xlu1 %7326, %v55_v14  }
  0x50   :  { %191 = vperm.xlu0 %7338, %v64_v19  }
  0x52   :  { %7327 = vset.pattern.permute.xlu1 %v13132_v1 }
  0x53   :  { %156 = vperm.xlu1 %7327, %v57_v21  }
  0x54   :  { %206 = vperm.xlu0 %7338, %v7966_v22  }
  0x57   :  { %7329 = vset.pattern.permute.xlu1 %v7807_v0 }
  0x58   :  { %336 = vperm.xlu1 %7329, %v57_v21   ;;  %7343 = vset.pattern.permute.xlu0 %v7807_v0 }
  0x59   :  { %380 = vperm.xlu0 %7343, %v68_v23  }
  0x5c   :  { %7330 = vset.pattern.permute.xlu1 %v13132_v1 }
  0x5d   :  { %161 = vperm.xlu1 %7330, %v58_v24   ;;  %7344 = vset.pattern.permute.xlu0 %v13132_v1 }
  0x5e   :  { %211 = vperm.xlu0 %7344, %v68_v23   ;;  %v69_v23 = vld [vmem:[%s13119_s0 + $0xd8] sm:$0xff] }
  0x61   :  { %7331 = vset.pattern.permute.xlu1 %v7807_v0 }
  0x62   :  { %340 = vperm.xlu1 %7331, %v58_v24   ;;  %226 = vperm.xlu0 %7344, %v7983_v25  }
  0x66   :  { %344 = vperm.xlu1 %7331, %v59_v15   ;;  %231 = vperm.xlu0 %7344, %v72_v26  }
  0x6a   :  { %7332 = vset.pattern.permute.xlu1 %v13132_v1  ;;  %7349 = vset.pattern.permute.xlu0 %v7807_v0 }
  0x6b   :  { %176 = vperm.xlu1 %7332, %v61_v27   ;;  %396 = vperm.xlu0 %7349, %v72_v26  }
  0x6f   :  { %7334 = vset.pattern.permute.xlu1 %v7807_v0 }
  0x70   :  { %352 = vperm.xlu1 %7334, %v61_v27  }
  0x74   :  { %7335 = vset.pattern.permute.xlu1 %v13132_v1 }
  0x75   :  { %181 = vperm.xlu1 %7335, %v62_v28  }
  0x79   :  { %7336 = vset.pattern.permute.xlu1 %v7807_v0 }
  0x7a   :  { %356 = vperm.xlu1 %7336, %v62_v28  }
  0x7e   :  { %360 = vperm.xlu1 %7336, %v63_v20  }
  0x81   :  { %v277_v32 = vpop.permute.xlu1 %276  ;;  %v82_v33 = vpop.permute.xlu0 %81 }
  0x82   :  { %v407_v34 = vmul.f32 %v8004_v29, %v277_v32  ;;  %v243_v35 = vmul.f32 %v8009_v30, %v82_v33  ;;  %7337 = vset.pattern.permute.xlu1 %v13132_v1 }
  0x83   :  { %196 = vperm.xlu1 %7337, %v65_v31  }
  0x84   :  { %v8022_v37 = vadd.f32 %v407_v34, %v243_v35 }
  0x85   :  { %v281_v38 = vpop.permute.xlu1 %280  ;;  %v87_v39 = vpop.permute.xlu0 %86 }
  0x86   :  { %v8026_v40 = vadd.f32 %v8020_v36, %v8022_v37  ;;  %v408_v41 = vmul.f32 %v8004_v29, %v281_v38  ;;  %v244_v42 = vmul.f32 %v8009_v30, %v87_v39 }
  0x87   :  { %7339 = vset.pattern.permute.xlu1 %v7807_v0 }
  0x88   :  { %v510_v43 = vand.u32 2139095040, %v8026_v40  ;;  %368 = vperm.xlu1 %7339, %v65_v31   ;;  %v507_v44 = vand.u32 2147483647, %v8026_v40  ;;  %v8033_v45 = vadd.f32 %v408_v41, %v244_v42  ;;  %vm509_vm14 = vcmp.lt.s32.totalorder %v8026_v40, 0 }
  0x89   :  { %v92_v57 = vpop.permute.xlu0 %91 }
  0x8a   :  { %v511_v46 = vshrl.u32 %v510_v43, 23  ;;  %v8040_v48 = vadd.f32 %v8020_v36, %v8033_v45  ;;  %v514_v50 = vand.u32 8388607, %v507_v44  ;;  %v245_v62 = vmul.f32 %v8009_v30, %v92_v57  ;;  %v70_v57 = vld [vmem:[%s13119_s0 + $0xe0] sm:$0xff] }
  0x8b   :  { %vm508_vm15 = vcmp.le.f32.partialorder %v507_v44, 0.7853982 }
  0x8c   :  { %v6591_v49 = vadd.s32 4294967169, %v511_v46  ;;  %7340 = vset.pattern.permute.xlu1 %v13132_v1  ;;  %v614_v51 = vand.u32 2139095040, %v8040_v48  ;;  %v515_v54 = vor.u32 8388608, %v514_v50 }
  0x8d   :  { %201 = vperm.xlu1 %7340, %v66_v47  }
  0x8e   :  { %v517_v52 = vadd.s32 1, %v6591_v49  ;;  %v615_v53 = vshrl.u32 %v614_v51, 23  ;;  %v555_v7 = vshll.u32 %v515_v54, 8  ;;  %v285_v18 = vpop.permute.xlu0 %284 }
  0x8f   :  { %v409_v32 = vmul.f32 %v8004_v29, %v285_v18  ;;  %v97_v18 = vpop.permute.xlu1 %96 }
  0x90   :  { %vm518_vm0 = vcmp.gt.s32.totalorder %v517_v52, 0  ;;  %v6595_v56 = vadd.s32 4294967169, %v615_v53 }
  0x91   :  { %v519_v55 = vsel %vm518_vm0, %v517_v52, 0  ;;  %7341 = vset.pattern.permute.xlu1 %v7807_v0 }
  0x92   :  { %v521_v58 = vand.u32 31, %v519_v55  ;;  %372 = vperm.xlu1 %7341, %v66_v47   ;;  %v520_v59 = vshrl.u32 %v519_v55, 5  ;;  %v621_v61 = vadd.s32 1, %v6595_v56  ;;  %v8078_v55 = vadd.f32 %v409_v32, %v245_v62 }
  0x94   :  { %v522_v60 = vsub.s32 32, %v521_v58  ;;  %v524_v2 = vshll.u32 %v13147_v63, %v521_v58  ;;  %v527_v4 = vshll.u32 %v13139_v3, %v521_v58  ;;  %v530_v6 = vshll.u32 %v13137_v5, %v521_v58 }
  0x95   :  { %v533_v12 = vshll.u32 %v13145_v10, %v521_v58  ;;  %v536_v15 = vshll.u32 %v13143_v13, %v521_v58  ;;  %vm539_vm1 = vcmp.lt.s32.totalorder %v520_v59, 1  ;;  %vm622_vm2 = vcmp.gt.s32.totalorder %v621_v61, 0 }
  0x96   :  { %v525_v8 = vshrl.u32 %v13139_v3, %v522_v60  ;;  %v528_v9 = vshrl.u32 %v13137_v5, %v522_v60  ;;  %v531_v11 = vshrl.u32 %v13145_v10, %v522_v60  ;;  %376 = vperm.xlu1 %7341, %v7966_v22   ;;  %v534_v14 = vshrl.u32 %v13143_v13, %v522_v60 }
  0x97   :  { %v537_v17 = vshrl.u32 %v13141_v16, %v522_v60  ;;  %vm542_vm3 = vcmp.lt.s32.totalorder %v520_v59, 4  ;;  %v623_v26 = vsel %vm622_vm2, %v621_v61, 0  ;;  %v523_v33 = vshrl.u32 %v13147_v63, %v522_v60 }
  0x98   :  { %v526_v19 = vor.u32 %v525_v8, %v524_v2  ;;  %v529_v20 = vor.u32 %v528_v9, %v527_v4  ;;  %v532_v21 = vor.u32 %v531_v11, %v530_v6  ;;  %v535_v24 = vor.u32 %v534_v14, %v533_v12 }
  0x99   :  { %v538_v22 = vor.u32 %v537_v17, %v536_v15  ;;  %vm541_vm4 = vcmp.lt.s32.totalorder %v520_v59, 3  ;;  %vm540_vm5 = vcmp.lt.s32.totalorder %v520_v59, 2  ;;  %v625_v41 = vand.u32 31, %v623_v26 }
  0x9a   :  { %v544_v27 = vsel %vm542_vm3, %v532_v21, 2102212464  ;;  %v547_v28 = vsel %vm539_vm1, %v526_v19, %v529_v20  ;;  %v551_v31 = vsel %vm539_vm1, %v529_v20, %v532_v21  ;;  %7342 = vset.pattern.permute.xlu1 %v13132_v1  ;;  %v548_v34 = vsel %vm542_vm3, %v535_v24, 920167782 }
  0x9b   :  { %v552_v35 = vsel %vm542_vm3, %v538_v22, 1326507024  ;;  %216 = vperm.xlu1 %7342, %v69_v23   ;;  %v549_v38 = vsel %vm541_vm4, %v532_v21, %v548_v34  ;;  %v543_v42 = vsel %vm539_vm1, %v523_v33, %v526_v19  ;;  %v545_v43 = vsel %vm541_vm4, %v529_v20, %v544_v27 }
  0x9c   :  { %v553_v39 = vsel %vm541_vm4, %v535_v24, %v552_v35  ;;  %v550_v46 = vsel %vm540_vm5, %v547_v28, %v549_v38  ;;  %v8075_v53 = vsub.s32 32, %v625_v41  ;;  %v546_v54 = vsel %vm540_vm5, %v543_v42, %v545_v43  ;;  %v289_v35 = vpop.permute.xlu1 %288 }
  0x9d   :  { %v554_v47 = vsel %vm540_vm5, %v551_v31, %v553_v39  ;;  %v8071_v51 = vmul.u32.u64.low %v555_v7, %v550_v46  ;;  %v8072_v52 = vmul.u32.u64.high %v555_v7, %v550_v46, %v8071_v51  ;;  %v562_v58 = vmul.u32 %v555_v7, %v546_v54 }
  0x9e   :  { %v8068_v49 = vmul.u32.u64.low %v555_v7, %v554_v47  ;;  %v8069_v50 = vmul.u32.u64.high %v555_v7, %v554_v47, %v8068_v49  ;;  %v638_v59 = vshrl.u32 %v13143_v13, %v8075_v53  ;;  %v611_v61 = vand.u32 2147483647, %v8040_v48 }
  0x9f   :  { %7345 = vset.pattern.permute.xlu1 %v7807_v0  ;;  %v565_v56 = vadd.s32 1, %v8072_v52  ;;  %v641_v62 = vshrl.u32 %v13141_v16, %v8075_v53  ;;  %v629_v4 = vshrl.u32 %v13139_v3, %v8075_v53  ;;  %v637_v6 = vshll.u32 %v13145_v10, %v625_v41 }
  0xa0   :  { %384 = vperm.xlu1 %7345, %v69_v23   ;;  %vm564_vm6 = vc.u32 %v8069_v50, %v8071_v51  ;;  %v8098_v7 = vadd.f32 %v8020_v36, %v8078_v55  ;;  %v8100_v8 = vshrl.u32 %v623_v26, 5  ;;  %v632_v9 = vshrl.u32 %v13137_v5, %v8075_v53 }
  0xa1   :  { %v566_v60 = vsel %vm564_vm6, %v565_v56, %v8072_v52  ;;  %v635_v11 = vshrl.u32 %v13145_v10, %v8075_v53  ;;  %v640_v12 = vshll.u32 %v13143_v13, %v625_v41  ;;  %v628_v15 = vshll.u32 %v13147_v63, %v625_v41 }
  0xa2   :  { %v567_v2 = vadd.s32 %v566_v60, %v562_v58  ;;  %v639_v17 = vor.u32 %v638_v59, %v637_v6  ;;  %v631_v19 = vshll.u32 %v13139_v3, %v625_v41  ;;  %v634_v20 = vshll.u32 %v13137_v5, %v625_v41 }
  0xa3   :  { %v642_v21 = vor.u32 %v641_v62, %v640_v12  ;;  %v618_v24 = vand.u32 8388607, %v611_v61  ;;  %v630_v22 = vor.u32 %v629_v4, %v628_v15  ;;  %vm646_vm7 = vcmp.lt.s32.totalorder %v8100_v8, 4 }
  0xa4   :  { %7346 = vset.pattern.permute.xlu1 %v13132_v1  ;;  %v568_v14 = vadd.s32 536870912, %v567_v2  ;;  %v633_v26 = vor.u32 %v632_v9, %v631_v19  ;;  %v636_v27 = vor.u32 %v635_v11, %v634_v20  ;;  %v718_v28 = vand.u32 2139095040, %v8098_v7 }
  0xa5   :  { %221 = vperm.xlu1 %7346, %v70_v57   ;;  %v652_v32 = vsel %vm646_vm7, %v639_v17, 920167782  ;;  %v656_v33 = vsel %vm646_vm7, %v642_v21, 1326507024  ;;  %vm643_vm8 = vcmp.lt.s32.totalorder %v8100_v8, 1  ;;  %vm645_vm9 = vcmp.lt.s32.totalorder %v8100_v8, 3 }
  0xa6   :  { %v8110_v23 = vshrl.u32 %v568_v14, 30  ;;  %v619_v38 = vor.u32 8388608, %v618_v24  ;;  %v651_v39 = vsel %vm643_vm8, %v630_v22, %v633_v26  ;;  %v653_v41 = vsel %vm645_vm9, %v636_v27, %v652_v32 }
  0xa7   :  { %v719_v42 = vshrl.u32 %v718_v28, 23  ;;  %v655_v46 = vsel %vm643_vm8, %v633_v26, %v636_v27  ;;  %v657_v47 = vsel %vm645_vm9, %v639_v17, %v656_v33  ;;  %vm644_vm10 = vcmp.lt.s32.totalorder %v8100_v8, 2 }
  0xa8   :  { %v570_v31 = vshll.u32 %v8110_v23, 30  ;;  %v410_v49 = vmul.f32 %v8004_v29, %v289_v35  ;;  %v654_v54 = vsel %vm644_vm10, %v651_v39, %v653_v41  ;;  %v658_v56 = vsel %vm644_vm10, %v655_v46, %v657_v47 }
  0xa9   :  { %7347 = vset.pattern.permute.xlu1 %v7807_v0  ;;  %v6599_v58 = vadd.s32 4294967169, %v719_v42  ;;  %v627_v14 = vshrl.u32 %v13147_v63, %v8075_v53  ;;  %v648_v15 = vsel %vm646_vm7, %v636_v27, 2102212464  ;;  %v593_v27 = vsub.s32 4, %v8110_v23 }
  0xaa   :  { %388 = vperm.xlu1 %7347, %v70_v57   ;;  %v571_v34 = vsub.s32 %v567_v2, %v570_v31  ;;  %v659_v57 = vshll.u32 %v619_v38, 8  ;;  %v649_v53 = vsel %vm645_vm9, %v633_v26, %v648_v15  ;;  %v715_v47 = vand.u32 2147483647, %v8098_v7 }
  0xab   :  { %v725_v11 = vadd.s32 1, %v6599_v58  ;;  %v647_v21 = vsel %vm643_vm8, %v627_v14, %v630_v22  ;;  %vm599_vm4 = vweird.f32 %v8026_v40 }
  0xac   :  { %v573_v43 = vsub.s32 0, %v571_v34  ;;  %v8141_v60 = vmul.u32.u64.low %v659_v57, %v654_v54  ;;  %v8142_v62 = vmul.u32.u64.high %v659_v57, %v654_v54, %v8141_v60  ;;  %v650_v22 = vsel %vm644_vm10, %v647_v21, %v649_v53  ;;  %v8199_v53 = vld [vmem:[%s13120_s1 + $0x4] ss:$0 sm:$0xff] }
  0xad   :  { %v8147_v6 = vmul.u32.u64.low %v659_v57, %v658_v56  ;;  %v8148_v9 = vmul.u32.u64.high %v659_v57, %v658_v56, %v8147_v6  ;;  %vm726_vm12 = vcmp.gt.s32.totalorder %v725_v11, 0  ;;  %v666_v46 = vmul.u32 %v659_v57, %v650_v22 }
  0xae   :  { %392 = vperm.xlu1 %7347, %v7983_v25   ;;  %v6592_v52 = vmin.u32 %v573_v43, %v571_v34  ;;  %v246_v25 = vmul.f32 %v8009_v30, %v97_v18  ;;  %v563_v18 = vadd.s32 %v8071_v51, %v8069_v50  ;;  %v669_v32 = vadd.s32 1, %v8142_v62 }
  0xaf   :  { %vm668_vm13 = vc.u32 %v8148_v9, %v8141_v60  ;;  %v727_v51 = vsel %vm726_vm12, %v725_v11, 0  ;;  %v594_v43 = vsel %vm509_vm14, %v593_v27, %v8110_v23  ;;  %v722_v58 = vand.u32 8388607, %v715_v47 }
  0xb0   :  { %v575_v59 = vclz %v6592_v52  ;;  %v8145_v2 = vadd.f32 %v410_v49, %v246_v25  ;;  %v670_v26 = vsel %vm668_vm13, %v669_v32, %v8142_v62  ;;  %v729_v38 = vand.u32 31, %v727_v51 }
  0xb1   :  { %v671_v49 = vadd.s32 %v670_v26, %v666_v46  ;;  %v596_v52 = vsel %vm508_vm15, 0, %v594_v43  ;;  %v8183_v57 = vshrl.u32 %v727_v51, 5 }
  0xb2   :  { %7348 = vset.pattern.permute.xlu1 %v13132_v1  ;;  %v6593_v4 = vadd.s32 4294967294, %v575_v59  ;;  %v8156_v17 = vadd.f32 %v8020_v36, %v8145_v2  ;;  %v730_v54 = vsub.s32 32, %v729_v38  ;;  %v600_v62 = vadd.s32 3, %v596_v52 }
  0xb3   :  { %v672_v23 = vadd.s32 536870912, %v671_v49  ;;  %v741_v44 = vshll.u32 %v13145_v10, %v729_v38  ;;  %v735_v14 = vshll.u32 %v13139_v3, %v729_v38  ;;  %v738_v15 = vshll.u32 %v13137_v5, %v729_v38 }
  0xb4   :  { %vm6594_vm11 = vcmp.lt.s32.totalorder %v6593_v4, 0  ;;  %v822_v33 = vand.u32 2139095040, %v8156_v17  ;;  %v742_v6 = vshrl.u32 %v13143_v13, %v730_v54  ;;  %v733_v21 = vshrl.u32 %v13139_v3, %v730_v54 }
  0xb5   :  { %v578_v12 = vsel %vm6594_vm11, 0, %v6593_v4  ;;  %v8201_v27 = vshrl.u32 %v672_v23, 30  ;;  %vm750_vm1 = vcmp.lt.s32.totalorder %v8183_v57, 4  ;;  %v601_v51 = vand.u32 3, %v600_v62 }
  0xb6   :  { %v579_v19 = vsub.s32 32, %v578_v12  ;;  %v583_v20 = vsub.s32 4294967266, %v578_v12  ;;  %v580_v24 = vshll.u32 %v571_v34, %v578_v12  ;;  %v823_v39 = vshrl.u32 %v822_v33, 23 }
  0xb7   :  { %v732_v12 = vshll.u32 %v13147_v63, %v729_v38  ;;  %v743_v32 = vor.u32 %v742_v6, %v741_v44  ;;  %v723_v33 = vor.u32 8388608, %v722_v58  ;;  %vm747_vm2 = vcmp.lt.s32.totalorder %v8183_v57, 1 }
  0xb8   :  { %v581_v28 = vshrl.u32 %v563_v18, %v579_v19  ;;  %v584_v31 = vadd.s32 127, %v583_v20  ;;  %v6603_v56 = vadd.s32 4294967169, %v823_v39  ;;  %v102_v18 = vpop.permute.xlu1 %101  ;;  %v744_v19 = vshll.u32 %v13143_v13, %v729_v38 }
  0xb9   :  { %v745_v20 = vshrl.u32 %v13141_v16, %v730_v54  ;;  %v8207_v26 = vor.u32 %v733_v21, %v732_v12  ;;  %vm749_vm3 = vcmp.lt.s32.totalorder %v8183_v57, 3  ;;  %v756_v43 = vsel %vm750_vm1, %v743_v32, 920167782 }
  0xba   :  { %v582_v35 = vor.u32 %v581_v28, %v580_v24  ;;  %v585_v50 = vshll.u32 %v584_v31, 23  ;;  %v829_v11 = vadd.s32 1, %v6603_v56  ;;  %v736_v24 = vshrl.u32 %v13137_v5, %v730_v54 }
  0xbb   :  { %v739_v28 = vshrl.u32 %v13145_v10, %v730_v54  ;;  %v746_v22 = vor.u32 %v745_v20, %v744_v19  ;;  %v8217_v46 = vshll.u32 %v723_v33, 8  ;;  %vm602_vm5 = vcmp.lt.s32.totalorder %v601_v51, 2 }
  0xbc   :  { %v586_v34 = vor.u32 4788187, %v585_v50  ;;  %v589_v42 = vcvt.s32.f32 %v582_v35  ;;  %vm830_vm0 = vcmp.gt.s32.totalorder %v829_v11, 0  ;;  %v13136_v35 = vand.u32 2147483647, %v8156_v17 }
  0xbd   :  { %v831_v31 = vsel %vm830_vm0, %v829_v11, 0  ;;  %v8209_v38 = vor.u32 %v736_v24, %v735_v14  ;;  %v740_v39 = vor.u32 %v739_v28, %v738_v15  ;;  %v760_v52 = vsel %vm750_vm1, %v746_v22, 1326507024 }
  0xbe   :  { %v587_v41 = vand.u32 2147483647, %v586_v34  ;;  %v833_v50 = vand.u32 31, %v831_v31  ;;  %v3875_v34 = vmul.f32 %v8199_v53, %v8022_v37  ;;  %v8221_v37 = vand.u32 8388607, %v13136_v35 }
  0xbf   :  { %v247_v56 = vmul.f32 %v8009_v30, %v102_v18  ;;  %vm603_vm6 = vcmp.eq.s32.totalorder %v601_v51, 0  ;;  %vm748_vm7 = vcmp.lt.s32.totalorder %v8183_v57, 2  ;;  %v757_v62 = vsel %vm749_vm3, %v740_v39, %v756_v43  ;;  %v73_v57 = vld [vmem:[%s13119_s0 + $0xf8] sm:$0xff] }
  0xc0   :  { %v590_v8 = vmul.f32 %v589_v42, %v587_v41  ;;  %v293_v41 = vpop.permute.xlu1 %292  ;;  %v674_v42 = vshll.u32 %v8201_v27, 30  ;;  %vm606_vm8 = vcmp.eq.s32.totalorder %v601_v51, 2  ;;  %v731_v6 = vshrl.u32 %v13147_v63, %v730_v54  ;;  %v6719_v54 = vld [vmem:[%s13120_s1 + $0x3] ss:$0 sm:$0xff]  ;;  %236 = vperm.xlu1 %7348, %v73_v57  }
  0xc1   :  { %v759_v12 = vsel %vm747_vm2, %v8209_v38, %v740_v39  ;;  %v761_v14 = vsel %vm749_vm3, %v743_v32, %v760_v52  ;;  %v8256_v24 = vshrl.u32 %v831_v31, 5  ;;  %v845_v32 = vshll.u32 %v13145_v10, %v833_v50 }
  0xc2   :  { %v591_v25 = vxor.u32 2147483648, %v590_v8  ;;  %v8236_v44 = vsub.s32 %v671_v49, %v674_v42  ;;  %v848_v42 = vshll.u32 %v13143_v13, %v833_v50  ;;  %v762_v31 = vsel %vm748_vm7, %v759_v12, %v761_v14 }
  0xc3   :  { %v836_v52 = vshll.u32 %v13147_v63, %v833_v50  ;;  %v839_v51 = vshll.u32 %v13139_v3, %v833_v50  ;;  %vm854_vm9 = vcmp.lt.s32.totalorder %v8256_v24, 4  ;;  %vm851_vm10 = vcmp.lt.s32.totalorder %v8256_v24, 1 }
  0xc4   :  { %v592_v59 = vsel %vm509_vm14, %v591_v25, %v590_v8  ;;  %v8223_v8 = vsub.s32 32, %v833_v50  ;;  %v411_v25 = vmul.f32 %v8004_v29, %v293_v41  ;;  %vm853_vm11 = vcmp.lt.s32.totalorder %v8256_v24, 3  ;;  %7350 = vset.pattern.permute.xlu1 %v7807_v0 }
  0xc5   :  { %v595_v4 = vsel %vm508_vm15, %v8026_v40, %v592_v59  ;;  %v755_v59 = vsel %vm747_vm2, %v8207_v26, %v8209_v38  ;;  %vm852_vm12 = vcmp.lt.s32.totalorder %v8256_v24, 2  ;;  %400 = vperm.xlu1 %7350, %v73_v57  }
  0xc6   :  { %7523 = vcosq.f32 %v595_v4  ;;  %v846_v15 = vshrl.u32 %v13143_v13, %v8223_v8  ;;  %v758_v19 = vsel %vm748_vm7, %v755_v59, %v757_v62  ;;  %v849_v49 = vshrl.u32 %v13141_v16, %v8223_v8 }
  0xc7   :  { %7525 = vsinq.f32 %v595_v4  ;;  %v8250_v20 = vadd.f32 %v411_v25, %v247_v56  ;;  %v837_v28 = vshrl.u32 %v13139_v3, %v8223_v8  ;;  %v840_v22 = vshrl.u32 %v13137_v5, %v8223_v8 }
  0xc8   :  { %v843_v41 = vshrl.u32 %v13145_v10, %v8223_v8  ;;  %v847_v56 = vor.u32 %v846_v15, %v845_v32  ;;  %v850_v59 = vor.u32 %v849_v49, %v848_v42  ;;  %v752_v49 = vsel %vm750_vm1, %v740_v39, 2102212464 }
  0xc9   :  { %v8281_v40 = vadd.f32 %v8020_v36, %v8250_v20  ;;  %v841_v12 = vor.u32 %v840_v22, %v839_v51  ;;  %v753_v22 = vsel %vm749_vm3, %v8209_v38, %v752_v49 }
  0xd0   :  { %v7524_v58 = vpop.eup %7523 }
  0xd1   :  { %v7526_v23 = vpop.eup %7525  ;;  %v607_v4 = vxor.u32 2147483648, %v7524_v58 }
  0xd2   :  { %v604_v11 = vxor.u32 2147483648, %v7526_v23 }
  0xd3   :  { %v608_v18 = vsel %vm606_vm8, %v607_v4, %v7526_v23  ;;  %v8275_v62 = vmul.u32.u64.low %v8217_v46, %v758_v19  ;;  %v8276_v23 = vmul.u32.u64.high %v8217_v46, %v758_v19, %v8275_v62  ;;  %v838_v4 = vor.u32 %v837_v28, %v836_v52 }
  0xd4   :  { %v605_v21 = vsel %vm603_vm6, %v7524_v58, %v604_v11  ;;  %v842_v58 = vshll.u32 %v13137_v5, %v833_v50  ;;  %v8287_v15 = vmul.u32.u64.low %v8217_v46, %v762_v31  ;;  %v8288_v50 = vmul.u32.u64.high %v8217_v46, %v762_v31, %v8287_v15 }
  0xd5   :  { %v609_v33 = vsel %vm602_vm5, %v605_v21, %v608_v18  ;;  %v860_v18 = vsel %vm854_vm9, %v847_v56, 920167782  ;;  %v677_v19 = vsub.s32 0, %v8236_v44  ;;  %v751_v21 = vsel %vm747_vm2, %v731_v6, %v8207_v26 }
  0xd6   :  { %v610_v43 = vsel %vm599_vm4, nan, %v609_v33  ;;  %v844_v14 = vor.u32 %v843_v41, %v842_v58  ;;  %v827_v28 = vor.u32 8388608, %v8221_v37  ;;  %v859_v32 = vsel %vm851_vm10, %v838_v4, %v841_v12  ;;  %v301_v33 = vpop.permute.xlu0 %300 }
  0xd7   :  { %v3839_v25 = vmul.f32 %v6719_v54, %v610_v43  ;;  %v926_v54 = vand.u32 2139095040, %v8281_v40  ;;  %v6596_v37 = vmin.u32 %v677_v19, %v8236_v44  ;;  %v754_v43 = vsel %vm748_vm7, %v751_v21, %v753_v22 }
  0xd8   :  { %v861_v39 = vsel %vm853_vm11, %v844_v14, %v860_v18  ;;  %v863_v41 = vsel %vm851_vm10, %v841_v12, %v844_v14  ;;  %v773_v31 = vadd.s32 1, %v8276_v23  ;;  %v867_v52 = vshll.u32 %v827_v28, 8 }
  0xd9   :  { %v8283_v11 = vadd.f32 %v3875_v34, %v3839_v25  ;;  %v864_v34 = vsel %vm854_vm9, %v850_v59, 1326507024  ;;  %v927_v26 = vshrl.u32 %v926_v54, 23  ;;  %v862_v6 = vsel %vm852_vm12, %v859_v32, %v861_v39 }
  0xda   :  { %v865_v42 = vsel %vm853_vm11, %v847_v56, %v864_v34  ;;  %vm772_vm13 = vc.u32 %v8288_v50, %v8275_v62  ;;  %v679_v25 = vclz %v6596_v37  ;;  %v8330_v59 = vpop.permute.xlu0 %106  ;;  %v770_v15 = vmul.u32 %v8217_v46, %v754_v43 }
  0xdb   :  { %13225 = vst [vmem:[#allocation2_spill] sm:$0xff] %v8283_v11  ;;  %v866_v38 = vsel %vm852_vm12, %v863_v41, %v865_v42  ;;  %v6607_v56 = vadd.s32 4294967169, %v927_v26  ;;  %v8326_v51 = vmul.u32.u64.low %v867_v52, %v862_v6  ;;  %v8327_v58 = vmul.u32.u64.high %v867_v52, %v862_v6, %v8326_v51 }
  0xdc   :  { %v8336_v18 = vmul.u32.u64.low %v867_v52, %v866_v38  ;;  %v8337_v19 = vmul.u32.u64.high %v867_v52, %v866_v38, %v8336_v18  ;;  %v774_v49 = vsel %vm772_vm13, %v773_v31, %v8276_v23  ;;  %v6597_v54 = vadd.s32 4294967294, %v679_v25 }
  0xdd   :  { %v933_v34 = vadd.s32 1, %v6607_v56  ;;  %v856_v21 = vsel %vm854_vm9, %v844_v14, 2102212464  ;;  %v775_v28 = vadd.s32 %v774_v49, %v770_v15  ;;  %v835_v32 = vshrl.u32 %v13147_v63, %v8223_v8 }
  0xde   :  { %v112_v39 = vpop.permute.xlu0 %111  ;;  %v857_v22 = vsel %vm853_vm11, %v841_v12, %v856_v21  ;;  %vm6598_vm15 = vcmp.lt.s32.totalorder %v6597_v54, 0  ;;  %v877_v23 = vadd.s32 1, %v8327_v58  ;;  %vm876_vm0 = vc.u32 %v8337_v19, %v8326_v51 }
  0xdf   :  { %v855_v46 = vsel %vm851_vm10, %v835_v32, %v838_v4  ;;  %vm934_vm14 = vcmp.gt.s32.totalorder %v933_v34, 0  ;;  %v776_v41 = vadd.s32 536870912, %v775_v28  ;;  %v413_v8 = vmul.f32 %v8004_v29, %v301_v33 }
  0xe0   :  { %v249_v0 = vmul.f32 %v8009_v30, %v112_v39  ;;  %v858_v14 = vsel %vm852_vm12, %v855_v46, %v857_v22  ;;  %v935_v42 = vsel %vm934_vm14, %v933_v34, 0  ;;  %v682_v4 = vsel %vm6598_vm15, 0, %v6597_v54 }
  0xe1   :  { %v878_v26 = vsel %vm876_vm0, %v877_v23, %v8327_v58  ;;  %v8357_v12 = vshrl.u32 %v776_v41, 30  ;;  %v874_v37 = vmul.u32 %v867_v52, %v858_v14  ;;  %v937_v6 = vand.u32 31, %v935_v42 }
  0xe2   :  { %v8359_v43 = vadd.f32 %v413_v8, %v249_v0  ;;  %v687_v31 = vsub.s32 4294967266, %v682_v4  ;;  %v667_v49 = vadd.s32 %v8141_v60, %v8148_v9  ;;  %v683_v34 = vsub.s32 32, %v682_v4 }
  0xe3   :  { %v879_v38 = vadd.s32 %v878_v26, %v874_v37  ;;  %v778_v56 = vshll.u32 %v8357_v12, 30  ;;  %v8362_v33 = vsub.s32 32, %v937_v6  ;;  %v13134_v21 = vand.u32 2147483647, %v8281_v40 }
  0xe4   :  { %v8366_v24 = vadd.f32 %v8020_v36, %v8359_v43  ;;  %v688_v25 = vadd.s32 127, %v687_v31  ;;  %v952_v39 = vshll.u32 %v13143_v13, %v937_v6  ;;  %v8382_v22 = vshrl.u32 %v935_v42, 5 }
  0xe5   :  { %v880_v57 = vadd.s32 536870912, %v879_v38  ;;  %v8368_v15 = vsub.s32 %v775_v28, %v778_v56  ;;  %v950_v52 = vshrl.u32 %v13143_v13, %v8362_v33  ;;  %v953_v58 = vshrl.u32 %v13141_v16, %v8362_v33  ;;  %v297_v56 = vpop.permute.xlu1 %296 }
  0xe6   :  { %v1134_v18 = vand.u32 2139095040, %v8366_v24  ;;  %v689_v54 = vshll.u32 %v688_v25, 23  ;;  %v949_v28 = vshll.u32 %v13145_v10, %v937_v6  ;;  %v941_v23 = vshrl.u32 %v13139_v3, %v8362_v33 }
  0xe7   :  { %v8378_v32 = vshrl.u32 %v880_v57, 30  ;;  %v944_v41 = vshrl.u32 %v13137_v5, %v8362_v33  ;;  %v947_v60 = vshrl.u32 %v13145_v10, %v8362_v33  ;;  %v781_v9 = vsub.s32 0, %v8368_v15 }
  0xe8   :  { %v1135_v46 = vshrl.u32 %v1134_v18, 23  ;;  %v951_v8 = vor.u32 %v950_v52, %v949_v28  ;;  %v954_v0 = vor.u32 %v953_v58, %v952_v39  ;;  %v930_v26 = vand.u32 8388607, %v13134_v21 }
  0xe9   :  { %v940_v42 = vshll.u32 %v13147_v63, %v937_v6  ;;  %v943_v37 = vshll.u32 %v13139_v3, %v937_v6  ;;  %v946_v31 = vshll.u32 %v13137_v5, %v937_v6  ;;  %v685_v25 = vshrl.u32 %v667_v49, %v683_v34 }
  0xea   :  { %v6615_v14 = vadd.s32 4294967169, %v1135_v46  ;;  %v882_v57 = vshll.u32 %v8378_v32, 30  ;;  %v248_v18 = vmul.f32 %v8009_v30, %v8330_v59  ;;  %vm958_vm1 = vcmp.lt.s32.totalorder %v8382_v22, 4 }
  0xeb   :  { %v942_v52 = vor.u32 %v941_v23, %v940_v42  ;;  %v945_v58 = vor.u32 %v944_v41, %v943_v37  ;;  %v948_v28 = vor.u32 %v947_v60, %v946_v31  ;;  %v6600_v39 = vmin.u32 %v781_v9, %v8368_v15 }
  0xec   :  { %v1141_v1 = vadd.s32 1, %v6615_v14  ;;  %v964_v46 = vsel %vm958_vm1, %v951_v8, 920167782  ;;  %v968_v6 = vsel %vm958_vm1, %v954_v0, 1326507024  ;;  %v412_v49 = vmul.f32 %v8004_v29, %v297_v56 }
  0xed   :  { %v684_v34 = vshll.u32 %v8236_v44, %v682_v4  ;;  %v690_v21 = vor.u32 4788187, %v689_v54  ;;  %v931_v30 = vor.u32 8388608, %v930_v26  ;;  %v8407_v59 = vsub.s32 %v879_v38, %v882_v57 }
  0xee   :  { %vm955_vm2 = vcmp.lt.s32.totalorder %v8382_v22, 1  ;;  %vm957_vm3 = vcmp.lt.s32.totalorder %v8382_v22, 3  ;;  %vm1142_vm4 = vcmp.gt.s32.totalorder %v1141_v1, 0  ;;  %v783_v38 = vclz %v6600_v39 }
  0xef   :  { %v963_v23 = vsel %vm955_vm2, %v942_v52, %v945_v58  ;;  %v965_v41 = vsel %vm957_vm3, %v948_v28, %v964_v46  ;;  %v967_v29 = vsel %vm955_vm2, %v945_v58, %v948_v28  ;;  %v969_v44 = vsel %vm957_vm3, %v951_v8, %v968_v6 }
  0xf0   :  { %v686_v4 = vor.u32 %v685_v25, %v684_v34  ;;  %v8419_v54 = vadd.f32 %v412_v49, %v248_v18  ;;  %vm956_vm5 = vcmp.lt.s32.totalorder %v8382_v22, 2  ;;  %v1143_v60 = vsel %vm1142_vm4, %v1141_v1, 0 }
  0xf1   :  { %v966_v9 = vsel %vm956_vm5, %v963_v23, %v965_v41  ;;  %v970_v0 = vsel %vm956_vm5, %v967_v29, %v969_v44  ;;  %v691_v14 = vand.u32 2147483647, %v690_v21  ;;  %v885_v26 = vsub.s32 0, %v8407_v59 }
  0xf2   :  { %13226 = vst [vmem:[#allocation3_spill] sm:$0xff] %v8419_v54  ;;  %v8427_v42 = vshll.u32 %v931_v30, 8  ;;  %v693_v37 = vcvt.s32.f32 %v686_v4  ;;  %v6601_v8 = vadd.s32 4294967294, %v783_v38  ;;  %v1145_v31 = vand.u32 31, %v1143_v60 }
  0xf3   :  { %v8431_v56 = vadd.f32 %v8020_v36, %v8419_v54  ;;  %v960_v21 = vsel %vm958_vm1, %v948_v28, 2102212464  ;;  %v6604_v46 = vmin.u32 %v885_v26, %v8407_v59  ;;  %v939_v6 = vshrl.u32 %v13147_v63, %v8362_v33 }
  0xf4   :  { %v8434_v1 = vmul.u32.u64.low %v8427_v42, %v970_v0  ;;  %v8435_v25 = vmul.u32.u64.high %v8427_v42, %v970_v0, %v8434_v1  ;;  %v8438_v57 = vmul.u32.u64.low %v8427_v42, %v966_v9  ;;  %v8439_v18 = vmul.u32.u64.high %v8427_v42, %v966_v9, %v8438_v57 }
  0xf5   :  { %13227 = vst [vmem:[#allocation4_spill] sm:$0xff] %v8431_v56  ;;  %v694_v39 = vmul.f32 %v693_v37, %v691_v14  ;;  %vm6602_vm6 = vcmp.lt.s32.totalorder %v6601_v8, 0  ;;  %v8447_v36 = vsub.s32 32, %v1145_v31  ;;  %v1030_v49 = vand.u32 2139095040, %v8431_v56 }
  0xf6   :  { %v959_v34 = vsel %vm955_vm2, %v939_v6, %v942_v52  ;;  %v961_v30 = vsel %vm957_vm3, %v945_v58, %v960_v21  ;;  %v13135_v23 = vand.u32 2147483647, %v8366_v24  ;;  %vm613_vm7 = vcmp.lt.s32.totalorder %v8040_v48, 0 }
  0xf7   :  { %v695_v28 = vxor.u32 2147483648, %v694_v39  ;;  %v697_v41 = vsub.s32 4, %v8201_v27  ;;  %v8457_v29 = vsel %vm6602_vm6, 0, %v6601_v8  ;;  %v887_v33 = vclz %v6604_v46 }
  0xf8   :  { %v962_v44 = vsel %vm956_vm5, %v959_v34, %v961_v30  ;;  %v1157_v4 = vshll.u32 %v13145_v10, %v1145_v31  ;;  %v1158_v52 = vshrl.u32 %v13143_v13, %v8447_v36  ;;  %v1031_v38 = vshrl.u32 %v1030_v49, 23 }
  0xf9   :  { %vm980_vm8 = vc.u32 %v8435_v25, %v8438_v57  ;;  %v981_v58 = vadd.s32 1, %v8439_v18  ;;  %v1138_v9 = vand.u32 8388607, %v13135_v23  ;;  %v8469_v0 = vshrl.u32 %v1143_v60, 5 }
  0xfa   :  { %v1148_v14 = vshll.u32 %v13147_v63, %v1145_v31  ;;  %v1151_v22 = vshll.u32 %v13139_v3, %v1145_v31  ;;  %v1160_v26 = vshll.u32 %v13143_v13, %v1145_v31  ;;  %v1161_v37 = vshrl.u32 %v13141_v16, %v8447_v36 }
  0xfb   :  { %v1149_v8 = vshrl.u32 %v13139_v3, %v8447_v36  ;;  %v1152_v1 = vshrl.u32 %v13137_v5, %v8447_v36  ;;  %v1154_v21 = vshll.u32 %v13137_v5, %v1145_v31  ;;  %v1155_v60 = vshrl.u32 %v13145_v10, %v8447_v36 }
  0xfc   :  { %v696_v46 = vsel %vm613_vm7, %v695_v28, %v694_v39  ;;  %v771_v6 = vadd.s32 %v8275_v62, %v8288_v50  ;;  %v1159_v49 = vor.u32 %v1158_v52, %v1157_v4  ;;  %v6611_v34 = vadd.s32 4294967169, %v1031_v38 }
  0xfd   :  { %v787_v30 = vsub.s32 32, %v8457_v29  ;;  %v791_v23 = vsub.s32 4294967266, %v8457_v29  ;;  %v6605_v35 = vadd.s32 4294967294, %v887_v33  ;;  %vm1166_vm9 = vcmp.lt.s32.totalorder %v8469_v0, 4 }
  0xfe   :  { %v978_v31 = vmul.u32 %v8427_v42, %v962_v44  ;;  %v982_v5 = vsel %vm980_vm8, %v981_v58, %v8439_v18  ;;  %v1162_v39 = vor.u32 %v1161_v37, %v1160_v26  ;;  %v1037_v28 = vadd.s32 1, %v6611_v34 }
  0xff   :  { %v1139_v3 = vor.u32 8388608, %v1138_v9  ;;  %v1150_v62 = vor.u32 %v1149_v8, %v1148_v14  ;;  %v1153_v50 = vor.u32 %v1152_v1, %v1151_v22  ;;  %v1156_v4 = vor.u32 %v1155_v60, %v1154_v21 }
 0x100   :  { %vm1163_vm10 = vcmp.lt.s32.totalorder %v8469_v0, 1  ;;  %vm1165_vm11 = vcmp.lt.s32.totalorder %v8469_v0, 3  ;;  %v1172_v33 = vsel %vm1166_vm9, %v1159_v49, 920167782  ;;  %vm1038_vm12 = vcmp.gt.s32.totalorder %v1037_v28, 0 }
 0x101   :  { %vm8501_vm13 = vcmp.le.f32.partialorder %v611_v61, 0.7853982  ;;  %vm6606_vm14 = vcmp.lt.s32.totalorder %v6605_v35, 0  ;;  %v8505_v18 = vadd.s32 %v982_v5, %v978_v31  ;;  %v698_v44 = vsel %vm613_vm7, %v697_v41, %v8201_v27  ;;  %v117_v27 = vpop.permute.xlu1 %116 }
 0x102   :  { %v699_v52 = vsel %vm8501_vm13, %v8040_v48, %v696_v46  ;;  %v1176_v38 = vsel %vm1166_vm9, %v1162_v39, 1326507024  ;;  %v1039_v58 = vsel %vm1038_vm12, %v1037_v28, 0  ;;  %v788_v61 = vshll.u32 %v8368_v15, %v8457_v29 }
 0x103   :  { %vm1164_vm15 = vcmp.lt.s32.totalorder %v8469_v0, 2  ;;  %v1171_v5 = vsel %vm1163_vm10, %v1150_v62, %v1153_v50  ;;  %v1173_v9 = vsel %vm1165_vm11, %v1156_v4, %v1172_v33  ;;  %v789_v41 = vshrl.u32 %v771_v6, %v787_v30 }
 0x104   :  { %v792_v14 = vadd.s32 127, %v791_v23  ;;  %v8522_v22 = vsel %vm6606_vm14, 0, %v6605_v35  ;;  %v8524_v26 = vshll.u32 %v1139_v3, 8  ;;  %v984_v37 = vadd.s32 536870912, %v8505_v18 }
 0x105   :  { %v1175_v15 = vsel %vm1163_vm10, %v1153_v50, %v1156_v4  ;;  %v1177_v29 = vsel %vm1165_vm11, %v1159_v49, %v1176_v38  ;;  %v1041_v8 = vand.u32 31, %v1039_v58  ;;  %v1174_v1 = vsel %vm1164_vm15, %v1171_v5, %v1173_v9  ;;  %v305_v31 = vpop.permute.xlu1 %304 }
 0x106   :  { %v700_v21 = vsel %vm8501_vm13, 0, %v698_v44  ;;  %7527 = vcosq.f32 %v699_v52  ;;  %vm717_vm0 = vcmp.lt.s32.totalorder %v8098_v7, 0  ;;  %v801_v3 = vsub.s32 4, %v8357_v12 }
 0x107   :  { %v8537_v35 = vor.u32 %v789_v41, %v788_v61  ;;  %v793_v23 = vshll.u32 %v792_v14, 23  ;;  %v895_v60 = vsub.s32 4294967266, %v8522_v22  ;;  %v1178_v46 = vsel %vm1164_vm15, %v1175_v15, %v1177_v29  ;;  %v8594_v15 = vld [vmem:[%s13120_s1] ss:$0 sm:$0xff] }
 0x108   :  { %v8542_v6 = vshrl.u32 %v984_v37, 30  ;;  %v8545_v49 = vmul.u32.u64.low %v8524_v26, %v1174_v1  ;;  %v8546_v34 = vmul.u32.u64.high %v8524_v26, %v1174_v1, %v8545_v49  ;;  %v8549_v30 = vsub.s32 32, %v1041_v8 }
 0x109   :  { %7529 = vsinq.f32 %v699_v52  ;;  %v8551_v39 = vadd.s32 3, %v700_v21  ;;  %v8555_v28 = vmul.f32 %v8199_v53, %v8033_v45  ;;  %v1147_v33 = vshrl.u32 %v13147_v63, %v8447_v36  ;;  %v8578_v36 = vld [vmem:[%s13120_s1 + $0x1] ss:$0 sm:$0xff] }
 0x10a   :  { %v8562_v42 = vsel %vm717_vm0, %v801_v3, %v8357_v12  ;;  %v1168_v44 = vsel %vm1166_vm9, %v1156_v4, 2102212464  ;;  %v8567_v38 = vmul.u32.u64.low %v8524_v26, %v1178_v46  ;;  %v8568_v52 = vmul.u32.u64.high %v8524_v26, %v1178_v46, %v8567_v38 }
 0x10b   :  { %v8570_v61 = vor.u32 4788187, %v793_v23  ;;  %v875_v5 = vadd.s32 %v8326_v51, %v8337_v19  ;;  %v414_v12 = vmul.f32 %v8578_v36, %v305_v31  ;;  %v891_v4 = vsub.s32 32, %v8522_v22 }
 0x10c   :  { %v896_v9 = vadd.s32 127, %v895_v60  ;;  %v986_v41 = vshll.u32 %v8542_v6, 30  ;;  %v1054_v14 = vshrl.u32 %v13143_v13, %v8549_v30  ;;  %v1167_v37 = vsel %vm1163_vm10, %v1147_v33, %v1150_v62 }
 0x10d   :  { %v1169_v51 = vsel %vm1165_vm11, %v1153_v50, %v1168_v44  ;;  %v1057_v19 = vshrl.u32 %v13141_v16, %v8549_v30  ;;  %v250_v29 = vmul.f32 %v8594_v15, %v117_v27  ;;  %v8598_v21 = vshrl.u32 %v1039_v58, 5 }
 0x10e   :  { %v1053_v3 = vshll.u32 %v13145_v10, %v1041_v8  ;;  %v1056_v62 = vshll.u32 %v13143_v13, %v1041_v8  ;;  %vm8604_vm1 = vcmp.le.f32.partialorder %v715_v47, 0.7853982  ;;  %v13232_v23 = vmov 2475754826   ;;  %v8624_v13 = vpop.permute.xlu0 %126 }
 0x10f   :  { %v1045_v60 = vshrl.u32 %v13232_v23, %v8549_v30  ;;  %v13233_v46 = vmov 2131351028   ;;  %v1051_v58 = vshrl.u32 %v13145_v10, %v8549_v30  ;;  %v8614_v31 = vadd.f32 %v414_v12, %v250_v29 }
 0x110   :  { %v1048_v27 = vshrl.u32 %v13233_v46, %v8549_v30  ;;  %v8616_v33 = vpop.eup %7527  ;;  %v8619_v44 = vsub.s32 %v8505_v18, %v986_v41  ;;  %v1170_v47 = vsel %vm1164_vm15, %v1167_v37, %v1169_v51  ;;  %v1189_v38 = vadd.s32 1, %v8546_v34  ;;  %v8636_v41 = vld [vmem:[%s13120_s1 + $0x2] ss:$0 sm:$0xff] }
 0x111   :  { %13234 = vst [vmem:[#allocation5_spill] sm:$0xff] %v8614_v31  ;;  %v1055_v16 = vor.u32 %v1054_v14, %v1053_v3  ;;  %v1044_v45 = vshll.u32 %v13147_v63, %v1041_v8  ;;  %v1047_v1 = vshll.u32 %v13232_v23, %v1041_v8  ;;  %v1050_v12 = vshll.u32 %v13233_v46, %v1041_v8 }
 0x112   :  { %v1058_v29 = vor.u32 %v1057_v19, %v1056_v62  ;;  %v897_v10 = vshll.u32 %v896_v9, 23  ;;  %vm1188_vm2 = vc.u32 %v8568_v52, %v8545_v49  ;;  %v13235_v18 = vand.u32 2147483647, %v8431_v56 }
 0x113   :  { %v8640_v14 = vadd.f32 %v8636_v41, %v8614_v31  ;;  %v8642_v37 = vpop.eup %7529  ;;  %v8644_v8 = vor.u32 %v1045_v60, %v1044_v45  ;;  %v8646_v9 = vor.u32 %v1048_v27, %v1047_v1  ;;  %v8648_v51 = vor.u32 %v1051_v58, %v1050_v12 }
 0x114   :  { %v1034_v0 = vand.u32 8388607, %v13235_v18  ;;  %vm1062_vm3 = vcmp.lt.s32.totalorder %v8598_v21, 4  ;;  %v893_v19 = vshrl.u32 %v875_v5, %v891_v4  ;;  %v1186_v3 = vmul.u32 %v8524_v26, %v1170_v47  ;;  %v132_v26 = vpop.permute.xlu0 %131 }
 0x115   :  { %13236 = vst [vmem:[#allocation6_spill] sm:$0xff] %v8640_v14  ;;  %v1068_v62 = vsel %vm1062_vm3, %v1055_v16, 920167782  ;;  %v1238_v18 = vand.u32 2139095040, %v8640_v14  ;;  %v795_v63 = vand.u32 2147483647, %v8570_v61  ;;  %v1190_v45 = vsel %vm1188_vm2, %v1189_v38, %v8546_v34 }
 0x116   :  { %v989_v11 = vsub.s32 0, %v8619_v44  ;;  %v1072_v1 = vsel %vm1062_vm3, %v1058_v29, 1326507024  ;;  %v892_v60 = vshll.u32 %v8407_v59, %v8522_v22  ;;  %v898_v5 = vor.u32 4788187, %v897_v10 }
 0x117   :  { %vm1059_vm4 = vcmp.lt.s32.totalorder %v8598_v21, 1  ;;  %vm1061_vm5 = vcmp.lt.s32.totalorder %v8598_v21, 3  ;;  %v1035_v4 = vor.u32 8388608, %v1034_v0  ;;  %v1239_v27 = vshrl.u32 %v1238_v18, 23 }
 0x118   :  { %v1067_v61 = vsel %vm1059_vm4, %v8644_v8, %v8646_v9  ;;  %v1069_v34 = vsel %vm1061_vm5, %v8648_v51, %v1068_v62  ;;  %v894_v58 = vor.u32 %v893_v19, %v892_v60  ;;  %v8671_v47 = vadd.s32 %v1190_v45, %v1186_v3 }
 0x119   :  { %v1071_v10 = vsel %vm1059_vm4, %v8646_v9, %v8648_v51  ;;  %v1073_v59 = vsel %vm1061_vm5, %v1055_v16, %v1072_v1  ;;  %v8681_v22 = vmul.f32 %v8199_v53, %v8078_v55  ;;  %v6608_v38 = vmin.u32 %v989_v11, %v8619_v44 }
 0x11a   :  { %vm1060_vm6 = vcmp.lt.s32.totalorder %v8598_v21, 2  ;;  %v6619_v12 = vadd.s32 4294967169, %v1239_v27  ;;  %v705_v29 = vand.u32 3, %v8551_v39  ;;  %v711_v0 = vxor.u32 2147483648, %v8616_v33  ;;  %v317_v27 = vpop.permute.xlu0 %316 }
 0x11b   :  { %v804_v19 = vsel %vm8604_vm1, 0, %v8562_v42  ;;  %v1070_v16 = vsel %vm1060_vm6, %v1067_v61, %v1069_v34  ;;  %v899_v3 = vand.u32 2147483647, %v898_v5  ;;  %v1074_v55 = vsel %vm1060_vm6, %v1071_v10, %v1073_v59 }
 0x11c   :  { %v8694_v62 = vshll.u32 %v1035_v4, 8  ;;  %v1245_v11 = vadd.s32 1, %v6619_v12  ;;  %v708_v18 = vxor.u32 2147483648, %v8642_v37  ;;  %v13237_v39 = vcvt.s32.f32 %v8537_v35 }
 0x11d   :  { %v901_v1 = vcvt.s32.f32 %v894_v58  ;;  %v1192_v60 = vadd.s32 536870912, %v8671_v47  ;;  %v991_v42 = vclz %v6608_v38  ;;  %v905_v5 = vsub.s32 4, %v8378_v32 }
 0x11e   :  { %v798_v45 = vmul.f32 %v13237_v39, %v795_v63  ;;  %v8701_v56 = vmul.u32.u64.low %v8694_v62, %v1070_v16  ;;  %v8702_v61 = vmul.u32.u64.high %v8694_v62, %v1070_v16, %v8701_v56  ;;  %vm1246_vm7 = vcmp.gt.s32.totalorder %v1245_v11, 0 }
 0x11f   :  { %v8707_v4 = vmul.u32.u64.low %v8694_v62, %v1074_v55  ;;  %v8708_v34 = vmul.u32.u64.high %v8694_v62, %v1074_v55, %v8707_v4  ;;  %v1247_v10 = vsel %vm1246_vm7, %v1245_v11, 0  ;;  %v902_v35 = vmul.f32 %v901_v1, %v899_v3 }
 0x120   :  { %v253_v63 = vmul.f32 %v8594_v15, %v132_v26  ;;  %v1249_v58 = vand.u32 31, %v1247_v10  ;;  %v417_v59 = vmul.f32 %v8578_v36, %v317_v27  ;;  %v799_v38 = vxor.u32 2147483648, %v798_v45 }
 0x121   :  { %vm821_vm8 = vcmp.lt.s32.totalorder %v8156_v17, 0  ;;  %v8715_v12 = vmul.f32 %v8199_v53, %v8145_v2  ;;  %v8717_v16 = vshrl.u32 %v1192_v60, 30  ;;  %vm707_vm9 = vcmp.eq.s32.totalorder %v705_v29, 0 }
 0x122   :  { %vm710_vm10 = vcmp.eq.s32.totalorder %v705_v29, 2  ;;  %v808_v55 = vadd.s32 3, %v804_v19  ;;  %v6609_v39 = vadd.s32 4294967294, %v991_v42  ;;  %v709_v3 = vsel %vm707_vm9, %v8616_v33, %v708_v18 }
 0x123   :  { %v712_v26 = vsel %vm710_vm10, %v711_v0, %v8642_v37  ;;  %v906_v11 = vsel %vm821_vm8, %v905_v5, %v8378_v32  ;;  %v1064_v1 = vsel %vm1062_vm3, %v8648_v51, 2102212464  ;;  %v903_v2 = vxor.u32 2147483648, %v902_v35 }
 0x124   :  { %v13238_v53 = vmov 683565275   ;;  %v8729_v27 = vsub.s32 32, %v1249_v58  ;;  %v8731_v19 = vadd.f32 %v417_v59, %v253_v63  ;;  %vm703_vm11 = vweird.f32 %v8040_v48 }
 0x125   :  { %v1043_v60 = vshrl.u32 %v13238_v53, %v8549_v30  ;;  %vm706_vm12 = vcmp.lt.s32.totalorder %v705_v29, 2  ;;  %v800_v33 = vsel %vm717_vm0, %v799_v38, %v798_v45  ;;  %v13240_v32 = vand.u32 2147483647, %v8156_v17 }
 0x126   :  { %13239 = vst [vmem:[#allocation7_spill] sm:$0xff] %v8731_v19  ;;  %v1194_v51 = vshll.u32 %v8717_v16, 30  ;;  %vm6610_vm14 = vcmp.lt.s32.totalorder %v6609_v39, 0  ;;  %v1065_v29 = vsel %vm1061_vm5, %v8646_v9, %v1064_v1  ;;  %v1085_v0 = vadd.s32 1, %v8702_v61 }
 0x127   :  { %vm8738_vm13 = vcmp.le.f32.partialorder %v13240_v32, 0.7853982  ;;  %v1063_v30 = vsel %vm1059_vm4, %v1043_v60, %v8644_v8  ;;  %v713_v18 = vsel %vm706_vm12, %v709_v3, %v712_v26  ;;  %v8750_v45 = vand.u32 3, %v808_v55 }
 0x128   :  { %v908_v42 = vsel %vm8738_vm13, 0, %v906_v11  ;;  %vm1084_vm15 = vc.u32 %v8708_v34, %v8701_v56  ;;  %v803_v5 = vsel %vm8604_vm1, %v8098_v7, %v800_v33  ;;  %v904_v8 = vsel %vm821_vm8, %v903_v2, %v902_v35 }
 0x129   :  { %v13243_v9 = vmov 920167782   ;;  %v8765_v63 = vadd.f32 %v8636_v41, %v8731_v19  ;;  %v8767_v59 = vsel %vm6610_vm14, 0, %v6609_v39  ;;  %v8770_v38 = vsub.s32 %v8671_v47, %v1194_v51 }
 0x12a   :  { %v1262_v4 = vshrl.u32 %v13243_v9, %v8729_v27  ;;  %v1066_v55 = vsel %vm1060_vm6, %v1063_v30, %v1065_v29  ;;  %v13245_v50 = vmov 1326507024   ;;  %v1086_v35 = vsel %vm1084_vm15, %v1085_v0, %v8702_v61 }
 0x12b   :  { %13244 = vst [vmem:[#allocation8_spill] sm:$0xff] %v8765_v63  ;;  %v1265_v3 = vshrl.u32 %v13245_v50, %v8729_v27  ;;  %v8778_v11 = vshrl.u32 %v1247_v10, 5  ;;  %v13246_v1 = vmov 2102212464   ;;  %v1253_v39 = vshrl.u32 %v13232_v23, %v8729_v27 }
 0x12c   :  { %v1261_v2 = vshll.u32 %v13246_v1, %v1249_v58  ;;  %v1256_v47 = vshrl.u32 %v13233_v46, %v8729_v27  ;;  %v1259_v21 = vshrl.u32 %v13246_v1, %v8729_v27  ;;  %v1264_v60 = vshll.u32 %v13243_v9, %v1249_v58 }
 0x12d   :  { %v999_v33 = vsub.s32 4294967266, %v8767_v59  ;;  %v1082_v61 = vmul.u32 %v8694_v62, %v1066_v55  ;;  %v1550_v10 = vand.u32 2139095040, %v8765_v63  ;;  %v1252_v51 = vshll.u32 %v13238_v53, %v1249_v58 }
 0x12e   :  { %v1263_v32 = vor.u32 %v1262_v4, %v1261_v2  ;;  %v1255_v30 = vshll.u32 %v13232_v23, %v1249_v58  ;;  %v1258_v29 = vshll.u32 %v13233_v46, %v1249_v58  ;;  %v1266_v0 = vor.u32 %v1265_v3, %v1264_v60  ;;  %v122_v3 = vpop.permute.xlu1 %121 }
 0x12f   :  { %v8796_v26 = vsel %vm703_vm11, nan, %v713_v18  ;;  %v1197_v19 = vsub.s32 0, %v8770_v38  ;;  %v8799_v31 = vadd.s32 %v1086_v35, %v1082_v61  ;;  %v13247_v62 = vand.u32 2147483647, %v8640_v14 }
 0x130   :  { %v8803_v55 = vor.u32 %v1253_v39, %v1252_v51  ;;  %v8805_v2 = vor.u32 %v1256_v47, %v1255_v30  ;;  %v1260_v54 = vor.u32 %v1259_v21, %v1258_v29  ;;  %vm1270_vm0 = vcmp.lt.s32.totalorder %v8778_v11, 4 }
 0x131   :  { %v1242_v4 = vand.u32 8388607, %v13247_v62  ;;  %7531 = vcosq.f32 %v803_v5  ;;  %v907_v48 = vsel %vm8738_vm13, %v8156_v17, %v904_v8  ;;  %v912_v58 = vadd.s32 3, %v908_v42 }
 0x132   :  { %v1276_v18 = vsel %vm1270_vm0, %v1263_v32, 920167782  ;;  %v995_v35 = vsub.s32 32, %v8767_v59  ;;  %v1000_v60 = vadd.s32 127, %v999_v33  ;;  %v1280_v39 = vsel %vm1270_vm0, %v1266_v0, 1326507024 }
 0x133   :  { %v1551_v47 = vshrl.u32 %v1550_v10, 23  ;;  %v6616_v21 = vmin.u32 %v1197_v19, %v8770_v38  ;;  %v1243_v61 = vor.u32 8388608, %v1242_v4  ;;  %vm1267_vm1 = vcmp.lt.s32.totalorder %v8778_v11, 1 }
 0x134   :  { %vm1269_vm2 = vcmp.lt.s32.totalorder %v8778_v11, 3  ;;  %v1088_v37 = vadd.s32 536870912, %v8799_v31  ;;  %v1275_v42 = vsel %vm1267_vm1, %v8803_v55, %v8805_v2  ;;  %7533 = vsinq.f32 %v803_v5 }
 0x135   :  { %v1277_v8 = vsel %vm1269_vm2, %v1260_v54, %v1276_v18  ;;  %v6631_v33 = vadd.s32 4294967169, %v1551_v47  ;;  %v979_v19 = vadd.s32 %v8438_v57, %v8435_v25  ;;  %v1279_v10 = vsel %vm1267_vm1, %v8805_v2, %v1260_v54  ;;  %v309_v25 = vpop.permute.xlu1 %308 }
 0x136   :  { %v1281_v51 = vsel %vm1269_vm2, %v1263_v32, %v1280_v39  ;;  %7535 = vcosq.f32 %v907_v48  ;;  %v8833_v30 = vand.u32 3, %v912_v58  ;;  %vm1268_vm3 = vcmp.lt.s32.totalorder %v8778_v11, 2 }
 0x137   :  { %v1557_v29 = vadd.s32 1, %v6631_v33  ;;  %v997_v0 = vshrl.u32 %v979_v19, %v995_v35  ;;  %v1001_v62 = vshll.u32 %v1000_v60, 23  ;;  %v1199_v4 = vclz %v6616_v21 }
 0x138   :  { %v1278_v5 = vsel %vm1268_vm3, %v1275_v42, %v1277_v8  ;;  %v8838_v57 = vshrl.u32 %v1088_v37, 30  ;;  %v1282_v18 = vsel %vm1268_vm3, %v1279_v10, %v1281_v51  ;;  %v8842_v47 = vshll.u32 %v1243_v61, 8 }
 0x139   :  { %vm1558_vm4 = vcmp.gt.s32.totalorder %v1557_v29, 0  ;;  %7537 = vsinq.f32 %v907_v48  ;;  %v996_v32 = vshll.u32 %v8619_v44, %v8767_v59  ;;  %v13155_v58 = vand.u32 2147483647, %v8765_v63 }
 0x13a   :  { %13248 = vst [vmem:[#allocation9_spill] sm:$0xff] %v8838_v57  ;;  %v1559_v35 = vsel %vm1558_vm4, %v1557_v29, 0  ;;  %v8848_v60 = vmul.u32.u64.low %v8842_v47, %v1278_v5  ;;  %v8849_v39 = vmul.u32.u64.high %v8842_v47, %v1278_v5, %v8848_v60  ;;  %v415_v37 = vmul.f32 %v8578_v36, %v309_v25 }
 0x13b   :  { %v1561_v21 = vand.u32 31, %v1559_v35  ;;  %v8853_v42 = vpop.eup %7531  ;;  %v8855_v61 = vor.u32 %v997_v0, %v996_v32  ;;  %v8857_v8 = vor.u32 4788187, %v1001_v62  ;;  %v6617_v59 = vadd.s32 4294967294, %v1199_v4 }
 0x13c   :  { %v8860_v48 = vmul.u32.u64.low %v8842_v47, %v1282_v18  ;;  %v8861_v44 = vmul.u32.u64.high %v8842_v47, %v1282_v18, %v8860_v48  ;;  %v1090_v33 = vshll.u32 %v8838_v57, 30  ;;  %v251_v10 = vmul.f32 %v8594_v15, %v122_v3 }
 0x13d   :  { %v8864_v19 = vsub.s32 32, %v1561_v21  ;;  %v1251_v51 = vshrl.u32 %v13238_v53, %v8729_v27  ;;  %v1554_v29 = vand.u32 8388607, %v13155_v58  ;;  %v1564_v0 = vshll.u32 %v13238_v53, %v1561_v21 }
 0x13e   :  { %v1567_v62 = vshll.u32 %v13232_v23, %v1561_v21  ;;  %v1272_v5 = vsel %vm1270_vm0, %v1260_v54, 2102212464  ;;  %v8875_v4 = vshrl.u32 %v1559_v35, 5  ;;  %v1573_v25 = vshll.u32 %v13246_v1, %v1561_v21  ;;  %v8880_v3 = vpop.eup %7533 }
 0x13f   :  { %v8878_v18 = vadd.f32 %v415_v37, %v251_v10  ;;  %v1565_v27 = vshrl.u32 %v13232_v23, %v8864_v19  ;;  %v1568_v32 = vshrl.u32 %v13233_v46, %v8864_v19  ;;  %v1570_v48 = vshll.u32 %v13233_v46, %v1561_v21 }
 0x140   :  { %v1571_v58 = vshrl.u32 %v13246_v1, %v8864_v19  ;;  %v8889_v54 = vpop.eup %7535  ;;  %vm6618_vm5 = vcmp.lt.s32.totalorder %v6617_v59, 0  ;;  %v8892_v35 = vsub.s32 %v8799_v31, %v1090_v33  ;;  %v1271_v37 = vsel %vm1267_vm1, %v1251_v51, %v8803_v55 }
 0x141   :  { %13249 = vst [vmem:[#allocation10_spill] sm:$0xff] %v8878_v18  ;;  %v1574_v10 = vshrl.u32 %v13243_v9, %v8864_v19  ;;  %v1273_v63 = vsel %vm1269_vm2, %v8805_v2, %v1272_v5  ;;  %v8902_v14 = vor.u32 %v1565_v27, %v1564_v0  ;;  %v8904_v57 = vor.u32 %v1568_v32, %v1567_v62 }
 0x142   :  { %v1576_v23 = vshll.u32 %v13243_v9, %v1561_v21  ;;  %v1293_v31 = vadd.s32 1, %v8849_v39  ;;  %v1555_v33 = vor.u32 8388608, %v1554_v29  ;;  %v8910_v55 = vadd.f32 %v8636_v41, %v8878_v18 }
 0x143   :  { %v1575_v1 = vor.u32 %v1574_v10, %v1573_v25  ;;  %v8912_v51 = vpop.eup %7537  ;;  %vm1292_vm6 = vc.u32 %v8861_v44, %v8848_v60  ;;  %v1572_v2 = vor.u32 %v1571_v58, %v1570_v48  ;;  %v1577_v0 = vshrl.u32 %v13245_v50, %v8864_v19 }
 0x144   :  { %13250 = vst [vmem:[#allocation11_spill] sm:$0xff] %v8910_v55  ;;  %vm1579_vm7 = vcmp.lt.s32.totalorder %v8875_v4, 1  ;;  %v1093_v21 = vsub.s32 0, %v8892_v35  ;;  %v1274_v29 = vsel %vm1268_vm3, %v1271_v37, %v1273_v63  ;;  %vm1581_vm8 = vcmp.lt.s32.totalorder %v8875_v4, 3 }
 0x145   :  { %vm1582_vm9 = vcmp.lt.s32.totalorder %v8875_v4, 4  ;;  %v1578_v62 = vor.u32 %v1577_v0, %v1576_v23  ;;  %vm1580_vm10 = vcmp.lt.s32.totalorder %v8875_v4, 2  ;;  %v1587_v58 = vsel %vm1579_vm7, %v8902_v14, %v8904_v57 }
 0x146   :  { %v1588_v5 = vsel %vm1582_vm9, %v1575_v1, 920167782  ;;  %vm814_vm11 = vcmp.eq.s32.totalorder %v8750_v45, 2  ;;  %v8933_v11 = vsel %vm6618_vm5, 0, %v6617_v59  ;;  %v1294_v63 = vsel %vm1292_vm6, %v1293_v31, %v8849_v39 }
 0x147   :  { %v8936_v25 = vshll.u32 %v1555_v33, 8  ;;  %v1342_v23 = vand.u32 2139095040, %v8910_v55  ;;  %vm811_vm12 = vcmp.eq.s32.totalorder %v8750_v45, 0  ;;  %v1290_v27 = vmul.u32 %v8842_v47, %v1274_v29 }
 0x148   :  { %v1589_v32 = vsel %vm1581_vm8, %v1572_v2, %v1588_v5  ;;  %v1591_v48 = vsel %vm1579_vm7, %v8904_v57, %v1572_v2  ;;  %v1592_v59 = vsel %vm1582_vm9, %v1578_v62, 1326507024  ;;  %vm915_vm13 = vcmp.eq.s32.totalorder %v8833_v30, 0 }
 0x149   :  { %vm918_vm14 = vcmp.eq.s32.totalorder %v8833_v30, 2  ;;  %v6612_v39 = vmin.u32 %v1093_v21, %v8892_v35  ;;  %v1590_v37 = vsel %vm1580_vm10, %v1587_v58, %v1589_v32  ;;  %v1593_v47 = vsel %vm1581_vm8, %v1575_v1, %v1592_v59 }
 0x14a   :  { %v815_v10 = vxor.u32 2147483648, %v8853_v42  ;;  %v1003_v31 = vand.u32 2147483647, %v8857_v8  ;;  %v8957_v33 = vadd.s32 %v1294_v63, %v1290_v27  ;;  %v1594_v0 = vsel %vm1580_vm10, %v1591_v48, %v1593_v47 }
 0x14b   :  { %v1207_v29 = vsub.s32 4294967266, %v8933_v11  ;;  %v8963_v62 = vmul.u32.u64.low %v8936_v25, %v1590_v37  ;;  %v8964_v21 = vmul.u32.u64.high %v8936_v25, %v1590_v37, %v8963_v62  ;;  %v1343_v58 = vshrl.u32 %v1342_v23, 23 }
 0x14c   :  { %vm810_vm15 = vcmp.lt.s32.totalorder %v8750_v45, 2  ;;  %vm925_vm0 = vcmp.lt.s32.totalorder %v8281_v40, 0  ;;  %v1005_v1 = vcvt.s32.f32 %v8855_v61  ;;  %v1563_v8 = vshrl.u32 %v13238_v53, %v8864_v19 }
 0x14d   :  { %v8973_v5 = vmul.u32.u64.low %v8936_v25, %v1594_v0  ;;  %v8974_v63 = vmul.u32.u64.high %v8936_v25, %v1594_v0, %v8973_v5  ;;  %v812_v27 = vxor.u32 2147483648, %v8880_v3  ;;  %vm914_vm1 = vcmp.lt.s32.totalorder %v8833_v30, 2 }
 0x14e   :  { %v919_v32 = vxor.u32 2147483648, %v8889_v54  ;;  %v1095_v23 = vclz %v6612_v39  ;;  %v1584_v48 = vsel %vm1582_vm9, %v1572_v2, 2102212464  ;;  %v916_v59 = vxor.u32 2147483648, %v8912_v51 }
 0x14f   :  { %v1006_v61 = vmul.f32 %v1005_v1, %v1003_v31  ;;  %v1296_v37 = vadd.s32 536870912, %v8957_v33  ;;  %v6623_v19 = vadd.s32 4294967169, %v1343_v58  ;;  %vm1133_vm2 = vcmp.lt.s32.totalorder %v8366_v24, 0 }
 0x150   :  { %v1187_v47 = vadd.s32 %v8545_v49, %v8568_v52  ;;  %v1203_v0 = vsub.s32 32, %v8933_v11  ;;  %v1208_v5 = vadd.s32 127, %v1207_v29  ;;  %vm807_vm3 = vweird.f32 %v8098_v7 }
 0x151   :  { %v816_v2 = vsel %vm814_vm11, %v815_v10, %v8880_v3  ;;  %vm911_vm4 = vweird.f32 %v8156_v17  ;;  %v13251_v39 = vand.u32 2147483647, %v8281_v40  ;;  %v1583_v49 = vsel %vm1579_vm7, %v1563_v8, %v8902_v14 }
 0x152   :  { %v1585_v52 = vsel %vm1581_vm8, %v8904_v57, %v1584_v48  ;;  %v1349_v29 = vadd.s32 1, %v6623_v19  ;;  %v813_v3 = vsel %vm811_vm12, %v8853_v42, %v812_v27  ;;  %v920_v10 = vsel %vm918_vm14, %v919_v32, %v8912_v51  ;;  %v313_v19 = vpop.permute.xlu1 %312 }
 0x153   :  { %vm8994_vm5 = vcmp.le.f32.partialorder %v13251_v39, 0.7853982  ;;  %v1009_v58 = vsub.s32 4, %v8542_v6  ;;  %v6613_v1 = vadd.s32 4294967294, %v1095_v23  ;;  %v917_v14 = vsel %vm915_vm13, %v8889_v54, %v916_v59 }
 0x154   :  { %v1007_v8 = vxor.u32 2147483648, %v1006_v61  ;;  %v1204_v57 = vshll.u32 %v8770_v38, %v8933_v11  ;;  %v9016_v48 = vshrl.u32 %v1296_v37, 30  ;;  %v1205_v39 = vshrl.u32 %v1187_v47, %v1203_v0 }
 0x155   :  { %v1209_v42 = vshll.u32 %v1208_v5, 23  ;;  %v1586_v27 = vsel %vm1580_vm10, %v1583_v49, %v1585_v52  ;;  %v1605_v51 = vadd.s32 1, %v8964_v21  ;;  %v1217_v32 = vsub.s32 4, %v8717_v16 }
 0x156   :  { %v252_v23 = vmul.f32 %v8594_v15, %v8624_v13  ;;  %vm1604_vm6 = vc.u32 %v8974_v63, %v8963_v62  ;;  %vm1350_vm7 = vcmp.gt.s32.totalorder %v1349_v29, 0  ;;  %v817_v38 = vsel %vm810_vm15, %v813_v3, %v816_v2 }
 0x157   :  { %v1010_v54 = vsel %vm925_vm0, %v1009_v58, %v8542_v6  ;;  %vm6614_vm8 = vcmp.lt.s32.totalorder %v6613_v1, 0  ;;  %v416_v4 = vmul.f32 %v8578_v36, %v313_v19  ;;  %v921_v11 = vsel %vm914_vm1, %v917_v14, %v920_v10  ;;  %v9042_v6 = vld [vmem:[%s13120_s1 + $0x3] ss:$0 sm:$0xff] }
 0x158   :  { %v1008_v13 = vsel %vm925_vm0, %v1007_v8, %v1006_v61  ;;  %v1298_v59 = vshll.u32 %v9016_v48, 30  ;;  %v1602_v37 = vmul.u32 %v8936_v25, %v1586_v27  ;;  %v1206_v47 = vor.u32 %v1205_v39, %v1204_v57 }
 0x159   :  { %v1210_v45 = vor.u32 4788187, %v1209_v42  ;;  %v1606_v0 = vsel %vm1604_vm6, %v1605_v51, %v8964_v21  ;;  %v1351_v5 = vsel %vm1350_vm7, %v1349_v29, 0  ;;  %v3840_v30 = vmul.f32 %v9042_v6, %v8796_v26 }
 0x15a   :  { %v13254_v2 = vand.u32 2147483647, %v8366_v24  ;;  %v1218_v25 = vsel %vm1133_vm2, %v1217_v32, %v8717_v16  ;;  %v1098_v21 = vsel %vm6614_vm8, 0, %v6613_v1  ;;  %v818_v49 = vsel %vm807_vm3, nan, %v817_v38 }
 0x15b   :  { %v922_v52 = vsel %vm911_vm4, nan, %v921_v11  ;;  %v1012_v26 = vsel %vm8994_vm5, 0, %v1010_v54  ;;  %v9061_v29 = vadd.f32 %v416_v4, %v252_v23  ;;  %v1011_v3 = vsel %vm8994_vm5, %v8281_v40, %v1008_v13 }
 0x15c   :  { %vm9048_vm9 = vcmp.le.f32.partialorder %v13254_v2, 0.7853982  ;;  %v9067_v10 = vsub.s32 %v8957_v33, %v1298_v59  ;;  %v9069_v16 = vadd.s32 %v1606_v0, %v1602_v37  ;;  %v1353_v58 = vand.u32 31, %v1351_v5  ;;  %v9078_v33 = vld [vmem:[%s13120_s1 + $0x4] ss:$0 sm:$0xff]  ;;  %v333_v37 = vpop.permute.xlu0 %332 }
 0x15d   :  { %13257 = vst [vmem:[#allocation12_spill] sm:$0xff] %v9061_v29  ;;  %v1211_v7 = vand.u32 2147483647, %v1210_v45  ;;  %v1213_v1 = vcvt.s32.f32 %v1206_v47  ;;  %v1220_v17 = vsel %vm9048_vm9, 0, %v1218_v25  ;;  %v1099_v14 = vsub.s32 32, %v1098_v21  ;;  %v13262_v47 = vld [vmem:[#allocation3_spill] sm:$0xff] }
 0x15e   :  { %v3841_v8 = vmul.f32 %v9042_v6, %v818_v49  ;;  %v3842_v57 = vmul.f32 %v9042_v6, %v922_v52  ;;  %v1016_v19 = vadd.s32 3, %v1012_v26  ;;  %v1103_v39 = vsub.s32 4294967266, %v1098_v21  ;;  %v13264_v49 = vld [vmem:[#allocation5_spill] sm:$0xff] }
 0x15f   :  { %7539 = vcosq.f32 %v1011_v3  ;;  %v9082_v31 = vmul.f32 %v9078_v33, %v8250_v20  ;;  %v1083_v42 = vadd.s32 %v8701_v56, %v8708_v34  ;;  %v9088_v27 = vadd.f32 %v8636_v41, %v9061_v29 }
 0x160   :  { %v1224_v51 = vadd.s32 3, %v1220_v17  ;;  %v1301_v32 = vsub.s32 0, %v9067_v10  ;;  %v1608_v23 = vadd.s32 536870912, %v9069_v16  ;;  %v9092_v38 = vsub.s32 32, %v1353_v58 }
 0x161   :  { %v9095_v54 = vadd.f32 %v8555_v28, %v3840_v30  ;;  %v1214_v4 = vmul.f32 %v1213_v1, %v1211_v7  ;;  %v9099_v20 = vmul.f32 %v9078_v33, %v8359_v43  ;;  %v1101_v56 = vshrl.u32 %v1083_v42, %v1099_v14 }
 0x162   :  { %v9102_v34 = vadd.f32 %v8681_v22, %v3841_v8  ;;  %v9105_v11 = vadd.f32 %v8715_v12, %v3842_v57  ;;  %v9107_v13 = vand.u32 3, %v1016_v19  ;;  %v1104_v59 = vadd.s32 127, %v1103_v39 }
 0x163   :  { %13258 = vst [vmem:[#allocation13_spill] sm:$0xff] %v9095_v54  ;;  %13259 = vst [vmem:[#allocation14_spill] sm:$0xff] %v9099_v20  ;;  %7541 = vsinq.f32 %v1011_v3  ;;  %v1100_v28 = vshll.u32 %v8892_v35, %v1098_v21  ;;  %v9112_v45 = vmul.f32 %v9078_v33, %v13262_v47  ;;  %v1446_v43 = vand.u32 2139095040, %v9088_v27 }
 0x164   :  { %13260 = vst [vmem:[#allocation15_spill] sm:$0xff] %v9102_v34  ;;  %13261 = vst [vmem:[#allocation16_spill] sm:$0xff] %v9105_v11  ;;  %v9115_v0 = vand.u32 3, %v1224_v51  ;;  %v6620_v22 = vmin.u32 %v1301_v32, %v9067_v10  ;;  %v9118_v30 = vshrl.u32 %v1608_v23, 30  ;;  %v1369_v12 = vshrl.u32 %v13245_v50, %v9092_v38  ;;  %v9141_v51 = vpop.permute.xlu0 %146 }
 0x165   :  { %13263 = vst [vmem:[#allocation3_spill] sm:$0xff] %v9112_v45  ;;  %v1215_v2 = vxor.u32 2147483648, %v1214_v4  ;;  %v1102_v25 = vor.u32 %v1101_v56, %v1100_v28  ;;  %v9124_v35 = vmul.f32 %v9078_v33, %v13264_v49  ;;  %v9127_v21 = vmul.f32 %v8578_v36, %v333_v37 }
 0x166   :  { %v1105_v52 = vshll.u32 %v1104_v59, 23  ;;  %v13164_v26 = vand.u32 2147483647, %v8910_v55  ;;  %v1366_v3 = vshrl.u32 %v13243_v9, %v9092_v38  ;;  %v1368_v7 = vshll.u32 %v13243_v9, %v1353_v58 }
 0x167   :  { %13265 = vst [vmem:[#allocation5_spill] sm:$0xff] %v9124_v35  ;;  %v9133_v1 = vshrl.u32 %v1351_v5, 5  ;;  %v1360_v17 = vshrl.u32 %v13233_v46, %v9092_v38  ;;  %v13266_v14 = vmov 2102212464   ;;  %v1447_v57 = vshrl.u32 %v1446_v43, 23 }
 0x168   :  { %v1363_v8 = vshrl.u32 %v13266_v14, %v9092_v38  ;;  %v1303_v19 = vclz %v6620_v22  ;;  %v1610_v36 = vshll.u32 %v9118_v30, 30  ;;  %v1365_v39 = vshll.u32 %v13266_v14, %v1353_v58 }
 0x169   :  { %v1370_v42 = vor.u32 %v1369_v12, %v1368_v7  ;;  %v9143_v32 = vpop.eup %7539  ;;  %v13267_v5 = vmov 2475754826   ;;  %v1362_v59 = vshll.u32 %v13233_v46, %v1353_v58  ;;  %v6627_v37 = vadd.s32 4294967169, %v1447_v57 }
 0x16a   :  { %v1357_v23 = vshrl.u32 %v13267_v5, %v9092_v38  ;;  %v1359_v56 = vshll.u32 %v13267_v5, %v1353_v58  ;;  %v1216_v28 = vsel %vm1133_vm2, %v1215_v2, %v1214_v4  ;;  %v1106_v47 = vor.u32 4788187, %v1105_v52 }
 0x16b   :  { %v1346_v43 = vand.u32 8388607, %v13164_v26  ;;  %v1367_v22 = vor.u32 %v1366_v3, %v1365_v39  ;;  %v1356_v12 = vshll.u32 %v13238_v53, %v1353_v58  ;;  %v1364_v7 = vor.u32 %v1363_v8, %v1362_v59 }
 0x16c   :  { %v9154_v49 = vor.u32 %v1360_v17, %v1359_v56  ;;  %vm1374_vm10 = vcmp.lt.s32.totalorder %v9133_v1, 4  ;;  %v6621_v11 = vadd.s32 4294967294, %v1303_v19  ;;  %v9158_v34 = vsub.s32 %v9069_v16, %v1610_v36  ;;  %v152_v19 = vpop.permute.xlu0 %151 }
 0x16d   :  { %v1384_v57 = vsel %vm1374_vm10, %v1370_v42, 1326507024  ;;  %v1453_v4 = vadd.s32 1, %v6627_v37  ;;  %v9162_v2 = vpop.eup %7541  ;;  %v1219_v58 = vsel %vm9048_vm9, %v8366_v24, %v1216_v28  ;;  %v1109_v3 = vcvt.s32.f32 %v1102_v25 }
 0x16e   :  { %v9168_v17 = vor.u32 %v1357_v23, %v1356_v12  ;;  %v1107_v8 = vand.u32 2147483647, %v1106_v47  ;;  %vm1371_vm11 = vcmp.lt.s32.totalorder %v9133_v1, 1  ;;  %vm1373_vm12 = vcmp.lt.s32.totalorder %v9133_v1, 3  ;;  %v13268_v47 = vld [vmem:[#allocation4_spill] sm:$0xff] }
 0x16f   :  { %v1380_v16 = vsel %vm1374_vm10, %v1367_v22, 920167782  ;;  %v1347_v36 = vor.u32 8388608, %v1346_v43  ;;  %v1383_v39 = vsel %vm1371_vm11, %v9154_v49, %v1364_v7  ;;  %v1385_v61 = vsel %vm1373_vm12, %v1367_v22, %v1384_v57  ;;  %v13269_v43 = vld [vmem:[#allocation9_spill] sm:$0xff] }
 0x170   :  { %vm1454_vm13 = vcmp.gt.s32.totalorder %v1453_v4, 0  ;;  %vm6622_vm14 = vcmp.lt.s32.totalorder %v6621_v11, 0  ;;  %v1613_v25 = vsub.s32 0, %v9158_v34  ;;  %vm1372_vm15 = vcmp.lt.s32.totalorder %v9133_v1, 2 }
 0x171   :  { %v1455_v42 = vsel %vm1454_vm13, %v1453_v4, 0  ;;  %v1379_v23 = vsel %vm1371_vm11, %v9168_v17, %v9154_v49  ;;  %v1381_v56 = vsel %vm1373_vm12, %v1364_v7, %v1380_v16  ;;  %v257_v37 = vmul.f32 %v8594_v15, %v152_v19 }
 0x172   :  { %v1457_v59 = vand.u32 31, %v1455_v42  ;;  %7543 = vcosq.f32 %v1219_v58  ;;  %vm1029_vm0 = vcmp.lt.s32.totalorder %v13268_v47, 0  ;;  %v1113_v22 = vsub.s32 4, %v13269_v43 }
 0x173   :  { %v1386_v12 = vsel %vm1372_vm15, %v1383_v39, %v1385_v61  ;;  %7545 = vsinq.f32 %v1219_v58  ;;  %v1110_v57 = vmul.f32 %v1109_v3, %v1107_v8  ;;  %v9193_v4 = vshll.u32 %v1347_v36, 8 }
 0x174   :  { %v9195_v26 = vsub.s32 32, %v1457_v59  ;;  %v9198_v16 = vsel %vm6622_vm14, 0, %v6621_v11  ;;  %v1355_v15 = vshrl.u32 %v13238_v53, %v9092_v38  ;;  %v1382_v19 = vsel %vm1372_vm15, %v1379_v23, %v1381_v56 }
 0x175   :  { %v6632_v28 = vmin.u32 %v1613_v25, %v9158_v34  ;;  %v9207_v58 = vmul.u32.u64.low %v9193_v4, %v1386_v12  ;;  %v9208_v3 = vmul.u32.u64.high %v9193_v4, %v1386_v12, %v9207_v58  ;;  %v9211_v8 = vadd.f32 %v9127_v21, %v257_v37 }
 0x176   :  { %v1461_v11 = vshrl.u32 %v13267_v5, %v9195_v26  ;;  %v1464_v38 = vshrl.u32 %v13233_v46, %v9195_v26  ;;  %v1467_v36 = vshrl.u32 %v13266_v14, %v9195_v26  ;;  %v1470_v39 = vshrl.u32 %v13243_v9, %v9195_v26 }
 0x177   :  { %vm1019_vm1 = vcmp.eq.s32.totalorder %v9107_v13, 0  ;;  %vm1022_vm2 = vcmp.eq.s32.totalorder %v9107_v13, 2  ;;  %v1376_v21 = vsel %vm1374_vm10, %v1364_v7, 2102212464  ;;  %v1469_v23 = vshll.u32 %v13266_v14, %v1457_v59 }
 0x178   :  { %v9226_v61 = vmul.u32.u64.low %v9193_v4, %v1382_v19  ;;  %v9227_v25 = vmul.u32.u64.high %v9193_v4, %v1382_v19, %v9226_v61  ;;  %v9231_v56 = vshrl.u32 %v1455_v42, 5  ;;  %v1460_v37 = vshll.u32 %v13238_v53, %v1457_v59 }
 0x179   :  { %v1463_v12 = vshll.u32 %v13267_v5, %v1457_v59  ;;  %v1466_v58 = vshll.u32 %v13233_v46, %v1457_v59  ;;  %v13270_v52 = vand.u32 2147483647, %v13268_v47  ;;  %v13273_v7 = vand.u32 2147483647, %v9088_v27 }
 0x17a   :  { %v1471_v35 = vor.u32 %v1470_v39, %v1469_v23  ;;  %v1472_v55 = vshll.u32 %v13243_v9, %v1457_v59  ;;  %v1473_v42 = vshrl.u32 %v13245_v50, %v9195_v26  ;;  %v9247_v29 = vor.u32 %v1461_v11, %v1460_v37 }
 0x17b   :  { %vm9238_vm3 = vcmp.le.f32.partialorder %v13270_v52, 0.7853982  ;;  %v1450_v19 = vand.u32 8388607, %v13273_v7  ;;  %v9249_v45 = vor.u32 %v1464_v38, %v1463_v12  ;;  %v9251_v18 = vor.u32 %v1467_v36, %v1466_v58 }
 0x17c   :  { %v9255_v52 = vadd.f32 %v8636_v41, %v9211_v8  ;;  %v1111_v20 = vxor.u32 2147483648, %v1110_v57  ;;  %v1114_v39 = vsel %vm1029_vm0, %v1113_v22, %v13269_v43  ;;  %v1615_v23 = vclz %v6632_v28  ;;  %v9260_v7 = vpop.eup %7543 }
 0x17d   :  { %v1474_v59 = vor.u32 %v1473_v42, %v1472_v55  ;;  %v1311_v11 = vsub.s32 4294967266, %v9198_v16  ;;  %v1375_v38 = vsel %vm1371_vm11, %v1355_v15, %v9168_v17  ;;  %v1377_v41 = vsel %vm1373_vm12, %v9154_v49, %v1376_v21  ;;  %v9270_v36 = vpop.eup %7545 }
 0x17e   :  { %13274 = vst [vmem:[#allocation4_spill] sm:$0xff] %v9255_v52  ;;  %vm1478_vm4 = vcmp.lt.s32.totalorder %v9231_v56, 4  ;;  %vm1018_vm5 = vcmp.lt.s32.totalorder %v9107_v13, 2  ;;  %v1451_v28 = vor.u32 8388608, %v1450_v19  ;;  %vm1475_vm6 = vcmp.lt.s32.totalorder %v9231_v56, 1 }
 0x17f   :  { %vm1477_vm7 = vcmp.lt.s32.totalorder %v9231_v56, 3  ;;  %v1484_v55 = vsel %vm1478_vm4, %v1471_v35, 920167782  ;;  %v1483_v17 = vsel %vm1475_vm6, %v9247_v29, %v9249_v45  ;;  %v1488_v43 = vsel %vm1478_vm4, %v1474_v59, 1326507024 }
 0x180   :  { %v1485_v49 = vsel %vm1477_vm7, %v9251_v18, %v1484_v55  ;;  %v1966_v22 = vand.u32 2139095040, %v9255_v52  ;;  %v6633_v15 = vadd.s32 4294967294, %v1615_v23  ;;  %v1397_v21 = vadd.s32 1, %v9227_v25 }
 0x181   :  { %v1487_v37 = vsel %vm1475_vm6, %v9249_v45, %v9251_v18  ;;  %v1489_v12 = vsel %vm1477_vm7, %v1471_v35, %v1488_v43  ;;  %v13275_v58 = vxor.u32 2147483648, %v9162_v2  ;;  %v13276_v42 = vxor.u32 2147483648, %v9143_v32 }
 0x182   :  { %vm1396_vm8 = vc.u32 %v9208_v3, %v9226_v61  ;;  %vm1476_vm9 = vcmp.lt.s32.totalorder %v9231_v56, 2  ;;  %v1112_v35 = vsel %vm1029_vm0, %v1111_v20, %v1110_v57  ;;  %v1312_v59 = vadd.s32 127, %v1311_v11 }
 0x183   :  { %v1021_v19 = vsel %vm1019_vm1, %v9143_v32, %v13275_v58  ;;  %v1024_v23 = vsel %vm1022_vm2, %v13276_v42, %v9162_v2  ;;  %v1378_v55 = vsel %vm1372_vm15, %v1375_v38, %v1377_v41  ;;  %v1486_v43 = vsel %vm1476_vm9, %v1483_v17, %v1485_v49 }
 0x184   :  { %v1116_v32 = vsel %vm9238_vm3, 0, %v1114_v39  ;;  %v1490_v2 = vsel %vm1476_vm9, %v1487_v37, %v1489_v12  ;;  %v9317_v58 = vshll.u32 %v1451_v28, 8  ;;  %v1967_v42 = vshrl.u32 %v1966_v22, 23 }
 0x185   :  { %vm1015_vm10 = vweird.f32 %v8281_v40  ;;  %vm1227_vm11 = vcmp.eq.s32.totalorder %v9115_v0, 0  ;;  %vm1230_vm12 = vcmp.eq.s32.totalorder %v9115_v0, 2  ;;  %v1291_v20 = vadd.s32 %v8848_v60, %v8861_v44 }
 0x186   :  { %v1307_v1 = vsub.s32 32, %v9198_v16  ;;  %vm6634_vm13 = vcmp.lt.s32.totalorder %v6633_v15, 0  ;;  %v1398_v57 = vsel %vm1396_vm8, %v1397_v21, %v9227_v25  ;;  %v1115_v39 = vsel %vm9238_vm3, %v13268_v47, %v1112_v35  ;;  %v7351_v25 = vld [vmem:[%s13121_s2 + $0x4] ss:$8 sps:$4 sm:$0xff]   ;;  %v7353_v21 = vld [vmem:[%s13121_s2] ss:$8 sps:$4 sm:$0xff]  }
 0x187   :  { %v1394_v11 = vmul.u32 %v9193_v4, %v1378_v55  ;;  %v9334_v38 = vmul.u32.u64.low %v9317_v58, %v1486_v43  ;;  %v9335_v41 = vmul.u32.u64.high %v9317_v58, %v1486_v43, %v9334_v38  ;;  %v1313_v60 = vshll.u32 %v1312_v59, 23  ;;  %v137_v55 = vpop.permute.xlu1 %136  ;;  %4052 = vmatprep.subr.bf16.mxu0 %v7351_v25  ;;  %7165 = vmatprep.subr.bf16.mxu1 %v7351_v25 }
 0x188   :  { %v9339_v44 = vmul.u32.u64.low %v9317_v58, %v1490_v2  ;;  %v9340_v28 = vmul.u32.u64.high %v9317_v58, %v1490_v2, %v9339_v44  ;;  %v6647_v17 = vadd.s32 4294967169, %v1967_v42  ;;  %v1025_v54 = vsel %vm1018_vm5, %v1021_v19, %v1024_v23  ;;  %4053 = vmatpush1.bf16.msra.mxu0 %v7353_v21  ;;  %7169 = vmatpush1.bf16.msra.mxu1 %v7353_v21  ;;  %v7354_v2 = vld [vmem:[%s13121_s2 + $0x14] ss:$8 sps:$4 sm:$0xff]  }
 0x189   :  { %v1120_v49 = vadd.s32 3, %v1116_v32  ;;  %v1618_v4 = vsel %vm6634_vm13, 0, %v6633_v15  ;;  %v9347_v22 = vadd.s32 %v1398_v57, %v1394_v11  ;;  %vm1226_vm14 = vcmp.lt.s32.totalorder %v9115_v0, 2  ;;  %4054 = vmatprep.subr.bf16.mxu0 %v7354_v2  ;;  %7166 = vmatprep.subr.bf16.mxu1 %v7354_v2  ;;  %v13278_v2 = vld [vmem:[#allocation6_spill] sm:$0xff] }
 0x18a   :  { %v1228_v37 = vxor.u32 2147483648, %v9270_v36  ;;  %v1231_v12 = vxor.u32 2147483648, %v9260_v7  ;;  %v1309_v35 = vshrl.u32 %v1291_v20, %v1307_v1  ;;  %v1973_v59 = vadd.s32 1, %v6647_v17 }
 0x18b   :  { %7547 = vcosq.f32 %v1115_v39  ;;  %v1308_v13 = vshll.u32 %v9067_v10, %v9198_v16  ;;  %v1603_v15 = vadd.s32 %v8963_v62, %v8974_v63  ;;  %v1480_v19 = vsel %vm1478_vm4, %v9251_v18, 2102212464  ;;  %v7356_v18 = vld [vmem:[%s13121_s2 + $0x10] ss:$8 sps:$4 sm:$0xff]   ;;  %v321_v40 = vpop.permute.xlu1 %320 }
 0x18c   :  { %v1314_v23 = vor.u32 4788187, %v1313_v60  ;;  %v1619_v43 = vsub.s32 32, %v1618_v4  ;;  %v1459_v32 = vshrl.u32 %v13238_v53, %v9195_v26  ;;  %vm1974_vm15 = vcmp.gt.s32.totalorder %v1973_v59, 0  ;;  %4055 = vmatpush1.bf16.msra.mxu0 %v7356_v18  ;;  %7170 = vmatpush1.bf16.msra.mxu1 %v7356_v18 }
 0x18d   :  { %7549 = vsinq.f32 %v1115_v39  ;;  %v1623_v10 = vsub.s32 4294967266, %v1618_v4  ;;  %v1400_v62 = vadd.s32 536870912, %v9347_v22  ;;  %v1975_v63 = vsel %vm1974_vm15, %v1973_v59, 0 }
 0x18e   :  { %v1310_v16 = vor.u32 %v1309_v35, %v1308_v13  ;;  %v1479_v42 = vsel %vm1475_vm6, %v1459_v32, %v9247_v29  ;;  %v1481_v26 = vsel %vm1477_vm7, %v9249_v45, %v1480_v19  ;;  %v1977_v20 = vand.u32 31, %v1975_v63  ;;  %v9419_v35 = vld [vmem:[%s13120_s1 + $0x1] ss:$0 sm:$0xff] }
 0x18f   :  { %v1026_v1 = vsel %vm1015_vm10, nan, %v1025_v54  ;;  %v1229_v57 = vsel %vm1227_vm11, %v9260_v7, %v1228_v37  ;;  %v1232_v39 = vsel %vm1230_vm12, %v1231_v12, %v9270_v36  ;;  %v1501_v29 = vadd.s32 1, %v9335_v41  ;;  %v13277_v37 = vld [vmem:[#allocation7_spill] sm:$0xff] }
 0x190   :  { %v1315_v11 = vand.u32 2147483647, %v1314_v23  ;;  %v1620_v45 = vshll.u32 %v9158_v34, %v1618_v4  ;;  %v1621_v60 = vshrl.u32 %v1603_v15, %v1619_v43  ;;  %vm1500_vm0 = vc.u32 %v9340_v28, %v9334_v38  ;;  %v9403_v4 = vld [vmem:[%s13120_s1] ss:$0 sm:$0xff] }
 0x191   :  { %v1624_v44 = vadd.s32 127, %v1623_v10  ;;  %v9389_v17 = vshrl.u32 %v1400_v62, 30  ;;  %v1482_v7 = vsel %vm1476_vm9, %v1479_v42, %v1481_v26  ;;  %v9393_v25 = vsub.s32 32, %v1977_v20 }
 0x192   :  { %v9396_v36 = vmul.f32 %v9042_v6, %v1026_v1  ;;  %v9398_v54 = vand.u32 3, %v1120_v49  ;;  %v1317_v34 = vcvt.s32.f32 %v1310_v16  ;;  %v9407_v21 = vmul.f32 %v9403_v4, %v9141_v51 }
 0x193   :  { %v1233_v56 = vsel %vm1226_vm14, %v1229_v57, %v1232_v39  ;;  %v9413_v12 = vmul.f32 %v9078_v33, %v13277_v37  ;;  %v1502_v49 = vsel %vm1500_vm0, %v1501_v29, %v9335_v41  ;;  %v418_v59 = vmul.f32 %v9419_v35, %v321_v40  ;;  %v9463_v37 = vpop.permute.xlu0 %166 }
 0x194   :  { %v9422_v13 = vmul.f32 %v1317_v34, %v1315_v11  ;;  %v9424_v51 = vor.u32 %v1621_v60, %v1620_v45  ;;  %v1498_v0 = vmul.u32 %v9317_v58, %v1482_v7  ;;  %v254_v15 = vmul.f32 %v9403_v4, %v137_v55 }
 0x195   :  { %v7548_v19 = vpop.eup %7547  ;;  %v1625_v23 = vshll.u32 %v1624_v44, 23  ;;  %v1402_v43 = vshll.u32 %v9389_v17, 30  ;;  %v1989_v41 = vshll.u32 %v13266_v14, %v1977_v20  ;;  %v1990_v32 = vshrl.u32 %v13243_v9, %v9393_v25 }
 0x196   :  { %vm1223_vm1 = vweird.f32 %v8366_v24  ;;  %vm1123_vm2 = vcmp.eq.s32.totalorder %v9398_v54, 0  ;;  %vm1126_vm3 = vcmp.eq.s32.totalorder %v9398_v54, 2  ;;  %vm1237_vm4 = vcmp.lt.s32.totalorder %v13278_v2, 0 }
 0x197   :  { %v9436_v58 = vadd.s32 %v1502_v49, %v1498_v0  ;;  %v13170_v55 = vand.u32 2147483647, %v9255_v52  ;;  %v9439_v10 = vshrl.u32 %v1975_v63, 5  ;;  %v1992_v62 = vshll.u32 %v13243_v9, %v1977_v20  ;;  %v7550_v18 = vpop.eup %7549 }
 0x198   :  { %v1980_v16 = vshll.u32 %v13238_v53, %v1977_v20  ;;  %v1983_v42 = vshll.u32 %v13267_v5, %v1977_v20  ;;  %v1993_v26 = vshrl.u32 %v13245_v50, %v9393_v25  ;;  %v9446_v1 = vadd.f32 %v418_v59, %v254_v15 }
 0x199   :  { %v1981_v57 = vshrl.u32 %v13267_v5, %v9393_v25  ;;  %v1984_v39 = vshrl.u32 %v13233_v46, %v9393_v25  ;;  %v1986_v63 = vshll.u32 %v13233_v46, %v1977_v20  ;;  %v1987_v29 = vshrl.u32 %v13266_v14, %v9393_v25 }
 0x19a   :  { %13279 = vst [vmem:[#allocation9_spill] sm:$0xff] %v9446_v1  ;;  %v1321_v11 = vsub.s32 4, %v9016_v48  ;;  %v1626_v45 = vor.u32 4788187, %v1625_v23  ;;  %v9457_v60 = vsub.s32 %v9347_v22, %v1402_v43  ;;  %v1991_v40 = vor.u32 %v1990_v32, %v1989_v41  ;;  %v9480_v32 = vld [vmem:[%s13120_s1 + $0x2] ss:$0 sm:$0xff] }
 0x19b   :  { %v1504_v44 = vadd.s32 536870912, %v9436_v58  ;;  %v1970_v7 = vand.u32 8388607, %v13170_v55  ;;  %v1994_v34 = vor.u32 %v1993_v26, %v1992_v62  ;;  %vm1998_vm5 = vcmp.lt.s32.totalorder %v9439_v10, 4  ;;  %v13284_v55 = vld [vmem:[#allocation8_spill] sm:$0xff] }
 0x19c   :  { %v1124_v20 = vxor.u32 2147483648, %v7550_v18  ;;  %v1127_v49 = vxor.u32 2147483648, %v7548_v19  ;;  %v13280_v59 = vand.u32 2147483647, %v13278_v2  ;;  %v1319_v22 = vxor.u32 2147483648, %v9422_v13 }
 0x19d   :  { %v1629_v15 = vcvt.s32.f32 %v9424_v51  ;;  %v9473_v23 = vor.u32 %v1981_v57, %v1980_v16  ;;  %v9475_v43 = vor.u32 %v1984_v39, %v1983_v42  ;;  %v1988_v41 = vor.u32 %v1987_v29, %v1986_v63 }
 0x19e   :  { %vm9467_vm6 = vcmp.le.f32.partialorder %v13280_v59, 0.7853982  ;;  %v9484_v62 = vadd.f32 %v9480_v32, %v9446_v1  ;;  %v1627_v26 = vand.u32 2147483647, %v1626_v45  ;;  %vm1995_vm7 = vcmp.lt.s32.totalorder %v9439_v10, 1 }
 0x19f   :  { %vm1997_vm8 = vcmp.lt.s32.totalorder %v9439_v10, 3  ;;  %v2004_v51 = vsel %vm1998_vm5, %v1991_v40, 920167782  ;;  %v1405_v16 = vsub.s32 0, %v9457_v60  ;;  %v9491_v42 = vshrl.u32 %v1504_v44, 30 }
 0x1a0   :  { %13283 = vst [vmem:[#allocation7_spill] sm:$0xff] %v9484_v62  ;;  %v1971_v57 = vor.u32 8388608, %v1970_v7  ;;  %v2008_v39 = vsel %vm1998_vm5, %v1994_v34, 1326507024  ;;  %v1234_v63 = vsel %vm1223_vm1, nan, %v1233_v56  ;;  %vm1119_vm9 = vweird.f32 %v13268_v47  ;;  %v172_v7 = vpop.permute.xlu0 %171 }
 0x1a1   :  { %v1125_v29 = vsel %vm1123_vm2, %v7548_v19, %v1124_v20  ;;  %v1128_v45 = vsel %vm1126_vm3, %v1127_v49, %v7550_v18  ;;  %v1322_v44 = vsel %vm1237_vm4, %v1321_v11, %v9016_v48  ;;  %vm1996_vm10 = vcmp.lt.s32.totalorder %v9439_v10, 2 }
 0x1a2   :  { %v2003_v24 = vsel %vm1995_vm7, %v9473_v23, %v9475_v43  ;;  %v2005_v56 = vsel %vm1997_vm8, %v1988_v41, %v2004_v51  ;;  %v1654_v19 = vand.u32 2139095040, %v9484_v62  ;;  %v1320_v18 = vsel %vm1237_vm4, %v1319_v22, %v9422_v13  ;;  %v13296_v13 = vld [vmem:[#allocation12_spill] sm:$0xff] }
 0x1a3   :  { %v1630_v34 = vmul.f32 %v1629_v15, %v1627_v26  ;;  %v2007_v48 = vsel %vm1995_vm7, %v9475_v43, %v1988_v41  ;;  %v2009_v11 = vsel %vm1997_vm8, %v1991_v40, %v2008_v39  ;;  %v6624_v20 = vmin.u32 %v1405_v16, %v9457_v60 }
 0x1a4   :  { %v1506_v49 = vshll.u32 %v9491_v42, 30  ;;  %v9523_v59 = vshll.u32 %v1971_v57, 8  ;;  %v1655_v51 = vshrl.u32 %v1654_v19, 23  ;;  %vm1122_vm11 = vcmp.lt.s32.totalorder %v9398_v54, 2 }
 0x1a5   :  { %v13285_v52 = vand.u32 2147483647, %v13284_v55  ;;  %vm1549_vm13 = vcmp.lt.s32.totalorder %v13284_v55, 0  ;;  %v2006_v40 = vsel %vm1996_vm10, %v2003_v24, %v2005_v56  ;;  %v3845_v22 = vmul.f32 %v9042_v6, %v1234_v63 }
 0x1a6   :  { %v1324_v15 = vsel %vm9467_vm6, 0, %v1322_v44  ;;  %v1633_v26 = vsub.s32 4, %v9118_v30  ;;  %v2010_v54 = vsel %vm1996_vm10, %v2007_v48, %v2009_v11  ;;  %v1129_v16 = vsel %vm1122_vm11, %v1125_v29, %v1128_v45  ;;  %v349_v44 = vpop.permute.xlu0 %348 }
 0x1a7   :  { %vm9528_vm12 = vcmp.le.f32.partialorder %v13285_v52, 0.7853982  ;;  %v1323_v52 = vsel %vm9467_vm6, %v13278_v2, %v1320_v18  ;;  %v1631_v57 = vxor.u32 2147483648, %v1630_v34  ;;  %v6635_v39 = vadd.s32 4294967169, %v1655_v51  ;;  %v7357_v18 = vld [vmem:[%s13121_s2 + $0x24] ss:$8 sps:$4 sm:$0xff]  }
 0x1a8   :  { %v1407_v19 = vclz %v6624_v20  ;;  %v9545_v24 = vsub.s32 %v9436_v58, %v1506_v49  ;;  %v9548_v63 = vmul.u32.u64.low %v9523_v59, %v2006_v40  ;;  %v9549_v56 = vmul.u32.u64.high %v9523_v59, %v2006_v40, %v9548_v63  ;;  %v7359_v49 = vld [vmem:[%s13121_s2 + $0x20] ss:$8 sps:$4 sm:$0xff]   ;;  %4056 = vmatprep.subr.bf16.mxu0 %v7357_v18  ;;  %7167 = vmatprep.subr.bf16.mxu1 %v7357_v18 }
 0x1a9   :  { %v1979_v48 = vshrl.u32 %v13238_v53, %v9393_v25  ;;  %v9555_v29 = vmul.u32.u64.low %v9523_v59, %v2010_v54  ;;  %v9556_v45 = vmul.u32.u64.high %v9523_v59, %v2010_v54, %v9555_v29  ;;  %v1661_v0 = vadd.s32 1, %v6635_v39  ;;  %4057 = vmatpush1.bf16.msra.mxu0 %v7359_v49  ;;  %7171 = vmatpush1.bf16.msra.mxu1 %v7359_v49 }
 0x1aa   :  { %v1130_v58 = vsel %vm1119_vm9, nan, %v1129_v16  ;;  %v1328_v11 = vadd.s32 3, %v1324_v15  ;;  %v9566_v20 = vsel %vm1549_vm13, %v1633_v26, %v9118_v30  ;;  %v2000_v25 = vsel %vm1998_vm5, %v1988_v41, 2102212464 }
 0x1ab   :  { %7551 = vcosq.f32 %v1323_v52  ;;  %v261_v51 = vmul.f32 %v9403_v4, %v172_v7  ;;  %vm1662_vm14 = vcmp.gt.s32.totalorder %v1661_v0, 0  ;;  %v425_v47 = vmul.f32 %v9419_v35, %v349_v44 }
 0x1ac   :  { %v1632_v40 = vsel %vm1549_vm13, %v1631_v57, %v1630_v34  ;;  %v6625_v30 = vadd.s32 4294967294, %v1407_v19  ;;  %v1509_v15 = vsub.s32 0, %v9545_v24  ;;  %v1663_v26 = vsel %vm1662_vm14, %v1661_v0, 0  ;;  %v13289_v57 = vld [vmem:[#allocation14_spill] sm:$0xff] }
 0x1ad   :  { %v1999_v41 = vsel %vm1995_vm7, %v1979_v48, %v9473_v23  ;;  %v2001_v7 = vsel %vm1997_vm8, %v9475_v43, %v2000_v25  ;;  %v13173_v54 = vand.u32 2147483647, %v9484_v62  ;;  %v1665_v16 = vand.u32 31, %v1663_v26  ;;  %v13294_v62 = vld [vmem:[#allocation3_spill] sm:$0xff] }
 0x1ae   :  { %v9587_v34 = vadd.f32 %v9082_v31, %v9396_v36  ;;  %v9590_v39 = vadd.f32 %v13289_v57, %v3845_v22  ;;  %7553 = vsinq.f32 %v1323_v52  ;;  %v9592_v19 = vand.u32 3, %v1328_v11 }
 0x1af   :  { %v9595_v44 = vmul.f32 %v9042_v6, %v1130_v58  ;;  %v9600_v43 = vsub.s32 32, %v1665_v16  ;;  %v9602_v48 = vadd.f32 %v425_v47, %v261_v51  ;;  %v1635_v31 = vsel %vm9528_vm12, %v13284_v55, %v1632_v40 }
 0x1b0   :  { %13288 = vst [vmem:[#allocation6_spill] sm:$0xff] %v9587_v34  ;;  %13290 = vst [vmem:[#allocation8_spill] sm:$0xff] %v9590_v39  ;;  %vm6626_vm15 = vcmp.lt.s32.totalorder %v6625_v30, 0  ;;  %v6628_v36 = vmin.u32 %v1509_v15, %v9545_v24  ;;  %v2002_v22 = vsel %vm1996_vm10, %v1999_v41, %v2001_v7  ;;  %vm2020_vm0 = vc.u32 %v9556_v45, %v9548_v63 }
 0x1b1   :  { %13291 = vst [vmem:[#allocation14_spill] sm:$0xff] %v9602_v48  ;;  %v2021_v6 = vadd.s32 1, %v9549_v56  ;;  %v1658_v52 = vand.u32 8388607, %v13173_v54  ;;  %v1668_v29 = vshll.u32 %v13238_v53, %v1665_v16  ;;  %v1669_v0 = vshrl.u32 %v13267_v5, %v9600_v43 }
 0x1b2   :  { %v1671_v18 = vshll.u32 %v13267_v5, %v1665_v16  ;;  %v1672_v58 = vshrl.u32 %v13233_v46, %v9600_v43  ;;  %v1675_v10 = vshrl.u32 %v13266_v14, %v9600_v43  ;;  %v9623_v11 = vshrl.u32 %v1663_v26, 5 }
 0x1b3   :  { %v1674_v25 = vshll.u32 %v13233_v46, %v1665_v16  ;;  %v1678_v49 = vshrl.u32 %v13243_v9, %v9600_v43  ;;  %v9630_v51 = vadd.f32 %v9480_v32, %v9602_v48  ;;  %7555 = vcosq.f32 %v1635_v31 }
 0x1b4   :  { %v9632_v47 = vor.u32 %v1669_v0, %v1668_v29  ;;  %v9634_v40 = vor.u32 %v1672_v58, %v1671_v18  ;;  %v1677_v15 = vshll.u32 %v13266_v14, %v1665_v16  ;;  %v9638_v26 = vsel %vm6626_vm15, 0, %v6625_v30 }
 0x1b5   :  { %v7552_v41 = vpop.eup %7551  ;;  %v2018_v7 = vmul.u32 %v9523_v59, %v2002_v22  ;;  %v1659_v57 = vor.u32 8388608, %v1658_v52  ;;  %v1676_v54 = vor.u32 %v1675_v10, %v1674_v25  ;;  %v2022_v23 = vsel %vm2020_vm0, %v2021_v6, %v9549_v56 }
 0x1b6   :  { %v1679_v39 = vor.u32 %v1678_v49, %v1677_v15  ;;  %v1680_v29 = vshll.u32 %v13243_v9, %v1665_v16  ;;  %v1681_v0 = vshrl.u32 %v13245_v50, %v9600_v43  ;;  %v1511_v18 = vclz %v6628_v36 }
 0x1b7   :  { %vm1683_vm1 = vcmp.lt.s32.totalorder %v9623_v11, 1  ;;  %vm1686_vm2 = vcmp.lt.s32.totalorder %v9623_v11, 4  ;;  %v2382_v59 = vand.u32 2139095040, %v9630_v51  ;;  %vm1685_vm3 = vcmp.lt.s32.totalorder %v9623_v11, 3 }
 0x1b8   :  { %v7554_v30 = vpop.eup %7553  ;;  %v1682_v22 = vor.u32 %v1681_v0, %v1680_v29  ;;  %v1691_v56 = vsel %vm1683_vm1, %v9632_v47, %v9634_v40  ;;  %v1692_v16 = vsel %vm1686_vm2, %v1679_v39, 920167782  ;;  %vm1330_vm4 = vcmp.lt.s32.totalorder %v9592_v19, 2  ;;  %v142_v0 = vpop.permute.xlu1 %141 }
 0x1b9   :  { %v1415_v36 = vsub.s32 4294967266, %v9638_v26  ;;  %v9660_v6 = vadd.s32 %v2022_v23, %v2018_v7  ;;  %vm1684_vm5 = vcmp.lt.s32.totalorder %v9623_v11, 2  ;;  %v1693_v52 = vsel %vm1685_vm3, %v1676_v54, %v1692_v16  ;;  %v7360_v23 = vld [vmem:[%s13121_s2 + $0x34] ss:$8 sps:$4 sm:$0xff]  }
 0x1ba   :  { %v1694_v58 = vsel %vm1684_vm5, %v1691_v56, %v1693_v52  ;;  %v1695_v10 = vsel %vm1683_vm1, %v9634_v40, %v1676_v54  ;;  %v1696_v25 = vsel %vm1686_vm2, %v1682_v22, 1326507024  ;;  %v9672_v49 = vshll.u32 %v1659_v57, 8  ;;  %v7362_v56 = vld [vmem:[%s13121_s2 + $0x30] ss:$8 sps:$4 sm:$0xff]   ;;  %4058 = vmatprep.subr.bf16.mxu0 %v7360_v23  ;;  %7168 = vmatprep.subr.bf16.mxu1 %v7360_v23 }
 0x1bb   :  { %v1332_v15 = vxor.u32 2147483648, %v7554_v30  ;;  %v1335_v7 = vxor.u32 2147483648, %v7552_v41  ;;  %7557 = vsinq.f32 %v1635_v31  ;;  %v2383_v29 = vshrl.u32 %v2382_v59, 23  ;;  %4059 = vmatpush1.bf16.msra.mxu0 %v7362_v56  ;;  %7172 = vmatpush1.bf16.msra.mxu1 %v7362_v56 }
 0x1bc   :  { %v6629_v16 = vadd.s32 4294967294, %v1511_v18  ;;  %v1697_v52 = vsel %vm1685_vm3, %v1679_v39, %v1696_v25  ;;  %v9683_v57 = vmul.u32.u64.low %v9672_v49, %v1694_v58  ;;  %v9684_v22 = vmul.u32.u64.high %v9672_v49, %v1694_v58, %v9683_v57 }
 0x1bd   :  { %vm1331_vm6 = vcmp.eq.s32.totalorder %v9592_v19, 0  ;;  %vm1334_vm7 = vcmp.eq.s32.totalorder %v9592_v19, 2  ;;  %v1416_v31 = vadd.s32 127, %v1415_v36  ;;  %v1698_v59 = vsel %vm1684_vm5, %v1695_v10, %v1697_v52  ;;  %v9691_v18 = vpop.eup %7555  ;;  %v13293_v10 = vld [vmem:[#allocation10_spill] sm:$0xff] }
 0x1be   :  { %vm1327_vm8 = vweird.f32 %v13278_v2  ;;  %v13292_v39 = vsel %vm9528_vm12, 0, %v9566_v20  ;;  %v2024_v25 = vadd.s32 536870912, %v9660_v6  ;;  %v1333_v36 = vsel %vm1331_vm6, %v7552_v41, %v1332_v15 }
 0x1bf   :  { %v1640_v58 = vadd.s32 3, %v13292_v39  ;;  %v9700_v23 = vmul.u32.u64.low %v9672_v49, %v1698_v59  ;;  %v9701_v34 = vmul.u32.u64.high %v9672_v49, %v1698_v59, %v9700_v23  ;;  %v1336_v48 = vsel %vm1334_vm7, %v1335_v7, %v7554_v30 }
 0x1c0   :  { %v9705_v56 = vmul.f32 %v9078_v33, %v13293_v10  ;;  %v6663_v52 = vadd.s32 4294967169, %v2383_v29  ;;  %v9709_v1 = vadd.f32 %v13294_v62, %v9595_v44  ;;  %vm6630_vm9 = vcmp.lt.s32.totalorder %v6629_v16, 0  ;;  %v325_v29 = vpop.permute.xlu1 %324 }
 0x1c1   :  { %v9713_v20 = vmul.f32 %v9078_v33, %v13296_v13  ;;  %v1688_v59 = vsel %vm1686_vm2, %v1676_v54, 2102212464  ;;  %v1411_v41 = vsub.s32 32, %v9638_v26  ;;  %v1417_v30 = vshll.u32 %v1416_v31, 23 }
 0x1c2   :  { %13295 = vst [vmem:[#allocation10_spill] sm:$0xff] %v9709_v1  ;;  %v1667_v15 = vshrl.u32 %v13238_v53, %v9600_v43  ;;  %v2389_v7 = vadd.s32 1, %v6663_v52  ;;  %v1337_v62 = vsel %vm1330_vm4, %v1333_v36, %v1336_v48  ;;  %v9722_v44 = vand.u32 3, %v1640_v58 }
 0x1c3   :  { %v1395_v33 = vadd.s32 %v9226_v61, %v9208_v3  ;;  %v9726_v39 = vshrl.u32 %v2024_v25, 30  ;;  %v9728_v23 = vsel %vm6630_vm9, 0, %v6629_v16  ;;  %v1689_v43 = vsel %vm1685_vm3, %v9634_v40, %v1688_v59 }
 0x1c4   :  { %v1687_v54 = vsel %vm1683_vm1, %v1667_v15, %v9632_v47  ;;  %vm2390_vm10 = vcmp.gt.s32.totalorder %v2389_v7, 0  ;;  %v1647_v19 = vxor.u32 2147483648, %v9691_v18  ;;  %v1709_v48 = vadd.s32 1, %v9684_v22 }
 0x1c5   :  { %v2391_v31 = vsel %vm2390_vm10, %v2389_v7, 0  ;;  %v419_v3 = vmul.f32 %v9419_v35, %v325_v29  ;;  %v7558_v61 = vpop.eup %7557  ;;  %v1413_v58 = vshrl.u32 %v1395_v33, %v1411_v41  ;;  %v1418_v16 = vor.u32 4788187, %v1417_v30 }
 0x1c6   :  { %vm1708_vm11 = vc.u32 %v9701_v34, %v9683_v57  ;;  %v2393_v25 = vand.u32 31, %v2391_v31  ;;  %vm1643_vm12 = vcmp.eq.s32.totalorder %v9722_v44, 0  ;;  %v1519_v47 = vsub.s32 4294967266, %v9728_v23 }
 0x1c7   :  { %v2026_v40 = vshll.u32 %v9726_v39, 30  ;;  %v1690_v36 = vsel %vm1684_vm5, %v1687_v54, %v1689_v43  ;;  %v255_v10 = vmul.f32 %v9403_v4, %v142_v0  ;;  %v9749_v52 = vsel %vm1327_vm8, nan, %v1337_v62  ;;  %v13298_v62 = vld [vmem:[#allocation11_spill] sm:$0xff] }
 0x1c8   :  { %vm1646_vm13 = vcmp.eq.s32.totalorder %v9722_v44, 2  ;;  %v1412_v13 = vshll.u32 %v9457_v60, %v9638_v26  ;;  %v9754_v59 = vsub.s32 32, %v2393_v25  ;;  %v1644_v41 = vxor.u32 2147483648, %v7558_v61 }
 0x1c9   :  { %v1425_v30 = vsub.s32 4, %v9389_v17  ;;  %v1710_v15 = vsel %vm1708_vm11, %v1709_v48, %v9684_v22  ;;  %v9758_v11 = vadd.f32 %v419_v3, %v255_v10  ;;  %v1648_v7 = vsel %vm1646_vm13, %v1647_v19, %v7558_v61 }
 0x1ca   :  { %v1414_v0 = vor.u32 %v1413_v58, %v1412_v13  ;;  %v1419_v29 = vand.u32 2147483647, %v1418_v16  ;;  %v1706_v2 = vmul.u32 %v9672_v49, %v1690_v36  ;;  %vm1642_vm14 = vcmp.lt.s32.totalorder %v9722_v44, 2 }
 0x1cb   :  { %13297 = vst [vmem:[#allocation3_spill] sm:$0xff] %v9758_v11  ;;  %vm1341_vm15 = vcmp.lt.s32.totalorder %v13298_v62, 0  ;;  %v1520_v33 = vadd.s32 127, %v1519_v47  ;;  %v9764_v60 = vsub.s32 %v9660_v6, %v2026_v40  ;;  %v13179_v26 = vand.u32 2147483647, %v9630_v51 }
 0x1cc   :  { %v2405_v54 = vshll.u32 %v13266_v14, %v2393_v25  ;;  %v9768_v22 = vadd.s32 %v1710_v15, %v1706_v2  ;;  %v9770_v43 = vshrl.u32 %v2391_v31, 5  ;;  %v2406_v19 = vshrl.u32 %v13243_v9, %v9754_v59 }
 0x1cd   :  { %v2408_v49 = vshll.u32 %v13243_v9, %v2393_v25  ;;  %v2396_v48 = vshll.u32 %v13238_v53, %v2393_v25  ;;  %v2399_v3 = vshll.u32 %v13267_v5, %v2393_v25  ;;  %v2402_v6 = vshll.u32 %v13233_v46, %v2393_v25 }
 0x1ce   :  { %v9780_v61 = vadd.f32 %v9480_v32, %v9758_v11  ;;  %v2397_v58 = vshrl.u32 %v13267_v5, %v9754_v59  ;;  %v2400_v31 = vshrl.u32 %v13233_v46, %v9754_v59  ;;  %v2403_v16 = vshrl.u32 %v13266_v14, %v9754_v59 }
 0x1cf   :  { %v2409_v47 = vshrl.u32 %v13245_v50, %v9754_v59  ;;  %v1421_v40 = vcvt.s32.f32 %v1414_v0  ;;  %v1499_v25 = vadd.s32 %v9334_v38, %v9340_v28  ;;  %v2029_v36 = vsub.s32 0, %v9764_v60 }
 0x1d0   :  { %13299 = vst [vmem:[#allocation12_spill] sm:$0xff] %v9780_v61  ;;  %v2407_v10 = vor.u32 %v2406_v19, %v2405_v54  ;;  %v1645_v13 = vsel %vm1643_vm12, %v9691_v18, %v1644_v41  ;;  %v13300_v15 = vand.u32 2147483647, %v13298_v62  ;;  %v2386_v1 = vand.u32 8388607, %v13179_v26 }
 0x1d1   :  { %v2410_v0 = vor.u32 %v2409_v47, %v2408_v49  ;;  %vm2414_vm1 = vcmp.lt.s32.totalorder %v9770_v43, 4  ;;  %vm1639_vm2 = vweird.f32 %v13284_v55  ;;  %v1422_v38 = vmul.f32 %v1421_v40, %v1419_v29 }
 0x1d2   :  { %vm9798_vm0 = vcmp.le.f32.partialorder %v13300_v15, 0.7853982  ;;  %vm1445_vm3 = vcmp.lt.s32.totalorder %v9088_v27, 0  ;;  %v1515_v28 = vsub.s32 32, %v9728_v23  ;;  %v1521_v18 = vshll.u32 %v1520_v33, 23 }
 0x1d3   :  { %v1712_v41 = vadd.s32 536870912, %v9768_v22  ;;  %v2398_v54 = vor.u32 %v2397_v58, %v2396_v48  ;;  %v2401_v19 = vor.u32 %v2400_v31, %v2399_v3  ;;  %v2404_v15 = vor.u32 %v2403_v16, %v2402_v6 }
 0x1d4   :  { %v1758_v11 = vand.u32 2139095040, %v9780_v61  ;;  %v6648_v26 = vmin.u32 %v2029_v36, %v9764_v60  ;;  %vm2411_vm4 = vcmp.lt.s32.totalorder %v9770_v43, 1  ;;  %vm2413_vm5 = vcmp.lt.s32.totalorder %v9770_v43, 3 }
 0x1d5   :  { %v2420_v29 = vsel %vm2414_vm1, %v2407_v10, 920167782  ;;  %v1649_v49 = vsel %vm1642_vm14, %v1645_v13, %v1648_v7  ;;  %v1426_v33 = vsel %vm1341_vm15, %v1425_v30, %v9389_v17  ;;  %v2387_v48 = vor.u32 8388608, %v2386_v1 }
 0x1d6   :  { %v2424_v3 = vsel %vm2414_vm1, %v2410_v0, 1326507024  ;;  %v1423_v6 = vxor.u32 2147483648, %v1422_v38  ;;  %v1517_v58 = vshrl.u32 %v1499_v25, %v1515_v28  ;;  %v1529_v31 = vsub.s32 4, %v9491_v42 }
 0x1d7   :  { %v9823_v16 = vshrl.u32 %v1712_v41, 30  ;;  %v13303_v47 = vand.u32 2147483647, %v9088_v27  ;;  %vm2412_vm7 = vcmp.lt.s32.totalorder %v9770_v43, 2  ;;  %v2419_v17 = vsel %vm2411_vm4, %v2398_v54, %v2401_v19 }
 0x1d8   :  { %v2421_v1 = vsel %vm2413_vm5, %v2404_v15, %v2420_v29  ;;  %v1759_v44 = vshrl.u32 %v1758_v11, 23  ;;  %v1522_v30 = vor.u32 4788187, %v1521_v18  ;;  %v2031_v7 = vclz %v6648_v26  ;;  %v329_v29 = vpop.permute.xlu1 %328  ;;  %v9851_v11 = vld [vmem:[%s13120_s1 + $0x3] ss:$0 sm:$0xff] }
 0x1d9   :  { %vm9827_vm6 = vcmp.le.f32.partialorder %v13303_v47, 0.7853982  ;;  %v2423_v25 = vsel %vm2411_vm4, %v2401_v19, %v2404_v15  ;;  %v2425_v36 = vsel %vm2413_vm5, %v2407_v10, %v2424_v3  ;;  %v1516_v13 = vshll.u32 %v9545_v24, %v9728_v23 }
 0x1da   :  { %v9844_v0 = vmul.f32 %v9403_v4, %v9463_v37  ;;  %v9846_v28 = vshll.u32 %v2387_v48, 8  ;;  %v6639_v41 = vadd.s32 4294967169, %v1759_v44  ;;  %v3846_v26 = vmul.f32 %v9851_v11, %v9749_v52 }
 0x1db   :  { %v1428_v10 = vsel %vm9798_vm0, 0, %v1426_v33  ;;  %v1714_v24 = vshll.u32 %v9823_v16, 30  ;;  %v2422_v37 = vsel %vm2412_vm7, %v2419_v17, %v2421_v1  ;;  %v1650_v23 = vsel %vm1639_vm2, nan, %v1649_v49 }
 0x1dc   :  { %13306 = vst [vmem:[#allocation11_spill] sm:$0xff] %v9844_v0  ;;  %v1518_v18 = vor.u32 %v1517_v58, %v1516_v13  ;;  %v1530_v48 = vsel %vm1445_vm3, %v1529_v31, %v9491_v42  ;;  %v2426_v3 = vsel %vm2412_vm7, %v2423_v25, %v2425_v36  ;;  %v1424_v52 = vsel %vm1341_vm15, %v1423_v6, %v1422_v38 }
 0x1dd   :  { %v1523_v33 = vand.u32 2147483647, %v1522_v30  ;;  %v6649_v47 = vadd.s32 4294967294, %v2031_v7  ;;  %v420_v44 = vmul.f32 %v9419_v35, %v329_v29  ;;  %v2395_v17 = vshrl.u32 %v13238_v53, %v9754_v59  ;;  %v13308_v29 = vld [vmem:[#allocation5_spill] sm:$0xff] }
 0x1de   :  { %v9873_v55 = vmul.u32.u64.low %v9846_v28, %v2422_v37  ;;  %v9874_v49 = vmul.u32.u64.high %v9846_v28, %v2422_v37, %v9873_v55  ;;  %v1765_v58 = vadd.s32 1, %v6639_v41  ;;  %v9878_v42 = vsub.s32 %v9768_v22, %v1714_v24 }
 0x1df   :  { %v2416_v31 = vsel %vm2414_vm1, %v2404_v15, 2102212464  ;;  %v9883_v38 = vmul.u32.u64.low %v9846_v28, %v2426_v3  ;;  %v9884_v6 = vmul.u32.u64.high %v9846_v28, %v2426_v3, %v9883_v38  ;;  %v3849_v1 = vmul.f32 %v9851_v11, %v1650_v23  ;;  %v9895_v15 = vld [vmem:[%s13120_s1 + $0x4] ss:$0 sm:$0xff] }
 0x1e0   :  { %v1432_v30 = vadd.s32 3, %v1428_v10  ;;  %v1525_v59 = vcvt.s32.f32 %v1518_v18  ;;  %vm1766_vm8 = vcmp.gt.s32.totalorder %v1765_v58, 0  ;;  %v1427_v7 = vsel %vm9798_vm0, %v13298_v62, %v1424_v52 }
 0x1e1   :  { %v1532_v22 = vsel %vm9827_vm6, 0, %v1530_v48  ;;  %vm6650_vm9 = vcmp.lt.s32.totalorder %v6649_v47, 0  ;;  %v9899_v25 = vmul.f32 %v9895_v15, %v9211_v8  ;;  %v2415_v13 = vsel %vm2411_vm4, %v2395_v17, %v2398_v54 }
 0x1e2   :  { %v1526_v36 = vmul.f32 %v1525_v59, %v1523_v33  ;;  %v2417_v2 = vsel %vm2413_vm5, %v2401_v19, %v2416_v31  ;;  %v1767_v41 = vsel %vm1766_vm8, %v1765_v58, 0  ;;  %v9906_v10 = vadd.f32 %v13308_v29, %v3846_v26 }
 0x1e3   :  { %13307 = vst [vmem:[#allocation17_spill] sm:$0xff] %v9899_v25  ;;  %v1717_v24 = vsub.s32 0, %v9878_v42  ;;  %v1769_v37 = vand.u32 31, %v1767_v41  ;;  %v9910_v23 = vadd.f32 %v420_v44, %v9407_v21  ;;  %v9913_v8 = vadd.f32 %v9413_v12, %v3849_v1 }
 0x1e4   :  { %13309 = vst [vmem:[#allocation5_spill] sm:$0xff] %v9906_v10  ;;  %v9915_v18 = vand.u32 3, %v1432_v30  ;;  %v9917_v48 = vadd.s32 3, %v1532_v22  ;;  %v9920_v54 = vsel %vm6650_vm9, 0, %v6649_v47  ;;  %7559 = vcosq.f32 %v1427_v7 }
 0x1e5   :  { %13310 = vst [vmem:[#allocation18_spill] sm:$0xff] %v9910_v23  ;;  %13311 = vst [vmem:[#allocation19_spill] sm:$0xff] %v9913_v8  ;;  %v2418_v19 = vsel %vm2412_vm7, %v2415_v13, %v2417_v2  ;;  %v13180_v26 = vand.u32 2147483647, %v9780_v61  ;;  %v9925_v3 = vsub.s32 32, %v1769_v37  ;;  %7561 = vsinq.f32 %v1427_v7 }
 0x1e6   :  { %v1527_v21 = vxor.u32 2147483648, %v1526_v36  ;;  %v2019_v12 = vadd.s32 %v9548_v63, %v9556_v45  ;;  %v2437_v52 = vadd.s32 1, %v9874_v49  ;;  %v2039_v33 = vsub.s32 4294967266, %v9920_v54 }
 0x1e7   :  { %v6636_v47 = vmin.u32 %v1717_v24, %v9878_v42  ;;  %vm2436_vm10 = vc.u32 %v9884_v6, %v9873_v55  ;;  %v9936_v43 = vadd.f32 %v9480_v32, %v9910_v23  ;;  %v2434_v44 = vmul.u32 %v9846_v28, %v2418_v19 }
 0x1e8   :  { %v1773_v17 = vshrl.u32 %v13267_v5, %v9925_v3  ;;  %v1776_v63 = vshrl.u32 %v13233_v46, %v9925_v3  ;;  %v1779_v45 = vshrl.u32 %v13266_v14, %v9925_v3  ;;  %v1762_v58 = vand.u32 8388607, %v13180_v26 }
 0x1e9   :  { %13312 = vst [vmem:[#allocation20_spill] sm:$0xff] %v9936_v43  ;;  %v1772_v31 = vshll.u32 %v13238_v53, %v1769_v37  ;;  %v1775_v38 = vshll.u32 %v13267_v5, %v1769_v37  ;;  %v1782_v1 = vshrl.u32 %v13243_v9, %v9925_v3  ;;  %v2438_v28 = vsel %vm2436_vm10, %v2437_v52, %v9874_v49 }
 0x1ea   :  { %v9952_v30 = vshrl.u32 %v1767_v41, 5  ;;  %v1778_v59 = vshll.u32 %v13233_v46, %v1769_v37  ;;  %v1781_v7 = vshll.u32 %v13266_v14, %v1769_v37  ;;  %v1719_v22 = vclz %v6636_v47 }
 0x1eb   :  { %v1774_v13 = vor.u32 %v1773_v17, %v1772_v31  ;;  %v1777_v2 = vor.u32 %v1776_v63, %v1775_v38  ;;  %v1862_v29 = vand.u32 2139095040, %v9936_v43  ;;  %v1784_v26 = vshll.u32 %v13243_v9, %v1769_v37 }
 0x1ec   :  { %v1780_v24 = vor.u32 %v1779_v45, %v1778_v59  ;;  %v1783_v19 = vor.u32 %v1782_v1, %v1781_v7  ;;  %v1785_v8 = vshrl.u32 %v13245_v50, %v9925_v3  ;;  %v1528_v49 = vsel %vm1445_vm3, %v1527_v21, %v1526_v36  ;;  %v365_v1 = vpop.permute.xlu0 %364 }
 0x1ed   :  { %v2035_v41 = vsub.s32 32, %v9920_v54  ;;  %v2036_v52 = vshll.u32 %v9764_v60, %v9920_v54  ;;  %v9965_v47 = vadd.s32 %v2438_v28, %v2434_v44  ;;  %v2040_v17 = vadd.s32 127, %v2039_v33 }
 0x1ee   :  { %v1763_v63 = vor.u32 8388608, %v1762_v58  ;;  %v1786_v31 = vor.u32 %v1785_v8, %v1784_v26  ;;  %vm1787_vm11 = vcmp.lt.s32.totalorder %v9952_v30, 1  ;;  %v7560_v45 = vpop.eup %7559  ;;  %v6637_v37 = vadd.s32 4294967294, %v1719_v22 }
 0x1ef   :  { %vm1790_vm12 = vcmp.lt.s32.totalorder %v9952_v30, 4  ;;  %v1795_v38 = vsel %vm1787_vm11, %v1774_v13, %v1777_v2  ;;  %v1863_v36 = vshrl.u32 %v1862_v29, 23  ;;  %v7562_v21 = vpop.eup %7561  ;;  %vm1789_vm13 = vcmp.lt.s32.totalorder %v9952_v30, 3 }
 0x1f0   :  { %v1796_v60 = vsel %vm1790_vm12, %v1783_v19, 920167782  ;;  %v1799_v8 = vsel %vm1787_vm11, %v1777_v2, %v1780_v24  ;;  %v1800_v54 = vsel %vm1790_vm12, %v1786_v31, 1326507024  ;;  %v2440_v26 = vadd.s32 536870912, %v9965_v47 }
 0x1f1   :  { %vm1788_vm14 = vcmp.lt.s32.totalorder %v9952_v30, 2  ;;  %v1797_v33 = vsel %vm1789_vm13, %v1780_v24, %v1796_v60  ;;  %v1801_v44 = vsel %vm1789_vm13, %v1783_v19, %v1800_v54  ;;  %vm1435_vm15 = vcmp.eq.s32.totalorder %v9915_v18, 0 }
 0x1f2   :  { %vm1438_vm0 = vcmp.eq.s32.totalorder %v9915_v18, 2  ;;  %v2037_v58 = vshrl.u32 %v2019_v12, %v2035_v41  ;;  %v1798_v28 = vsel %vm1788_vm14, %v1795_v38, %v1797_v33  ;;  %v1802_v59 = vsel %vm1788_vm14, %v1799_v8, %v1801_v44  ;;  %v13313_v8 = vld [vmem:[#allocation9_spill] sm:$0xff]  ;;  %v10015_v44 = vpop.permute.xlu0 %186 }
 0x1f3   :  { %v1803_v7 = vshll.u32 %v1763_v63, 8  ;;  %v2041_v22 = vshll.u32 %v2040_v17, 23  ;;  %vm6638_vm1 = vcmp.lt.s32.totalorder %v6637_v37, 0  ;;  %v1792_v29 = vsel %vm1790_vm12, %v1780_v24, 2102212464 }
 0x1f4   :  { %v6643_v31 = vadd.s32 4294967169, %v1863_v36  ;;  %v1531_v12 = vsel %vm9827_vm6, %v9088_v27, %v1528_v49  ;;  %v10002_v41 = vshrl.u32 %v2440_v26, 30  ;;  %v1771_v17 = vshrl.u32 %v13238_v53, %v9925_v3 }
 0x1f5   :  { %v9992_v60 = vmul.u32.u64.low %v1803_v7, %v1802_v59  ;;  %v9993_v19 = vmul.u32.u64.high %v1803_v7, %v1802_v59, %v9992_v60  ;;  %v9995_v54 = vmul.u32.u64.low %v1803_v7, %v1798_v28  ;;  %v9996_v10 = vmul.u32.u64.high %v1803_v7, %v1798_v28, %v9995_v54 }
 0x1f6   :  { %v1869_v63 = vadd.s32 1, %v6643_v31  ;;  %v1439_v38 = vxor.u32 2147483648, %v7560_v45  ;;  %v10007_v24 = vand.u32 3, %v9917_v48  ;;  %v10009_v36 = vsel %vm6638_vm1, 0, %v6637_v37 }
 0x1f7   :  { %v10013_v33 = vmul.f32 %v9895_v15, %v13313_v8  ;;  %v1436_v40 = vxor.u32 2147483648, %v7562_v21  ;;  %v1791_v49 = vsel %vm1787_vm11, %v1771_v17, %v1774_v13  ;;  %v1793_v3 = vsel %vm1789_vm13, %v1777_v2, %v1792_v29 }
 0x1f8   :  { %vm1870_vm2 = vcmp.gt.s32.totalorder %v1869_v63, 0  ;;  %7563 = vcosq.f32 %v1531_v12  ;;  %v2038_v26 = vor.u32 %v2037_v58, %v2036_v52  ;;  %v2042_v48 = vor.u32 4788187, %v2041_v22 }
 0x1f9   :  { %13314 = vst [vmem:[#allocation9_spill] sm:$0xff] %v10013_v33  ;;  %v1813_v37 = vadd.s32 1, %v9996_v10  ;;  %v1727_v28 = vsub.s32 4294967266, %v10009_v36  ;;  %v2442_v59 = vshll.u32 %v10002_v41, 30  ;;  %vm1812_vm3 = vc.u32 %v9993_v19, %v9995_v54 }
 0x1fa   :  { %v1871_v31 = vsel %vm1870_vm2, %v1869_v63, 0  ;;  %v1723_v60 = vsub.s32 32, %v10009_v36  ;;  %v1794_v13 = vsel %vm1788_vm14, %v1791_v49, %v1793_v3  ;;  %vm1434_vm4 = vcmp.lt.s32.totalorder %v9915_v18, 2  ;;  %v192_v49 = vpop.permute.xlu0 %191 }
 0x1fb   :  { %v1873_v29 = vand.u32 31, %v1871_v31  ;;  %v1437_v52 = vsel %vm1435_vm15, %v7560_v45, %v1436_v40  ;;  %v1440_v58 = vsel %vm1438_vm0, %v1439_v38, %v7562_v21  ;;  %7565 = vsinq.f32 %v1531_v12 }
 0x1fc   :  { %v429_v22 = vmul.f32 %v9419_v35, %v365_v1  ;;  %v2045_v17 = vcvt.s32.f32 %v2038_v26  ;;  %v1707_v63 = vadd.s32 %v9683_v57, %v9701_v34  ;;  %v1814_v30 = vsel %vm1812_vm3, %v1813_v37, %v9996_v10 }
 0x1fd   :  { %v10039_v8 = vsub.s32 32, %v1873_v29  ;;  %v2043_v3 = vand.u32 2147483647, %v2042_v48  ;;  %v1728_v2 = vadd.s32 127, %v1727_v28  ;;  %v10042_v0 = vsub.s32 %v9965_v47, %v2442_v59 }
 0x1fe   :  { %v1810_v45 = vmul.u32 %v1803_v7, %v1794_v13  ;;  %v1725_v40 = vshrl.u32 %v1707_v63, %v1723_v60  ;;  %v13315_v21 = vand.u32 2147483647, %v9936_v43  ;;  %v265_v1 = vmul.f32 %v9403_v4, %v192_v49  ;;  %v13316_v4 = vld [vmem:[#allocation4_spill] sm:$0xff] }
 0x1ff   :  { %v1877_v35 = vshrl.u32 %v13267_v5, %v10039_v8  ;;  %v1880_v34 = vshrl.u32 %v13233_v46, %v10039_v8  ;;  %v1883_v10 = vshrl.u32 %v13266_v14, %v10039_v8  ;;  %v1886_v47 = vshrl.u32 %v13243_v9, %v10039_v8 }
 0x200   :  { %v1866_v12 = vand.u32 8388607, %v13315_v21  ;;  %v10050_v57 = vadd.s32 %v1814_v30, %v1810_v45  ;;  %vm1431_vm5 = vweird.f32 %v13298_v62  ;;  %v1876_v7 = vshll.u32 %v13238_v53, %v1873_v29 }
 0x201   :  { %v1879_v38 = vshll.u32 %v13267_v5, %v1873_v29  ;;  %v1885_v26 = vshll.u32 %v13266_v14, %v1873_v29  ;;  %v1889_v48 = vshrl.u32 %v13245_v50, %v10039_v8  ;;  %v1729_v37 = vshll.u32 %v1728_v2, 23 }
 0x202   :  { %v2445_v28 = vsub.s32 0, %v10042_v0  ;;  %v10064_v59 = vshrl.u32 %v1871_v31, 5  ;;  %v1882_v60 = vshll.u32 %v13233_v46, %v1873_v29  ;;  %v10067_v13 = vpop.eup %7563  ;;  %vm1965_vm6 = vcmp.lt.s32.totalorder %v13316_v4, 0 }
 0x203   :  { %v10070_v63 = vor.u32 %v1877_v35, %v1876_v7  ;;  %v10072_v30 = vor.u32 %v1880_v34, %v1879_v38  ;;  %v1887_v49 = vor.u32 %v1886_v47, %v1885_v26  ;;  %v1888_v45 = vshll.u32 %v13243_v9, %v1873_v29 }
 0x204   :  { %v1724_v2 = vshll.u32 %v9878_v42, %v10009_v36  ;;  %v1816_v21 = vadd.s32 536870912, %v10050_v57  ;;  %v1867_v31 = vor.u32 8388608, %v1866_v12  ;;  %v1884_v33 = vor.u32 %v1883_v10, %v1882_v60 }
 0x205   :  { %v1441_v23 = vsel %vm1434_vm4, %v1437_v52, %v1440_v58  ;;  %v2046_v25 = vmul.f32 %v2045_v17, %v2043_v3  ;;  %v1890_v43 = vor.u32 %v1889_v48, %v1888_v45  ;;  %v10080_v61 = vadd.f32 %v429_v22, %v265_v1  ;;  %v7566_v35 = vpop.eup %7565 }
 0x206   :  { %v13318_v34 = vand.u32 2147483647, %v13316_v4  ;;  %v1726_v29 = vor.u32 %v1725_v40, %v1724_v2  ;;  %v1730_v42 = vor.u32 4788187, %v1729_v37  ;;  %vm1891_vm8 = vcmp.lt.s32.totalorder %v10064_v59, 1 }
 0x207   :  { %13317 = vst [vmem:[#allocation4_spill] sm:$0xff] %v10080_v61  ;;  %vm1894_vm9 = vcmp.lt.s32.totalorder %v10064_v59, 4  ;;  %v6664_v18 = vmin.u32 %v2445_v28, %v10042_v0  ;;  %vm1893_vm10 = vcmp.lt.s32.totalorder %v10064_v59, 3  ;;  %v1899_v36 = vsel %vm1891_vm8, %v10070_v63, %v10072_v30 }
 0x208   :  { %vm10084_vm7 = vcmp.le.f32.partialorder %v13318_v34, 0.7853982  ;;  %v1900_v52 = vsel %vm1894_vm9, %v1887_v49, 920167782  ;;  %v10098_v58 = vshrl.u32 %v1816_v21, 30  ;;  %vm1892_vm11 = vcmp.lt.s32.totalorder %v10064_v59, 2 }
 0x209   :  { %v1901_v22 = vsel %vm1893_vm10, %v1884_v33, %v1900_v52  ;;  %v10103_v17 = vshll.u32 %v1867_v31, 8  ;;  %v1903_v40 = vsel %vm1891_vm8, %v10072_v30, %v1884_v33  ;;  %v1904_v12 = vsel %vm1894_vm9, %v1890_v43, 1326507024 }
 0x20a   :  { %v1902_v3 = vsel %vm1892_vm11, %v1899_v36, %v1901_v22  ;;  %v10114_v10 = vadd.f32 %v9480_v32, %v10080_v61  ;;  %v1442_v1 = vsel %vm1431_vm5, nan, %v1441_v23  ;;  %vm1539_vm12 = vcmp.eq.s32.totalorder %v10007_v24, 0 }
 0x20b   :  { %v1543_v7 = vxor.u32 2147483648, %v10067_v13  ;;  %v2049_v38 = vsub.s32 4, %v9726_v39  ;;  %v1731_v26 = vand.u32 2147483647, %v1730_v42  ;;  %v1905_v48 = vsel %vm1893_vm10, %v1887_v49, %v1904_v12 }
 0x20c   :  { %v10124_v37 = vmul.u32.u64.low %v10103_v17, %v1902_v3  ;;  %v10125_v43 = vmul.u32.u64.high %v10103_v17, %v1902_v3, %v10124_v37  ;;  %vm1538_vm13 = vcmp.lt.s32.totalorder %v10007_v24, 2  ;;  %v2047_v32 = vxor.u32 2147483648, %v2046_v25 }
 0x20d   :  { %v2447_v62 = vclz %v6664_v18  ;;  %v1906_v23 = vsel %vm1892_vm11, %v1903_v40, %v1905_v48  ;;  %v2798_v28 = vand.u32 2139095040, %v10114_v10  ;;  %v1733_v60 = vcvt.s32.f32 %v1726_v29  ;;  %v13321_v18 = vld [vmem:[#allocation7_spill] sm:$0xff]  ;;  %v13325_v40 = vld [vmem:[#allocation14_spill] sm:$0xff] }
 0x20e   :  { %v1818_v45 = vshll.u32 %v10098_v58, 30  ;;  %v10134_v2 = vmul.u32.u64.low %v10103_v17, %v1906_v23  ;;  %v10135_v49 = vmul.u32.u64.high %v10103_v17, %v1906_v23, %v10134_v2  ;;  %v1540_v21 = vxor.u32 2147483648, %v7566_v35 }
 0x20f   :  { %vm1542_vm14 = vcmp.eq.s32.totalorder %v10007_v24, 2  ;;  %v2050_v31 = vsel %vm1965_vm6, %v2049_v38, %v9726_v39  ;;  %v2799_v34 = vshrl.u32 %v2798_v28, 23  ;;  %v3847_v42 = vmul.f32 %v9851_v11, %v1442_v1  ;;  %v157_v28 = vpop.permute.xlu1 %156 }
 0x210   :  { %vm1535_vm15 = vweird.f32 %v9088_v27  ;;  %vm1653_vm0 = vcmp.lt.s32.totalorder %v13321_v18, 0  ;;  %v1734_v29 = vmul.f32 %v1733_v60, %v1731_v26  ;;  %v1896_v36 = vsel %vm1894_vm9, %v1884_v33, 2102212464 }
 0x211   :  { %v2048_v52 = vsel %vm1965_vm6, %v2047_v32, %v2046_v25  ;;  %v13322_v22 = vand.u32 2147483647, %v13321_v18  ;;  %v6665_v39 = vadd.s32 4294967294, %v2447_v62  ;;  %v10156_v12 = vmul.f32 %v9895_v15, %v13325_v40 }
 0x212   :  { %v1875_v1 = vshrl.u32 %v13238_v53, %v10039_v8  ;;  %v1544_v38 = vsel %vm1542_vm14, %v1543_v7, %v7566_v35  ;;  %v2052_v33 = vsel %vm10084_vm7, 0, %v2050_v31  ;;  %v10163_v25 = vsub.s32 %v10050_v57, %v1818_v45 }
 0x213   :  { %vm10150_vm1 = vcmp.le.f32.partialorder %v13322_v22, 0.7853982  ;;  %13326 = vst [vmem:[#allocation7_spill] sm:$0xff] %v10156_v12  ;;  %v6679_v26 = vadd.s32 4294967169, %v2799_v34  ;;  %v1541_v48 = vsel %vm1539_vm12, %v10067_v13, %v1540_v21  ;;  %v1737_v32 = vsub.s32 4, %v9823_v16 }
 0x214   :  { %v1895_v15 = vsel %vm1891_vm8, %v1875_v1, %v10070_v63  ;;  %v1897_v8 = vsel %vm1893_vm10, %v10072_v30, %v1896_v36  ;;  %v2051_v57 = vsel %vm10084_vm7, %v13316_v4, %v2048_v52  ;;  %v1735_v35 = vxor.u32 2147483648, %v1734_v29  ;;  %v10226_v1 = vpop.permute.xlu0 %206 }
 0x215   :  { %v1917_v7 = vadd.s32 1, %v10125_v43  ;;  %v2805_v62 = vadd.s32 1, %v6679_v26  ;;  %v10180_v13 = vadd.f32 %v9705_v56, %v3847_v42  ;;  %v2056_v23 = vadd.s32 3, %v2052_v33 }
 0x216   :  { %vm6666_vm2 = vcmp.lt.s32.totalorder %v6665_v39, 0  ;;  %vm1916_vm3 = vc.u32 %v10135_v49, %v10124_v37  ;;  %v1545_v63 = vsel %vm1538_vm13, %v1541_v48, %v1544_v38  ;;  %v1821_v30 = vsub.s32 0, %v10163_v25  ;;  %v337_v38 = vpop.permute.xlu1 %336 }
 0x217   :  { %13327 = vst [vmem:[#allocation14_spill] sm:$0xff] %v10180_v13  ;;  %v1898_v47 = vsel %vm1892_vm11, %v1895_v15, %v1897_v8  ;;  %vm2806_vm4 = vcmp.gt.s32.totalorder %v2805_v62, 0  ;;  %7567 = vcosq.f32 %v2051_v57  ;;  %v10192_v56 = vsel %vm1653_vm0, %v1737_v32, %v9823_v16 }
 0x218   :  { %v13186_v60 = vand.u32 2147483647, %v10114_v10  ;;  %v2807_v45 = vsel %vm2806_vm4, %v2805_v62, 0  ;;  %v1736_v24 = vsel %vm1653_vm0, %v1735_v35, %v1734_v29  ;;  %v10197_v2 = vsel %vm6666_vm2, 0, %v6665_v39  ;;  %v10238_v62 = vld [vmem:[%s13120_s1] ss:$0 sm:$0xff] }
 0x219   :  { %v1918_v21 = vsel %vm1916_vm3, %v1917_v7, %v10125_v43  ;;  %v2809_v59 = vand.u32 31, %v2807_v45  ;;  %v10202_v31 = vsel %vm1535_vm15, nan, %v1545_v63  ;;  %7569 = vsinq.f32 %v2051_v57  ;;  %v10244_v63 = vld [vmem:[%s13120_s1 + $0x1] ss:$0 sm:$0xff] }
 0x21a   :  { %v10204_v34 = vand.u32 3, %v2056_v23  ;;  %v1914_v16 = vmul.u32 %v10103_v17, %v1898_v47  ;;  %v2435_v29 = vadd.s32 %v9873_v55, %v9884_v6  ;;  %v6640_v36 = vmin.u32 %v1821_v30, %v10163_v25 }
 0x21b   :  { %v2810_v43 = vsub.s32 32, %v2809_v59  ;;  %v1739_v27 = vsel %vm10150_vm1, %v13321_v18, %v1736_v24  ;;  %v2455_v52 = vsub.s32 4294967266, %v10197_v2  ;;  %v2802_v17 = vand.u32 8388607, %v13186_v60 }
 0x21c   :  { %v10217_v22 = vadd.s32 %v1918_v21, %v1914_v16  ;;  %v10221_v39 = vshrl.u32 %v2807_v45, 5  ;;  %v2812_v40 = vshll.u32 %v13238_v53, %v2809_v59  ;;  %v2815_v6 = vshll.u32 %v13267_v5, %v2809_v59 }
 0x21d   :  { %v2813_v55 = vshrl.u32 %v13267_v5, %v2810_v43  ;;  %v2816_v33 = vshrl.u32 %v13233_v46, %v2810_v43  ;;  %v2818_v26 = vshll.u32 %v13233_v46, %v2809_v59  ;;  %v2819_v48 = vshrl.u32 %v13266_v14, %v2810_v43 }
 0x21e   :  { %v2821_v32 = vshll.u32 %v13266_v14, %v2809_v59  ;;  %7571 = vcosq.f32 %v1739_v27  ;;  %v2451_v15 = vsub.s32 32, %v10197_v2  ;;  %v1823_v8 = vclz %v6640_v36 }
 0x21f   :  { %v2822_v57 = vshrl.u32 %v13243_v9, %v2810_v43  ;;  %v2456_v35 = vadd.s32 127, %v2455_v52  ;;  %v2824_v7 = vshll.u32 %v13243_v9, %v2809_v59  ;;  %v258_v23 = vmul.f32 %v10238_v62, %v157_v28 }
 0x220   :  { %v422_v30 = vmul.f32 %v10244_v63, %v337_v38  ;;  %v1920_v47 = vadd.s32 536870912, %v10217_v22  ;;  %v2803_v45 = vor.u32 8388608, %v2802_v17  ;;  %v2814_v24 = vor.u32 %v2813_v55, %v2812_v40  ;;  %v381_v38 = vpop.permute.xlu0 %380 }
 0x221   :  { %v2817_v21 = vor.u32 %v2816_v33, %v2815_v6  ;;  %v10248_v59 = vpop.eup %7567  ;;  %v2820_v16 = vor.u32 %v2819_v48, %v2818_v26  ;;  %v2823_v36 = vor.u32 %v2822_v57, %v2821_v32  ;;  %v2825_v52 = vshrl.u32 %v13245_v50, %v2810_v43 }
 0x222   :  { %vm2827_vm5 = vcmp.lt.s32.totalorder %v10221_v39, 1  ;;  %7573 = vsinq.f32 %v1739_v27  ;;  %v2452_v28 = vshll.u32 %v10042_v0, %v10197_v2  ;;  %v2453_v60 = vshrl.u32 %v2435_v29, %v2451_v15 }
 0x223   :  { %v6641_v42 = vadd.s32 4294967294, %v1823_v8  ;;  %v7570_v13 = vpop.eup %7569  ;;  %v2826_v61 = vor.u32 %v2825_v52, %v2824_v7  ;;  %vm2829_vm6 = vcmp.lt.s32.totalorder %v10221_v39, 3  ;;  %vm2830_vm7 = vcmp.lt.s32.totalorder %v10221_v39, 4  ;;  %v10287_v8 = vld [vmem:[%s13120_s1 + $0x2] ss:$0 sm:$0xff] }
 0x224   :  { %v10256_v17 = vadd.f32 %v422_v30, %v258_v23  ;;  %v2457_v40 = vshll.u32 %v2456_v35, 23  ;;  %v10258_v55 = vshrl.u32 %v1920_v47, 30  ;;  %vm2828_vm8 = vcmp.lt.s32.totalorder %v10221_v39, 2 }
 0x225   :  { %v2835_v27 = vsel %vm2827_vm5, %v2814_v24, %v2817_v21  ;;  %vm2381_vm9 = vcmp.lt.s32.totalorder %v9630_v51, 0  ;;  %v2836_v0 = vsel %vm2830_vm7, %v2823_v36, 920167782  ;;  %v2839_v2 = vsel %vm2827_vm5, %v2817_v21, %v2820_v16 }
 0x226   :  { %13328 = vst [vmem:[#allocation21_spill] sm:$0xff] %v10256_v17  ;;  %v2840_v29 = vsel %vm2830_vm7, %v2826_v61, 1326507024  ;;  %v10270_v6 = vshll.u32 %v2803_v45, 8  ;;  %vm2059_vm10 = vcmp.eq.s32.totalorder %v10204_v34, 0  ;;  %vm6642_vm11 = vcmp.lt.s32.totalorder %v6641_v42, 0 }
 0x227   :  { %v2811_v33 = vshrl.u32 %v13238_v53, %v2810_v43  ;;  %v2837_v26 = vsel %vm2829_vm6, %v2820_v16, %v2836_v0  ;;  %v2841_v48 = vsel %vm2829_vm6, %v2823_v36, %v2840_v29  ;;  %v2832_v32 = vsel %vm2830_vm7, %v2820_v16, 2102212464  ;;  %v212_v36 = vpop.permute.xlu0 %211 }
 0x228   :  { %v2838_v15 = vsel %vm2828_vm8, %v2835_v27, %v2837_v26  ;;  %v2842_v61 = vsel %vm2828_vm8, %v2839_v2, %v2841_v48  ;;  %v10291_v43 = vadd.f32 %v10287_v8, %v10256_v17  ;;  %v10293_v57 = vpop.eup %7571  ;;  %v13330_v35 = vsel %vm10150_vm1, 0, %v10192_v56 }
 0x229   :  { %v1744_v7 = vadd.s32 3, %v13330_v35  ;;  %v13331_v23 = vand.u32 2147483647, %v9630_v51  ;;  %v2454_v47 = vor.u32 %v2453_v60, %v2452_v28  ;;  %v2458_v45 = vor.u32 4788187, %v2457_v40 }
 0x22a   :  { %13329 = vst [vmem:[#allocation22_spill] sm:$0xff] %v10291_v43  ;;  %v1922_v16 = vshll.u32 %v10258_v55, 30  ;;  %v10307_v52 = vmul.u32.u64.low %v10270_v6, %v2842_v61  ;;  %v10308_v27 = vmul.u32.u64.high %v10270_v6, %v2842_v61, %v10307_v52  ;;  %v2063_v56 = vxor.u32 2147483648, %v10248_v59 }
 0x22b   :  { %vm10301_vm12 = vcmp.le.f32.partialorder %v13331_v23, 0.7853982  ;;  %v10311_v3 = vmul.u32.u64.low %v10270_v6, %v2838_v15  ;;  %v10312_v0 = vmul.u32.u64.high %v10270_v6, %v2838_v15, %v10311_v3  ;;  %v10317_v2 = vsel %vm6642_vm11, 0, %v6641_v42 }
 0x22c   :  { %v2831_v60 = vsel %vm2827_vm5, %v2811_v33, %v2814_v24  ;;  %v2833_v28 = vsel %vm2829_vm6, %v2817_v21, %v2832_v32  ;;  %v2060_v40 = vxor.u32 2147483648, %v7570_v13  ;;  %v2070_v29 = vand.u32 2139095040, %v10291_v43  ;;  %v7574_v15 = vpop.eup %7573 }
 0x22d   :  { %v433_v26 = vmul.f32 %v10244_v63, %v381_v38  ;;  %v269_v48 = vmul.f32 %v10238_v62, %v212_v36  ;;  %vm2062_vm13 = vcmp.eq.s32.totalorder %v10204_v34, 2  ;;  %v2459_v61 = vand.u32 2147483647, %v2458_v45 }
 0x22e   :  { %v2461_v35 = vcvt.s32.f32 %v2454_v47  ;;  %v2465_v42 = vsub.s32 4, %v10002_v41  ;;  %vm2055_vm14 = vweird.f32 %v13316_v4  ;;  %v1831_v24 = vsub.s32 4294967266, %v10317_v2 }
 0x22f   :  { %v10331_v21 = vsub.s32 %v10217_v22, %v1922_v16  ;;  %v2834_v33 = vsel %vm2828_vm8, %v2831_v60, %v2833_v28  ;;  %v2853_v38 = vadd.s32 1, %v10312_v0  ;;  %v3848_v32 = vmul.f32 %v9851_v11, %v10202_v31 }
 0x230   :  { %v10338_v23 = vand.u32 3, %v1744_v7  ;;  %vm2852_vm15 = vc.u32 %v10308_v27, %v10311_v3  ;;  %v2071_v47 = vshrl.u32 %v2070_v29, 23  ;;  %vm2058_vm0 = vcmp.lt.s32.totalorder %v10204_v34, 2 }
 0x231   :  { %v2061_v22 = vsel %vm2059_vm10, %v10248_v59, %v2060_v40  ;;  %v2064_v45 = vsel %vm2062_vm13, %v2063_v56, %v7570_v13  ;;  %v10346_v39 = vadd.f32 %v433_v26, %v269_v48  ;;  %v2462_v16 = vmul.f32 %v2461_v35, %v2459_v61 }
 0x232   :  { %v2466_v11 = vsel %vm2381_vm9, %v2465_v42, %v10002_v41  ;;  %v2850_v31 = vmul.u32 %v10270_v6, %v2834_v33  ;;  %v6651_v7 = vadd.s32 4294967169, %v2071_v47  ;;  %v1832_v36 = vadd.s32 127, %v1831_v24 }
 0x233   :  { %13334 = vst [vmem:[#allocation23_spill] sm:$0xff] %v10346_v39  ;;  %v10354_v52 = vmul.f32 %v10238_v62, %v10015_v44  ;;  %v1925_v60 = vsub.s32 0, %v10331_v21  ;;  %v2854_v59 = vsel %vm2852_vm15, %v2853_v38, %v10312_v0  ;;  %v10359_v13 = vadd.f32 %v9713_v20, %v3848_v32 }
 0x234   :  { %vm1747_vm1 = vcmp.eq.s32.totalorder %v10338_v23, 0  ;;  %v2077_v56 = vadd.s32 1, %v6651_v7  ;;  %v10364_v41 = vadd.f32 %v10287_v8, %v10346_v39  ;;  %v2065_v6 = vsel %vm2058_vm0, %v2061_v22, %v2064_v45 }
 0x235   :  { %13335 = vst [vmem:[#allocation24_spill] sm:$0xff] %v10354_v52  ;;  %13336 = vst [vmem:[#allocation25_spill] sm:$0xff] %v10359_v13  ;;  %v1748_v28 = vxor.u32 2147483648, %v7574_v15  ;;  %v1751_v44 = vxor.u32 2147483648, %v10293_v57  ;;  %v2468_v40 = vsel %vm10301_vm12, 0, %v2466_v11  ;;  %v2463_v0 = vxor.u32 2147483648, %v2462_v16 }
 0x236   :  { %13337 = vst [vmem:[#allocation26_spill] sm:$0xff] %v10364_v41  ;;  %v1827_v20 = vsub.s32 32, %v10317_v2  ;;  %v10372_v29 = vadd.s32 %v2854_v59, %v2850_v31  ;;  %vm2078_vm2 = vcmp.gt.s32.totalorder %v2077_v56, 0  ;;  %vm1750_vm3 = vcmp.eq.s32.totalorder %v10338_v23, 2 }
 0x237   :  { %v1833_v26 = vshll.u32 %v1832_v36, 23  ;;  %v6644_v48 = vmin.u32 %v1925_v60, %v10331_v21  ;;  %v2079_v61 = vsel %vm2078_vm2, %v2077_v56, 0  ;;  %v10378_v34 = vsel %vm2055_vm14, nan, %v2065_v6 }
 0x238   :  { %v1811_v35 = vadd.s32 %v9995_v54, %v9993_v19  ;;  %v13188_v42 = vand.u32 2147483647, %v10291_v43  ;;  %v3214_v24 = vand.u32 2139095040, %v10364_v41  ;;  %v10387_v33 = vsel %vm1747_vm1, %v10293_v57, %v1748_v28 }
 0x239   :  { %v10389_v38 = vsel %vm1750_vm3, %v1751_v44, %v7574_v15  ;;  %v10391_v32 = vadd.s32 3, %v2468_v40  ;;  %v2081_v47 = vand.u32 31, %v2079_v61  ;;  %v2464_v4 = vsel %vm2381_vm9, %v2463_v0, %v2462_v16 }
 0x23a   :  { %v1829_v22 = vshrl.u32 %v1811_v35, %v1827_v20  ;;  %v1841_v19 = vsub.s32 4, %v10098_v58  ;;  %v2856_v54 = vadd.s32 536870912, %v10372_v29  ;;  %v1828_v45 = vshll.u32 %v10163_v25, %v10317_v2 }
 0x23b   :  { %v1834_v11 = vor.u32 4788187, %v1833_v26  ;;  %v1927_v31 = vclz %v6644_v48  ;;  %v2082_v57 = vsub.s32 32, %v2081_v47  ;;  %v2074_v15 = vand.u32 8388607, %v13188_v42  ;;  %v13339_v48 = vld [vmem:[#allocation12_spill] sm:$0xff] }
 0x23c   :  { %v10401_v7 = vshrl.u32 %v2079_v61, 5  ;;  %v2084_v36 = vshll.u32 %v13238_v53, %v2081_v47  ;;  %v3215_v60 = vshrl.u32 %v3214_v24, 23  ;;  %v2087_v59 = vshll.u32 %v13267_v5, %v2081_v47 }
 0x23d   :  { %v2085_v16 = vshrl.u32 %v13267_v5, %v2082_v57  ;;  %v2088_v56 = vshrl.u32 %v13233_v46, %v2082_v57  ;;  %v2091_v6 = vshrl.u32 %v13266_v14, %v2082_v57  ;;  %v1830_v25 = vor.u32 %v1829_v22, %v1828_v45 }
 0x23e   :  { %v10408_v2 = vshrl.u32 %v2856_v54, 30  ;;  %v2090_v28 = vshll.u32 %v13233_v46, %v2081_v47  ;;  %v2094_v44 = vshrl.u32 %v13243_v9, %v2082_v57  ;;  %v6645_v40 = vadd.s32 4294967294, %v1927_v31 }
 0x23f   :  { %v2086_v0 = vor.u32 %v2085_v16, %v2084_v36  ;;  %v2089_v20 = vor.u32 %v2088_v56, %v2087_v59  ;;  %v2093_v26 = vshll.u32 %v13266_v14, %v2081_v47  ;;  %vm1757_vm4 = vcmp.lt.s32.totalorder %v13339_v48, 0 }
 0x240   :  { %13338 = vst [vmem:[#allocation27_spill] sm:$0xff] %v10408_v2  ;;  %v1835_v61 = vand.u32 2147483647, %v1834_v11  ;;  %v2075_v35 = vor.u32 8388608, %v2074_v15  ;;  %v2092_v24 = vor.u32 %v2091_v6, %v2090_v28  ;;  %v6695_v42 = vadd.s32 4294967169, %v3215_v60 }
 0x241   :  { %v2095_v39 = vor.u32 %v2094_v44, %v2093_v26  ;;  %v2096_v22 = vshll.u32 %v13243_v9, %v2081_v47  ;;  %v2097_v54 = vshrl.u32 %v13245_v50, %v2082_v57  ;;  %vm2099_vm5 = vcmp.lt.s32.totalorder %v10401_v7, 1 }
 0x242   :  { %v1837_v45 = vcvt.s32.f32 %v1830_v25  ;;  %v2858_v31 = vshll.u32 %v10408_v2, 30  ;;  %vm2102_vm6 = vcmp.lt.s32.totalorder %v10401_v7, 4  ;;  %v2107_v36 = vsel %vm2099_vm5, %v2086_v0, %v2089_v20 }
 0x243   :  { %vm6646_vm7 = vcmp.lt.s32.totalorder %v6645_v40, 0  ;;  %v2098_v11 = vor.u32 %v2097_v54, %v2096_v22  ;;  %vm2101_vm8 = vcmp.lt.s32.totalorder %v10401_v7, 3  ;;  %v2108_v15 = vsel %vm2102_vm6, %v2095_v39, 920167782 }
 0x244   :  { %v2467_v47 = vsel %vm10301_vm12, %v9630_v51, %v2464_v4  ;;  %v1838_v60 = vmul.f32 %v1837_v45, %v1835_v61  ;;  %vm2100_vm9 = vcmp.lt.s32.totalorder %v10401_v7, 2  ;;  %v2109_v16 = vsel %vm2101_vm8, %v2092_v24, %v2108_v15  ;;  %v162_v45 = vpop.permute.xlu1 %161  ;;  %v13342_v7 = vld [vmem:[#allocation2_spill] sm:$0xff] }
 0x245   :  { %v2104_v59 = vsel %vm2102_vm6, %v2092_v24, 2102212464  ;;  %v2110_v56 = vsel %vm2100_vm9, %v2107_v36, %v2109_v16  ;;  %v2115_v6 = vshll.u32 %v2075_v35, 8  ;;  %v3221_v25 = vadd.s32 1, %v6695_v42 }
 0x246   :  { %v10434_v28 = vsel %vm6646_vm7, 0, %v6645_v40  ;;  %v10437_v44 = vsub.s32 %v10372_v29, %v2858_v31  ;;  %v2083_v30 = vshrl.u32 %v13238_v53, %v2082_v57  ;;  %v2111_v4 = vsel %vm2099_vm5, %v2089_v20, %v2092_v24 }
 0x247   :  { %7575 = vcosq.f32 %v2467_v47  ;;  %v2112_v26 = vsel %vm2102_vm6, %v2098_v11, 1326507024  ;;  %v10444_v61 = vmul.u32.u64.low %v2115_v6, %v2110_v56  ;;  %v10445_v22 = vmul.u32.u64.high %v2115_v6, %v2110_v56, %v10444_v61  ;;  %v13343_v56 = vld [vmem:[#allocation13_spill] sm:$0xff] }
 0x248   :  { %v1839_v35 = vxor.u32 2147483648, %v1838_v60  ;;  %v2103_v42 = vsel %vm2099_vm5, %v2083_v30, %v2086_v0  ;;  %v2105_v29 = vsel %vm2101_vm8, %v2089_v20, %v2104_v59  ;;  %v2113_v57 = vsel %vm2101_vm8, %v2095_v39, %v2112_v26 }
 0x249   :  { %13340 = vst [vmem:[#allocation12_spill] sm:$0xff] %v10444_v61  ;;  %v10457_v40 = vsel %vm1757_vm4, %v1841_v19, %v10098_v58  ;;  %v1935_v24 = vsub.s32 4294967266, %v10434_v28  ;;  %v2114_v54 = vsel %vm2100_vm9, %v2111_v4, %v2113_v57  ;;  %vm3222_vm10 = vcmp.gt.s32.totalorder %v3221_v25, 0  ;;  %v341_v57 = vpop.permute.xlu1 %340 }
 0x24a   :  { %7577 = vsinq.f32 %v2467_v47  ;;  %v2861_v0 = vsub.s32 0, %v10437_v44  ;;  %v13190_v20 = vand.u32 2147483647, %v10364_v41  ;;  %v3223_v31 = vsel %vm3222_vm10, %v3221_v25, 0 }
 0x24b   :  { %v1915_v39 = vadd.s32 %v10124_v37, %v10135_v49  ;;  %v2106_v58 = vsel %vm2100_vm9, %v2103_v42, %v2105_v29  ;;  %v10468_v19 = vmul.u32.u64.low %v2115_v6, %v2114_v54  ;;  %v10469_v36 = vmul.u32.u64.high %v2115_v6, %v2114_v54, %v10468_v19 }
 0x24c   :  { %v10473_v11 = vsel %vm1757_vm4, %v1839_v35, %v1838_v60  ;;  %v2125_v15 = vadd.s32 1, %v10445_v22  ;;  %v259_v47 = vmul.f32 %v10238_v62, %v162_v45  ;;  %v3225_v16 = vand.u32 31, %v3223_v31 }
 0x24d   :  { %13341 = vst [vmem:[#allocation28_spill] sm:$0xff] %v10469_v36  ;;  %v1931_v59 = vsub.s32 32, %v10434_v28  ;;  %v1936_v49 = vadd.s32 127, %v1935_v24  ;;  %v6680_v30 = vmin.u32 %v2861_v0, %v10437_v44  ;;  %v2122_v4 = vmul.u32 %v2115_v6, %v2106_v58 }
 0x24e   :  { %v3218_v60 = vand.u32 8388607, %v13190_v20  ;;  %v3226_v26 = vsub.s32 32, %v3225_v16  ;;  %vm2124_vm11 = vc.u32 %v10469_v36, %v10444_v61  ;;  %v3224_v35 = vshrl.u32 %v3223_v31, 5 }
 0x24f   :  { %v3228_v42 = vshll.u32 %v13238_v53, %v3225_v16  ;;  %v3231_v29 = vshll.u32 %v13267_v5, %v3225_v16  ;;  %v2126_v24 = vsel %vm2124_vm11, %v2125_v15, %v10445_v22  ;;  %v3234_v45 = vshll.u32 %v13233_v46, %v3225_v16 }
 0x250   :  { %v3229_v54 = vshrl.u32 %v13267_v5, %v3226_v26  ;;  %v3237_v6 = vshll.u32 %v13266_v14, %v3225_v16  ;;  %v2127_v58 = vadd.s32 %v2126_v24, %v2122_v4  ;;  %v3232_v19 = vshrl.u32 %v13233_v46, %v3226_v26 }
 0x251   :  { %v10493_v0 = vpop.eup %7575  ;;  %v3235_v31 = vshrl.u32 %v13266_v14, %v3226_v26  ;;  %v3238_v20 = vshrl.u32 %v13243_v9, %v3226_v26  ;;  %v13344_v25 = vand.u32 2147483647, %v13339_v48  ;;  %v2863_v22 = vclz %v6680_v30 }
 0x252   :  { %v3240_v15 = vshll.u32 %v13243_v9, %v3225_v16  ;;  %v3241_v13 = vshrl.u32 %v13245_v50, %v3226_v26  ;;  %v423_v52 = vmul.f32 %v10244_v63, %v341_v57  ;;  %v2128_v4 = vadd.s32 536870912, %v2127_v58 }
 0x253   :  { %vm10500_vm12 = vcmp.le.f32.partialorder %v13344_v25, 0.7853982  ;;  %v3219_v24 = vor.u32 8388608, %v3218_v60  ;;  %v3230_v17 = vor.u32 %v3229_v54, %v3228_v42  ;;  %v3233_v41 = vor.u32 %v3232_v19, %v3231_v29 }
 0x254   :  { %v10507_v12 = vpop.eup %7577  ;;  %vm1746_vm13 = vcmp.lt.s32.totalorder %v10338_v23, 2  ;;  %v3236_v43 = vor.u32 %v3235_v31, %v3234_v45  ;;  %v3239_v25 = vor.u32 %v3238_v20, %v3237_v6  ;;  %v3242_v61 = vor.u32 %v3241_v13, %v3240_v15 }
 0x255   :  { %vm3243_vm14 = vcmp.lt.s32.totalorder %v3224_v35, 1  ;;  %v1933_v36 = vshrl.u32 %v1915_v39, %v1931_v59  ;;  %v10510_v30 = vshrl.u32 %v2128_v4, 30  ;;  %v3227_v16 = vshrl.u32 %v13238_v53, %v3226_v26 }
 0x256   :  { %vm3246_vm15 = vcmp.lt.s32.totalorder %v3224_v35, 4  ;;  %v1937_v2 = vshll.u32 %v1936_v49, 23  ;;  %v6681_v57 = vadd.s32 4294967294, %v2863_v22  ;;  %vm3245_vm0 = vcmp.lt.s32.totalorder %v3224_v35, 3 }
 0x257   :  { %v3248_v60 = vsel %vm3246_vm15, %v3236_v43, 2102212464  ;;  %v2130_v42 = vshll.u32 %v10510_v30, 30  ;;  %vm3244_vm1 = vcmp.lt.s32.totalorder %v3224_v35, 2  ;;  %v3251_v29 = vsel %vm3243_vm14, %v3230_v17, %v3233_v41 }
 0x258   :  { %v3259_v54 = vshll.u32 %v3219_v24, 8  ;;  %vm1743_vm2 = vweird.f32 %v13321_v18  ;;  %v3252_v13 = vsel %vm3246_vm15, %v3239_v25, 920167782  ;;  %v3255_v20 = vsel %vm3243_vm14, %v3233_v41, %v3236_v43 }
 0x259   :  { %v3256_v39 = vsel %vm3246_vm15, %v3242_v61, 1326507024  ;;  %v10517_v59 = vadd.f32 %v423_v52, %v259_v47  ;;  %v3247_v26 = vsel %vm3243_vm14, %v3227_v16, %v3230_v17  ;;  %v3249_v49 = vsel %vm3245_vm0, %v3233_v41, %v3248_v60 }
 0x25a   :  { %v3253_v45 = vsel %vm3245_vm0, %v3236_v43, %v3252_v13  ;;  %v3257_v6 = vsel %vm3245_vm0, %v3239_v25, %v3256_v39  ;;  %v1938_v19 = vor.u32 4788187, %v1937_v2  ;;  %v10520_v31 = vsub.s32 %v2127_v58, %v2130_v42  ;;  %v13351_v42 = vld [vmem:[#allocation20_spill] sm:$0xff] }
 0x25b   :  { %v3254_v22 = vsel %vm3244_vm1, %v3251_v29, %v3253_v45  ;;  %v3258_v15 = vsel %vm3244_vm1, %v3255_v20, %v3257_v6  ;;  %v1843_v4 = vsel %vm10500_vm12, %v13339_v48, %v10473_v11  ;;  %v13347_v52 = vshll.u32 %v10331_v21, %v10434_v28  ;;  %v10546_v11 = vld [vmem:[%s13120_s1 + $0x3] ss:$0 sm:$0xff]  ;;  %v13352_v29 = vld [vmem:[#allocation17_spill] sm:$0xff] }
 0x25c   :  { %v10531_v17 = vmul.u32.u64.low %v3259_v54, %v3258_v15  ;;  %v10532_v41 = vmul.u32.u64.high %v3259_v54, %v3258_v15, %v10531_v17  ;;  %v3250_v43 = vsel %vm3244_vm1, %v3247_v26, %v3249_v49  ;;  %v10541_v58 = vadd.f32 %v10287_v8, %v10517_v59  ;;  %v13357_v15 = vld [vmem:[#allocation18_spill] sm:$0xff] }
 0x25d   :  { %v1934_v61 = vor.u32 %v1933_v36, %v13347_v52  ;;  %v10535_v2 = vmul.u32.u64.low %v3259_v54, %v3254_v22  ;;  %v10536_v47 = vmul.u32.u64.high %v3259_v54, %v3254_v22, %v10535_v2  ;;  %v3853_v21 = vmul.f32 %v10546_v11, %v10378_v34 }
 0x25e   :  { %v1753_v28 = vsel %vm1746_vm13, %v10387_v33, %v10389_v38  ;;  %vm6682_vm3 = vcmp.lt.s32.totalorder %v6681_v57, 0  ;;  %vm4003_vm4 = vcmask 523264   ;;  %7579 = vcosq.f32 %v1843_v4 }
 0x25f   :  { %v1939_v36 = vand.u32 2147483647, %v1938_v19  ;;  %v2133_v35 = vsub.s32 0, %v10520_v31  ;;  %v2174_v24 = vand.u32 2139095040, %v10541_v58  ;;  %v13348_v25 = vpack.c.bf16 %v13343_v56, %v13342_v7 }
 0x260   :  { %v2473_v34 = vand.u32 3, %v10391_v32  ;;  %v1844_v23 = vsel %vm10500_vm12, 0, %v10457_v40  ;;  %7581 = vsinq.f32 %v1843_v4  ;;  %v3266_v33 = vmul.u32 %v3259_v54, %v3250_v43  ;;  %v10575_v32 = vld [vmem:[%s13120_s1 + $0x4] ss:$0 sm:$0xff]  ;;  %v13350_v40 = vld [vmem:[#allocation3_spill] sm:$0xff] }
 0x261   :  { %6729 = vmatmul.mubr.msk.bf16.vlgmr.msra.gmra.mrb[0].mxu0 %vm4003_vm4, %v13348_v25  ;;  %v13349_v38 = vmov 0   ;;  %v1941_v16 = vcvt.s32.f32 %v1934_v61  ;;  %v10565_v60 = vsel %vm6682_vm3, 0, %v6681_v57  ;;  %vm3268_vm5 = vc.u32 %v10532_v41, %v10535_v2 }
 0x262   :  { %4094 = vmatprep.mubr.bf16.mxu0 %v13349_v38  ;;  %v3269_v7 = vadd.s32 1, %v10536_v47  ;;  %v1754_v56 = vsel %vm1743_vm2, nan, %v1753_v28  ;;  %v10579_v37 = vmul.f32 %v10575_v32, %v13350_v40  ;;  %vm1861_vm6 = vcmp.lt.s32.totalorder %v13351_v42, 0 }
 0x263   :  { %v2175_v57 = vshrl.u32 %v2174_v24, 23  ;;  %v10583_v54 = vadd.f32 %v13352_v29, %v3853_v21  ;;  %v1942_v13 = vmul.f32 %v1941_v16, %v1939_v36  ;;  %v6652_v20 = vmin.u32 %v2133_v35, %v10520_v31 }
 0x264   :  { %v3270_v18 = vsel %vm3268_vm5, %v3269_v7, %v10536_v47  ;;  %v1848_v39 = vadd.s32 3, %v1844_v23  ;;  %v2871_v26 = vsub.s32 4294967266, %v10565_v60  ;;  %v3850_v6 = vmul.f32 %v10546_v11, %v1754_v56  ;;  %v13358_v23 = vld [vmem:[#allocation9_spill] sm:$0xff] }
 0x265   :  { %13353 = vst [vmem:[#allocation2_spill] sm:$0xff] %v10583_v54  ;;  %v3271_v49 = vadd.s32 %v3270_v18, %v3266_v33  ;;  %v6655_v45 = vadd.s32 4294967169, %v2175_v57  ;;  %vm2474_vm7 = vcmp.lt.s32.totalorder %v2473_v34, 2  ;;  %v13354_v19 = vand.u32 2147483647, %v13351_v42 }
 0x266   :  { %v10597_v4 = vmul.f32 %v10575_v32, %v13357_v15  ;;  %vm2475_vm9 = vcmp.eq.s32.totalorder %v2473_v34, 0  ;;  %v2476_v52 = vxor.u32 2147483648, %v10507_v12  ;;  %vm2478_vm10 = vcmp.eq.s32.totalorder %v2473_v34, 2 }
 0x267   :  { %vm10591_vm8 = vcmp.le.f32.partialorder %v13354_v19, 0.7853982  ;;  %v2479_v61 = vxor.u32 2147483648, %v10493_v0  ;;  %v1943_v17 = vxor.u32 2147483648, %v1942_v13  ;;  %v2135_v43 = vclz %v6652_v20 }
 0x268   :  { %v3272_v47 = vadd.s32 536870912, %v3271_v49  ;;  %v2181_v21 = vadd.s32 1, %v6655_v45  ;;  %v10601_v28 = vand.u32 3, %v1848_v39  ;;  %v2851_v36 = vadd.s32 %v10311_v3, %v10308_v27  ;;  %v7580_v25 = vpop.eup %7579 }
 0x269   :  { %v2867_v35 = vsub.s32 32, %v10565_v60  ;;  %v2872_v24 = vadd.s32 127, %v2871_v26  ;;  %v10607_v33 = vadd.f32 %v13358_v23, %v3850_v6  ;;  %v10611_v16 = vmul.f32 %v10238_v62, %v10226_v1 }
 0x26a   :  { %v10613_v7 = vshrl.u32 %v3272_v47, 30  ;;  %vm2182_vm11 = vcmp.gt.s32.totalorder %v2181_v21, 0  ;;  %v7582_v56 = vpop.eup %7581  ;;  %v2477_v40 = vsel %vm2475_vm9, %v10493_v0, %v2476_v52  ;;  %v2480_v27 = vsel %vm2478_vm10, %v2479_v61, %v10507_v12  ;;  %v345_v12 = vpop.permute.xlu1 %344 }
 0x26b   :  { %13359 = vst [vmem:[#allocation13_spill] sm:$0xff] %v10607_v33  ;;  %13360 = vst [vmem:[#allocation3_spill] sm:$0xff] %v10611_v16  ;;  %v1945_v3 = vsub.s32 4, %v10258_v55  ;;  %v2183_v57 = vsel %vm2182_vm11, %v2181_v21, 0  ;;  %v1944_v29 = vsel %vm1861_vm6, %v1943_v17, %v1942_v13  ;;  %v6653_v20 = vadd.s32 4294967294, %v2135_v43  ;;  %v13370_v16 = vld [vmem:[#allocation16_spill] sm:$0xff] }
 0x26c   :  { %v3274_v1 = vshll.u32 %v10613_v7, 30  ;;  %v2185_v18 = vand.u32 31, %v2183_v57  ;;  %vm1851_vm12 = vcmp.eq.s32.totalorder %v10601_v28, 0  ;;  %vm1854_vm13 = vcmp.eq.s32.totalorder %v10601_v28, 2 }
 0x26d   :  { %v2868_v0 = vshll.u32 %v10437_v44, %v10565_v60  ;;  %v2869_v39 = vshrl.u32 %v2851_v36, %v2867_v35  ;;  %v2873_v26 = vshll.u32 %v2872_v24, 23  ;;  %v10628_v45 = vsel %vm2474_vm7, %v2477_v40, %v2480_v27 }
 0x26e   :  { %v10630_v6 = vsub.s32 %v3271_v49, %v3274_v1  ;;  %v13200_v13 = vand.u32 2147483647, %v10541_v58  ;;  %v2186_v19 = vsub.s32 32, %v2185_v18  ;;  %v1852_v15 = vxor.u32 2147483648, %v7582_v56 }
 0x26f   :  { %v1855_v52 = vxor.u32 2147483648, %v7580_v25  ;;  %v10636_v61 = vsel %vm1861_vm6, %v1945_v3, %v10258_v55  ;;  %v10641_v44 = vsel %vm10591_vm8, %v13351_v42, %v1944_v29  ;;  %vm6654_vm14 = vcmp.lt.s32.totalorder %v6653_v20, 0 }
 0x270   :  { %v3277_v34 = vsub.s32 0, %v10630_v6  ;;  %v2189_v60 = vshrl.u32 %v13267_v5, %v2186_v19  ;;  %v424_v49 = vmul.f32 %v10244_v63, %v345_v12  ;;  %v10646_v17 = vor.u32 %v2869_v39, %v2868_v0  ;;  %v13361_v39 = vld [vmem:[#allocation11_spill] sm:$0xff] }
 0x271   :  { %v10648_v43 = vor.u32 4788187, %v2873_v26  ;;  %v2192_v47 = vshrl.u32 %v13233_v46, %v2186_v19  ;;  %v2195_v55 = vshrl.u32 %v13266_v14, %v2186_v19  ;;  %v2178_v21 = vand.u32 8388607, %v13200_v13 }
 0x272   :  { %v2188_v36 = vshll.u32 %v13238_v53, %v2185_v18  ;;  %v2191_v35 = vshll.u32 %v13267_v5, %v2185_v18  ;;  %v2198_v24 = vshrl.u32 %v13243_v9, %v2186_v19  ;;  %v10657_v23 = vsel %vm6654_vm14, 0, %v6653_v20 }
 0x273   :  { %v6696_v40 = vmin.u32 %v3277_v34, %v10630_v6  ;;  %v2194_v27 = vshll.u32 %v13233_v46, %v2185_v18  ;;  %v2197_v3 = vshll.u32 %v13266_v14, %v2185_v18  ;;  %v2184_v29 = vshrl.u32 %v2183_v57, 5 }
 0x274   :  { %v2190_v1 = vor.u32 %v2189_v60, %v2188_v36  ;;  %v2193_v0 = vor.u32 %v2192_v47, %v2191_v35  ;;  %v10663_v26 = vadd.f32 %v424_v49, %v13361_v39  ;;  %v2200_v54 = vshll.u32 %v13243_v9, %v2185_v18 }
 0x275   :  { %v2196_v12 = vor.u32 %v2195_v55, %v2194_v27  ;;  %v2199_v13 = vor.u32 %v2198_v24, %v2197_v3  ;;  %v2201_v33 = vshrl.u32 %v13245_v50, %v2186_v19  ;;  %vm2471_vm15 = vweird.f32 %v9630_v51 }
 0x276   :  { %13362 = vst [vmem:[#allocation20_spill] sm:$0xff] %v10663_v26  ;;  %v1853_v20 = vsel %vm1851_vm12, %v7580_v25, %v1852_v15  ;;  %v1856_v34 = vsel %vm1854_vm13, %v1855_v52, %v7582_v56  ;;  %v1948_v57 = vsel %vm10591_vm8, 0, %v10636_v61  ;;  %v2179_v60 = vor.u32 8388608, %v2178_v21 }
 0x277   :  { %vm1850_vm0 = vcmp.lt.s32.totalorder %v10601_v28, 2  ;;  %7583 = vcosq.f32 %v10641_v44  ;;  %v2877_v18 = vcvt.s32.f32 %v10646_v17  ;;  %v3279_v49 = vclz %v6696_v40 }
 0x278   :  { %v2202_v47 = vor.u32 %v2201_v33, %v2200_v54  ;;  %v2875_v55 = vand.u32 2147483647, %v10648_v43  ;;  %v2143_v25 = vsub.s32 4294967266, %v10657_v23  ;;  %vm2203_vm1 = vcmp.lt.s32.totalorder %v2184_v29, 1 }
 0x279   :  { %vm2206_vm2 = vcmp.lt.s32.totalorder %v2184_v29, 4  ;;  %v2211_v15 = vsel %vm2203_vm1, %v2190_v1, %v2193_v0  ;;  %v10683_v52 = vadd.f32 %v10287_v8, %v10663_v26  ;;  %vm2797_vm3 = vcmp.lt.s32.totalorder %v10114_v10, 0 }
 0x27a   :  { %v2208_v56 = vsel %vm2206_vm2, %v2196_v12, 2102212464  ;;  %v2212_v22 = vsel %vm2206_vm2, %v2199_v13, 920167782  ;;  %v2187_v61 = vshrl.u32 %v13238_v53, %v2186_v19  ;;  %vm2205_vm5 = vcmp.lt.s32.totalorder %v2184_v29, 3 }
 0x27b   :  { %v2215_v54 = vsel %vm2203_vm1, %v2193_v0, %v2196_v12  ;;  %v2219_v33 = vshll.u32 %v2179_v60, 8  ;;  %vm1847_vm6 = vweird.f32 %v13339_v48  ;;  %v6697_v17 = vadd.s32 4294967294, %v3279_v49 }
 0x27c   :  { %vm2204_vm7 = vcmp.lt.s32.totalorder %v2184_v29, 2  ;;  %v2213_v43 = vsel %vm2205_vm5, %v2196_v12, %v2212_v22  ;;  %v2216_v21 = vsel %vm2206_vm2, %v2202_v47, 1326507024  ;;  %v2207_v36 = vsel %vm2203_vm1, %v2187_v61, %v2190_v1  ;;  %v10702_v12 = vpop.permute.xlu0 %226 }
 0x27d   :  { %v2209_v35 = vsel %vm2205_vm5, %v2193_v0, %v2208_v56  ;;  %v2214_v24 = vsel %vm2204_vm7, %v2211_v15, %v2213_v43  ;;  %v2217_v40 = vsel %vm2205_vm5, %v2199_v13, %v2216_v21  ;;  %v13363_v27 = vand.u32 2147483647, %v10114_v10  ;;  %v13366_v43 = vld [vmem:[#allocation27_spill] sm:$0xff] }
 0x27e   :  { %v2218_v3 = vsel %vm2204_vm7, %v2215_v54, %v2217_v40  ;;  %v10698_v39 = vmul.u32.u64.low %v2219_v33, %v2214_v24  ;;  %v10699_v60 = vmul.u32.u64.high %v2219_v33, %v2214_v24, %v10698_v39  ;;  %v2278_v1 = vand.u32 2139095040, %v10683_v52  ;;  %v13367_v24 = vld [vmem:[#allocation28_spill] sm:$0xff] }
 0x27f   :  { %vm10693_vm8 = vcmp.le.f32.partialorder %v13363_v27, 0.7853982  ;;  %v2139_v0 = vsub.s32 32, %v10657_v23  ;;  %v2144_v49 = vadd.s32 127, %v2143_v25  ;;  %v2482_v56 = vsel %vm2471_vm15, nan, %v10628_v45  ;;  %v13368_v40 = vld [vmem:[#allocation12_spill] sm:$0xff] }
 0x280   :  { %v10706_v13 = vmul.u32.u64.low %v2219_v33, %v2218_v3  ;;  %v10707_v47 = vmul.u32.u64.high %v2219_v33, %v2218_v3, %v10706_v13  ;;  %v1952_v15 = vadd.s32 3, %v1948_v57  ;;  %v2210_v22 = vsel %vm2204_vm7, %v2207_v36, %v2209_v35  ;;  %v13369_v25 = vld [vmem:[#allocation15_spill] sm:$0xff] }
 0x281   :  { %v2279_v61 = vshrl.u32 %v2278_v1, 23  ;;  %v1857_v54 = vsel %vm1850_vm0, %v1853_v20, %v1856_v34  ;;  %v2881_v21 = vsub.s32 4, %v13366_v43  ;;  %v2123_v27 = vadd.s32 %v13368_v40, %v13367_v24  ;;  %v10720_v13 = vpop.eup %7583 }
 0x282   :  { %v3940_v3 = vpack.c.bf16 %v13370_v16, %v13369_v25  ;;  %v2878_v26 = vmul.f32 %v2877_v18, %v2875_v55  ;;  %vm6698_vm9 = vcmp.lt.s32.totalorder %v6697_v17, 0  ;;  %v2229_v51 = vadd.s32 1, %v10699_v60  ;;  %v232_v18 = vpop.permute.xlu0 %231 }
 0x283   :  { %v6659_v45 = vadd.s32 4294967169, %v2279_v61  ;;  %v2141_v29 = vshrl.u32 %v2123_v27, %v2139_v0  ;;  %v2145_v57 = vshll.u32 %v2144_v49, 23  ;;  %v2226_v36 = vmul.u32 %v2219_v33, %v2210_v22 }
 0x284   :  { %vm2228_vm10 = vc.u32 %v10707_v47, %v10698_v39  ;;  %6730 = vmatmul.mubr.msk.bf16.gmra.mrb[4].mxu0 %vm4003_vm4, %v3940_v3  ;;  %v10727_v28 = vmul.f32 %v10546_v11, %v2482_v56  ;;  %v10729_v20 = vand.u32 3, %v1952_v15  ;;  %v10735_v55 = vsel %vm1847_vm6, nan, %v1857_v54 }
 0x285   :  { %v2230_v16 = vsel %vm2228_vm10, %v2229_v51, %v10699_v60  ;;  %v2285_v34 = vadd.s32 1, %v6659_v45  ;;  %4104 = vmatprep.mubr.bf16.mxu0 %v13349_v38  ;;  %v2140_v33 = vshll.u32 %v10520_v31, %v10657_v23  ;;  %v3282_v35 = vsel %vm6698_vm9, 0, %v6697_v17 }
 0x286   :  { %v2231_v1 = vadd.s32 %v2230_v16, %v2226_v36  ;;  %v2879_v0 = vxor.u32 2147483648, %v2878_v26  ;;  %v10743_v49 = vsel %vm2797_vm3, %v2881_v21, %v13366_v43  ;;  %v13202_v60 = vand.u32 2147483647, %v10683_v52  ;;  %v397_v27 = vpop.permute.xlu0 %396 }
 0x287   :  { %vm2286_vm11 = vcmp.gt.s32.totalorder %v2285_v34, 0  ;;  %v2142_v56 = vor.u32 %v2141_v29, %v2140_v33  ;;  %v2146_v15 = vor.u32 4788187, %v2145_v57  ;;  %v3267_v61 = vadd.s32 %v10535_v2, %v10532_v41 }
 0x288   :  { %v2232_v48 = vadd.s32 536870912, %v2231_v1  ;;  %v2287_v22 = vsel %vm2286_vm11, %v2285_v34, 0  ;;  %v3283_v31 = vsub.s32 32, %v3282_v35  ;;  %v3287_v23 = vsub.s32 4294967266, %v3282_v35 }
 0x289   :  { %v2289_v17 = vand.u32 31, %v2287_v22  ;;  %7585 = vsinq.f32 %v10641_v44  ;;  %v1959_v54 = vxor.u32 2147483648, %v10720_v13  ;;  %v2884_v43 = vsel %vm10693_vm8, 0, %v10743_v49 }
 0x28a   :  { %v10753_v21 = vshrl.u32 %v2232_v48, 30  ;;  %v2880_v24 = vsel %vm2797_vm3, %v2879_v0, %v2878_v26  ;;  %v2282_v40 = vand.u32 8388607, %v13202_v60  ;;  %v273_v2 = vmul.f32 %v10238_v62, %v232_v18 }
 0x28b   :  { %v2290_v41 = vsub.s32 32, %v2289_v17  ;;  %v2147_v25 = vand.u32 2147483647, %v2146_v15  ;;  %v2149_v44 = vcvt.s32.f32 %v2142_v56  ;;  %v3284_v3 = vshll.u32 %v10630_v6, %v3282_v35 }
 0x28c   :  { %v2234_v51 = vshll.u32 %v10753_v21, 30  ;;  %v3285_v45 = vshrl.u32 %v3267_v61, %v3283_v31  ;;  %v3288_v29 = vadd.s32 127, %v3287_v23  ;;  %v2292_v26 = vshll.u32 %v13238_v53, %v2289_v17 }
 0x28d   :  { %v2293_v57 = vshrl.u32 %v13267_v5, %v2290_v41  ;;  %v2296_v36 = vshrl.u32 %v13233_v46, %v2290_v41  ;;  %v2295_v16 = vshll.u32 %v13267_v5, %v2289_v17  ;;  %v2299_v34 = vshrl.u32 %v13266_v14, %v2290_v41 }
 0x28e   :  { %v437_v62 = vmul.f32 %v10244_v63, %v397_v27  ;;  %v10768_v18 = vsub.s32 %v2231_v1, %v2234_v51  ;;  %v2283_v33 = vor.u32 8388608, %v2282_v40  ;;  %v2288_v6 = vshrl.u32 %v2287_v22, 5  ;;  %v177_v51 = vpop.permute.xlu1 %176 }
 0x28f   :  { %v2298_v35 = vshll.u32 %v13233_v46, %v2289_v17  ;;  %v2294_v0 = vor.u32 %v2293_v57, %v2292_v26  ;;  %v2297_v56 = vor.u32 %v2296_v36, %v2295_v16  ;;  %v2301_v15 = vshll.u32 %v13266_v14, %v2289_v17 }
 0x290   :  { %v2302_v48 = vshrl.u32 %v13243_v9, %v2290_v41  ;;  %v2883_v61 = vsel %vm10693_vm8, %v10114_v10, %v2880_v24  ;;  %v2304_v23 = vshll.u32 %v13243_v9, %v2289_v17  ;;  %v2305_v63 = vshrl.u32 %v13245_v50, %v2290_v41 }
 0x291   :  { %v2300_v31 = vor.u32 %v2299_v34, %v2298_v35  ;;  %v2150_v1 = vmul.f32 %v2149_v44, %v2147_v25  ;;  %v10778_v40 = vor.u32 %v3285_v45, %v3284_v3  ;;  %v3289_v22 = vshll.u32 %v3288_v29, 23  ;;  %v13372_v25 = vld [vmem:[#allocation22_spill] sm:$0xff] }
 0x292   :  { %v2303_v27 = vor.u32 %v2302_v48, %v2301_v15  ;;  %vm1958_vm12 = vcmp.eq.s32.totalorder %v10729_v20, 2  ;;  %v2237_v57 = vsub.s32 0, %v10768_v18  ;;  %v2306_v36 = vor.u32 %v2305_v63, %v2304_v23 }
 0x293   :  { %vm2307_vm13 = vcmp.lt.s32.totalorder %v2288_v6, 1  ;;  %v10782_v26 = vadd.f32 %v437_v62, %v273_v2  ;;  %v7586_v24 = vpop.eup %7585  ;;  %vm2309_vm14 = vcmp.lt.s32.totalorder %v2288_v6, 3  ;;  %vm2310_vm15 = vcmp.lt.s32.totalorder %v2288_v6, 4 }
 0x294   :  { %v2315_v17 = vsel %vm2307_vm13, %v2294_v0, %v2297_v56  ;;  %v2323_v16 = vshll.u32 %v2283_v33, 8  ;;  %vm1955_vm0 = vcmp.eq.s32.totalorder %v10729_v20, 0  ;;  %vm2069_vm1 = vcmp.lt.s32.totalorder %v13372_v25, 0 }
 0x295   :  { %13371 = vst [vmem:[#allocation17_spill] sm:$0xff] %v10782_v26  ;;  %v2312_v44 = vsel %vm2310_vm15, %v2300_v31, 2102212464  ;;  %v2316_v3 = vsel %vm2310_vm15, %v2303_v27, 920167782  ;;  %v2319_v45 = vsel %vm2307_vm13, %v2297_v56, %v2300_v31  ;;  %v2291_v34 = vshrl.u32 %v13238_v53, %v2290_v41 }
 0x296   :  { %v2320_v29 = vsel %vm2310_vm15, %v2306_v36, 1326507024  ;;  %vm2308_vm2 = vcmp.lt.s32.totalorder %v2288_v6, 2  ;;  %v2317_v2 = vsel %vm2309_vm14, %v2300_v31, %v2316_v3  ;;  %v6656_v35 = vmin.u32 %v2237_v57, %v10768_v18  ;;  %v353_v31 = vpop.permute.xlu1 %352 }
 0x297   :  { %v2321_v62 = vsel %vm2309_vm14, %v2303_v27, %v2320_v29  ;;  %v2318_v33 = vsel %vm2308_vm2, %v2315_v17, %v2317_v2  ;;  %v10796_v48 = vadd.f32 %v10287_v8, %v10782_v26  ;;  %v2311_v23 = vsel %vm2307_vm13, %v2291_v34, %v2294_v0 }
 0x298   :  { %v2322_v15 = vsel %vm2308_vm2, %v2319_v45, %v2321_v62  ;;  %v2313_v63 = vsel %vm2309_vm14, %v2297_v56, %v2312_v44  ;;  %7587 = vcosq.f32 %v2883_v61  ;;  %v3290_v27 = vor.u32 4788187, %v3289_v22  ;;  %v10813_v44 = vld [vmem:[%s13120_s1 + $0x1] ss:$0 sm:$0xff]  ;;  %v10829_v62 = vld [vmem:[%s13120_s1] ss:$0 sm:$0xff] }
 0x299   :  { %13373 = vst [vmem:[#allocation18_spill] sm:$0xff] %v10796_v48  ;;  %v10800_v41 = vmul.u32.u64.low %v2323_v16, %v2322_v15  ;;  %v10801_v36 = vmul.u32.u64.high %v2323_v16, %v2322_v15, %v10800_v41  ;;  %v10803_v3 = vmul.u32.u64.low %v2323_v16, %v2318_v33  ;;  %v10804_v57 = vmul.u32.u64.high %v2323_v16, %v2318_v33, %v10803_v3 }
 0x29a   :  { %v1956_v17 = vxor.u32 2147483648, %v7586_v24  ;;  %7589 = vsinq.f32 %v2883_v61  ;;  %v2151_v45 = vxor.u32 2147483648, %v2150_v1  ;;  %v2153_v29 = vsub.s32 4, %v10510_v30  ;;  %v13375_v41 = vld [vmem:[#allocation7_spill] sm:$0xff] }
 0x29b   :  { %v2239_v2 = vclz %v6656_v35  ;;  %v2314_v0 = vsel %vm2308_vm2, %v2311_v23, %v2313_v63  ;;  %v3630_v56 = vand.u32 2139095040, %v10796_v48  ;;  %v426_v22 = vmul.f32 %v10813_v44, %v353_v31 }
 0x29c   :  { %vm1951_vm3 = vweird.f32 %v13351_v42  ;;  %v1960_v61 = vsel %vm1958_vm12, %v1959_v54, %v7586_v24  ;;  %v2888_v6 = vadd.s32 3, %v2884_v43  ;;  %v3293_v34 = vcvt.s32.f32 %v10778_v40 }
 0x29d   :  { %v262_v35 = vmul.f32 %v10829_v62, %v177_v51  ;;  %v3291_v33 = vand.u32 2147483647, %v3290_v27  ;;  %vm2332_vm5 = vc.u32 %v10801_v36, %v10803_v3  ;;  %v2333_v54 = vadd.s32 1, %v10804_v57  ;;  %v13377_v27 = vld [vmem:[#allocation4_spill] sm:$0xff] }
 0x29e   :  { %v3631_v24 = vshrl.u32 %v3630_v56, 23  ;;  %v1957_v19 = vsel %vm1955_vm0, %v10720_v13, %v1956_v17  ;;  %v2152_v49 = vsel %vm2069_vm1, %v2151_v45, %v2150_v1  ;;  %v2154_v43 = vsel %vm2069_vm1, %v2153_v29, %v10510_v30 }
 0x29f   :  { %v2330_v40 = vmul.u32 %v2323_v16, %v2314_v0  ;;  %v6657_v51 = vadd.s32 4294967294, %v2239_v2  ;;  %v2334_v15 = vsel %vm2332_vm5, %v2333_v54, %v10804_v57  ;;  %v10844_v63 = vadd.f32 %v426_v22, %v262_v35 }
 0x2a0   :  { %v6711_v23 = vadd.s32 4294967169, %v3631_v24  ;;  %v10848_v31 = vadd.f32 %v13375_v41, %v10727_v28  ;;  %v10852_v13 = vmul.f32 %v10575_v32, %v13377_v27  ;;  %v13379_v1 = vand.u32 2147483647, %v13372_v25  ;;  %v13383_v24 = vld [vmem:[#allocation26_spill] sm:$0xff] }
 0x2a1   :  { %13374 = vst [vmem:[#allocation9_spill] sm:$0xff] %v10844_v63  ;;  %v2335_v30 = vadd.s32 %v2334_v15, %v2330_v40  ;;  %vm1954_vm7 = vcmp.lt.s32.totalorder %v10729_v20, 2  ;;  %v3294_v57 = vmul.f32 %v3293_v34, %v3291_v33  ;;  %v3851_v45 = vmul.f32 %v10546_v11, %v10735_v55 }
 0x2a2   :  { %13376 = vst [vmem:[#allocation11_spill] sm:$0xff] %v10848_v31  ;;  %13378 = vst [vmem:[#allocation27_spill] sm:$0xff] %v10852_v13  ;;  %vm10856_vm6 = vcmp.le.f32.partialorder %v13379_v1, 0.7853982  ;;  %v3637_v28 = vadd.s32 1, %v6711_v23  ;;  %v1961_v29 = vsel %vm1954_vm7, %v1957_v19, %v1960_v61  ;;  %v7588_v56 = vpop.eup %7587  ;;  %v10868_v22 = vand.u32 3, %v2888_v6 }
 0x2a3   :  { %v2155_v16 = vsel %vm10856_vm6, %v13372_v25, %v2152_v49  ;;  %v2156_v2 = vsel %vm10856_vm6, 0, %v2154_v43  ;;  %v2336_v0 = vadd.s32 536870912, %v2335_v30  ;;  %vm6658_vm8 = vcmp.lt.s32.totalorder %v6657_v51, 0  ;;  %v13385_v23 = vld [vmem:[#allocation21_spill] sm:$0xff] }
 0x2a4   :  { %vm3638_vm9 = vcmp.gt.s32.totalorder %v3637_v28, 0  ;;  %v10872_v20 = vadd.f32 %v10287_v8, %v10844_v63  ;;  %v7590_v35 = vpop.eup %7589  ;;  %7591 = vcosq.f32 %v2155_v16  ;;  %v3297_v34 = vsub.s32 4, %v10613_v7 }
 0x2a5   :  { %v10875_v33 = vshrl.u32 %v2336_v0, 30  ;;  %v3639_v55 = vsel %vm3638_vm9, %v3637_v28, 0  ;;  %v1962_v61 = vsel %vm1951_vm3, nan, %v1961_v29  ;;  %v2160_v54 = vadd.s32 3, %v2156_v2 }
 0x2a6   :  { %13382 = vst [vmem:[#allocation28_spill] sm:$0xff] %v10872_v20  ;;  %vm3213_vm10 = vcmp.lt.s32.totalorder %v13383_v24, 0  ;;  %v3295_v6 = vxor.u32 2147483648, %v3294_v57  ;;  %v2895_v19 = vxor.u32 2147483648, %v7588_v56  ;;  %v2242_v49 = vsel %vm6658_vm8, 0, %v6657_v51 }
 0x2a7   :  { %v2338_v43 = vshll.u32 %v10875_v33, 30  ;;  %v3641_v8 = vand.u32 31, %v3639_v55  ;;  %v10882_v40 = vadd.f32 %v10579_v37, %v3851_v45  ;;  %v2892_v15 = vxor.u32 2147483648, %v7590_v35 }
 0x2a8   :  { %v10886_v41 = vmul.f32 %v10575_v32, %v13385_v23  ;;  %v2486_v42 = vand.u32 2139095040, %v10872_v20  ;;  %vm2891_vm11 = vcmp.eq.s32.totalorder %v10868_v22, 0  ;;  %v13387_v27 = vand.u32 2147483647, %v13383_v24 }
 0x2a9   :  { %13384 = vst [vmem:[#allocation12_spill] sm:$0xff] %v10882_v40  ;;  %v3298_v37 = vsel %vm3213_vm10, %v3297_v34, %v10613_v7  ;;  %v10899_v51 = vsub.s32 %v2335_v30, %v2338_v43  ;;  %v10902_v17 = vmul.f32 %v10546_v11, %v1962_v61  ;;  %vm2894_vm13 = vcmp.eq.s32.totalorder %v10868_v22, 2 }
 0x2aa   :  { %13386 = vst [vmem:[#allocation15_spill] sm:$0xff] %v10886_v41  ;;  %vm10892_vm12 = vcmp.le.f32.partialorder %v13387_v27, 0.7853982  ;;  %v3296_v32 = vsel %vm3213_vm10, %v3295_v6, %v3294_v57  ;;  %v2247_v28 = vsub.s32 4294967266, %v2242_v49  ;;  %v10907_v45 = vsel %vm2894_vm13, %v2895_v19, %v7590_v35 }
 0x2ab   :  { %v10909_v29 = vand.u32 3, %v2160_v54  ;;  %v2341_v2 = vsub.s32 0, %v10899_v51  ;;  %v3642_v0 = vsub.s32 32, %v3641_v8  ;;  %v10912_v23 = vsel %vm2891_vm11, %v7588_v56, %v2892_v15 }
 0x2ac   :  { %7593 = vsinq.f32 %v2155_v16  ;;  %v3300_v11 = vsel %vm10892_vm12, 0, %v3298_v37  ;;  %v2487_v7 = vshrl.u32 %v2486_v42, 23  ;;  %v3299_v30 = vsel %vm10892_vm12, %v13383_v24, %v3296_v32 }
 0x2ad   :  { %v2227_v57 = vadd.s32 %v10698_v39, %v10707_v47  ;;  %v6660_v35 = vmin.u32 %v2341_v2, %v10899_v51  ;;  %v2243_v61 = vsub.s32 32, %v2242_v49  ;;  %v2248_v54 = vadd.s32 127, %v2247_v28 }
 0x2ae   :  { %v10923_v56 = vshrl.u32 %v3639_v55, 5  ;;  %v3653_v16 = vshll.u32 %v13266_v14, %v3641_v8  ;;  %v10926_v6 = vpop.eup %7591  ;;  %v3654_v43 = vshrl.u32 %v13243_v9, %v3642_v0  ;;  %v3656_v15 = vshll.u32 %v13243_v9, %v3641_v8 }
 0x2af   :  { %v2343_v19 = vclz %v6660_v35  ;;  %v3657_v42 = vshrl.u32 %v13245_v50, %v3642_v0  ;;  %v3644_v39 = vshll.u32 %v13238_v53, %v3641_v8  ;;  %v3647_v47 = vshll.u32 %v13267_v5, %v3641_v8 }
 0x2b0   :  { %v3650_v27 = vshll.u32 %v13233_v46, %v3641_v8  ;;  %v6667_v1 = vadd.s32 4294967169, %v2487_v7  ;;  %v3645_v37 = vshrl.u32 %v13267_v5, %v3642_v0  ;;  %v3648_v32 = vshrl.u32 %v13233_v46, %v3642_v0 }
 0x2b1   :  { %v6661_v55 = vadd.s32 4294967294, %v2343_v19  ;;  %v3651_v28 = vshrl.u32 %v13266_v14, %v3642_v0  ;;  %v10938_v35 = vadd.s32 3, %v3300_v11  ;;  %v2245_v60 = vshrl.u32 %v2227_v57, %v2243_v61 }
 0x2b2   :  { %v2249_v34 = vshll.u32 %v2248_v54, 23  ;;  %7595 = vcosq.f32 %v3299_v30  ;;  %v2244_v26 = vshll.u32 %v10768_v18, %v2242_v49  ;;  %v3655_v31 = vor.u32 %v3654_v43, %v3653_v16 }
 0x2b3   :  { %v3658_v40 = vor.u32 %v3657_v42, %v3656_v15  ;;  %vm6662_vm14 = vcmp.lt.s32.totalorder %v6661_v55, 0  ;;  %v13390_v8 = vand.u32 2147483647, %v10796_v48  ;;  %vm3662_vm15 = vcmp.lt.s32.totalorder %v10923_v56, 4 }
 0x2b4   :  { %v13205_v19 = vand.u32 2147483647, %v10872_v20  ;;  %v3646_v63 = vor.u32 %v3645_v37, %v3644_v39  ;;  %v3649_v41 = vor.u32 %v3648_v32, %v3647_v47  ;;  %v3652_v2 = vor.u32 %v3651_v28, %v3650_v27 }
 0x2b5   :  { %v3634_v7 = vand.u32 8388607, %v13390_v8  ;;  %v2493_v11 = vadd.s32 1, %v6667_v1  ;;  %v10947_v57 = vor.u32 %v2245_v60, %v2244_v26  ;;  %v10949_v61 = vor.u32 4788187, %v2249_v34 }
 0x2b6   :  { %v10945_v13 = vpop.eup %7593  ;;  %vm3659_vm0 = vcmp.lt.s32.totalorder %v10923_v56, 1  ;;  %vm3661_vm1 = vcmp.lt.s32.totalorder %v10923_v56, 3  ;;  %v10953_v18 = vsel %vm6662_vm14, 0, %v6661_v55  ;;  %v3668_v49 = vsel %vm3662_vm15, %v3655_v31, 920167782 }
 0x2b7   :  { %v3672_v54 = vsel %vm3662_vm15, %v3658_v40, 1326507024  ;;  %vm2494_vm2 = vcmp.gt.s32.totalorder %v2493_v11, 0  ;;  %v3635_v16 = vor.u32 8388608, %v3634_v7  ;;  %v3643_v43 = vshrl.u32 %v13238_v53, %v3642_v0 }
 0x2b8   :  { %v2490_v60 = vand.u32 8388607, %v13205_v19  ;;  %v2495_v26 = vsel %vm2494_vm2, %v2493_v11, 0  ;;  %vm3660_vm3 = vcmp.lt.s32.totalorder %v10923_v56, 2  ;;  %v3664_v34 = vsel %vm3662_vm15, %v3652_v2, 2102212464 }
 0x2b9   :  { %v3667_v15 = vsel %vm3659_vm0, %v3646_v63, %v3649_v41  ;;  %v3671_v42 = vsel %vm3659_vm0, %v3649_v41, %v3652_v2  ;;  %v2351_v40 = vsub.s32 4294967266, %v10953_v18  ;;  %v3669_v0 = vsel %vm3661_vm1, %v3652_v2, %v3668_v49 }
 0x2ba   :  { %v3673_v39 = vsel %vm3661_vm1, %v3655_v31, %v3672_v54  ;;  %v2497_v47 = vand.u32 31, %v2495_v26  ;;  %7597 = vsinq.f32 %v3299_v30  ;;  %v2253_v1 = vcvt.s32.f32 %v10947_v57 }
 0x2bb   :  { %v2331_v55 = vadd.s32 %v10803_v3, %v10801_v36  ;;  %v2251_v37 = vand.u32 2147483647, %v10949_v61  ;;  %v10979_v32 = vshll.u32 %v3635_v16, 8  ;;  %v2491_v28 = vor.u32 8388608, %v2490_v60 }
 0x2bc   :  { %v2498_v8 = vsub.s32 32, %v2497_v47  ;;  %v10981_v7 = vpop.eup %7595  ;;  %v10985_v31 = vsel %vm3659_vm0, %v3643_v43, %v3646_v63  ;;  %v10989_v30 = vsel %vm3661_vm1, %v3649_v41, %v3664_v34  ;;  %v3670_v2 = vsel %vm3660_vm3, %v3667_v15, %v3669_v0  ;;  %v182_v0 = vpop.permute.xlu1 %181 }
 0x2bd   :  { %v3674_v36 = vsel %vm3660_vm3, %v3671_v42, %v3673_v39  ;;  %v2352_v3 = vadd.s32 127, %v2351_v40  ;;  %v2496_v11 = vshrl.u32 %v2495_v26, 5  ;;  %v2500_v57 = vshll.u32 %v13238_v53, %v2497_v47 }
 0x2be   :  { %v2501_v61 = vshrl.u32 %v13267_v5, %v2498_v8  ;;  %v2503_v49 = vshll.u32 %v13267_v5, %v2497_v47  ;;  %v2504_v63 = vshrl.u32 %v13233_v46, %v2498_v8  ;;  %v2506_v54 = vshll.u32 %v13233_v46, %v2497_v47 }
 0x2bf   :  { %v2507_v41 = vshrl.u32 %v13266_v14, %v2498_v8  ;;  %v2509_v43 = vshll.u32 %v13266_v14, %v2497_v47  ;;  %v2510_v60 = vshrl.u32 %v13243_v9, %v2498_v8  ;;  %v2513_v34 = vshrl.u32 %v13245_v50, %v2498_v8 }
 0x2c0   :  { %v2502_v16 = vor.u32 %v2501_v61, %v2500_v57  ;;  %v2347_v26 = vsub.s32 32, %v10953_v18  ;;  %v2505_v15 = vor.u32 %v2504_v63, %v2503_v49  ;;  %v2512_v40 = vshll.u32 %v13243_v9, %v2497_v47  ;;  %v357_v20 = vpop.permute.xlu1 %356 }
 0x2c1   :  { %v2508_v42 = vor.u32 %v2507_v41, %v2506_v54  ;;  %v2348_v39 = vshll.u32 %v10899_v51, %v10953_v18  ;;  %v11009_v19 = vmul.u32.u64.low %v10979_v32, %v3674_v36  ;;  %v11010_v27 = vmul.u32.u64.high %v10979_v32, %v3674_v36, %v11009_v19 }
 0x2c2   :  { %v2511_v57 = vor.u32 %v2510_v60, %v2509_v43  ;;  %v2353_v61 = vshll.u32 %v2352_v3, 23  ;;  %v2514_v48 = vor.u32 %v2513_v34, %v2512_v40  ;;  %vm2515_vm5 = vcmp.lt.s32.totalorder %v2496_v11, 1 }
 0x2c3   :  { %vm2518_vm6 = vcmp.lt.s32.totalorder %v2496_v11, 4  ;;  %vm2166_vm7 = vcmp.eq.s32.totalorder %v10909_v29, 2  ;;  %v11014_v49 = vmul.u32.u64.low %v10979_v32, %v3670_v2  ;;  %v11015_v63 = vmul.u32.u64.high %v10979_v32, %v3670_v2, %v11014_v49 }
 0x2c4   :  { %v2523_v47 = vsel %vm2515_vm5, %v2502_v16, %v2505_v15  ;;  %v2524_v51 = vsel %vm2518_vm6, %v2511_v57, 920167782  ;;  %v11020_v18 = vpop.eup %7597  ;;  %vm2163_vm8 = vcmp.eq.s32.totalorder %v10909_v29, 0  ;;  %v2349_v19 = vshrl.u32 %v2331_v55, %v2347_v26 }
 0x2c5   :  { %v2499_v36 = vshrl.u32 %v13238_v53, %v2498_v8  ;;  %vm2517_vm9 = vcmp.lt.s32.totalorder %v2496_v11, 3  ;;  %v2520_v3 = vsel %vm2518_vm6, %v2508_v42, 2102212464  ;;  %vm2516_vm10 = vcmp.lt.s32.totalorder %v2496_v11, 2 }
 0x2c6   :  { %v2525_v54 = vsel %vm2517_vm9, %v2508_v42, %v2524_v51  ;;  %v2527_v2 = vsel %vm2515_vm5, %v2505_v15, %v2508_v42  ;;  %v2531_v41 = vshll.u32 %v2491_v28, 8  ;;  %v2354_v43 = vor.u32 4788187, %v2353_v61 }
 0x2c7   :  { %v2519_v60 = vsel %vm2515_vm5, %v2499_v36, %v2502_v16  ;;  %v2526_v34 = vsel %vm2516_vm10, %v2523_v47, %v2525_v54  ;;  %v2528_v40 = vsel %vm2518_vm6, %v2514_v48, 1326507024  ;;  %vm2890_vm11 = vcmp.lt.s32.totalorder %v10868_v22, 2  ;;  %v13391_v36 = vld [vmem:[#allocation6_spill] sm:$0xff] }
 0x2c8   :  { %vm2173_vm12 = vcmp.lt.s32.totalorder %v10541_v58, 0  ;;  %v2521_v55 = vsel %vm2517_vm9, %v2505_v15, %v2520_v3  ;;  %v2529_v8 = vsel %vm2517_vm9, %v2511_v57, %v2528_v40  ;;  %v2254_v42 = vmul.f32 %v2253_v1, %v2251_v37  ;;  %v13392_v54 = vld [vmem:[#allocation10_spill] sm:$0xff] }
 0x2c9   :  { %v11031_v26 = vmul.u32.u64.low %v2531_v41, %v2526_v34  ;;  %v11032_v50 = vmul.u32.u64.high %v2531_v41, %v2526_v34, %v11031_v26  ;;  %v2350_v28 = vor.u32 %v2349_v19, %v2348_v39  ;;  %v2530_v61 = vsel %vm2516_vm10, %v2527_v2, %v2529_v8  ;;  %v13394_v19 = vld [vmem:[#allocation5_spill] sm:$0xff] }
 0x2ca   :  { %v263_v16 = vmul.f32 %v10829_v62, %v182_v0  ;;  %v11037_v47 = vmul.u32.u64.low %v2531_v41, %v2530_v61  ;;  %v11038_v51 = vmul.u32.u64.high %v2531_v41, %v2530_v61, %v11037_v47  ;;  %v427_v48 = vmul.f32 %v10813_v44, %v357_v20 }
 0x2cb   :  { %v3941_v9 = vpack.c.bf16 %v13392_v54, %v13391_v36  ;;  %v11044_v15 = vand.u32 3, %v10938_v35  ;;  %v2355_v57 = vand.u32 2147483647, %v2354_v43  ;;  %v3666_v1 = vsel %vm3660_vm3, %v10985_v31, %v10989_v30  ;;  %v13393_v35 = vld [vmem:[#allocation8_spill] sm:$0xff] }
 0x2cc   :  { %v2522_v37 = vsel %vm2516_vm10, %v2519_v60, %v2521_v55  ;;  %vm2887_vm13 = vweird.f32 %v10114_v10  ;;  %vm2159_vm14 = vweird.f32 %v13372_v25  ;;  %v3685_v20 = vadd.s32 1, %v11015_v63  ;;  %v11078_v60 = vld [vmem:[%s13120_s1 + $0x2] ss:$0 sm:$0xff] }
 0x2cd   :  { %v2541_v0 = vadd.s32 1, %v11032_v50  ;;  %v11055_v39 = vadd.f32 %v427_v48, %v263_v16  ;;  %6731 = vmatmul.mubr.msk.bf16.gmra.mrb[8].mxu0 %vm4003_vm4, %v3941_v9  ;;  %v3942_v3 = vpack.c.bf16 %v13394_v19, %v13393_v35  ;;  %v13395_v56 = vxor.u32 2147483648, %v10926_v6 }
 0x2ce   :  { %v2255_v30 = vxor.u32 2147483648, %v2254_v42  ;;  %v2357_v11 = vcvt.s32.f32 %v2350_v28  ;;  %vm3684_vm15 = vc.u32 %v11010_v27, %v11014_v49  ;;  %4114 = vmatprep.mubr.bf16.mxu0 %v13349_v38  ;;  %v13396_v2 = vxor.u32 2147483648, %v10945_v13 }
 0x2cf   :  { %v2168_v31 = vsel %vm2166_vm7, %v13395_v56, %v10945_v13  ;;  %v2538_v43 = vmul.u32 %v2531_v41, %v2522_v37  ;;  %vm2540_vm0 = vc.u32 %v11038_v51, %v11031_v26  ;;  %v11082_v34 = vadd.f32 %v11078_v60, %v11055_v39 }
 0x2d0   :  { %v2165_v9 = vsel %vm2163_vm8, %v10926_v6, %v13396_v2  ;;  %v2257_v40 = vsub.s32 4, %v10753_v21  ;;  %v2358_v13 = vmul.f32 %v2357_v11, %v2355_v57  ;;  %v3682_v55 = vmul.u32 %v10979_v32, %v3666_v1  ;;  %v361_v32 = vpop.permute.xlu1 %360 }
 0x2d1   :  { %v2542_v6 = vsel %vm2540_vm0, %v2541_v0, %v11032_v50  ;;  %vm2162_vm1 = vcmp.lt.s32.totalorder %v10909_v29, 2  ;;  %v13397_v41 = vand.u32 2147483647, %v10541_v58  ;;  %v3686_v28 = vsel %vm3684_vm15, %v3685_v20, %v11015_v63 }
 0x2d2   :  { %v2543_v61 = vadd.s32 %v2542_v6, %v2538_v43  ;;  %v2897_v16 = vsel %vm2890_vm11, %v10912_v23, %v10907_v45  ;;  %vm3307_vm3 = vcmp.eq.s32.totalorder %v11044_v15, 0  ;;  %v2256_v50 = vsel %vm2173_vm12, %v2255_v30, %v2254_v42  ;;  %v13400_v30 = vld [vmem:[#allocation24_spill] sm:$0xff] }
 0x2d3   :  { %vm11090_vm2 = vcmp.le.f32.partialorder %v13397_v41, 0.7853982  ;;  %v2590_v29 = vand.u32 2139095040, %v11082_v34  ;;  %v2169_v47 = vsel %vm2162_vm1, %v2165_v9, %v2168_v31  ;;  %vm3310_vm5 = vcmp.eq.s32.totalorder %v11044_v15, 2 }
 0x2d4   :  { %v3311_v48 = vxor.u32 2147483648, %v10981_v7  ;;  %v2544_v63 = vadd.s32 536870912, %v2543_v61  ;;  %v3308_v36 = vxor.u32 2147483648, %v11020_v18  ;;  %v2258_v22 = vsel %vm2173_vm12, %v2257_v40, %v10753_v21 }
 0x2d5   :  { %v2359_v45 = vxor.u32 2147483648, %v2358_v13  ;;  %v11109_v23 = vadd.s32 %v3686_v28, %v3682_v55  ;;  %v2259_v42 = vsel %vm11090_vm2, %v10541_v58, %v2256_v50  ;;  %v2591_v57 = vshrl.u32 %v2590_v29, 23  ;;  %6732 = vmatmul.mubr.msk.bf16.gmra.mrb[12].mxu0 %vm4003_vm4, %v3942_v3  ;;  %v11180_v29 = vld [vmem:[%s13120_s1 + $0x4] ss:$0 sm:$0xff] }
 0x2d6   :  { %v11114_v54 = vshrl.u32 %v2544_v63, 30  ;;  %v428_v1 = vmul.f32 %v10813_v44, %v361_v32  ;;  %v2898_v37 = vsel %vm2887_vm13, nan, %v2897_v16  ;;  %v2170_v21 = vsel %vm2159_vm14, nan, %v2169_v47  ;;  %4124 = vmatprep.mubr.bf16.mxu0 %v13349_v38 }
 0x2d7   :  { %vm3306_vm6 = vcmp.lt.s32.totalorder %v11044_v15, 2  ;;  %vm2277_vm7 = vcmp.lt.s32.totalorder %v10683_v52, 0  ;;  %vm3303_vm8 = vweird.f32 %v13383_v24  ;;  %v3312_v20 = vsel %vm3310_vm5, %v3311_v48, %v11020_v18  ;;  %v13405_v48 = vld [vmem:[#allocation20_spill] sm:$0xff] }
 0x2d8   :  { %v2260_v0 = vsel %vm11090_vm2, 0, %v2258_v22  ;;  %v2546_v10 = vshll.u32 %v11114_v54, 30  ;;  %v6671_v35 = vadd.s32 4294967169, %v2591_v57  ;;  %v3309_v25 = vsel %vm3307_vm3, %v10981_v7, %v3308_v36  ;;  %v11151_v7 = vld [vmem:[%s13120_s1 + $0x3] ss:$0 sm:$0xff]  ;;  %v13406_v36 = vld [vmem:[#allocation27_spill] sm:$0xff] }
 0x2d9   :  { %7599 = vcosq.f32 %v2259_v42  ;;  %v2360_v19 = vsel %vm2277_vm7, %v2359_v45, %v2358_v13  ;;  %v3688_v3 = vadd.s32 536870912, %v11109_v23  ;;  %v13212_v18 = vand.u32 2147483647, %v11082_v34  ;;  %v13408_v45 = vld [vmem:[#allocation15_spill] sm:$0xff] }
 0x2da   :  { %v11138_v56 = vsub.s32 %v2543_v61, %v2546_v10  ;;  %v2597_v31 = vadd.s32 1, %v6671_v35  ;;  %v11142_v11 = vadd.f32 %v428_v1, %v13400_v30  ;;  %v11146_v2 = vadd.f32 %v10597_v4, %v10902_v17 }
 0x2db   :  { %v3861_v9 = vmul.f32 %v11151_v7, %v2898_v37  ;;  %v3854_v43 = vmul.f32 %v11151_v7, %v2170_v21  ;;  %v13401_v40 = vand.u32 2147483647, %v10683_v52  ;;  %v3313_v55 = vsel %vm3306_vm6, %v3309_v25, %v3312_v20 }
 0x2dc   :  { %v2264_v4 = vadd.s32 3, %v2260_v0  ;;  %v2549_v17 = vsub.s32 0, %v11138_v56  ;;  %vm2598_vm10 = vcmp.gt.s32.totalorder %v2597_v31, 0  ;;  %v2361_v6 = vsub.s32 4, %v10875_v33 }
 0x2dd   :  { %vm11157_vm9 = vcmp.le.f32.partialorder %v13401_v40, 0.7853982  ;;  %v11168_v8 = vshrl.u32 %v3688_v3, 30  ;;  %v2599_v28 = vsel %vm2598_vm10, %v2597_v31, 0  ;;  %v2594_v16 = vand.u32 8388607, %v13212_v18 }
 0x2de   :  { %v2363_v41 = vsel %vm11157_vm9, %v10683_v52, %v2360_v19  ;;  %v6668_v61 = vmin.u32 %v2549_v17, %v11138_v56  ;;  %v2601_v15 = vand.u32 31, %v2599_v28  ;;  %v11175_v50 = vadd.f32 %v11078_v60, %v11142_v11 }
 0x2df   :  { %13404 = vst [vmem:[#allocation16_spill] sm:$0xff] %v11168_v8  ;;  %7601 = vsinq.f32 %v2259_v42  ;;  %v11184_v32 = vmul.f32 %v11180_v29, %v10517_v59  ;;  %v11188_v47 = vmul.f32 %v10829_v62, %v10702_v12  ;;  %v11192_v63 = vmul.f32 %v11180_v29, %v13405_v48 }
 0x2e0   :  { %v11195_v22 = vadd.f32 %v13406_v36, %v3861_v9  ;;  %v11198_v42 = vadd.f32 %v13408_v45, %v3854_v43  ;;  %v11200_v57 = vand.u32 3, %v2264_v4  ;;  %v2551_v1 = vclz %v6668_v61 }
 0x2e1   :  { %v3314_v59 = vsel %vm3303_vm8, nan, %v3313_v55  ;;  %v11207_v12 = vsel %vm2277_vm7, %v2361_v6, %v10875_v33  ;;  %7603 = vcosq.f32 %v2363_v41  ;;  %v2602_v37 = vsub.s32 32, %v2601_v15 }
 0x2e2   :  { %13407 = vst [vmem:[#allocation22_spill] sm:$0xff] %v11195_v22  ;;  %13409 = vst [vmem:[#allocation7_spill] sm:$0xff] %v11198_v42  ;;  %v3690_v21 = vshll.u32 %v11168_v8, 30  ;;  %v6669_v20 = vadd.s32 4294967294, %v2551_v1  ;;  %v2595_v0 = vor.u32 8388608, %v2594_v16  ;;  %v2694_v10 = vand.u32 2139095040, %v11175_v50 }
 0x2e3   :  { %v11211_v35 = vpop.eup %7599  ;;  %v2604_v25 = vshll.u32 %v13238_v53, %v2601_v15  ;;  %v2605_v24 = vshrl.u32 %v13267_v5, %v2602_v37  ;;  %v2607_v19 = vshll.u32 %v13267_v5, %v2601_v15  ;;  %v2608_v3 = vshrl.u32 %v13233_v46, %v2602_v37 }
 0x2e4   :  { %vm6670_vm11 = vcmp.lt.s32.totalorder %v6669_v20, 0  ;;  %v2600_v33 = vshrl.u32 %v2599_v28, 5  ;;  %v2611_v31 = vshrl.u32 %v13266_v14, %v2602_v37  ;;  %v13410_v30 = vmov 920167782  }
 0x2e5   :  { %v2614_v9 = vshrl.u32 %v13410_v30, %v2602_v37  ;;  %v2606_v43 = vor.u32 %v2605_v24, %v2604_v25  ;;  %v2609_v40 = vor.u32 %v2608_v3, %v2607_v19  ;;  %v2610_v55 = vshll.u32 %v13233_v46, %v2601_v15 }
 0x2e6   :  { %v2613_v4 = vshll.u32 %v13266_v14, %v2601_v15  ;;  %v2271_v17 = vxor.u32 2147483648, %v11211_v35  ;;  %v2364_v6 = vsel %vm11157_vm9, 0, %v11207_v12  ;;  %7605 = vsinq.f32 %v2363_v41  ;;  %v197_v12 = vpop.permute.xlu1 %196 }
 0x2e7   :  { %v2616_v61 = vshll.u32 %v13410_v30, %v2601_v15  ;;  %v11226_v28 = vsel %vm6670_vm11, 0, %v6669_v20  ;;  %v2612_v16 = vor.u32 %v2611_v31, %v2610_v55  ;;  %v13411_v36 = vmov 1326507024  }
 0x2e8   :  { %v2615_v48 = vor.u32 %v2614_v9, %v2613_v4  ;;  %v2617_v45 = vshrl.u32 %v13411_v36, %v2602_v37  ;;  %vm2267_vm12 = vcmp.eq.s32.totalorder %v11200_v57, 0  ;;  %v11231_v1 = vsub.s32 %v11109_v23, %v3690_v21 }
 0x2e9   :  { %vm2619_vm13 = vcmp.lt.s32.totalorder %v2600_v33, 1  ;;  %v2635_v25 = vshll.u32 %v2595_v0, 8  ;;  %v2695_v24 = vshrl.u32 %v2694_v10, 23  ;;  %v7602_v19 = vpop.eup %7601  ;;  %v2603_v13 = vshrl.u32 %v13238_v53, %v2602_v37 }
 0x2ea   :  { %v2618_v41 = vor.u32 %v2617_v45, %v2616_v61  ;;  %vm2622_vm14 = vcmp.lt.s32.totalorder %v2600_v33, 4  ;;  %v2627_v15 = vsel %vm2619_vm13, %v2606_v43, %v2609_v40  ;;  %v2559_v20 = vsub.s32 4294967266, %v11226_v28 }
 0x2eb   :  { %vm2621_vm15 = vcmp.lt.s32.totalorder %v2600_v33, 3  ;;  %v2624_v3 = vsel %vm2622_vm14, %v2612_v16, 2102212464  ;;  %v2628_v31 = vsel %vm2622_vm14, %v2615_v48, 920167782  ;;  %v11236_v9 = vpop.eup %7603  ;;  %vm2266_vm0 = vcmp.lt.s32.totalorder %v11200_v57, 2 }
 0x2ec   :  { %vm2620_vm1 = vcmp.lt.s32.totalorder %v2600_v33, 2  ;;  %v2629_v23 = vsel %vm2621_vm15, %v2612_v16, %v2628_v31  ;;  %v2631_v21 = vsel %vm2619_vm13, %v2609_v40, %v2612_v16  ;;  %v2632_v0 = vsel %vm2622_vm14, %v2618_v41, 1326507024 }
 0x2ed   :  { %v2268_v37 = vxor.u32 2147483648, %v7602_v19  ;;  %v3693_v10 = vsub.s32 0, %v11231_v1  ;;  %v2623_v55 = vsel %vm2619_vm13, %v2603_v13, %v2606_v43  ;;  %v2630_v4 = vsel %vm2620_vm1, %v2627_v15, %v2629_v23 }
 0x2ee   :  { %v2625_v61 = vsel %vm2621_vm15, %v2609_v40, %v2624_v3  ;;  %v2633_v45 = vsel %vm2621_vm15, %v2615_v48, %v2632_v0  ;;  %v11243_v18 = vmul.u32.u64.low %v2635_v25, %v2630_v4  ;;  %v11244_v8 = vmul.u32.u64.high %v2635_v25, %v2630_v4, %v11243_v18  ;;  %v369_v40 = vpop.permute.xlu1 %368 }
 0x2ef   :  { %vm2270_vm2 = vcmp.eq.s32.totalorder %v11200_v57, 2  ;;  %v2555_v31 = vsub.s32 32, %v11226_v28  ;;  %v2634_v16 = vsel %vm2620_vm1, %v2631_v21, %v2633_v45  ;;  %v6675_v41 = vadd.s32 4294967169, %v2695_v24 }
 0x2f0   :  { %v11251_v22 = vmul.f32 %v11151_v7, %v3314_v59  ;;  %v2560_v42 = vadd.s32 127, %v2559_v20  ;;  %v11253_v43 = vmul.u32.u64.low %v2635_v25, %v2634_v16  ;;  %v11254_v13 = vmul.u32.u64.high %v2635_v25, %v2634_v16, %v11253_v43  ;;  %v11256_v48 = vpop.eup %7605 }
 0x2f1   :  { %v2368_v15 = vadd.s32 3, %v2364_v6  ;;  %v2539_v3 = vadd.s32 %v11031_v26, %v11038_v51  ;;  %v2626_v23 = vsel %vm2620_vm1, %v2623_v55, %v2625_v61  ;;  %v2701_v0 = vadd.s32 1, %v6675_v41 }
 0x2f2   :  { %13412 = vst [vmem:[#allocation4_spill] sm:$0xff] %v11251_v22  ;;  %v2269_v24 = vsel %vm2267_vm12, %v11211_v35, %v2268_v37  ;;  %v2272_v59 = vsel %vm2270_vm2, %v2271_v17, %v7602_v19  ;;  %v11265_v20 = vmin.u32 %v3693_v10, %v11231_v1  ;;  %v2645_v21 = vadd.s32 1, %v11244_v8 }
 0x2f3   :  { %v2557_v4 = vshrl.u32 %v2539_v3, %v2555_v31  ;;  %v13215_v45 = vand.u32 2147483647, %v11175_v50  ;;  %vm2702_vm3 = vcmp.gt.s32.totalorder %v2701_v0, 0  ;;  %v430_v6 = vmul.f32 %v10813_v44, %v369_v40 }
 0x2f4   :  { %v2561_v26 = vshll.u32 %v2560_v42, 23  ;;  %v2642_v51 = vmul.u32 %v2635_v25, %v2626_v23  ;;  %vm2644_vm5 = vc.u32 %v11254_v13, %v11243_v18  ;;  %v2703_v33 = vsel %vm2702_vm3, %v2701_v0, 0 }
 0x2f5   :  { %v11274_v35 = vsel %vm2266_vm0, %v2269_v24, %v2272_v59  ;;  %v11276_v17 = vand.u32 3, %v2368_v15  ;;  %v2646_v19 = vsel %vm2644_vm5, %v2645_v21, %v11244_v8  ;;  %v266_v37 = vmul.f32 %v10829_v62, %v197_v12 }
 0x2f6   :  { %v2556_v42 = vshll.u32 %v11138_v56, %v11226_v28  ;;  %v2647_v25 = vadd.s32 %v2646_v19, %v2642_v51  ;;  %v2705_v55 = vand.u32 31, %v2703_v33  ;;  %v2372_v61 = vxor.u32 2147483648, %v11256_v48 }
 0x2f7   :  { %v2375_v31 = vxor.u32 2147483648, %v11236_v9  ;;  %v2698_v57 = vand.u32 8388607, %v13215_v45  ;;  %v11287_v16 = vadd.f32 %v430_v6, %v266_v37  ;;  %v2562_v8 = vor.u32 4788187, %v2561_v26 }
 0x2f8   :  { %v2558_v41 = vor.u32 %v2557_v4, %v2556_v42  ;;  %v2648_v43 = vadd.s32 536870912, %v2647_v25  ;;  %v2706_v12 = vsub.s32 32, %v2705_v55  ;;  %v11289_v40 = vshrl.u32 %v2703_v33, 5 }
 0x2f9   :  { %v2708_v15 = vshll.u32 %v13238_v53, %v2705_v55  ;;  %v2711_v56 = vshll.u32 %v13267_v5, %v2705_v55  ;;  %v2714_v28 = vshll.u32 %v13233_v46, %v2705_v55  ;;  %v2717_v24 = vshll.u32 %v13266_v14, %v2705_v55 }
 0x2fa   :  { %v11294_v3 = vshrl.u32 %v2648_v43, 30  ;;  %v2709_v23 = vshrl.u32 %v13267_v5, %v2706_v12  ;;  %v2712_v0 = vshrl.u32 %v13233_v46, %v2706_v12  ;;  %vm2374_vm6 = vcmp.eq.s32.totalorder %v11276_v17, 2 }
 0x2fb   :  { %v2715_v59 = vshrl.u32 %v13266_v14, %v2706_v12  ;;  %v2718_v21 = vshrl.u32 %v13410_v30, %v2706_v12  ;;  %v2720_v4 = vshll.u32 %v13410_v30, %v2705_v55  ;;  %v2721_v6 = vshrl.u32 %v13411_v36, %v2706_v12 }
 0x2fc   :  { %vm2371_vm7 = vcmp.eq.s32.totalorder %v11276_v17, 0  ;;  %v2650_v26 = vshll.u32 %v11294_v3, 30  ;;  %v2699_v51 = vor.u32 8388608, %v2698_v57  ;;  %v2710_v33 = vor.u32 %v2709_v23, %v2708_v15  ;;  %v13413_v15 = vld [vmem:[#allocation28_spill] sm:$0xff] }
 0x2fd   :  { %v2713_v19 = vor.u32 %v2712_v0, %v2711_v56  ;;  %v2565_v37 = vcvt.s32.f32 %v2558_v41  ;;  %v2716_v42 = vor.u32 %v2715_v59, %v2714_v28  ;;  %v2719_v43 = vor.u32 %v2718_v21, %v2717_v24 }
 0x2fe   :  { %v2722_v45 = vor.u32 %v2721_v6, %v2720_v4  ;;  %v2563_v10 = vand.u32 2147483647, %v2562_v8  ;;  %v11306_v22 = vsub.s32 %v2647_v25, %v2650_v26  ;;  %vm2723_vm8 = vcmp.lt.s32.totalorder %v11289_v40, 1 }
 0x2ff   :  { %vm2726_vm9 = vcmp.lt.s32.totalorder %v11289_v40, 4  ;;  %vm2263_vm10 = vweird.f32 %v10541_v58  ;;  %vm2725_vm11 = vcmp.lt.s32.totalorder %v11289_v40, 3  ;;  %v2731_v55 = vsel %vm2723_vm8, %v2710_v33, %v2713_v19 }
 0x300   :  { %v2732_v57 = vsel %vm2726_vm9, %v2719_v43, 920167782  ;;  %v11316_v41 = vadd.f32 %v11078_v60, %v11287_v16  ;;  %vm2485_vm12 = vcmp.lt.s32.totalorder %v13413_v15, 0  ;;  %v2653_v25 = vsub.s32 0, %v11306_v22 }
 0x301   :  { %vm2724_vm13 = vcmp.lt.s32.totalorder %v11289_v40, 2  ;;  %v2733_v8 = vsel %vm2725_vm11, %v2716_v42, %v2732_v57  ;;  %v2739_v56 = vshll.u32 %v2699_v51, 8  ;;  %v2728_v28 = vsel %vm2726_vm9, %v2716_v42, 2102212464 }
 0x302   :  { %v2734_v23 = vsel %vm2724_vm13, %v2731_v55, %v2733_v8  ;;  %v2735_v0 = vsel %vm2723_vm8, %v2713_v19, %v2716_v42  ;;  %v2736_v24 = vsel %vm2726_vm9, %v2722_v45, 1326507024  ;;  %v2566_v59 = vmul.f32 %v2565_v37, %v2563_v10 }
 0x303   :  { %v6672_v21 = vmin.u32 %v2653_v25, %v11306_v22  ;;  %v2707_v4 = vshrl.u32 %v13238_v53, %v2706_v12  ;;  %v2737_v6 = vsel %vm2725_vm11, %v2719_v43, %v2736_v24  ;;  %vm2367_vm14 = vweird.f32 %v10683_v52 }
 0x304   :  { %v2738_v26 = vsel %vm2724_vm13, %v2735_v0, %v2737_v6  ;;  %v11334_v51 = vmul.u32.u64.low %v2739_v56, %v2734_v23  ;;  %v11335_v57 = vmul.u32.u64.high %v2739_v56, %v2734_v23, %v11334_v51  ;;  %v2902_v42 = vand.u32 2139095040, %v11316_v41 }
 0x305   :  { %v2376_v45 = vsel %vm2374_vm6, %v2375_v31, %v11256_v48  ;;  %v2655_v10 = vclz %v6672_v21  ;;  %v2727_v12 = vsel %vm2723_vm8, %v2707_v4, %v2710_v33  ;;  %v2729_v37 = vsel %vm2725_vm11, %v2713_v19, %v2728_v28  ;;  %v13417_v33 = vld [vmem:[#allocation9_spill] sm:$0xff] }
 0x306   :  { %v2373_v43 = vsel %vm2371_vm7, %v11236_v9, %v2372_v61  ;;  %v2569_v55 = vsub.s32 4, %v11114_v54  ;;  %v11350_v25 = vmul.u32.u64.low %v2739_v56, %v2738_v26  ;;  %v11351_v8 = vmul.u32.u64.high %v2739_v56, %v2738_v26, %v11350_v25 }
 0x307   :  { %v13414_v23 = vand.u32 2147483647, %v13413_v15  ;;  %v2567_v31 = vxor.u32 2147483648, %v2566_v59  ;;  %v11361_v0 = vmul.f32 %v11180_v29, %v13417_v33  ;;  %v6673_v19 = vadd.s32 4294967294, %v2655_v10 }
 0x308   :  { %vm2370_vm0 = vcmp.lt.s32.totalorder %v11276_v17, 2  ;;  %v2730_v9 = vsel %vm2724_vm13, %v2727_v12, %v2729_v37  ;;  %v2749_v61 = vadd.s32 1, %v11335_v57  ;;  %v2903_v28 = vshrl.u32 %v2902_v42, 23  ;;  %v202_v37 = vpop.permute.xlu1 %201 }
 0x309   :  { %vm11355_vm15 = vcmp.le.f32.partialorder %v13414_v23, 0.7853982  ;;  %v2274_v24 = vsel %vm2263_vm10, nan, %v11274_v35  ;;  %v2377_v21 = vsel %vm2370_vm0, %v2373_v43, %v2376_v45  ;;  %v13418_v4 = vclz %v11265_v20 }
 0x30a   :  { %vm6674_vm1 = vcmp.lt.s32.totalorder %v6673_v19, 0  ;;  %v2570_v26 = vsel %vm2485_vm12, %v2569_v55, %v11114_v54  ;;  %vm2748_vm2 = vc.u32 %v11351_v8, %v11334_v51  ;;  %v6683_v40 = vadd.s32 4294967169, %v2903_v28 }
 0x30b   :  { %v6713_v6 = vadd.s32 4294967294, %v13418_v4  ;;  %v2658_v17 = vsel %vm6674_vm1, 0, %v6673_v19  ;;  %v2568_v42 = vsel %vm2485_vm12, %v2567_v31, %v2566_v59  ;;  %v2746_v58 = vmul.u32 %v2739_v56, %v2730_v9 }
 0x30c   :  { %v2663_v10 = vsub.s32 4294967266, %v2658_v17  ;;  %v13217_v35 = vand.u32 2147483647, %v11316_v41  ;;  %v3855_v20 = vmul.f32 %v11151_v7, %v2274_v24  ;;  %v11383_v45 = vadd.s32 %v11014_v49, %v11010_v27  ;;  %v13420_v27 = vld [vmem:[#allocation14_spill] sm:$0xff]  ;;  %v13421_v49 = vld [vmem:[#allocation25_spill] sm:$0xff] }
 0x30d   :  { %v2750_v54 = vsel %vm2748_vm2, %v2749_v61, %v11335_v57  ;;  %v2909_v12 = vadd.s32 1, %v6683_v40  ;;  %v2378_v43 = vsel %vm2367_vm14, nan, %v2377_v21  ;;  %vm6714_vm3 = vcmp.lt.s32.totalorder %v6713_v6, 0 }
 0x30e   :  { %13419 = vst [vmem:[#allocation26_spill] sm:$0xff] %v11383_v45  ;;  %v2572_v59 = vsel %vm11355_vm15, 0, %v2570_v26  ;;  %v2751_v56 = vadd.s32 %v2750_v54, %v2746_v58  ;;  %v2571_v55 = vsel %vm11355_vm15, %v13413_v15, %v2568_v42  ;;  %v2659_v25 = vsub.s32 32, %v2658_v17 }
 0x30f   :  { %vm2910_vm5 = vcmp.gt.s32.totalorder %v2909_v12, 0  ;;  %v3943_v23 = vpack.c.bf16 %v13421_v49, %v13420_v27  ;;  %v2664_v57 = vadd.s32 127, %v2663_v10  ;;  %v2906_v52 = vand.u32 8388607, %v13217_v35 }
 0x310   :  { %v2752_v31 = vadd.s32 536870912, %v2751_v56  ;;  %v2911_v33 = vsel %vm2910_vm5, %v2909_v12, 0  ;;  %v11398_v19 = vadd.f32 %v11184_v32, %v3855_v20  ;;  %v2643_v9 = vadd.s32 %v11243_v18, %v11254_v13 }
 0x311   :  { %v11404_v48 = vmul.f32 %v11180_v29, %v11055_v39  ;;  %v2913_v61 = vand.u32 31, %v2911_v33  ;;  %6733 = vmatmul.mubr.msk.bf16.gmra.mrb[16].mxu0 %vm4003_vm4, %v3943_v23  ;;  %v11408_v28 = vmul.f32 %v11151_v7, %v2378_v43  ;;  %v11411_v24 = vsel %vm6714_vm3, 0, %v6713_v6  ;;  %v373_v39 = vpop.permute.xlu1 %372 }
 0x312   :  { %7607 = vcosq.f32 %v2571_v55  ;;  %v11413_v21 = vshrl.u32 %v2752_v31, 30  ;;  %4134 = vmatprep.mubr.bf16.mxu0 %v13349_v38  ;;  %v2576_v18 = vadd.s32 3, %v2572_v59  ;;  %v2661_v32 = vshrl.u32 %v2643_v9, %v2659_v25 }
 0x313   :  { %7609 = vsinq.f32 %v2571_v55  ;;  %v2914_v13 = vsub.s32 32, %v2913_v61  ;;  %v2660_v4 = vshll.u32 %v11306_v22, %v2658_v17  ;;  %v2665_v26 = vshll.u32 %v2664_v57, 23 }
 0x314   :  { %v2754_v40 = vshll.u32 %v11413_v21, 30  ;;  %v2907_v42 = vor.u32 8388608, %v2906_v52  ;;  %v267_v20 = vmul.f32 %v10829_v62, %v202_v37  ;;  %v2916_v12 = vshll.u32 %v13238_v53, %v2913_v61 }
 0x315   :  { %v2917_v10 = vshrl.u32 %v13267_v5, %v2914_v13  ;;  %v2920_v6 = vshrl.u32 %v13233_v46, %v2914_v13  ;;  %v2923_v58 = vshrl.u32 %v13266_v14, %v2914_v13  ;;  %v2926_v43 = vshrl.u32 %v13410_v30, %v2914_v13 }
 0x316   :  { %v11422_v54 = vsub.s32 %v2751_v56, %v2754_v40  ;;  %v431_v22 = vmul.f32 %v10813_v44, %v373_v39  ;;  %v2662_v17 = vor.u32 %v2661_v32, %v2660_v4  ;;  %v2912_v59 = vshrl.u32 %v2911_v33, 5 }
 0x317   :  { %v2919_v55 = vshll.u32 %v13267_v5, %v2913_v61  ;;  %v2922_v25 = vshll.u32 %v13233_v46, %v2913_v61  ;;  %v2666_v27 = vor.u32 4788187, %v2665_v26  ;;  %v2918_v23 = vor.u32 %v2917_v10, %v2916_v12 }
 0x318   :  { %v2757_v49 = vsub.s32 0, %v11422_v54  ;;  %v2925_v62 = vshll.u32 %v13266_v14, %v2913_v61  ;;  %vm2589_vm6 = vcmp.lt.s32.totalorder %v11082_v34, 0  ;;  %v2928_v57 = vshll.u32 %v13410_v30, %v2913_v61 }
 0x319   :  { %v2921_v37 = vor.u32 %v2920_v6, %v2919_v55  ;;  %v2924_v56 = vor.u32 %v2923_v58, %v2922_v25  ;;  %v2929_v44 = vshrl.u32 %v13411_v36, %v2914_v13  ;;  %v11434_v31 = vand.u32 3, %v2576_v18 }
 0x31a   :  { %v2673_v52 = vsub.s32 4, %v11294_v3  ;;  %v6676_v33 = vmin.u32 %v2757_v49, %v11422_v54  ;;  %v2927_v9 = vor.u32 %v2926_v43, %v2925_v62  ;;  %v2669_v32 = vcvt.s32.f32 %v2662_v17 }
 0x31b   :  { %v2930_v39 = vor.u32 %v2929_v44, %v2928_v57  ;;  %v2947_v4 = vshll.u32 %v2907_v42, 8  ;;  %v11438_v26 = vadd.f32 %v431_v22, %v267_v20  ;;  %v13422_v10 = vand.u32 2147483647, %v11082_v34 }
 0x31c   :  { %v11440_v40 = vpop.eup %7607  ;;  %v2667_v18 = vand.u32 2147483647, %v2666_v27  ;;  %v2759_v6 = vclz %v6676_v33  ;;  %vm2931_vm8 = vcmp.lt.s32.totalorder %v2912_v59, 1  ;;  %vm2934_vm9 = vcmp.lt.s32.totalorder %v2912_v59, 4 }
 0x31d   :  { %vm11444_vm7 = vcmp.le.f32.partialorder %v13422_v10, 0.7853982  ;;  %v7610_v58 = vpop.eup %7609  ;;  %v2915_v12 = vshrl.u32 %v13238_v53, %v2914_v13  ;;  %vm2932_vm10 = vcmp.lt.s32.totalorder %v2912_v59, 2  ;;  %v2936_v43 = vsel %vm2934_vm9, %v2924_v56, 2102212464 }
 0x31e   :  { %v2939_v42 = vsel %vm2931_vm8, %v2918_v23, %v2921_v37  ;;  %v6677_v20 = vadd.s32 4294967294, %v2759_v6  ;;  %vm2933_vm11 = vcmp.lt.s32.totalorder %v2912_v59, 3  ;;  %v2940_v22 = vsel %vm2934_vm9, %v2927_v9, 920167782 }
 0x31f   :  { %v2943_v17 = vsel %vm2931_vm8, %v2921_v37, %v2924_v56  ;;  %v2935_v55 = vsel %vm2931_vm8, %v2915_v12, %v2918_v23  ;;  %v2941_v25 = vsel %vm2933_vm11, %v2924_v56, %v2940_v22  ;;  %v2944_v49 = vsel %vm2934_vm9, %v2930_v39, 1326507024 }
 0x320   :  { %v11451_v62 = vadd.f32 %v11078_v60, %v11438_v26  ;;  %vm6678_vm12 = vcmp.lt.s32.totalorder %v6677_v20, 0  ;;  %v2937_v27 = vsel %vm2933_vm11, %v2921_v37, %v2936_v43  ;;  %v2942_v57 = vsel %vm2932_vm10, %v2939_v42, %v2941_v25  ;;  %v377_v37 = vpop.permute.xlu1 %376 }
 0x321   :  { %v2945_v44 = vsel %vm2933_vm11, %v2927_v9, %v2944_v49  ;;  %v2762_v13 = vsel %vm6678_vm12, 0, %v6677_v20  ;;  %v11455_v10 = vmul.u32.u64.low %v2947_v4, %v2942_v57  ;;  %v11456_v6 = vmul.u32.u64.high %v2947_v4, %v2942_v57, %v11455_v10 }
 0x322   :  { %v2946_v33 = vsel %vm2932_vm10, %v2943_v17, %v2945_v44  ;;  %v2674_v23 = vsel %vm2589_vm6, %v2673_v52, %v11294_v3  ;;  %v2747_v56 = vadd.s32 %v11334_v51, %v11351_v8  ;;  %v2763_v39 = vsub.s32 32, %v2762_v13  ;;  %v11476_v52 = vld [vmem:[%s13120_s1 + $0x1] ss:$0 sm:$0xff] }
 0x323   :  { %v2767_v12 = vsub.s32 4294967266, %v2762_v13  ;;  %v2670_v43 = vmul.f32 %v2669_v32, %v2667_v18  ;;  %v11464_v42 = vmul.u32.u64.low %v2947_v4, %v2946_v33  ;;  %v11465_v9 = vmul.u32.u64.high %v2947_v4, %v2946_v33, %v11464_v42 }
 0x324   :  { %v3006_v20 = vand.u32 2139095040, %v11451_v62  ;;  %vm2579_vm13 = vcmp.eq.s32.totalorder %v11434_v31, 0  ;;  %v2765_v22 = vshrl.u32 %v2747_v56, %v2763_v39  ;;  %v2938_v25 = vsel %vm2932_vm10, %v2935_v55, %v2937_v27 }
 0x325   :  { %v2768_v17 = vadd.s32 127, %v2767_v12  ;;  %v2676_v3 = vsel %vm11444_vm7, 0, %v2674_v23  ;;  %v2957_v51 = vadd.s32 1, %v11456_v6  ;;  %v432_v32 = vmul.f32 %v11476_v52, %v377_v37 }
 0x326   :  { %v3007_v8 = vshrl.u32 %v3006_v20, 23  ;;  %v2580_v18 = vxor.u32 2147483648, %v7610_v58  ;;  %v2583_v49 = vxor.u32 2147483648, %v11440_v40  ;;  %v2764_v57 = vshll.u32 %v11422_v54, %v2762_v13  ;;  %v13425_v54 = vld [vmem:[#allocation3_spill] sm:$0xff] }
 0x327   :  { %v2769_v59 = vshll.u32 %v2768_v17, 23  ;;  %vm2575_vm14 = vweird.f32 %v13413_v15  ;;  %v2671_v55 = vxor.u32 2147483648, %v2670_v43  ;;  %v2954_v27 = vmul.u32 %v2947_v4, %v2938_v25 }
 0x328   :  { %vm2956_vm15 = vc.u32 %v11465_v9, %v11455_v10  ;;  %v6687_v44 = vadd.s32 4294967169, %v3007_v8  ;;  %v2766_v33 = vor.u32 %v2765_v22, %v2764_v57  ;;  %v13216_v39 = vand.u32 2147483647, %v11451_v62 }
 0x329   :  { %v2770_v23 = vor.u32 4788187, %v2769_v59  ;;  %v2958_v56 = vsel %vm2956_vm15, %v2957_v51, %v11456_v6  ;;  %vm2582_vm0 = vcmp.eq.s32.totalorder %v11434_v31, 2  ;;  %v11488_v13 = vadd.f32 %v432_v32, %v13425_v54 }
 0x32a   :  { %v2959_v12 = vadd.s32 %v2958_v56, %v2954_v27  ;;  %v3013_v37 = vadd.s32 1, %v6687_v44  ;;  %vm2578_vm1 = vcmp.lt.s32.totalorder %v11434_v31, 2  ;;  %v2581_v4 = vsel %vm2579_vm13, %v11440_v40, %v2580_v18 }
 0x32b   :  { %v2584_v42 = vsel %vm2582_vm0, %v2583_v49, %v7610_v58  ;;  %v2771_v20 = vand.u32 2147483647, %v2770_v23  ;;  %v2672_v6 = vsel %vm2589_vm6, %v2671_v55, %v2670_v43  ;;  %v2680_v22 = vadd.s32 3, %v2676_v3 }
 0x32c   :  { %v2960_v17 = vadd.s32 536870912, %v2959_v12  ;;  %vm3014_vm2 = vcmp.gt.s32.totalorder %v3013_v37, 0  ;;  %v2773_v25 = vcvt.s32.f32 %v2766_v33  ;;  %v2777_v51 = vsub.s32 4, %v11413_v21 }
 0x32d   :  { %v3010_v8 = vand.u32 8388607, %v13216_v39  ;;  %v3015_v32 = vsel %vm3014_vm2, %v3013_v37, 0  ;;  %v2585_v57 = vsel %vm2578_vm1, %v2581_v4, %v2584_v42  ;;  %v11503_v40 = vadd.f32 %v11078_v60, %v11488_v13 }
 0x32e   :  { %v11499_v59 = vshrl.u32 %v2960_v17, 30  ;;  %v3017_v31 = vand.u32 31, %v3015_v32  ;;  %v11507_v58 = vadd.f32 %v11192_v63, %v11408_v28  ;;  %v2675_v3 = vsel %vm11444_vm7, %v11082_v34, %v2672_v6 }
 0x32f   :  { %v2774_v18 = vmul.f32 %v2773_v25, %v2771_v20  ;;  %vm2693_vm3 = vcmp.lt.s32.totalorder %v11175_v50, 0  ;;  %v11516_v49 = vmul.f32 %v11180_v29, %v11142_v11  ;;  %v11521_v63 = vsel %vm2575_vm14, nan, %v2585_v57  ;;  %v217_v20 = vpop.permute.xlu1 %216 }
 0x330   :  { %v2962_v60 = vshll.u32 %v11499_v59, 30  ;;  %v3018_v55 = vsub.s32 32, %v3017_v31  ;;  %v11523_v28 = vand.u32 3, %v2680_v22  ;;  %v11528_v61 = vsel %vm2693_vm3, %v2777_v51, %v11413_v21 }
 0x331   :  { %v3011_v27 = vor.u32 8388608, %v3010_v8  ;;  %7611 = vcosq.f32 %v2675_v3  ;;  %v3016_v11 = vshrl.u32 %v3015_v32, 5  ;;  %v3110_v33 = vand.u32 2139095040, %v11503_v40 }
 0x332   :  { %v11530_v44 = vsub.s32 %v2959_v12, %v2962_v60  ;;  %v2775_v23 = vxor.u32 2147483648, %v2774_v18  ;;  %v3020_v56 = vshll.u32 %v13238_v53, %v3017_v31  ;;  %v3021_v15 = vshrl.u32 %v13267_v5, %v3018_v55 }
 0x333   :  { %v3024_v37 = vshrl.u32 %v13233_v46, %v3018_v55  ;;  %v3023_v4 = vshll.u32 %v13267_v5, %v3017_v31  ;;  %v3026_v21 = vshll.u32 %v13233_v46, %v3017_v31  ;;  %v3027_v42 = vshrl.u32 %v13266_v14, %v3018_v55 }
 0x334   :  { %v2965_v54 = vsub.s32 0, %v11530_v44  ;;  %7613 = vsinq.f32 %v2675_v3  ;;  %v13426_v12 = vand.u32 2147483647, %v11175_v50  ;;  %v3029_v6 = vshll.u32 %v13266_v14, %v3017_v31 }
 0x335   :  { %v3030_v22 = vshrl.u32 %v13410_v30, %v3018_v55  ;;  %v11548_v17 = vshll.u32 %v3011_v27, 8  ;;  %v3022_v51 = vor.u32 %v3021_v15, %v3020_v56  ;;  %v3025_v8 = vor.u32 %v3024_v37, %v3023_v4 }
 0x336   :  { %vm11542_vm5 = vcmp.le.f32.partialorder %v13426_v12, 0.7853982  ;;  %v6684_v25 = vmin.u32 %v2965_v54, %v11530_v44  ;;  %v3028_v32 = vor.u32 %v3027_v42, %v3026_v21  ;;  %v3032_v3 = vshll.u32 %v13410_v30, %v3017_v31 }
 0x337   :  { %v3031_v57 = vor.u32 %v3030_v22, %v3029_v6  ;;  %v3033_v60 = vshrl.u32 %v13411_v36, %v3018_v55  ;;  %v3111_v12 = vshrl.u32 %v3110_v33, 23  ;;  %v2776_v43 = vsel %vm2693_vm3, %v2775_v23, %v2774_v18 }
 0x338   :  { %v2967_v39 = vclz %v6684_v25  ;;  %v3019_v35 = vshrl.u32 %v13238_v53, %v3018_v55  ;;  %vm3035_vm6 = vcmp.lt.s32.totalorder %v3016_v11, 1  ;;  %vm3036_vm7 = vcmp.lt.s32.totalorder %v3016_v11, 2 }
 0x339   :  { %v3034_v27 = vor.u32 %v3033_v60, %v3032_v3  ;;  %vm3037_vm8 = vcmp.lt.s32.totalorder %v3016_v11, 3  ;;  %vm3038_vm9 = vcmp.lt.s32.totalorder %v3016_v11, 4  ;;  %v3043_v37 = vsel %vm3035_vm6, %v3022_v51, %v3025_v8 }
 0x33a   :  { %v6685_v56 = vadd.s32 4294967294, %v2967_v39  ;;  %v3040_v15 = vsel %vm3038_vm9, %v3028_v32, 2102212464  ;;  %v3044_v54 = vsel %vm3038_vm9, %v3031_v57, 920167782  ;;  %v3039_v4 = vsel %vm3035_vm6, %v3019_v35, %v3022_v51 }
 0x33b   :  { %v3045_v31 = vsel %vm3037_vm8, %v3028_v32, %v3044_v54  ;;  %v3047_v21 = vsel %vm3035_vm6, %v3025_v8, %v3028_v32  ;;  %v3048_v42 = vsel %vm3038_vm9, %v3034_v27, 1326507024  ;;  %v11556_v33 = vpop.eup %7611  ;;  %v3041_v18 = vsel %vm3037_vm8, %v3025_v8, %v3040_v15 }
 0x33c   :  { %vm6686_vm10 = vcmp.lt.s32.totalorder %v6685_v56, 0  ;;  %v3046_v23 = vsel %vm3036_vm7, %v3043_v37, %v3045_v31  ;;  %v3049_v55 = vsel %vm3037_vm8, %v3031_v57, %v3048_v42  ;;  %v2780_v35 = vsel %vm11542_vm5, 0, %v11528_v61 }
 0x33d   :  { %v2970_v6 = vsel %vm6686_vm10, 0, %v6685_v56  ;;  %v3050_v22 = vsel %vm3036_vm7, %v3047_v21, %v3049_v55  ;;  %v11561_v25 = vmul.u32.u64.low %v11548_v17, %v3046_v23  ;;  %v11562_v39 = vmul.u32.u64.high %v11548_v17, %v3046_v23, %v11561_v25 }
 0x33e   :  { %v2955_v51 = vadd.s32 %v11455_v10, %v11465_v9  ;;  %v2971_v32 = vsub.s32 32, %v2970_v6  ;;  %v2975_v8 = vsub.s32 4294967266, %v2970_v6  ;;  %v7614_v3 = vpop.eup %7613  ;;  %v2779_v57 = vsel %vm11542_vm5, %v11175_v50, %v2776_v43 }
 0x33f   :  { %v3042_v60 = vsel %vm3036_vm7, %v3039_v4, %v3041_v18  ;;  %v11575_v27 = vmul.u32.u64.low %v11548_v17, %v3050_v22  ;;  %v11576_v56 = vmul.u32.u64.high %v11548_v17, %v3050_v22, %v11575_v27  ;;  %vm2683_vm11 = vcmp.eq.s32.totalorder %v11523_v28, 0 }
 0x340   :  { %vm2901_vm12 = vcmp.lt.s32.totalorder %v11316_v41, 0  ;;  %v2972_v61 = vshll.u32 %v11530_v44, %v2970_v6  ;;  %v2973_v10 = vshrl.u32 %v2955_v51, %v2971_v32  ;;  %v2976_v9 = vadd.s32 127, %v2975_v8  ;;  %v13433_v6 = vld [vmem:[#allocation13_spill] sm:$0xff] }
 0x341   :  { %v6691_v15 = vadd.s32 4294967169, %v3111_v12  ;;  %v3858_v37 = vmul.f32 %v11151_v7, %v11521_v63  ;;  %vm2686_vm13 = vcmp.eq.s32.totalorder %v11523_v28, 2  ;;  %v3061_v43 = vadd.s32 1, %v11562_v39 }
 0x342   :  { %v13218_v11 = vand.u32 2147483647, %v11503_v40  ;;  %7615 = vcosq.f32 %v2779_v57  ;;  %v2974_v54 = vor.u32 %v2973_v10, %v2972_v61  ;;  %v2977_v4 = vshll.u32 %v2976_v9, 23  ;;  %v11612_v61 = vld [vmem:[%s13120_s1] ss:$0 sm:$0xff]  ;;  %v385_v9 = vpop.permute.xlu1 %384 }
 0x343   :  { %v3117_v31 = vadd.s32 1, %v6691_v15  ;;  %v2784_v21 = vadd.s32 3, %v2780_v35  ;;  %v11588_v44 = vmul.f32 %v11180_v29, %v11287_v16  ;;  %v3058_v12 = vmul.u32 %v11548_v17, %v3042_v60  ;;  %v13432_v17 = vld [vmem:[#allocation19_spill] sm:$0xff] }
 0x344   :  { %vm3060_vm14 = vc.u32 %v11576_v56, %v11561_v25  ;;  %v2684_v7 = vxor.u32 2147483648, %v7614_v3  ;;  %v2687_v63 = vxor.u32 2147483648, %v11556_v33  ;;  %v2978_v42 = vor.u32 4788187, %v2977_v4 }
 0x345   :  { %v3062_v18 = vsel %vm3060_vm14, %v3061_v43, %v11562_v39  ;;  %v13429_v23 = vand.u32 2147483647, %v11316_v41  ;;  %v2985_v29 = vsub.s32 4, %v11499_v59  ;;  %vm3118_vm0 = vcmp.gt.s32.totalorder %v3117_v31, 0 }
 0x346   :  { %v3063_v16 = vadd.s32 %v3062_v18, %v3058_v12  ;;  %v3944_v22 = vpack.c.bf16 %v13433_v6, %v13432_v17  ;;  %v2979_v35 = vand.u32 2147483647, %v2978_v42  ;;  %v2981_v51 = vcvt.s32.f32 %v2974_v54 }
 0x347   :  { %vm11597_vm15 = vcmp.le.f32.partialorder %v13429_v23, 0.7853982  ;;  %v3114_v32 = vand.u32 8388607, %v13218_v11  ;;  %v3119_v8 = vsel %vm3118_vm0, %v3117_v31, 0  ;;  %v11607_v39 = vadd.f32 %v11361_v0, %v3858_v37  ;;  %v13434_v37 = vld [vmem:[#allocation12_spill] sm:$0xff] }
 0x348   :  { %v3064_v60 = vadd.s32 536870912, %v3063_v16  ;;  %v3121_v27 = vand.u32 31, %v3119_v8  ;;  %v270_v10 = vmul.f32 %v11612_v61, %v217_v20  ;;  %6734 = vmatmul.mubr.msk.bf16.gmra.mrb[20].mxu0 %vm4003_vm4, %v3944_v22  ;;  %v11618_v15 = vsel %vm2686_vm13, %v2687_v63, %v7614_v3 }
 0x349   :  { %v11620_v43 = vand.u32 3, %v2784_v21  ;;  %v2982_v0 = vmul.f32 %v2981_v51, %v2979_v35  ;;  %4144 = vmatprep.mubr.bf16.mxu0 %v13349_v38  ;;  %v3945_v54 = vpack.c.bf16 %v11146_v2, %v13434_v37  ;;  %v11628_v4 = vsel %vm2683_vm11, %v11556_v33, %v2684_v7 }
 0x34a   :  { %v11633_v20 = vsel %vm2901_vm12, %v2985_v29, %v11499_v59  ;;  %v11635_v3 = vshrl.u32 %v3064_v60, 30  ;;  %v3122_v31 = vsub.s32 32, %v3121_v27  ;;  %7617 = vsinq.f32 %v2779_v57 }
 0x34b   :  { %v2983_v21 = vxor.u32 2147483648, %v2982_v0  ;;  %v3115_v12 = vor.u32 8388608, %v3114_v32  ;;  %v434_v63 = vmul.f32 %v11476_v52, %v385_v9  ;;  %v3124_v42 = vshll.u32 %v13238_v53, %v3121_v27 }
 0x34c   :  { %v3066_v2 = vshll.u32 %v11635_v3, 30  ;;  %v3125_v33 = vshrl.u32 %v13267_v5, %v3122_v31  ;;  %v3127_v7 = vshll.u32 %v13267_v5, %v3121_v27  ;;  %v11642_v18 = vpop.eup %7615  ;;  %v3128_v23 = vshrl.u32 %v13233_v46, %v3122_v31 }
 0x34d   :  { %v2984_v59 = vsel %vm2901_vm12, %v2983_v21, %v2982_v0  ;;  %v3131_v57 = vshrl.u32 %v13266_v14, %v3122_v31  ;;  %v3134_v29 = vshrl.u32 %v13410_v30, %v3122_v31  ;;  %v11651_v6 = vshrl.u32 %v3119_v8, 5  ;;  %v222_v21 = vpop.permute.xlu1 %221 }
 0x34e   :  { %v11649_v17 = vsub.s32 %v3063_v16, %v3066_v2  ;;  %v3130_v22 = vshll.u32 %v13233_v46, %v3121_v27  ;;  %v3133_v35 = vshll.u32 %v13266_v14, %v3121_v27  ;;  %v2987_v51 = vsel %vm11597_vm15, %v11316_v41, %v2984_v59 }
 0x34f   :  { %v2988_v32 = vsel %vm11597_vm15, 0, %v11633_v20  ;;  %v3126_v60 = vor.u32 %v3125_v33, %v3124_v42  ;;  %v3129_v9 = vor.u32 %v3128_v23, %v3127_v7  ;;  %v2791_v0 = vxor.u32 2147483648, %v11642_v18 }
 0x350   :  { %v3069_v16 = vsub.s32 0, %v11649_v17  ;;  %v3132_v8 = vor.u32 %v3131_v57, %v3130_v22  ;;  %v3135_v37 = vor.u32 %v3134_v29, %v3133_v35  ;;  %6735 = vmatmul.mubr.msk.bf16.gmra.mrb[24].mxu0 %vm4003_vm4, %v3945_v54  ;;  %v3136_v2 = vshll.u32 %v13410_v30, %v3121_v27 }
 0x351   :  { %v3137_v11 = vshrl.u32 %v13411_v36, %v3122_v31  ;;  %v11666_v59 = vshll.u32 %v3115_v12, 8  ;;  %v11668_v45 = vadd.f32 %v434_v63, %v270_v10  ;;  %4154 = vmatprep.mubr.bf16.mxu0 %v13349_v38  ;;  %vm2790_vm1 = vcmp.eq.s32.totalorder %v11620_v43, 2  ;;  %v389_v22 = vpop.permute.xlu1 %388 }
 0x352   :  { %7619 = vcosq.f32 %v2987_v51  ;;  %v6688_v55 = vmin.u32 %v3069_v16, %v11649_v17  ;;  %vm3139_vm2 = vcmp.lt.s32.totalorder %v11651_v6, 1  ;;  %vm3142_vm3 = vcmp.lt.s32.totalorder %v11651_v6, 4 }
 0x353   :  { %vm2787_vm5 = vcmp.eq.s32.totalorder %v11620_v43, 0  ;;  %7621 = vsinq.f32 %v2987_v51  ;;  %v3138_v27 = vor.u32 %v3137_v11, %v3136_v2  ;;  %v3147_v54 = vsel %vm3139_vm2, %v3126_v60, %v3129_v9 }
 0x354   :  { %v3148_v10 = vsel %vm3142_vm3, %v3135_v37, 920167782  ;;  %v3071_v20 = vclz %v6688_v55  ;;  %v3123_v12 = vshrl.u32 %v13238_v53, %v3122_v31  ;;  %vm3141_vm6 = vcmp.lt.s32.totalorder %v11651_v6, 3  ;;  %v7618_v42 = vpop.eup %7617 }
 0x355   :  { %v3144_v63 = vsel %vm3142_vm3, %v3132_v8, 2102212464  ;;  %vm3140_vm7 = vcmp.lt.s32.totalorder %v11651_v6, 2  ;;  %v3149_v33 = vsel %vm3141_vm6, %v3132_v8, %v3148_v10  ;;  %v3151_v7 = vsel %vm3139_vm2, %v3129_v9, %v3132_v8  ;;  %v11710_v10 = vld [vmem:[%s13120_s1 + $0x2] ss:$0 sm:$0xff] }
 0x356   :  { %v3152_v23 = vsel %vm3142_vm3, %v3138_v27, 1326507024  ;;  %vm3005_vm8 = vcmp.lt.s32.totalorder %v11451_v62, 0  ;;  %v6689_v11 = vadd.s32 4294967294, %v3071_v20  ;;  %v3143_v57 = vsel %vm3139_vm2, %v3123_v12, %v3126_v60 }
 0x357   :  { %v3150_v31 = vsel %vm3140_vm7, %v3147_v54, %v3149_v33  ;;  %v3153_v29 = vsel %vm3141_vm6, %v3135_v37, %v3152_v23  ;;  %vm2682_vm9 = vcmp.lt.s32.totalorder %v11523_v28, 2  ;;  %v3145_v35 = vsel %vm3141_vm6, %v3129_v9, %v3144_v63 }
 0x358   :  { %v3154_v51 = vsel %vm3140_vm7, %v3151_v7, %v3153_v29  ;;  %v11692_v16 = vmul.u32.u64.low %v11666_v59, %v3150_v31  ;;  %v11693_v8 = vmul.u32.u64.high %v11666_v59, %v3150_v31, %v11692_v16  ;;  %vm2786_vm10 = vcmp.lt.s32.totalorder %v11620_v43, 2 }
 0x359   :  { %v2788_v2 = vxor.u32 2147483648, %v7618_v42  ;;  %vm6690_vm11 = vcmp.lt.s32.totalorder %v6689_v11, 0  ;;  %v11698_v60 = vmul.u32.u64.low %v11666_v59, %v3154_v51  ;;  %v11699_v55 = vmul.u32.u64.high %v11666_v59, %v3154_v51, %v11698_v60 }
 0x35a   :  { %v2992_v37 = vadd.s32 3, %v2988_v32  ;;  %v13435_v27 = vand.u32 2147483647, %v11451_v62  ;;  %v3074_v54 = vsel %vm6690_vm11, 0, %v6689_v11  ;;  %v11714_v20 = vadd.f32 %v11710_v10, %v11668_v45 }
 0x35b   :  { %v435_v12 = vmul.f32 %v11476_v52, %v389_v22  ;;  %v3059_v32 = vadd.s32 %v11561_v25, %v11576_v56  ;;  %v3075_v63 = vsub.s32 32, %v3074_v54  ;;  %v3079_v33 = vsub.s32 4294967266, %v3074_v54 }
 0x35c   :  { %vm11703_vm12 = vcmp.le.f32.partialorder %v13435_v27, 0.7853982  ;;  %v3146_v7 = vsel %vm3140_vm7, %v3143_v57, %v3145_v35  ;;  %vm2783_vm13 = vweird.f32 %v11175_v50  ;;  %v2792_v23 = vsel %vm2790_vm1, %v2791_v0, %v7618_v42  ;;  %v7620_v22 = vpop.eup %7619  ;;  %v11767_v50 = vld [vmem:[%s13120_s1 + $0x4] ss:$0 sm:$0xff] }
 0x35d   :  { %v3089_v11 = vsub.s32 4, %v11635_v3  ;;  %v3165_v31 = vadd.s32 1, %v11693_v8  ;;  %v271_v29 = vmul.f32 %v11612_v61, %v222_v21  ;;  %v2789_v25 = vsel %vm2787_vm5, %v11642_v18, %v2788_v2  ;;  %v7622_v35 = vpop.eup %7621 }
 0x35e   :  { %v3076_v56 = vshll.u32 %v11649_v17, %v3074_v54  ;;  %v3077_v6 = vshrl.u32 %v3059_v32, %v3075_v63  ;;  %v3080_v57 = vadd.s32 127, %v3079_v33  ;;  %v3162_v51 = vmul.u32 %v11666_v59, %v3146_v7 }
 0x35f   :  { %vm3164_vm14 = vc.u32 %v11699_v55, %v11692_v16  ;;  %v3318_v0 = vand.u32 2139095040, %v11714_v20  ;;  %v11735_v42 = vadd.f32 %v435_v12, %v271_v29  ;;  %v13219_v18 = vand.u32 2147483647, %v11714_v20 }
 0x360   :  { %v3078_v21 = vor.u32 %v3077_v6, %v3076_v56  ;;  %v3081_v60 = vshll.u32 %v3080_v57, 23  ;;  %v3166_v27 = vsel %vm3164_vm14, %v3165_v31, %v11693_v8  ;;  %vm2679_vm15 = vweird.f32 %v11082_v34 }
 0x361   :  { %13438 = vst [vmem:[#allocation21_spill] sm:$0xff] %v11735_v42  ;;  %v2993_v17 = vand.u32 3, %v2992_v37  ;;  %v3090_v59 = vsel %vm3005_vm8, %v3089_v11, %v11635_v3  ;;  %v3167_v2 = vadd.s32 %v3166_v27, %v3162_v51  ;;  %v3319_v54 = vshrl.u32 %v3318_v0, 23  ;;  %v393_v0 = vpop.permute.xlu1 %392 }
 0x362   :  { %v2689_v12 = vsel %vm2682_vm9, %v11628_v4, %v11618_v15  ;;  %v2996_v32 = vxor.u32 2147483648, %v7622_v35  ;;  %v2999_v63 = vxor.u32 2147483648, %v7620_v22  ;;  %v3082_v33 = vor.u32 4788187, %v3081_v60 }
 0x363   :  { %v2793_v8 = vsel %vm2786_vm10, %v2789_v25, %v2792_v23  ;;  %vm2991_vm0 = vweird.f32 %v11316_v41  ;;  %v3168_v37 = vadd.s32 536870912, %v3167_v2  ;;  %v6699_v7 = vadd.s32 4294967169, %v3319_v54 }
 0x364   :  { %v11752_v3 = vadd.f32 %v11710_v10, %v11735_v42  ;;  %v3083_v11 = vand.u32 2147483647, %v3082_v33  ;;  %v3085_v31 = vcvt.s32.f32 %v3078_v21  ;;  %v3092_v28 = vsel %vm11703_vm12, 0, %v3090_v59  ;;  %v13448_v42 = vld [vmem:[#allocation7_spill] sm:$0xff] }
 0x365   :  { %v3322_v15 = vand.u32 8388607, %v13219_v18  ;;  %vm2995_vm1 = vcmp.eq.s32.totalorder %v2993_v17, 0  ;;  %vm2998_vm2 = vcmp.eq.s32.totalorder %v2993_v17, 2  ;;  %v11758_v43 = vshrl.u32 %v3168_v37, 30 }
 0x366   :  { %v3325_v4 = vadd.s32 1, %v6699_v7  ;;  %v2794_v23 = vsel %vm2783_vm13, nan, %v2793_v8  ;;  %v2997_v29 = vsel %vm2995_vm1, %v7620_v22, %v2996_v32  ;;  %v3000_v25 = vsel %vm2998_vm2, %v2999_v63, %v7622_v35 }
 0x367   :  { %v3086_v56 = vmul.f32 %v3085_v31, %v3083_v11  ;;  %v3096_v6 = vadd.s32 3, %v3092_v28  ;;  %v3170_v57 = vshll.u32 %v11758_v43, 30  ;;  %v3422_v51 = vand.u32 2139095040, %v11752_v3 }
 0x368   :  { %vm3326_vm3 = vcmp.gt.s32.totalorder %v3325_v4, 0  ;;  %vm2994_vm5 = vcmp.lt.s32.totalorder %v2993_v17, 2  ;;  %v3323_v60 = vor.u32 8388608, %v3322_v15  ;;  %v11771_v22 = vmul.f32 %v11767_v50, %v11438_v26  ;;  %v11782_v17 = vld [vmem:[%s13120_s1 + $0x3] ss:$0 sm:$0xff] }
 0x369   :  { %v3087_v21 = vxor.u32 2147483648, %v3086_v56  ;;  %v3327_v27 = vsel %vm3326_vm3, %v3325_v4, 0  ;;  %v3001_v59 = vsel %vm2994_vm5, %v2997_v29, %v3000_v25  ;;  %v11773_v35 = vsub.s32 %v3167_v2, %v3170_v57 }
 0x36a   :  { %v3329_v54 = vand.u32 31, %v3327_v27  ;;  %v11777_v32 = vsel %vm2679_vm15, nan, %v2689_v12  ;;  %v11785_v63 = vmul.f32 %v11782_v17, %v2794_v23  ;;  %v11790_v26 = vmul.f32 %v11476_v52, %v393_v0 }
 0x36b   :  { %v3088_v33 = vsel %vm3005_vm8, %v3087_v21, %v3086_v56  ;;  %v11792_v2 = vand.u32 3, %v3096_v6  ;;  %v3173_v34 = vsub.s32 0, %v11773_v35  ;;  %v3423_v8 = vshrl.u32 %v3422_v51, 23 }
 0x36c   :  { %v3330_v12 = vsub.s32 32, %v3329_v54  ;;  %v11797_v37 = vsel %vm2991_vm0, nan, %v3001_v59  ;;  %v3091_v7 = vsel %vm11703_vm12, %v11451_v62, %v3088_v33  ;;  %v11802_v11 = vshll.u32 %v3323_v60, 8 }
 0x36d   :  { %v13220_v31 = vand.u32 2147483647, %v11752_v3  ;;  %v6692_v52 = vmin.u32 %v3173_v34, %v11773_v35  ;;  %v3193_v28 = vsub.s32 4, %v11758_v43  ;;  %v11807_v15 = vshrl.u32 %v3327_v27, 5 }
 0x36e   :  { %v3332_v4 = vshll.u32 %v13238_v53, %v3329_v54  ;;  %v3333_v41 = vshrl.u32 %v13267_v5, %v3330_v12  ;;  %v3335_v23 = vshll.u32 %v13267_v5, %v3329_v54  ;;  %v3336_v29 = vshrl.u32 %v13233_v46, %v3330_v12 }
 0x36f   :  { %v3339_v9 = vshrl.u32 %v13266_v14, %v3330_v12  ;;  %7623 = vcosq.f32 %v3091_v7  ;;  %v3175_v25 = vclz %v6692_v52  ;;  %v3338_v56 = vshll.u32 %v13233_v46, %v3329_v54 }
 0x370   :  { %v6703_v6 = vadd.s32 4294967169, %v3423_v8  ;;  %vm3109_vm6 = vcmp.lt.s32.totalorder %v11503_v40, 0  ;;  %v3334_v57 = vor.u32 %v3333_v41, %v3332_v4  ;;  %v3337_v51 = vor.u32 %v3336_v29, %v3335_v23 }
 0x371   :  { %v3341_v0 = vshll.u32 %v13266_v14, %v3329_v54  ;;  %v3342_v21 = vshrl.u32 %v13410_v30, %v3330_v12  ;;  %v6693_v60 = vadd.s32 4294967294, %v3175_v25  ;;  %v3340_v27 = vor.u32 %v3339_v9, %v3338_v56 }
 0x372   :  { %v3344_v59 = vshll.u32 %v13410_v30, %v3329_v54  ;;  %v3345_v33 = vshrl.u32 %v13411_v36, %v3330_v12  ;;  %7625 = vsinq.f32 %v3091_v7  ;;  %vm3347_vm7 = vcmp.lt.s32.totalorder %v11807_v15, 1 }
 0x373   :  { %v3343_v34 = vor.u32 %v3342_v21, %v3341_v0  ;;  %vm3348_vm8 = vcmp.lt.s32.totalorder %v11807_v15, 2  ;;  %v13439_v8 = vand.u32 2147483647, %v11503_v40  ;;  %vm6694_vm10 = vcmp.lt.s32.totalorder %v6693_v60, 0  ;;  %v7365_v0 = vld [vmem:[%s13122_s4 + $0x4] ss:$8 sps:$4 sm:$0xff]  }
 0x374   :  { %v3346_v4 = vor.u32 %v3345_v33, %v3344_v59  ;;  %vm3349_vm11 = vcmp.lt.s32.totalorder %v11807_v15, 3  ;;  %vm3350_vm12 = vcmp.lt.s32.totalorder %v11807_v15, 4  ;;  %v3178_v54 = vsel %vm6694_vm10, 0, %v6693_v60  ;;  %4571 = vmatprep.subr.bf16.mxu1 %v7365_v0 }
 0x375   :  { %vm11824_vm9 = vcmp.le.f32.partialorder %v13439_v8, 0.7853982  ;;  %v3331_v7 = vshrl.u32 %v13238_v53, %v3330_v12  ;;  %v3355_v41 = vsel %vm3347_vm7, %v3334_v57, %v3337_v51  ;;  %v3356_v23 = vsel %vm3350_vm12, %v3343_v34, 920167782 }
 0x376   :  { %v3163_v29 = vadd.s32 %v11692_v16, %v11699_v55  ;;  %v3179_v9 = vsub.s32 32, %v3178_v54  ;;  %v3183_v25 = vsub.s32 4294967266, %v3178_v54  ;;  %v3352_v56 = vsel %vm3350_vm12, %v3340_v27, 2102212464 }
 0x377   :  { %v3351_v21 = vsel %vm3347_vm7, %v3331_v7, %v3334_v57  ;;  %v3357_v12 = vsel %vm3349_vm11, %v3340_v27, %v3356_v23  ;;  %v3359_v60 = vsel %vm3347_vm7, %v3337_v51, %v3340_v27  ;;  %v3360_v59 = vsel %vm3350_vm12, %v3346_v4, 1326507024 }
 0x378   :  { %v3180_v33 = vshll.u32 %v11773_v35, %v3178_v54  ;;  %v3181_v16 = vshrl.u32 %v3163_v29, %v3179_v9  ;;  %v3184_v55 = vadd.s32 127, %v3183_v25  ;;  %v3358_v8 = vsel %vm3348_vm8, %v3355_v41, %v3357_v12 }
 0x379   :  { %v3353_v18 = vsel %vm3349_vm11, %v3337_v51, %v3352_v56  ;;  %v3361_v57 = vsel %vm3349_vm11, %v3343_v34, %v3360_v59  ;;  %v11852_v7 = vmul.u32.u64.low %v11802_v11, %v3358_v8  ;;  %v11853_v23 = vmul.u32.u64.high %v11802_v11, %v3358_v8, %v11852_v7  ;;  %v11856_v27 = vpop.eup %7623 }
 0x37a   :  { %v3182_v35 = vor.u32 %v3181_v16, %v3180_v33  ;;  %v3185_v4 = vshll.u32 %v3184_v55, 23  ;;  %v3194_v54 = vsel %vm3109_vm6, %v3193_v28, %v11758_v43  ;;  %v3362_v41 = vsel %vm3348_vm8, %v3359_v60, %v3361_v57 }
 0x37b   :  { %v11864_v51 = vmul.u32.u64.low %v11802_v11, %v3362_v41  ;;  %v11865_v29 = vmul.u32.u64.high %v11802_v11, %v3362_v41, %v11864_v51  ;;  %v11869_v34 = vand.u32 8388607, %v13220_v31  ;;  %v3429_v9 = vadd.s32 1, %v6703_v6 }
 0x37c   :  { %v11873_v25 = vmul.f32 %v11782_v17, %v11777_v32  ;;  %v11877_v56 = vadd.f32 %v11516_v49, %v11785_v63  ;;  %v3186_v43 = vor.u32 4788187, %v3185_v4  ;;  %v3354_v28 = vsel %vm3348_vm8, %v3351_v21, %v3353_v18  ;;  %v7626_v0 = vpop.eup %7625 }
 0x37d   :  { %v3196_v12 = vsel %vm11824_vm9, 0, %v3194_v54  ;;  %v3373_v60 = vadd.s32 1, %v11853_v23  ;;  %vm3430_vm13 = vcmp.gt.s32.totalorder %v3429_v9, 0  ;;  %v11886_v6 = vadd.f32 %v11790_v26, %v11188_v47 }
 0x37e   :  { %v11890_v32 = vmul.f32 %v11782_v17, %v11797_v37  ;;  %v3187_v49 = vand.u32 2147483647, %v3186_v43  ;;  %v3189_v63 = vcvt.s32.f32 %v3182_v35  ;;  %v3431_v59 = vsel %vm3430_vm13, %v3429_v9, 0 }
 0x37f   :  { %13442 = vst [vmem:[#allocation6_spill] sm:$0xff] %v11886_v6  ;;  %vm3099_vm14 = vcmp.eq.s32.totalorder %v11792_v2, 0  ;;  %vm3102_vm15 = vcmp.eq.s32.totalorder %v11792_v2, 2  ;;  %v3370_v18 = vmul.u32 %v11802_v11, %v3354_v28  ;;  %vm3372_vm0 = vc.u32 %v11865_v29, %v11852_v7 }
 0x380   :  { %v3427_v15 = vor.u32 8388608, %v11869_v34  ;;  %v3433_v47 = vand.u32 31, %v3431_v59  ;;  %v3103_v26 = vxor.u32 2147483648, %v11856_v27  ;;  %v3190_v21 = vmul.f32 %v3189_v63, %v3187_v49 }
 0x381   :  { %v3200_v37 = vadd.s32 3, %v3196_v12  ;;  %v3374_v33 = vsel %vm3372_vm0, %v3373_v60, %v11853_v23  ;;  %v3100_v16 = vxor.u32 2147483648, %v7626_v0  ;;  %v11900_v8 = vshrl.u32 %v3431_v59, 5 }
 0x382   :  { %v3375_v55 = vadd.s32 %v3374_v33, %v3370_v18  ;;  %v3434_v57 = vsub.s32 32, %v3433_v47  ;;  %v3191_v35 = vxor.u32 2147483648, %v3190_v21  ;;  %v3436_v11 = vshll.u32 %v13238_v53, %v3433_v47 }
 0x383   :  { %v3439_v4 = vshll.u32 %v13267_v5, %v3433_v47  ;;  %v3442_v54 = vshll.u32 %v13233_v46, %v3433_v47  ;;  %v3445_v9 = vshll.u32 %v13266_v14, %v3433_v47  ;;  %vm3098_vm1 = vcmp.lt.s32.totalorder %v11792_v2, 2 }
 0x384   :  { %v3376_v41 = vadd.s32 536870912, %v3375_v55  ;;  %v3437_v51 = vshrl.u32 %v13267_v5, %v3434_v57  ;;  %v3440_v34 = vshrl.u32 %v13233_v46, %v3434_v57  ;;  %v3192_v23 = vsel %vm3109_vm6, %v3191_v35, %v3190_v21 }
 0x385   :  { %v3443_v43 = vshrl.u32 %v13266_v14, %v3434_v57  ;;  %v3446_v28 = vshrl.u32 %v13410_v30, %v3434_v57  ;;  %v3449_v12 = vshrl.u32 %v13411_v36, %v3434_v57  ;;  %v3195_v60 = vsel %vm11824_vm9, %v11503_v40, %v3192_v23 }
 0x386   :  { %v3377_v49 = vshrl.u32 %v3376_v41, 30  ;;  %v3438_v63 = vor.u32 %v3437_v51, %v3436_v11  ;;  %v3441_v59 = vor.u32 %v3440_v34, %v3439_v4  ;;  %7627 = vcosq.f32 %v3195_v60 }
 0x387   :  { %v3444_v18 = vor.u32 %v3443_v43, %v3442_v54  ;;  %v3447_v33 = vor.u32 %v3446_v28, %v3445_v9  ;;  %v3448_v21 = vshll.u32 %v13410_v30, %v3433_v47  ;;  %7629 = vsinq.f32 %v3195_v60  ;;  %v11931_v47 = vpop.f32.mrb[0].mxu0 }
 0x388   :  { %v11918_v35 = vand.u32 3, %v3200_v37  ;;  %vm3317_vm2 = vcmp.lt.s32.totalorder %v11714_v20, 0  ;;  %v3378_v31 = vshll.u32 %v3377_v49, 30  ;;  %v11923_v52 = vadd.f32 %v11710_v10, %v11886_v6 }
 0x389   :  { %v3101_v11 = vsel %vm3099_vm14, %v11856_v27, %v3100_v16  ;;  %v3104_v4 = vsel %vm3102_vm15, %v3103_v26, %v7626_v0  ;;  %v3450_v54 = vor.u32 %v3449_v12, %v3448_v21  ;;  %vm3451_vm3 = vcmp.lt.s32.totalorder %v11900_v8, 1 }
 0x38a   :  { %v11933_v37 = vsub.s32 %v3375_v55, %v3378_v31  ;;  %vm3454_vm5 = vcmp.lt.s32.totalorder %v11900_v8, 4  ;;  %v3459_v41 = vsel %vm3451_vm3, %v3438_v63, %v3441_v59  ;;  %v11938_v51 = vshll.u32 %v3427_v15, 8  ;;  %v11953_v15 = vpop.f32.mrb[1].mxu0 }
 0x38b   :  { %vm3095_vm6 = vweird.f32 %v11451_v62  ;;  %v13443_v27 = vand.u32 2147483647, %v11714_v20  ;;  %v3435_v26 = vshrl.u32 %v13238_v53, %v3434_v57  ;;  %vm3453_vm8 = vcmp.lt.s32.totalorder %v11900_v8, 3  ;;  %v11966_v12 = vpop.f32.mrb[2].mxu0 }
 0x38c   :  { %v3456_v31 = vsel %vm3454_vm5, %v3444_v18, 2102212464  ;;  %v3460_v16 = vsel %vm3454_vm5, %v3447_v33, 920167782  ;;  %v3381_v55 = vsub.s32 0, %v11933_v37  ;;  %vm3452_vm9 = vcmp.lt.s32.totalorder %v11900_v8, 2 }
 0x38d   :  { %vm11943_vm7 = vcmp.le.f32.partialorder %v13443_v27, 0.7853982  ;;  %v3461_v34 = vsel %vm3453_vm8, %v3444_v18, %v3460_v16  ;;  %v3463_v57 = vsel %vm3451_vm3, %v3441_v59, %v3444_v18  ;;  %v3401_v9 = vsub.s32 4, %v3377_v49  ;;  %v11975_v16 = vpop.f32.mrb[3].mxu0 }
 0x38e   :  { %v3462_v23 = vsel %vm3452_vm9, %v3459_v41, %v3461_v34  ;;  %v3464_v43 = vsel %vm3454_vm5, %v3450_v54, 1326507024  ;;  %v3526_v28 = vand.u32 2139095040, %v11923_v52  ;;  %v6700_v60 = vmin.u32 %v3381_v55, %v11933_v37  ;;  %v11984_v6 = vpop.f32.mrb[4].mxu0 }
 0x38f   :  { %v3455_v21 = vsel %vm3451_vm3, %v3435_v26, %v3438_v63  ;;  %v3457_v27 = vsel %vm3453_vm8, %v3441_v59, %v3456_v31  ;;  %v3465_v18 = vsel %vm3453_vm8, %v3447_v33, %v3464_v43  ;;  %v3105_v63 = vsel %vm3098_vm1, %v3101_v11, %v3104_v4  ;;  %v11990_v33 = vpop.f32.mrb[5].mxu0 }
 0x390   :  { %v3466_v54 = vsel %vm3452_vm9, %v3463_v57, %v3465_v18  ;;  %v11980_v41 = vmul.u32.u64.low %v11938_v51, %v3462_v23  ;;  %v11981_v34 = vmul.u32.u64.high %v11938_v51, %v3462_v23, %v11980_v41  ;;  %v3527_v55 = vshrl.u32 %v3526_v28, 23  ;;  %13446 = vst [vmem:[#allocation10_spill] sm:$0xff] %v11990_v33  ;;  %v7628_v26 = vpop.eup %7627 }
 0x391   :  { %vm3202_vm10 = vcmp.lt.s32.totalorder %v11918_v35, 2  ;;  %vm3203_vm11 = vcmp.eq.s32.totalorder %v11918_v35, 0  ;;  %v3383_v59 = vclz %v6700_v60  ;;  %v3402_v31 = vsel %vm3317_vm2, %v3401_v9, %v3377_v49  ;;  %v7630_v28 = vpop.eup %7629 }
 0x392   :  { %v11995_v57 = vmul.u32.u64.low %v11938_v51, %v3466_v54  ;;  %v11996_v23 = vmul.u32.u64.high %v11938_v51, %v3466_v54, %v11995_v57  ;;  %v6707_v43 = vadd.s32 4294967169, %v3527_v55  ;;  %vm3206_vm12 = vcmp.eq.s32.totalorder %v11918_v35, 2 }
 0x393   :  { %v3207_v2 = vxor.u32 2147483648, %v7628_v26  ;;  %v6701_v11 = vadd.s32 4294967294, %v3383_v59  ;;  %v3458_v4 = vsel %vm3452_vm9, %v3455_v21, %v3457_v27  ;;  %vm3199_vm13 = vweird.f32 %v11503_v40  ;;  %v237_v57 = vpop.permute.xlu1 %236  ;;  %v13447_v59 = vld [vmem:[#allocation2_spill] sm:$0xff]  ;;  %v12010_v21 = vpop.f32.mrb[6].mxu0 }
 0x394   :  { %v3204_v60 = vxor.u32 2147483648, %v7630_v28  ;;  %v3477_v18 = vadd.s32 1, %v11981_v34  ;;  %v3533_v9 = vadd.s32 1, %v6707_v43  ;;  %v3106_v54 = vsel %vm3095_vm6, nan, %v3105_v63  ;;  %v12017_v62 = vpop.f32.mrb[7].mxu0 }
 0x395   :  { %vm6702_vm14 = vcmp.lt.s32.totalorder %v6701_v11, 0  ;;  %v3404_v55 = vsel %vm11943_vm7, 0, %v3402_v31  ;;  %v3946_v8 = vpack.c.bf16 %v13448_v42, %v13447_v59  ;;  %v3371_v27 = vadd.s32 %v11852_v7, %v11865_v29  ;;  %13449 = vst [vmem:[#allocation8_spill] sm:$0xff] %v12017_v62  ;;  %v7804_v40 = vld [vmem:[%s13120_s1 + $0x1] ss:$0 sm:$0xff] }
 0x396   :  { %v3386_v33 = vsel %vm6702_vm14, 0, %v6701_v11  ;;  %v3474_v49 = vmul.u32 %v11938_v51, %v3458_v4  ;;  %vm3476_vm15 = vc.u32 %v11996_v23, %v11980_v41  ;;  %v3205_v63 = vsel %vm3203_vm11, %v7628_v26, %v3204_v60 }
 0x397   :  { %v3208_v31 = vsel %vm3206_vm12, %v3207_v2, %v7630_v28  ;;  %v3387_v42 = vsub.s32 32, %v3386_v33  ;;  %v3391_v43 = vsub.s32 4294967266, %v3386_v33  ;;  %6736 = vmatmul.mubr.msk.bf16.gmra.mrb[28].mxu0 %vm4003_vm4, %v3946_v8  ;;  %v3408_v59 = vadd.s32 3, %v3404_v55  ;;  %v7363_v28 = vld [vmem:[%s13122_s4] ss:$8 sps:$4 sm:$0xff]   ;;  %v401_v35 = vpop.permute.xlu1 %400 }
 0x398   :  { %v3478_v7 = vsel %vm3476_vm15, %v3477_v18, %v11981_v34  ;;  %v13450_v29 = vand.u32 2147483647, %v11923_v52  ;;  %vm3534_vm0 = vcmp.gt.s32.totalorder %v3533_v9, 0  ;;  %v3388_v11 = vshll.u32 %v11933_v37, %v3386_v33  ;;  %v13451_v18 = vld [vmem:[#allocation11_spill] sm:$0xff]  ;;  %v7368_v37 = vld [vmem:[%s13122_s4 + $0x14] ss:$8 sps:$4 sm:$0xff]  }
 0x399   :  { %v3389_v4 = vshrl.u32 %v3371_v27, %v3387_v42  ;;  %v3392_v62 = vadd.s32 127, %v3391_v43  ;;  %v3479_v26 = vadd.s32 %v3478_v7, %v3474_v49  ;;  %v3209_v2 = vsel %vm3202_vm10, %v3205_v63, %v3208_v31  ;;  %v7371_v42 = vld [vmem:[%s13122_s4 + $0x24] ss:$8 sps:$4 sm:$0xff]  }
 0x39a   :  { %v12027_v51 = vand.u32 8388607, %v13450_v29  ;;  %v3535_v60 = vsel %vm3534_vm0, %v3533_v9, 0  ;;  %v3947_v34 = vpack.c.bf16 %v11507_v58, %v11398_v19  ;;  %v3948_v55 = vpack.c.bf16 %v11607_v39, %v13451_v18 }
 0x39b   :  { %v12044_v33 = vadd.f32 %v11404_v48, %v11873_v25  ;;  %v3390_v49 = vor.u32 %v3389_v4, %v3388_v11  ;;  %v3393_v8 = vshll.u32 %v3392_v62, 23  ;;  %v3480_v27 = vadd.s32 536870912, %v3479_v26 }
 0x39c   :  { %v12048_v9 = vadd.f32 %v11588_v44, %v11890_v32  ;;  %v12051_v19 = vmul.f32 %v11782_v17, %v3106_v54  ;;  %v3900_v58 = vmul.f32 %v11767_v50, %v11488_v13  ;;  %v3537_v39 = vand.u32 31, %v3535_v60  ;;  %6737 = vmatmul.mubr.msk.bf16.vlgmr.msra.gmra.mrb[0].mxu1 %vm4003_vm4, %v3947_v34  ;;  %v7366_v32 = vld [vmem:[%s13122_s4 + $0x10] ss:$8 sps:$4 sm:$0xff]  }
 0x39d   :  { %v3210_v48 = vsel %vm3199_vm13, nan, %v3209_v2  ;;  %v3394_v25 = vor.u32 4788187, %v3393_v8  ;;  %v12058_v62 = vshrl.u32 %v3480_v27, 30  ;;  %4174 = vmatprep.mubr.bf16.mxu1 %v13349_v38  ;;  %v3949_v44 = vpack.c.bf16 %v11877_v56, %v12044_v33  ;;  %4572 = vmatpush1.bf16.msra.mxu1 %v7363_v28 }
 0x39e   :  { %v12066_v13 = vand.u32 3, %v3408_v59  ;;  %v3531_v54 = vor.u32 8388608, %v12027_v51  ;;  %v3538_v63 = vsub.s32 32, %v3537_v39  ;;  %v438_v31 = vmul.f32 %v7804_v40, %v401_v35  ;;  %4573 = vmatprep.subr.bf16.mxu1 %v7368_v37 }
 0x39f   :  { %v3395_v43 = vand.u32 2147483647, %v3394_v25  ;;  %v3397_v7 = vcvt.s32.f32 %v3390_v49  ;;  %v3482_v29 = vshll.u32 %v12058_v62, 30  ;;  %v274_v59 = vmul.f32 %v11612_v61, %v237_v57  ;;  %v7369_v61 = vld [vmem:[%s13122_s4 + $0x20] ss:$8 sps:$4 sm:$0xff]  }
 0x3a0   :  { %v3864_v11 = vmul.f32 %v11782_v17, %v3210_v48  ;;  %v3541_v51 = vshrl.u32 %v13267_v5, %v3538_v63  ;;  %v3544_v4 = vshrl.u32 %v13233_v46, %v3538_v63  ;;  %v3547_v28 = vshrl.u32 %v13266_v14, %v3538_v63 }
 0x3a1   :  { %v3398_v2 = vmul.f32 %v3397_v7, %v3395_v43  ;;  %v12081_v34 = vsub.s32 %v3479_v26, %v3482_v29  ;;  %v3540_v18 = vshll.u32 %v13238_v53, %v3537_v39  ;;  %v3550_v37 = vshrl.u32 %v13410_v30, %v3538_v63  ;;  %4574 = vmatpush1.bf16.msra.mxu1 %v7366_v32  ;;  %v7374_v26 = vld [vmem:[%s13122_s4 + $0x34] ss:$8 sps:$4 sm:$0xff]  }
 0x3a2   :  { %v12088_v57 = vshrl.u32 %v3535_v60, 5  ;;  %v3543_v49 = vshll.u32 %v13267_v5, %v3537_v39  ;;  %v3546_v8 = vshll.u32 %v13233_v46, %v3537_v39  ;;  %v12092_v27 = vadd.f32 %v438_v31, %v274_v59  ;;  %4575 = vmatprep.subr.bf16.mxu1 %v7371_v42 }
 0x3a3   :  { %v3399_v35 = vxor.u32 2147483648, %v3398_v2  ;;  %v3485_v48 = vsub.s32 0, %v12081_v34  ;;  %v3542_v25 = vor.u32 %v3541_v51, %v3540_v18  ;;  %v3549_v32 = vshll.u32 %v13266_v14, %v3537_v39  ;;  %v7372_v51 = vld [vmem:[%s13122_s4 + $0x30] ss:$8 sps:$4 sm:$0xff]  }
 0x3a4   :  { %v3545_v40 = vor.u32 %v3544_v4, %v3543_v49  ;;  %v3548_v60 = vor.u32 %v3547_v28, %v3546_v8  ;;  %v3552_v43 = vshll.u32 %v13410_v30, %v3537_v39  ;;  %v3553_v7 = vshrl.u32 %v13411_v36, %v3538_v63  ;;  %6738 = vmatmul.mubr.msk.bf16.gmra.mrb[4].mxu1 %vm4003_vm4, %v3948_v55 }
 0x3a5   :  { %v3400_v31 = vsel %vm3317_vm2, %v3399_v35, %v3398_v2  ;;  %v6704_v42 = vmin.u32 %v3485_v48, %v12081_v34  ;;  %v3551_v29 = vor.u32 %v3550_v37, %v3549_v32  ;;  %v12105_v59 = vshll.u32 %v3531_v54, 8  ;;  %4184 = vmatprep.mubr.bf16.mxu1 %v13349_v38  ;;  %4576 = vmatpush1.bf16.msra.mxu1 %v7369_v61  ;;  %v7377_v54 = vld [vmem:[%s13122_s4 + $0x44] ss:$8 sps:$4 sm:$0xff]   ;;  %v7375_v61 = vld [vmem:[%s13122_s4 + $0x40] ss:$8 sps:$4 sm:$0xff]  }
 0x3a6   :  { %v12111_v39 = vadd.f32 %v3900_v58, %v3864_v11  ;;  %v3403_v55 = vsel %vm11943_vm7, %v11714_v20, %v3400_v31  ;;  %v3554_v4 = vor.u32 %v3553_v7, %v3552_v43  ;;  %v12118_v28 = vadd.f32 %v11710_v10, %v12092_v27  ;;  %4577 = vmatprep.subr.bf16.mxu1 %v7374_v26  ;;  %v12136_v43 = vpop.f32.mrb[8].mxu0 }
 0x3a7   :  { %7631 = vcosq.f32 %v3403_v55  ;;  %v3487_v2 = vclz %v6704_v42  ;;  %vm3555_vm1 = vcmp.lt.s32.totalorder %v12088_v57, 1  ;;  %vm3558_vm2 = vcmp.lt.s32.totalorder %v12088_v57, 4 }
 0x3a8   :  { %7633 = vsinq.f32 %v3403_v55  ;;  %v3539_v0 = vshrl.u32 %v13238_v53, %v3538_v63  ;;  %v3560_v58 = vsel %vm3558_vm2, %v3548_v60, 2102212464  ;;  %v3563_v11 = vsel %vm3555_vm1, %v3542_v25, %v3545_v40  ;;  %v7380_v63 = vld [vmem:[%s13122_s4 + $0x54] ss:$8 sps:$4 sm:$0xff]  }
 0x3a9   :  { %v6705_v18 = vadd.s32 4294967294, %v3487_v2  ;;  %vm3557_vm3 = vcmp.lt.s32.totalorder %v12088_v57, 3  ;;  %v3564_v10 = vsel %vm3558_vm2, %v3551_v29, 920167782  ;;  %v3567_v37 = vsel %vm3555_vm1, %v3545_v40, %v3548_v60  ;;  %4578 = vmatpush1.bf16.msra.mxu1 %v7372_v51 }
 0x3aa   :  { %vm3556_vm5 = vcmp.lt.s32.totalorder %v12088_v57, 2  ;;  %v3559_v49 = vsel %vm3555_vm1, %v3539_v0, %v3542_v25  ;;  %v3565_v8 = vsel %vm3557_vm3, %v3548_v60, %v3564_v10  ;;  %v3568_v26 = vsel %vm3558_vm2, %v3554_v4, 1326507024  ;;  %4579 = vmatprep.subr.bf16.mxu1 %v7377_v54  ;;  %v7378_v4 = vld [vmem:[%s13122_s4 + $0x50] ss:$8 sps:$4 sm:$0xff]  }
 0x3ab   :  { %vm6706_vm6 = vcmp.lt.s32.totalorder %v6705_v18, 0  ;;  %v3561_v35 = vsel %vm3557_vm3, %v3545_v40, %v3560_v58  ;;  %v3566_v48 = vsel %vm3556_vm5, %v3563_v11, %v3565_v8  ;;  %v3569_v32 = vsel %vm3557_vm3, %v3551_v29, %v3568_v26  ;;  %v12149_v40 = vpop.f32.mrb[9].mxu0  ;;  %v7381_v57 = vld [vmem:[%s13122_s4 + $0x60] ss:$8 sps:$4 sm:$0xff]  }
 0x3ac   :  { %v3490_v7 = vsel %vm6706_vm6, 0, %v6705_v18  ;;  %v3570_v31 = vsel %vm3556_vm5, %v3567_v37, %v3569_v32  ;;  %v12141_v25 = vmul.u32.u64.low %v12105_v59, %v3566_v48  ;;  %v12142_v60 = vmul.u32.u64.high %v12105_v59, %v3566_v48, %v12141_v25  ;;  %6739 = vmatmul.mubr.msk.bf16.gmra.mrb[8].mxu1 %vm4003_vm4, %v3949_v44  ;;  %v12158_v54 = vpop.f32.mrb[10].mxu0  ;;  %v13452_v18 = vld [vmem:[#allocation22_spill] sm:$0xff] }
 0x3ad   :  { %v3703_v42 = vsub.s32 4294967266, %v11411_v24  ;;  %v3475_v29 = vadd.s32 %v11980_v41, %v11996_v23  ;;  %v3491_v51 = vsub.s32 32, %v3490_v7  ;;  %v3495_v55 = vsub.s32 4294967266, %v3490_v7  ;;  %4194 = vmatprep.mubr.bf16.mxu1 %v13349_v38  ;;  %4580 = vmatpush1.bf16.msra.mxu1 %v7375_v61  ;;  %v7383_v23 = vld [vmem:[%s13122_s4 + $0x64] ss:$8 sps:$4 sm:$0xff]   ;;  %v12172_v2 = vpop.f32.mrb[11].mxu0 }
 0x3ae   :  { %v12162_v56 = vadd.f32 %v11771_v22, %v12051_v19  ;;  %v12165_v33 = vmul.u32.u64.low %v12105_v59, %v3570_v31  ;;  %v12166_v44 = vmul.u32.u64.high %v12105_v59, %v3570_v31, %v12165_v33  ;;  %v3734_v41 = vand.u32 2139095040, %v12118_v28  ;;  %4581 = vmatprep.subr.bf16.mxu1 %v7380_v63 }
 0x3af   :  { %vm3414_vm7 = vcmp.eq.s32.totalorder %v12066_v13, 2  ;;  %v3493_v0 = vshrl.u32 %v3475_v29, %v3491_v51  ;;  %v3496_v58 = vadd.s32 127, %v3495_v55  ;;  %v3562_v22 = vsel %vm3556_vm5, %v3559_v49, %v3561_v35  ;;  %v12196_v55 = vpop.f32.mrb[12].mxu0 }
 0x3b0   :  { %v3581_v19 = vadd.s32 1, %v12142_v60  ;;  %v3735_v11 = vshrl.u32 %v3734_v41, 23  ;;  %v3950_v10 = vpack.c.bf16 %v12048_v9, %v13452_v18  ;;  %v3951_v37 = vpack.c.bf16 %v12111_v39, %v12162_v56  ;;  %v12202_v41 = vpop.f32.mrb[13].mxu0 }
 0x3b1   :  { %v7632_v61 = vpop.eup %7631  ;;  %v3492_v8 = vshll.u32 %v12081_v34, %v3490_v7  ;;  %v3497_v26 = vshll.u32 %v3496_v58, 23  ;;  %v3731_v63 = vand.u32 2147483647, %v12118_v28  ;;  %4582 = vmatpush1.bf16.msra.mxu1 %v7378_v4  ;;  %v4245_v49 = vpack.c.bf16 %v11966_v12, %v11931_v47  ;;  %v7386_v34 = vld [vmem:[%s13122_s4 + $0x74] ss:$8 sps:$4 sm:$0xff]  }
 0x3b2   :  { %v7634_v35 = vpop.eup %7633  ;;  %v3415_v48 = vxor.u32 2147483648, %v7632_v61  ;;  %v3578_v9 = vmul.u32 %v12105_v59, %v3562_v22  ;;  %vm3580_vm8 = vc.u32 %v12166_v44, %v12141_v25  ;;  %v6715_v32 = vadd.s32 4294967169, %v3735_v11  ;;  %4583 = vmatprep.subr.bf16.mxu1 %v7383_v23  ;;  %v7384_v58 = vld [vmem:[%s13122_s4 + $0x70] ss:$8 sps:$4 sm:$0xff]   ;;  %v12211_v22 = vpop.f32.mrb[14].mxu0  ;;  %v13454_v11 = vld [vmem:[#allocation26_spill] sm:$0xff] }
 0x3b3   :  { %v3412_v7 = vxor.u32 2147483648, %v7634_v35  ;;  %v3494_v31 = vor.u32 %v3493_v0, %v3492_v8  ;;  %v3498_v29 = vor.u32 4788187, %v3497_v26  ;;  %v3582_v51 = vsel %vm3580_vm8, %v3581_v19, %v12142_v60 }
 0x3b4   :  { %vm3411_vm9 = vcmp.eq.s32.totalorder %v12066_v13, 0  ;;  %v3416_v59 = vsel %vm3414_vm7, %v3415_v48, %v7634_v35  ;;  %v3583_v4 = vadd.s32 %v3582_v51, %v3578_v9  ;;  %v3741_v33 = vadd.s32 1, %v6715_v32  ;;  %6740 = vmatmul.mubr.msk.bf16.gmra.mrb[12].mxu1 %vm4003_vm4, %v3950_v10  ;;  %v13455_v32 = vld [vmem:[#allocation23_spill] sm:$0xff] }
 0x3b5   :  { %v3700_v23 = vshll.u32 %v11231_v1, %v11411_v24  ;;  %vm3410_vm10 = vcmp.lt.s32.totalorder %v12066_v13, 2  ;;  %v3413_v0 = vsel %vm3411_vm9, %v7632_v61, %v3412_v7  ;;  %v3499_v60 = vand.u32 2147483647, %v3498_v29  ;;  %4204 = vmatprep.mubr.bf16.mxu1 %v13349_v38  ;;  %4584 = vmatpush1.bf16.msra.mxu1 %v7381_v57  ;;  %v7389_v1 = vld [vmem:[%s13122_s4 + $0x84] ss:$8 sps:$4 sm:$0xff]   ;;  %v12219_v13 = vpop.f32.mrb[15].mxu0 }
 0x3b6   :  { %v13453_v19 = vsub.s32 32, %v11411_v24  ;;  %v3417_v10 = vsel %vm3410_vm10, %v3413_v0, %v3416_v59  ;;  %v3584_v8 = vadd.s32 536870912, %v3583_v4  ;;  %vm3742_vm11 = vcmp.gt.s32.totalorder %v3741_v33, 0  ;;  %4585 = vmatprep.subr.bf16.mxu1 %v7386_v34  ;;  %v7387_v24 = vld [vmem:[%s13122_s4 + $0x80] ss:$8 sps:$4 sm:$0xff]   ;;  %v13456_v59 = vld [vmem:[#allocation4_spill] sm:$0xff] }
 0x3b7   :  { %v12223_v61 = vadd.s32 127, %v3703_v42  ;;  %v3501_v26 = vcvt.s32.f32 %v3494_v31  ;;  %v3738_v57 = vand.u32 8388607, %v3731_v63  ;;  %v3743_v35 = vsel %vm3742_vm11, %v3741_v33, 0 }
 0x3b8   :  { %v3701_v18 = vshrl.u32 %v13454_v11, %v13453_v19  ;;  %vm3407_vm12 = vweird.f32 %v11714_v20  ;;  %v12228_v48 = vshrl.u32 %v3584_v8, 30  ;;  %v3745_v9 = vand.u32 31, %v3743_v35  ;;  %v7392_v20 = vld [vmem:[%s13122_s4 + $0x94] ss:$8 sps:$4 sm:$0xff]  }
 0x3b9   :  { %v3901_v34 = vmul.f32 %v11767_v50, %v13455_v32  ;;  %v3418_v7 = vsel %vm3407_vm12, nan, %v3417_v10  ;;  %v3502_v29 = vmul.f32 %v3501_v26, %v3499_v60  ;;  %4586 = vmatpush1.bf16.msra.mxu1 %v7384_v58  ;;  %v4246_v42 = vpack.c.bf16 %v11975_v16, %v11953_v15 }
 0x3ba   :  { %v3586_v31 = vshll.u32 %v12228_v48, 30  ;;  %v3746_v51 = vsub.s32 32, %v3745_v9  ;;  %4587 = vmatprep.subr.bf16.mxu1 %v7389_v1  ;;  %v12244_v0 = vor.u32 %v3701_v18, %v3700_v23  ;;  %v3705_v60 = vshll.u32 %v12223_v61, 23  ;;  %v7402_v61 = vld [vmem:[%s13122_s4 + $0xd0] ss:$8 sps:$4 sm:$0xff]  }
 0x3bb   :  { %v12242_v33 = vadd.f32 %v3901_v34, %v13456_v59  ;;  %v3739_v58 = vor.u32 8388608, %v3738_v57  ;;  %v3866_v19 = vmul.f32 %v11782_v17, %v3418_v7  ;;  %v3902_v11 = vmul.f32 %v11767_v50, %v11668_v45  ;;  %v7390_v45 = vld [vmem:[%s13122_s4 + $0x90] ss:$8 sps:$4 sm:$0xff]  }
 0x3bc   :  { %v12250_v10 = vsub.s32 %v3583_v4, %v3586_v31  ;;  %v12252_v8 = vshrl.u32 %v3743_v35, 5  ;;  %6741 = vmatmul.mubr.msk.bf16.gmra.mrb[16].mxu1 %vm4003_vm4, %v3951_v37  ;;  %v3503_v1 = vxor.u32 2147483648, %v3502_v29  ;;  %v3748_v23 = vshll.u32 %v13238_v53, %v3745_v9  ;;  %v7395_v37 = vld [vmem:[%s13122_s4 + $0xa4] ss:$8 sps:$4 sm:$0xff]  }
 0x3bd   :  { %v3749_v18 = vshrl.u32 %v13267_v5, %v3746_v51  ;;  %v3752_v26 = vshrl.u32 %v13233_v46, %v3746_v51  ;;  %4214 = vmatprep.mubr.bf16.mxu1 %v13349_v38  ;;  %4588 = vmatpush1.bf16.msra.mxu1 %v7387_v24  ;;  %v3751_v17 = vshll.u32 %v13267_v5, %v3745_v9  ;;  %vm3421_vm13 = vcmp.lt.s32.totalorder %v11752_v3, 0 }
 0x3be   :  { %v3589_v50 = vsub.s32 0, %v12250_v10  ;;  %v3754_v39 = vshll.u32 %v13233_v46, %v3745_v9  ;;  %v3755_v56 = vshrl.u32 %v13266_v14, %v3746_v51  ;;  %4589 = vmatprep.subr.bf16.mxu1 %v7392_v20  ;;  %v3757_v4 = vshll.u32 %v13266_v14, %v3745_v9  ;;  %v7393_v14 = vld [vmem:[%s13122_s4 + $0xa0] ss:$8 sps:$4 sm:$0xff]  }
 0x3bf   :  { %v3758_v57 = vshrl.u32 %v13410_v30, %v3746_v51  ;;  %v12275_v35 = vshll.u32 %v3739_v58, 8  ;;  %v3750_v5 = vor.u32 %v3749_v18, %v3748_v23  ;;  %v3753_v34 = vor.u32 %v3752_v26, %v3751_v17  ;;  %v7396_v18 = vld [vmem:[%s13122_s4 + $0xb0] ss:$8 sps:$4 sm:$0xff]  }
 0x3c0   :  { %v6708_v32 = vmin.u32 %v3589_v50, %v12250_v10  ;;  %v3756_v46 = vor.u32 %v3755_v56, %v3754_v39  ;;  %v3934_v7 = vadd.f32 %v3902_v11, %v3866_v19  ;;  %v3760_v31 = vshll.u32 %v13410_v30, %v3745_v9  ;;  %v7398_v30 = vld [vmem:[%s13122_s4 + $0xb4] ss:$8 sps:$4 sm:$0xff]   ;;  %v7401_v39 = vld [vmem:[%s13122_s4 + $0xc4] ss:$8 sps:$4 sm:$0xff]  }
 0x3c1   :  { %v3759_v24 = vor.u32 %v3758_v57, %v3757_v4  ;;  %v3761_v20 = vshrl.u32 %v13411_v36, %v3746_v51  ;;  %4590 = vmatpush1.bf16.msra.mxu1 %v7390_v45  ;;  %v3504_v59 = vsel %vm3421_vm13, %v3503_v1, %v3502_v29  ;;  %v3747_v50 = vshrl.u32 %v13238_v53, %v3746_v51 }
 0x3c2   :  { %v3591_v58 = vclz %v6708_v32  ;;  %vm3763_vm14 = vcmp.lt.s32.totalorder %v12252_v8, 1  ;;  %4591 = vmatprep.subr.bf16.mxu1 %v7395_v37  ;;  %vm3764_vm15 = vcmp.lt.s32.totalorder %v12252_v8, 2  ;;  %vm3765_vm0 = vcmp.lt.s32.totalorder %v12252_v8, 3 }
 0x3c3   :  { %v3762_v9 = vor.u32 %v3761_v20, %v3760_v31  ;;  %vm3766_vm1 = vcmp.lt.s32.totalorder %v12252_v8, 4  ;;  %v3771_v29 = vsel %vm3763_vm14, %v3750_v5, %v3753_v34  ;;  %v3767_v1 = vsel %vm3763_vm14, %v3747_v50, %v3750_v5  ;;  %v7399_v50 = vld [vmem:[%s13122_s4 + $0xc0] ss:$8 sps:$4 sm:$0xff]   ;;  %v7404_v8 = vld [vmem:[%s13122_s4 + $0xd4] ss:$8 sps:$4 sm:$0xff]  }
 0x3c4   :  { %v6709_v36 = vadd.s32 4294967294, %v3591_v58  ;;  %v3768_v19 = vsel %vm3766_vm1, %v3756_v46, 2102212464  ;;  %v3772_v11 = vsel %vm3766_vm1, %v3759_v24, 920167782  ;;  %v3775_v51 = vsel %vm3763_vm14, %v3753_v34, %v3756_v46 }
 0x3c5   :  { %v3773_v53 = vsel %vm3765_vm0, %v3756_v46, %v3772_v11  ;;  %v3776_v23 = vsel %vm3766_vm1, %v3762_v9, 1326507024  ;;  %4592 = vmatpush1.bf16.msra.mxu1 %v7393_v14  ;;  %v3769_v26 = vsel %vm3765_vm0, %v3753_v34, %v3768_v19  ;;  %v13457_v32 = vand.u32 2147483647, %v11752_v3 }
 0x3c6   :  { %vm6710_vm2 = vcmp.lt.s32.totalorder %v6709_v36, 0  ;;  %v3774_v45 = vsel %vm3764_vm15, %v3771_v29, %v3773_v53  ;;  %v3777_v17 = vsel %vm3765_vm0, %v3759_v24, %v3776_v23  ;;  %4593 = vmatprep.subr.bf16.mxu1 %v7398_v30  ;;  %v3579_v34 = vadd.s32 %v12141_v25, %v12166_v44 }
 0x3c7   :  { %v3594_v56 = vsel %vm6710_vm2, 0, %v6709_v36  ;;  %v3778_v37 = vsel %vm3764_vm15, %v3775_v51, %v3777_v17  ;;  %v12304_v4 = vmul.u32.u64.low %v12275_v35, %v3774_v45  ;;  %v12305_v57 = vmul.u32.u64.high %v12275_v35, %v3774_v45, %v12304_v4 }
 0x3c8   :  { %vm12310_vm3 = vcmp.le.f32.partialorder %v13457_v32, 0.7853982  ;;  %v3595_v46 = vsub.s32 32, %v3594_v56  ;;  %v3599_v24 = vsub.s32 4294967266, %v3594_v56  ;;  %v3770_v20 = vsel %vm3764_vm15, %v3767_v1, %v3769_v26  ;;  %v13461_v26 = vld [vmem:[#allocation8_spill] sm:$0xff] }
 0x3c9   :  { %v3507_v31 = vsel %vm12310_vm3, %v11752_v3, %v3504_v59  ;;  %v12322_v14 = vmul.u32.u64.low %v12275_v35, %v3778_v37  ;;  %v12323_v58 = vmul.u32.u64.high %v12275_v35, %v3778_v37, %v12322_v14  ;;  %4594 = vmatpush1.bf16.msra.mxu1 %v7396_v18  ;;  %v3596_v25 = vshll.u32 %v12250_v10, %v3594_v56  ;;  %v13460_v18 = vld [vmem:[#allocation10_spill] sm:$0xff] }
 0x3ca   :  { %v3597_v44 = vshrl.u32 %v3579_v34, %v3595_v46  ;;  %v3600_v30 = vadd.s32 127, %v3599_v24  ;;  %v3952_v9 = vpack.c.bf16 %v3934_v7, %v12242_v33  ;;  %4595 = vmatprep.subr.bf16.mxu1 %v7401_v39  ;;  %v3706_v59 = vor.u32 4788187, %v3705_v60  ;;  %v7410_v24 = vld [vmem:[%s13122_s4 + $0xf4] ss:$8 sps:$4 sm:$0xff]  }
 0x3cb   :  { %v3505_v36 = vsub.s32 4, %v12058_v62  ;;  %v3789_v19 = vadd.s32 1, %v12305_v57  ;;  %7635 = vcosq.f32 %v3507_v31  ;;  %v4247_v33 = vpack.c.bf16 %v12010_v21, %v11984_v6 }
 0x3cc   :  { %v3598_v29 = vor.u32 %v3597_v44, %v3596_v25  ;;  %v3601_v11 = vshll.u32 %v3600_v30, 23  ;;  %6742 = vmatmul.mubr.msk.bf16.gmra.mrb[20].mxu1 %vm4003_vm4, %v3952_v9  ;;  %7637 = vsinq.f32 %v3507_v31  ;;  %v3786_v10 = vmul.u32 %v12275_v35, %v3770_v20  ;;  %v7407_v35 = vld [vmem:[%s13122_s4 + $0xe4] ss:$8 sps:$4 sm:$0xff]   ;;  %v7408_v44 = vld [vmem:[%s13122_s4 + $0xf0] ss:$8 sps:$4 sm:$0xff]  }
 0x3cd   :  { %vm3788_vm5 = vc.u32 %v12323_v58, %v12304_v4  ;;  %4224 = vmatprep.mubr.bf16.mxu1 %v13349_v38  ;;  %4596 = vmatpush1.bf16.msra.mxu1 %v7399_v50  ;;  %v3709_v60 = vcvt.s32.f32 %v12244_v0  ;;  %v3707_v53 = vand.u32 2147483647, %v3706_v59  ;;  %v3506_v51 = vsel %vm3421_vm13, %v3505_v36, %v12058_v62 }
 0x3ce   :  { %v3602_v7 = vor.u32 4788187, %v3601_v11  ;;  %v3790_v1 = vsel %vm3788_vm5, %v3789_v19, %v12305_v57  ;;  %4597 = vmatprep.subr.bf16.mxu1 %v7404_v8  ;;  %v4248_v45 = vpack.c.bf16 %v13461_v26, %v13460_v18  ;;  %v3605_v39 = vcvt.s32.f32 %v3598_v29  ;;  %v7405_v57 = vld [vmem:[%s13122_s4 + $0xe0] ss:$8 sps:$4 sm:$0xff]  }
 0x3cf   :  { %v3791_v23 = vadd.s32 %v3790_v1, %v3786_v10  ;;  %v4249_v0 = vpack.c.bf16 %v12158_v54, %v12136_v43  ;;  %v4250_v56 = vpack.c.bf16 %v12172_v2, %v12149_v40  ;;  %v4251_v62 = vpack.c.bf16 %v12211_v22, %v12196_v55  ;;  %v13465_v10 = vld [vmem:[#allocation18_spill] sm:$0xff] }
 0x3d0   :  { %v3603_v17 = vand.u32 2147483647, %v3602_v7  ;;  %v3508_v32 = vsel %vm12310_vm3, 0, %v3506_v51  ;;  %v3609_v46 = vsub.s32 4, %v12228_v48  ;;  %v4252_v31 = vpack.c.bf16 %v12219_v13, %v12202_v41 }
 0x3d1   :  { %v3792_v37 = vadd.s32 536870912, %v3791_v23  ;;  %4598 = vmatpush1.bf16.msra.mxu1 %v7402_v61  ;;  %v3710_v14 = vmul.f32 %v3709_v60, %v3707_v53  ;;  %v3512_v25 = vadd.s32 3, %v3508_v32  ;;  %vm3525_vm6 = vcmp.lt.s32.totalorder %v11923_v52, 0 }
 0x3d2   :  { %v3606_v34 = vmul.f32 %v3605_v39, %v3603_v17  ;;  %4599 = vmatprep.subr.bf16.mxu1 %v7407_v35  ;;  %v13462_v9 = vand.u32 2147483647, %v11923_v52  ;;  %v3610_v36 = vsel %vm3525_vm6, %v3609_v46, %v12228_v48  ;;  %vm3629_vm8 = vcmp.lt.s32.totalorder %v13465_v10, 0 }
 0x3d3   :  { %v12374_v20 = vshrl.u32 %v3792_v37, 30  ;;  %v3711_v61 = vxor.u32 2147483648, %v3710_v14  ;;  %v3513_v60 = vand.u32 3, %v3512_v25  ;;  %v13466_v51 = vand.u32 2147483647, %v13465_v10 }
 0x3d4   :  { %v3607_v50 = vxor.u32 2147483648, %v3606_v34  ;;  %vm12383_vm7 = vcmp.le.f32.partialorder %v13462_v9, 0.7853982  ;;  %vm3511_vm14 = vweird.f32 %v11752_v3  ;;  %vm3615_vm1 = vweird.f32 %v11923_v52 }
 0x3d5   :  { %v3794_v5 = vshll.u32 %v12374_v20, 30  ;;  %4600 = vmatpush1.bf16.msra.mxu1 %v7405_v57  ;;  %v7636_v30 = vpop.eup %7635  ;;  %v3612_v7 = vsel %vm12383_vm7, 0, %v3610_v36  ;;  %vm12396_vm9 = vcmp.le.f32.partialorder %v13466_v51, 0.7853982  ;;  %vm3515_vm10 = vcmp.eq.s32.totalorder %v3513_v60, 0 }
 0x3d6   :  { %v3608_v59 = vsel %vm3525_vm6, %v3607_v50, %v3606_v34  ;;  %4601 = vmatprep.subr.bf16.mxu1 %v7410_v24  ;;  %v7638_v19 = vpop.eup %7637  ;;  %v3519_v48 = vxor.u32 2147483648, %v7636_v30  ;;  %v3616_v39 = vadd.s32 3, %v3612_v7  ;;  %vm3518_vm11 = vcmp.eq.s32.totalorder %v3513_v60, 2 }
 0x3d7   :  { %v3611_v29 = vsel %vm12383_vm7, %v11923_v52, %v3608_v59  ;;  %v3795_v11 = vsub.s32 %v3791_v23, %v3794_v5  ;;  %v3516_v35 = vxor.u32 2147483648, %v7638_v19  ;;  %v3712_v23 = vsel %vm3629_vm8, %v3711_v61, %v3710_v14  ;;  %v13469_v5 = vld [vmem:[#allocation16_spill] sm:$0xff]  ;;  %v13470_v52 = vld [vmem:[#allocation21_spill] sm:$0xff] }
 0x3d8   :  { %7639 = vcosq.f32 %v3611_v29  ;;  %v3520_v32 = vsel %vm3518_vm11, %v3519_v48, %v7638_v19  ;;  %v3715_v34 = vsel %vm12396_vm9, %v13465_v10, %v3712_v23  ;;  %vm3514_vm12 = vcmp.lt.s32.totalorder %v3513_v60, 2 }
 0x3d9   :  { %7641 = vsinq.f32 %v3611_v29  ;;  %v3797_v1 = vsub.s32 0, %v3795_v11  ;;  %4602 = vmatpush1.bf16.msra.mxu1 %v7408_v44  ;;  %v3517_v57 = vsel %vm3515_vm10, %v7636_v30, %v3516_v35  ;;  %v3617_v24 = vand.u32 3, %v3616_v39  ;;  %v12413_v35 = vld [vmem:[%s13120_s1 + $0x3] ss:$0 sm:$0xff] }
 0x3da   :  { %v3521_v50 = vsel %vm3514_vm12, %v3517_v57, %v3520_v32  ;;  %v3713_v44 = vsub.s32 4, %v13469_v5  ;;  %7643 = vcosq.f32 %v3715_v34  ;;  %v3787_v30 = vadd.s32 %v12304_v4, %v12323_v58 }
 0x3db   :  { %v6716_v53 = vmin.u32 %v3797_v1, %v3795_v11  ;;  %v3522_v19 = vsel %vm3511_vm14, nan, %v3521_v50  ;;  %vm3619_vm15 = vcmp.eq.s32.totalorder %v3617_v24, 0  ;;  %vm3622_vm0 = vcmp.eq.s32.totalorder %v3617_v24, 2 }
 0x3dc   :  { %vm3618_vm2 = vcmp.lt.s32.totalorder %v3617_v24, 2  ;;  %v3867_v4 = vmul.f32 %v12413_v35, %v3522_v19  ;;  %7645 = vsinq.f32 %v3715_v34  ;;  %v7815_v34 = vmov 1966171168  }
 0x3dd   :  { %v3799_v37 = vclz %v6716_v53  ;;  %v4288_v24 = vunpack.c.l.s4 %v7815_v34  ;;  %v4290_v50 = vlaneseq  ;;  %vm3733_vm3 = vcmp.lt.s32.totalorder %v12118_v28, 0 }
 0x3de   :  { %vm3732_vm5 = vcmp.le.f32.partialorder %v3731_v63, 0.7853982 }
 0x3df   :  { %v6717_v46 = vadd.s32 4294967294, %v3799_v37  ;;  %v13471_v37 = vld [vmem:[#allocation6_spill] sm:$0xff] }
 0x3e1   :  { %vm6718_vm13 = vcmp.lt.s32.totalorder %v6717_v46, 0 }
 0x3e2   :  { %v7640_v25 = vpop.eup %7639  ;;  %v3802_v14 = vsel %vm6718_vm13, 0, %v6717_v46  ;;  %v3714_v46 = vsel %vm3629_vm8, %v3713_v44, %v13469_v5  ;;  %vm3823_vm13 = vweird.f32 %v12118_v28 }
 0x3e3   :  { %v7642_v9 = vpop.eup %7641  ;;  %v3623_v8 = vxor.u32 2147483648, %v7640_v25  ;;  %v3803_v59 = vsub.s32 32, %v3802_v14  ;;  %v3807_v36 = vsub.s32 4294967266, %v3802_v14  ;;  %v3804_v60 = vshll.u32 %v3795_v11, %v3802_v14  ;;  %v12419_v11 = vld [vmem:[%s13120_s1 + $0x4] ss:$0 sm:$0xff] }
 0x3e4   :  { %v3620_v29 = vxor.u32 2147483648, %v7642_v9  ;;  %v3903_v23 = vmul.f32 %v12419_v11, %v13470_v52  ;;  %v3904_v57 = vmul.f32 %v12419_v11, %v13471_v37  ;;  %v3716_v19 = vsel %vm12396_vm9, 0, %v3714_v46 }
 0x3e5   :  { %v3624_v61 = vsel %vm3622_vm0, %v3623_v8, %v7642_v9  ;;  %v3805_v7 = vshrl.u32 %v3787_v30, %v3803_v59  ;;  %v3808_v1 = vadd.s32 127, %v3807_v36  ;;  %v12429_v30 = vpop.f32.mrb[16].mxu0  ;;  %v7644_v59 = vpop.eup %7643  ;;  %vm3719_vm9 = vweird.f32 %v13465_v10 }
 0x3e6   :  { %v3621_v3 = vsel %vm3619_vm15, %v7640_v25, %v3620_v29  ;;  %v3935_v25 = vadd.f32 %v3903_v23, %v3867_v4  ;;  %v12431_v36 = vpop.f32.mrb[17].mxu0  ;;  %v4291_v4 = vshrl.u32 %v4290_v50, 7  ;;  %v7646_v52 = vpop.eup %7645  ;;  %v3727_v34 = vxor.u32 2147483648, %v7644_v59 }
 0x3e7   :  { %v3625_v58 = vsel %vm3618_vm2, %v3621_v3, %v3624_v61  ;;  %v3806_v48 = vor.u32 %v3805_v7, %v3804_v60  ;;  %v3809_v53 = vshll.u32 %v3808_v1, 23  ;;  %v3817_v61 = vsub.s32 4, %v12374_v20  ;;  %v12436_v5 = vpop.f32.mrb[18].mxu0 }
 0x3e8   :  { %v3626_v51 = vsel %vm3615_vm1, nan, %v3625_v58  ;;  %v4253_v44 = vpack.c.bf16 %v12436_v5, %v12429_v30  ;;  %v12440_v7 = vpop.f32.mrb[19].mxu0  ;;  %v4289_v3 = vunpack.c.0.s8 %v4288_v24  ;;  %v3720_v58 = vadd.s32 3, %v3716_v19 }
 0x3e9   :  { %v3868_v39 = vmul.f32 %v12413_v35, %v3626_v51  ;;  %v3810_v32 = vor.u32 4788187, %v3809_v53  ;;  %v3813_v8 = vcvt.s32.f32 %v3806_v48  ;;  %v4254_v17 = vpack.c.bf16 %v12440_v7, %v12431_v36  ;;  %v6745_v48 = vld.sshfl [vmem:[%s13123_s3] sm:$0x11 pattern:$0x75316420] }
 0x3ea   :  { %v3818_v51 = vsel %vm3733_vm3, %v3817_v61, %v12374_v20  ;;  %v4286_v37 = vcombine.high %v6745_v48, %v6745_v48  ;;  %v3724_v46 = vxor.u32 2147483648, %v7646_v52 }
 0x3eb   :  { %v3936_v14 = vadd.f32 %v3904_v57, %v3868_v39  ;;  %v3811_v9 = vand.u32 2147483647, %v3810_v32  ;;  %v12454_v39 = vsub.s32 %v4289_v3, %v4291_v4  ;;  %v3721_v57 = vand.u32 3, %v3720_v58 }
 0x3ec   :  { %v3820_v32 = vsel %vm3732_vm5, 0, %v3818_v51 }
 0x3ed   :  { %v3814_v29 = vmul.f32 %v3813_v8, %v3811_v9  ;;  %v3953_v60 = vpack.c.bf16 %v3936_v14, %v3935_v25  ;;  %v3824_v24 = vadd.s32 3, %v3820_v32  ;;  %v4300_v50 = vrot.slane %v4286_v37, %v12454_v39 }
 0x3ee   :  { %vm3723_vm6 = vcmp.eq.s32.totalorder %v3721_v57, 0  ;;  %vm3726_vm7 = vcmp.eq.s32.totalorder %v3721_v57, 2  ;;  %vm3722_vm8 = vcmp.lt.s32.totalorder %v3721_v57, 2  ;;  %v12457_v14 = vsub.s32 0, %v4291_v4 }
 0x3ef   :  { %v3815_v1 = vxor.u32 2147483648, %v3814_v29  ;;  %6743 = vmatmul.mubr.msk.bf16.gmra.mrb[24].mxu1 %vm4003_vm4, %v3953_v60  ;;  %v3725_v63 = vsel %vm3723_vm6, %v7644_v59, %v3724_v46  ;;  %v3728_v25 = vsel %vm3726_vm7, %v3727_v34, %v7646_v52  ;;  %v3825_v20 = vand.u32 3, %v3824_v24 }
 0x3f0   :  { %4234 = vmatprep.mubr.bf16.mxu1 %v13349_v38  ;;  %v4309_v9 = vpack.i.b16 %v4300_v50, %v4300_v50  ;;  %v3729_v8 = vsel %vm3722_vm8, %v3725_v63, %v3728_v25  ;;  %v4293_v58 = vrot.slane %v6745_v48, %v12454_v39  ;;  %v3906_v48 = vmul.f32 %v12419_v11, %v12092_v27 }
 0x3f1   :  { %v3816_v53 = vsel %vm3733_vm3, %v3815_v1, %v3814_v29  ;;  %v3730_v60 = vsel %vm3719_vm9, nan, %v3729_v8  ;;  %vm3830_vm10 = vcmp.eq.s32.totalorder %v3825_v20, 2  ;;  %vm3827_vm11 = vcmp.eq.s32.totalorder %v3825_v20, 0 }
 0x3f2   :  { %v3819_v23 = vsel %vm3732_vm5, %v12118_v28, %v3816_v53  ;;  %v12461_v3 = vrot.slane %v4309_v9, %v12457_v14  ;;  %vm3826_vm12 = vcmp.lt.s32.totalorder %v3825_v20, 2  ;;  %v3869_v53 = vmul.f32 %v12413_v35, %v3730_v60  ;;  %v7416_v60 = vld [vmem:[%s13124_s6 + $0x14] ss:$8 sps:$4 sm:$0xff]  }
 0x3f3   :  { %7647 = vcosq.f32 %v3819_v23  ;;  %v4302_v32 = vpack.i.b16 %v4293_v58, %v4293_v58  ;;  %v7422_v58 = vld [vmem:[%s13124_s6 + $0x34] ss:$8 sps:$4 sm:$0xff]  }
 0x3f4   :  { %7649 = vsinq.f32 %v3819_v23  ;;  %v4316_v10 = vadd.bf16 %v12461_v3, %v4246_v42  ;;  %v13472_v23 = vld [vmem:[#allocation17_spill] sm:$0xff]  ;;  %v4318_v15 = vadd.bf16 %v12461_v3, %v4248_v45  ;;  %v4324_v41 = vadd.bf16 %v12461_v3, %v4254_v17 }
 0x3f5   :  { %v3905_v37 = vmul.f32 %v12419_v11, %v13472_v23  ;;  %v12477_v50 = vrot.slane %v4302_v32, %v12457_v14  ;;  %v7431_v23 = vld [vmem:[%s13124_s6 + $0x64] ss:$8 sps:$4 sm:$0xff]   ;;  %v7429_v32 = vld [vmem:[%s13124_s6 + $0x60] ss:$8 sps:$4 sm:$0xff]  }
 0x3f6   :  { %v4348_v28 = vmax.bf16 %v13349_v38, %v4316_v10  ;;  %v4350_v27 = vmax.bf16 %v13349_v38, %v4318_v15  ;;  %v7428_v10 = vld [vmem:[%s13124_s6 + $0x54] ss:$8 sps:$4 sm:$0xff]  }
 0x3f7   :  { %v3937_v46 = vadd.f32 %v3905_v37, %v3869_v53  ;;  %v4315_v16 = vadd.bf16 %v12477_v50, %v4245_v49  ;;  %v4317_v18 = vadd.bf16 %v12477_v50, %v4247_v33  ;;  %v4322_v49 = vadd.bf16 %v12461_v3, %v4252_v31  ;;  %v7425_v53 = vld [vmem:[%s13124_s6 + $0x44] ss:$8 sps:$4 sm:$0xff]  }
 0x3f8   :  { %v4319_v40 = vadd.bf16 %v12477_v50, %v4249_v0  ;;  %v4321_v43 = vadd.bf16 %v12477_v50, %v4251_v62  ;;  %v4356_v0 = vmax.bf16 %v13349_v38, %v4324_v41  ;;  %v4323_v55 = vadd.bf16 %v12477_v50, %v4253_v44  ;;  %v7411_v44 = vld [vmem:[%s13124_s6] ss:$8 sps:$4 sm:$0xff]  }
 0x3f9   :  { %v4347_v42 = vmax.bf16 %v13349_v38, %v4315_v16  ;;  %v4349_v12 = vmax.bf16 %v13349_v38, %v4317_v18  ;;  %v4354_v6 = vmax.bf16 %v13349_v38, %v4322_v49 }
 0x3fa   :  { %v4351_v21 = vmax.bf16 %v13349_v38, %v4319_v40  ;;  %v4355_v25 = vmax.bf16 %v13349_v38, %v4323_v55  ;;  %v7446_v55 = vld [vmem:[%s13124_s6 + $0xb4] ss:$8 sps:$4 sm:$0xff]  }
 0x3fd   :  { %v7648_v19 = vpop.eup %7647 }
 0x3fe   :  { %v7650_v29 = vpop.eup %7649  ;;  %v3831_v61 = vxor.u32 2147483648, %v7648_v19 }
 0x3ff   :  { %v3828_v1 = vxor.u32 2147483648, %v7650_v29 }
 0x400   :  { %v3832_v59 = vsel %vm3830_vm10, %v3831_v61, %v7650_v29  ;;  %v7413_v29 = vld [vmem:[%s13124_s6 + $0x4] ss:$8 sps:$4 sm:$0xff]   ;;  %v7414_v61 = vld [vmem:[%s13124_s6 + $0x10] ss:$8 sps:$4 sm:$0xff]  }
 0x401   :  { %v3829_v4 = vsel %vm3827_vm11, %v7648_v19, %v3828_v1  ;;  %5090 = vmatprep.subr.bf16.mxu0 %v7413_v29  ;;  %v7419_v1 = vld [vmem:[%s13124_s6 + $0x24] ss:$8 sps:$4 sm:$0xff]  }
 0x402   :  { %v3833_v51 = vsel %vm3826_vm12, %v3829_v4, %v3832_v59  ;;  %5091 = vmatpush1.bf16.msra.mxu0 %v7411_v44  ;;  %v7417_v59 = vld [vmem:[%s13124_s6 + $0x20] ss:$8 sps:$4 sm:$0xff]   ;;  %v7420_v4 = vld [vmem:[%s13124_s6 + $0x30] ss:$8 sps:$4 sm:$0xff]  }
 0x403   :  { %v3834_v52 = vsel %vm3823_vm13, nan, %v3833_v51  ;;  %5092 = vmatprep.subr.bf16.mxu0 %v7416_v60  ;;  %v7423_v51 = vld [vmem:[%s13124_s6 + $0x40] ss:$8 sps:$4 sm:$0xff]  }
 0x404   :  { %v3870_v57 = vmul.f32 %v12413_v35, %v3834_v52  ;;  %v4320_v35 = vadd.bf16 %v12461_v3, %v4250_v56  ;;  %v4353_v56 = vmax.bf16 %v13349_v38, %v4321_v43  ;;  %v7426_v52 = vld [vmem:[%s13124_s6 + $0x50] ss:$8 sps:$4 sm:$0xff]  }
 0x406   :  { %v3938_v34 = vadd.f32 %v3906_v48, %v3870_v57  ;;  %v4352_v47 = vmax.bf16 %v13349_v38, %v4320_v35  ;;  %5093 = vmatpush1.bf16.msra.mxu0 %v7414_v61  ;;  %v7432_v35 = vld [vmem:[%s13124_s6 + $0x70] ss:$8 sps:$4 sm:$0xff]   ;;  %v7447_v61 = vld [vmem:[%s13124_s6 + $0xc0] ss:$8 sps:$4 sm:$0xff]  }
 0x407   :  { %5094 = vmatprep.subr.bf16.mxu0 %v7419_v1  ;;  %v7452_v1 = vld [vmem:[%s13124_s6 + $0xd4] ss:$8 sps:$4 sm:$0xff]  }
 0x408   :  { %v3954_v24 = vpack.c.bf16 %v3938_v34, %v3937_v46 }
 0x40a   :  { %6744 = vmatmul.mubr.msk.bf16.gmra.mrb[28].mxu1 %vm4003_vm4, %v3954_v24  ;;  %5095 = vmatpush1.bf16.msra.mxu0 %v7417_v59 }
 0x40b   :  { %4603 = vmatprep.mubr.bf16.mxu1 %v4348_v28  ;;  %5096 = vmatprep.subr.bf16.mxu0 %v7422_v58  ;;  %v7434_v28 = vld [vmem:[%s13124_s6 + $0x74] ss:$8 sps:$4 sm:$0xff]  }
 0x40e   :  { %5097 = vmatpush1.bf16.msra.mxu0 %v7420_v4 }
 0x40f   :  { %5098 = vmatprep.subr.bf16.mxu0 %v7425_v53 }
 0x412   :  { %4604 = vmatmul.mubr.bf16.vlgmr.msra.gmra.mrb[32].mxu1 %v4347_v42  ;;  %5099 = vmatpush1.bf16.msra.mxu0 %v7423_v51  ;;  %v7450_v51 = vld [vmem:[%s13124_s6 + $0xd0] ss:$8 sps:$4 sm:$0xff]  }
 0x413   :  { %4613 = vmatprep.mubr.bf16.mxu1 %v4350_v27  ;;  %5100 = vmatprep.subr.bf16.mxu0 %v7428_v10  ;;  %v7455_v10 = vld [vmem:[%s13124_s6 + $0xe4] ss:$8 sps:$4 sm:$0xff]  }
 0x416   :  { %5101 = vmatpush1.bf16.msra.mxu0 %v7426_v52 }
 0x417   :  { %5102 = vmatprep.subr.bf16.mxu0 %v7431_v23 }
 0x41a   :  { %4614 = vmatmul.mubr.bf16.gmra.mrb[36].mxu1 %v4349_v12  ;;  %5103 = vmatpush1.bf16.msra.mxu0 %v7429_v32  ;;  %v7453_v32 = vld [vmem:[%s13124_s6 + $0xe0] ss:$8 sps:$4 sm:$0xff]  }
 0x41b   :  { %4623 = vmatprep.mubr.bf16.mxu1 %v4352_v47  ;;  %v4136_v2 = vpop.f32.mrb[20].mxu0  ;;  %5104 = vmatprep.subr.bf16.mxu0 %v7434_v28  ;;  %v7437_v47 = vld [vmem:[%s13124_s6 + $0x84] ss:$8 sps:$4 sm:$0xff]  }
 0x41c   :  { %v4138_v33 = vpop.f32.mrb[21].mxu0 }
 0x41d   :  { %v4140_v26 = vpop.f32.mrb[22].mxu0 }
 0x41e   :  { %v4255_v13 = vpack.c.bf16 %v4140_v26, %v4136_v2  ;;  %v4142_v45 = vpop.f32.mrb[23].mxu0  ;;  %5105 = vmatpush1.bf16.msra.mxu0 %v7432_v35  ;;  %v7435_v2 = vld [vmem:[%s13124_s6 + $0x80] ss:$8 sps:$4 sm:$0xff]   ;;  %v7440_v26 = vld [vmem:[%s13124_s6 + $0x94] ss:$8 sps:$4 sm:$0xff]  }
 0x41f   :  { %v4256_v54 = vpack.c.bf16 %v4142_v45, %v4138_v33  ;;  %5106 = vmatprep.subr.bf16.mxu0 %v7437_v47 }
 0x420   :  { %v4325_v9 = vadd.bf16 %v12477_v50, %v4255_v13 }
 0x421   :  { %v4326_v36 = vadd.bf16 %v12461_v3, %v4256_v54  ;;  %v7438_v54 = vld [vmem:[%s13124_s6 + $0x90] ss:$8 sps:$4 sm:$0xff]  }
 0x422   :  { %4624 = vmatmul.mubr.bf16.gmra.mrb[40].mxu1 %v4351_v21  ;;  %v4357_v19 = vmax.bf16 %v13349_v38, %v4325_v9  ;;  %5107 = vmatpush1.bf16.msra.mxu0 %v7435_v2  ;;  %v7444_v9 = vld [vmem:[%s13124_s6 + $0xb0] ss:$8 sps:$4 sm:$0xff]  }
 0x423   :  { %4633 = vmatprep.mubr.bf16.mxu1 %v4354_v6  ;;  %v4146_v31 = vpop.f32.mrb[24].mxu0  ;;  %v4358_v62 = vmax.bf16 %v13349_v38, %v4326_v36  ;;  %5108 = vmatprep.subr.bf16.mxu0 %v7440_v26 }
 0x424   :  { %v4148_v11 = vpop.f32.mrb[25].mxu0 }
 0x425   :  { %v4150_v63 = vpop.f32.mrb[26].mxu0 }
 0x426   :  { %v4257_v7 = vpack.c.bf16 %v4150_v63, %v4146_v31  ;;  %v4152_v17 = vpop.f32.mrb[27].mxu0  ;;  %5109 = vmatpush1.bf16.msra.mxu0 %v7438_v54 }
 0x427   :  { %v4258_v22 = vpack.c.bf16 %v4152_v17, %v4148_v11 }
 0x428   :  { %v4327_v30 = vadd.bf16 %v12477_v50, %v4257_v7  ;;  %v7441_v7 = vld [vmem:[%s13124_s6 + $0xa0] ss:$8 sps:$4 sm:$0xff]  }
 0x429   :  { %v4328_v20 = vadd.bf16 %v12461_v3, %v4258_v22 }
 0x42a   :  { %4634 = vmatmul.mubr.bf16.gmra.mrb[44].mxu1 %v4353_v56  ;;  %v4359_v5 = vmax.bf16 %v13349_v38, %v4327_v30  ;;  %v7443_v56 = vld [vmem:[%s13124_s6 + $0xa4] ss:$8 sps:$4 sm:$0xff]  }
 0x42b   :  { %4643 = vmatprep.mubr.bf16.mxu1 %v4356_v0  ;;  %v4360_v8 = vmax.bf16 %v13349_v38, %v4328_v20  ;;  %5110 = vmatprep.subr.bf16.mxu0 %v7443_v56 }
 0x42c   :  { %5111 = vmatpush1.bf16.msra.mxu0 %v7441_v7 }
 0x42d   :  { %5112 = vmatprep.subr.bf16.mxu0 %v7446_v55 }
 0x430   :  { %5113 = vmatpush1.bf16.msra.mxu0 %v7444_v9 }
 0x432   :  { %4644 = vmatmul.mubr.bf16.gmra.mrb[48].mxu1 %v4355_v25 }
 0x433   :  { %4653 = vmatprep.mubr.bf16.mxu1 %v4358_v62 }
 0x43a   :  { %4654 = vmatmul.mubr.bf16.gmra.mrb[52].mxu1 %v4357_v19  ;;  %v7449_v19 = vld [vmem:[%s13124_s6 + $0xc4] ss:$8 sps:$4 sm:$0xff]  }
 0x43b   :  { %4663 = vmatprep.mubr.bf16.mxu1 %v4360_v8  ;;  %5114 = vmatprep.subr.bf16.mxu0 %v7449_v19 }
 0x43c   :  { %5115 = vmatpush1.bf16.msra.mxu0 %v7447_v61 }
 0x43d   :  { %5116 = vmatprep.subr.bf16.mxu0 %v7452_v1 }
 0x440   :  { %5117 = vmatpush1.bf16.msra.mxu0 %v7450_v51 }
 0x441   :  { %5118 = vmatprep.subr.bf16.mxu0 %v7455_v10 }
 0x442   :  { %4664 = vmatmul.mubr.bf16.gmra.mrb[56].mxu1 %v4359_v5 }
 0x444   :  { %5119 = vmatpush1.bf16.msra.mxu0 %v7453_v32 }
 0x46a   :  { %v4156_v37 = vpop.f32.mrb[28].mxu0 }
 0x46b   :  { %v4158_v57 = vpop.f32.mrb[29].mxu0 }
 0x46c   :  { %v4160_v48 = vpop.f32.mrb[30].mxu0 }
 0x46d   :  { %v4259_v46 = vpack.c.bf16 %v4160_v48, %v4156_v37  ;;  %v4162_v34 = vpop.f32.mrb[31].mxu0 }
 0x46e   :  { %v4260_v24 = vpack.c.bf16 %v4162_v34, %v4158_v57  ;;  %v7458_v34 = vld [vmem:[%s13124_s6 + $0xf4] ss:$8 sps:$4 sm:$0xff]  }
 0x46f   :  { %v4329_v15 = vadd.bf16 %v12477_v50, %v4259_v46  ;;  %v4166_v16 = vpop.f32.mrb[0].mxu1  ;;  %5120 = vmatprep.subr.bf16.mxu0 %v7458_v34 }
 0x470   :  { %v4330_v27 = vadd.bf16 %v12461_v3, %v4260_v24  ;;  %v4168_v42 = vpop.f32.mrb[1].mxu1 }
 0x471   :  { %v4170_v18 = vpop.f32.mrb[2].mxu1  ;;  %v4361_v6 = vmax.bf16 %v13349_v38, %v4329_v15 }
 0x472   :  { %v4362_v12 = vmax.bf16 %v13349_v38, %v4330_v27  ;;  %v4261_v49 = vpack.c.bf16 %v4170_v18, %v4166_v16  ;;  %v4172_v40 = vpop.f32.mrb[3].mxu1  ;;  %v7456_v27 = vld [vmem:[%s13124_s6 + $0xf0] ss:$8 sps:$4 sm:$0xff]  }
 0x473   :  { %v4262_v21 = vpack.c.bf16 %v4172_v40, %v4168_v42  ;;  %5121 = vmatpush1.bf16.msra.mxu0 %v7456_v27 }
 0x474   :  { %4673 = vmatprep.mubr.bf16.mxu1 %v4362_v12  ;;  %v4331_v41 = vadd.bf16 %v12477_v50, %v4261_v49 }
 0x475   :  { %4674 = vmatmul.mubr.bf16.gmra.mrb[60].mxu1 %v4361_v6  ;;  %v4332_v33 = vadd.bf16 %v12461_v3, %v4262_v21 }
 0x476   :  { %v4363_v63 = vmax.bf16 %v13349_v38, %v4331_v41 }
 0x477   :  { %v4176_v13 = vpop.f32.mrb[4].mxu1  ;;  %v4364_v45 = vmax.bf16 %v13349_v38, %v4332_v33 }
 0x478   :  { %v4178_v43 = vpop.f32.mrb[5].mxu1 }
 0x479   :  { %4683 = vmatprep.mubr.bf16.mxu1 %v4364_v45  ;;  %v4180_v0 = vpop.f32.mrb[6].mxu1 }
 0x47a   :  { %v4263_v31 = vpack.c.bf16 %v4180_v0, %v4176_v13  ;;  %v4182_v11 = vpop.f32.mrb[7].mxu1 }
 0x47b   :  { %v4264_v36 = vpack.c.bf16 %v4182_v11, %v4178_v43 }
 0x47c   :  { %v4333_v22 = vadd.bf16 %v12477_v50, %v4263_v31 }
 0x47d   :  { %4684 = vmatmul.mubr.bf16.gmra.mrb[64].mxu1 %v4363_v63  ;;  %v4334_v17 = vadd.bf16 %v12461_v3, %v4264_v36 }
 0x47e   :  { %v4365_v44 = vmax.bf16 %v13349_v38, %v4333_v22 }
 0x47f   :  { %v4366_v62 = vmax.bf16 %v13349_v38, %v4334_v17  ;;  %v4186_v25 = vpop.f32.mrb[8].mxu1 }
 0x480   :  { %v4188_v20 = vpop.f32.mrb[9].mxu1 }
 0x481   :  { %4693 = vmatprep.mubr.bf16.mxu1 %v4366_v62  ;;  %v4190_v8 = vpop.f32.mrb[10].mxu1 }
 0x482   :  { %v4265_v30 = vpack.c.bf16 %v4190_v8, %v4186_v25  ;;  %v4192_v5 = vpop.f32.mrb[11].mxu1 }
 0x483   :  { %v4266_v29 = vpack.c.bf16 %v4192_v5, %v4188_v20  ;;  %v6778_v20 = vld.sshfl [vmem:[%s13125_s5] sm:$0x11 pattern:$0x75316420] }
 0x484   :  { %v4335_v59 = vadd.bf16 %v12477_v50, %v4265_v30  ;;  %v4805_v9 = vcombine.high %v6778_v20, %v6778_v20  ;;  %v4812_v30 = vrot.slane %v6778_v20, %v12454_v39 }
 0x485   :  { %4694 = vmatmul.mubr.bf16.gmra.mrb[68].mxu1 %v4365_v44  ;;  %v4336_v60 = vadd.bf16 %v12461_v3, %v4266_v29 }
 0x486   :  { %v4367_v57 = vmax.bf16 %v13349_v38, %v4335_v59  ;;  %v4819_v44 = vrot.slane %v4805_v9, %v12454_v39  ;;  %v4821_v59 = vpack.i.b16 %v4812_v30, %v4812_v30 }
 0x487   :  { %v4196_v58 = vpop.f32.mrb[12].mxu1  ;;  %v4368_v4 = vmax.bf16 %v13349_v38, %v4336_v60 }
 0x488   :  { %v4198_v53 = vpop.f32.mrb[13].mxu1 }
 0x489   :  { %4703 = vmatprep.mubr.bf16.mxu1 %v4368_v4  ;;  %v4200_v52 = vpop.f32.mrb[14].mxu1  ;;  %v4828_v4 = vpack.i.b16 %v4819_v44, %v4819_v44 }
 0x48a   :  { %v4267_v23 = vpack.c.bf16 %v4200_v52, %v4196_v58  ;;  %v4202_v37 = vpop.f32.mrb[15].mxu1 }
 0x48b   :  { %v4268_v48 = vpack.c.bf16 %v4202_v37, %v4198_v53 }
 0x48c   :  { %v4337_v28 = vadd.bf16 %v12477_v50, %v4267_v23  ;;  %v12671_v23 = vrot.slane %v4821_v59, %v12457_v14 }
 0x48d   :  { %4704 = vmatmul.mubr.bf16.gmra.mrb[72].mxu1 %v4367_v57  ;;  %v4338_v46 = vadd.bf16 %v12461_v3, %v4268_v48  ;;  %v12674_v57 = vrot.slane %v4828_v4, %v12457_v14 }
 0x48e   :  { %v4369_v47 = vmax.bf16 %v13349_v38, %v4337_v28 }
 0x48f   :  { %v4370_v24 = vmax.bf16 %v13349_v38, %v4338_v46  ;;  %v4206_v15 = vpop.f32.mrb[16].mxu1 }
 0x490   :  { %v4208_v16 = vpop.f32.mrb[17].mxu1 }
 0x491   :  { %4713 = vmatprep.mubr.bf16.mxu1 %v4370_v24  ;;  %v4210_v42 = vpop.f32.mrb[18].mxu1 }
 0x492   :  { %v4269_v35 = vpack.c.bf16 %v4210_v42, %v4206_v15  ;;  %v4212_v18 = vpop.f32.mrb[19].mxu1 }
 0x493   :  { %v4270_v12 = vpack.c.bf16 %v4212_v18, %v4208_v16 }
 0x494   :  { %v4339_v40 = vadd.bf16 %v12477_v50, %v4269_v35 }
 0x495   :  { %4714 = vmatmul.mubr.bf16.gmra.mrb[76].mxu1 %v4369_v47  ;;  %v4340_v49 = vadd.bf16 %v12461_v3, %v4270_v12 }
 0x496   :  { %v4371_v21 = vmax.bf16 %v13349_v38, %v4339_v40 }
 0x497   :  { %v4372_v6 = vmax.bf16 %v13349_v38, %v4340_v49 }
 0x499   :  { %4723 = vmatprep.mubr.bf16.mxu1 %v4372_v6 }
 0x49d   :  { %4724 = vmatmul.mubr.bf16.gmra.mrb[80].mxu1 %v4371_v21 }
 0x49f   :  { %v4216_v2 = vpop.f32.mrb[20].mxu1 }
 0x4a0   :  { %v4218_v33 = vpop.f32.mrb[21].mxu1 }
 0x4a1   :  { %v4220_v26 = vpop.f32.mrb[22].mxu1 }
 0x4a2   :  { %v4271_v41 = vpack.c.bf16 %v4220_v26, %v4216_v2  ;;  %v4222_v13 = vpop.f32.mrb[23].mxu1 }
 0x4a3   :  { %v4272_v45 = vpack.c.bf16 %v4222_v13, %v4218_v33 }
 0x4a4   :  { %v4341_v43 = vadd.bf16 %v12477_v50, %v4271_v41 }
 0x4a5   :  { %v4342_v54 = vadd.bf16 %v12461_v3, %v4272_v45 }
 0x4a6   :  { %v4373_v56 = vmax.bf16 %v13349_v38, %v4341_v43 }
 0x4a7   :  { %v4374_v0 = vmax.bf16 %v13349_v38, %v4342_v54 }
 0x4a9   :  { %4733 = vmatprep.mubr.bf16.mxu1 %v4374_v0 }
 0x4aa   :  { %4734 = vmatmul.mubr.bf16.gmra.mrb[84].mxu1 %v4373_v56 }
 0x4c2   :  { %v4226_v31 = vpop.f32.mrb[24].mxu1 }
 0x4c3   :  { %v4228_v11 = vpop.f32.mrb[25].mxu1 }
 0x4c4   :  { %v4230_v63 = vpop.f32.mrb[26].mxu1 }
 0x4c5   :  { %v4273_v36 = vpack.c.bf16 %v4230_v63, %v4226_v31  ;;  %v4232_v7 = vpop.f32.mrb[27].mxu1 }
 0x4c6   :  { %v4274_v17 = vpack.c.bf16 %v4232_v7, %v4228_v11 }
 0x4c7   :  { %v4343_v55 = vadd.bf16 %v12477_v50, %v4273_v36 }
 0x4c8   :  { %v4344_v22 = vadd.bf16 %v12461_v3, %v4274_v17  ;;  %v7459_v17 = vld [vmem:[%s13126_s8] ss:$8 sps:$4 sm:$0xff]  }
 0x4c9   :  { %v4375_v25 = vmax.bf16 %v13349_v38, %v4343_v55 }
 0x4ca   :  { %v4376_v62 = vmax.bf16 %v13349_v38, %v4344_v22 }
 0x4cc   :  { %4743 = vmatprep.mubr.bf16.mxu1 %v4376_v62  ;;  %v7461_v62 = vld [vmem:[%s13126_s8 + $0x4] ss:$8 sps:$4 sm:$0xff]  }
 0x4cd   :  { %4744 = vmatmul.mubr.bf16.gmra.mrb[88].mxu1 %v4375_v25  ;;  %5609 = vmatprep.subr.bf16.mxu1 %v7461_v62  ;;  %v7483_v62 = vld [vmem:[%s13126_s8 + $0x80] ss:$8 sps:$4 sm:$0xff]  }
 0x4ce   :  { %5610 = vmatpush1.bf16.msra.mxu1 %v7459_v17 }
 0x4dd   :  { %v4236_v8 = vpop.f32.mrb[28].mxu1 }
 0x4de   :  { %v4238_v19 = vpop.f32.mrb[29].mxu1 }
 0x4df   :  { %v4240_v5 = vpop.f32.mrb[30].mxu1 }
 0x4e0   :  { %v4275_v29 = vpack.c.bf16 %v4240_v5, %v4236_v8  ;;  %v4242_v61 = vpop.f32.mrb[31].mxu1 }
 0x4e1   :  { %v4276_v60 = vpack.c.bf16 %v4242_v61, %v4238_v19 }
 0x4e2   :  { %v4345_v1 = vadd.bf16 %v12477_v50, %v4275_v29 }
 0x4e3   :  { %v4346_v58 = vadd.bf16 %v12461_v3, %v4276_v60 }
 0x4e4   :  { %v4377_v52 = vmax.bf16 %v13349_v38, %v4345_v1 }
 0x4e5   :  { %v4378_v53 = vmax.bf16 %v13349_v38, %v4346_v58  ;;  %v4605_v51 = vpop.f32.mrb[32].mxu1 }
 0x4e6   :  { %v4607_v10 = vpop.f32.mrb[33].mxu1 }
 0x4e7   :  { %4753 = vmatprep.mubr.bf16.mxu1 %v4378_v53  ;;  %v4609_v37 = vpop.f32.mrb[34].mxu1 }
 0x4e8   :  { %4754 = vmatmul.mubr.bf16.gmra.mrb[92].mxu1 %v4377_v52  ;;  %v4764_v50 = vpack.c.bf16 %v4609_v37, %v4605_v51  ;;  %v4611_v48 = vpop.f32.mrb[35].mxu1 }
 0x4e9   :  { %v4765_v32 = vpack.c.bf16 %v4611_v48, %v4607_v10 }
 0x4ea   :  { %v4834_v3 = vadd.bf16 %v12671_v23, %v4764_v50 }
 0x4eb   :  { %v4835_v46 = vadd.bf16 %v12674_v57, %v4765_v32 }
 0x4ec   :  { %v4866_v24 = vmax.bf16 %v13349_v38, %v4834_v3 }
 0x4ed   :  { %v4615_v34 = vpop.f32.mrb[36].mxu1  ;;  %v4867_v28 = vmax.bf16 %v13349_v38, %v4835_v46 }
 0x4ee   :  { %v4617_v15 = vpop.f32.mrb[37].mxu1 }
 0x4ef   :  { %5122 = vmatprep.mubr.bf16.mxu0 %v4867_v28  ;;  %v4619_v16 = vpop.f32.mrb[38].mxu1 }
 0x4f0   :  { %5123 = vmatmul.mubr.bf16.vlgmr.msra.gmra.mrb[32].mxu0 %v4866_v24  ;;  %v4766_v27 = vpack.c.bf16 %v4619_v16, %v4615_v34  ;;  %v4621_v42 = vpop.f32.mrb[39].mxu1 }
 0x4f1   :  { %v4767_v35 = vpack.c.bf16 %v4621_v42, %v4617_v15  ;;  %v7464_v42 = vld [vmem:[%s13126_s8 + $0x14] ss:$8 sps:$4 sm:$0xff]  }
 0x4f2   :  { %v4836_v18 = vadd.bf16 %v12671_v23, %v4766_v27  ;;  %v7462_v27 = vld [vmem:[%s13126_s8 + $0x10] ss:$8 sps:$4 sm:$0xff]   ;;  %5611 = vmatprep.subr.bf16.mxu1 %v7464_v42 }
 0x4f3   :  { %v4837_v47 = vadd.bf16 %v12674_v57, %v4767_v35  ;;  %v7467_v35 = vld [vmem:[%s13126_s8 + $0x24] ss:$8 sps:$4 sm:$0xff]   ;;  %5612 = vmatpush1.bf16.msra.mxu1 %v7462_v27  ;;  %v7500_v27 = vld [vmem:[%s13126_s8 + $0xd4] ss:$8 sps:$4 sm:$0xff]  }
 0x4f4   :  { %v4868_v40 = vmax.bf16 %v13349_v38, %v4836_v18  ;;  %v7465_v18 = vld [vmem:[%s13126_s8 + $0x20] ss:$8 sps:$4 sm:$0xff]   ;;  %5613 = vmatprep.subr.bf16.mxu1 %v7467_v35 }
 0x4f5   :  { %v4869_v12 = vmax.bf16 %v13349_v38, %v4837_v47  ;;  %v4625_v49 = vpop.f32.mrb[40].mxu1  ;;  %v7470_v47 = vld [vmem:[%s13126_s8 + $0x34] ss:$8 sps:$4 sm:$0xff]  }
 0x4f6   :  { %v4627_v6 = vpop.f32.mrb[41].mxu1 }
 0x4f7   :  { %5132 = vmatprep.mubr.bf16.mxu0 %v4869_v12  ;;  %v4629_v21 = vpop.f32.mrb[42].mxu1  ;;  %5614 = vmatpush1.bf16.msra.mxu1 %v7465_v18  ;;  %v7468_v12 = vld [vmem:[%s13126_s8 + $0x30] ss:$8 sps:$4 sm:$0xff]  }
 0x4f8   :  { %5133 = vmatmul.mubr.bf16.gmra.mrb[36].mxu0 %v4868_v40  ;;  %v4768_v2 = vpack.c.bf16 %v4629_v21, %v4625_v49  ;;  %v4631_v33 = vpop.f32.mrb[43].mxu1  ;;  %5615 = vmatprep.subr.bf16.mxu1 %v7470_v47  ;;  %v7473_v49 = vld [vmem:[%s13126_s8 + $0x44] ss:$8 sps:$4 sm:$0xff]   ;;  %v7471_v40 = vld [vmem:[%s13126_s8 + $0x40] ss:$8 sps:$4 sm:$0xff]  }
 0x4f9   :  { %v4769_v26 = vpack.c.bf16 %v4631_v33, %v4627_v6  ;;  %v7474_v6 = vld [vmem:[%s13126_s8 + $0x50] ss:$8 sps:$4 sm:$0xff]   ;;  %v7476_v21 = vld [vmem:[%s13126_s8 + $0x54] ss:$8 sps:$4 sm:$0xff]  }
 0x4fa   :  { %v4838_v41 = vadd.bf16 %v12671_v23, %v4768_v2  ;;  %v7479_v2 = vld [vmem:[%s13126_s8 + $0x64] ss:$8 sps:$4 sm:$0xff]   ;;  %v7498_v47 = vld [vmem:[%s13126_s8 + $0xd0] ss:$8 sps:$4 sm:$0xff]  }
 0x4fb   :  { %v4839_v13 = vadd.bf16 %v12674_v57, %v4769_v26  ;;  %5616 = vmatpush1.bf16.msra.mxu1 %v7468_v12  ;;  %v7503_v12 = vld [vmem:[%s13126_s8 + $0xe4] ss:$8 sps:$4 sm:$0xff]  }
 0x4fc   :  { %v4870_v0 = vmax.bf16 %v13349_v38, %v4838_v41  ;;  %5617 = vmatprep.subr.bf16.mxu1 %v7473_v49 }
 0x4fd   :  { %v4635_v45 = vpop.f32.mrb[44].mxu1  ;;  %v4871_v43 = vmax.bf16 %v13349_v38, %v4839_v13  ;;  %v7477_v13 = vld [vmem:[%s13126_s8 + $0x60] ss:$8 sps:$4 sm:$0xff]  }
 0x4fe   :  { %v4637_v54 = vpop.f32.mrb[45].mxu1 }
 0x4ff   :  { %5142 = vmatprep.mubr.bf16.mxu0 %v4871_v43  ;;  %v4639_v56 = vpop.f32.mrb[46].mxu1  ;;  %5618 = vmatpush1.bf16.msra.mxu1 %v7471_v40 }
 0x500   :  { %5143 = vmatmul.mubr.bf16.gmra.mrb[40].mxu0 %v4870_v0  ;;  %v4770_v31 = vpack.c.bf16 %v4639_v56, %v4635_v45  ;;  %v4641_v11 = vpop.f32.mrb[47].mxu1  ;;  %5619 = vmatprep.subr.bf16.mxu1 %v7476_v21 }
 0x501   :  { %v4771_v63 = vpack.c.bf16 %v4641_v11, %v4637_v54  ;;  %v7482_v54 = vld [vmem:[%s13126_s8 + $0x74] ss:$8 sps:$4 sm:$0xff]   ;;  %v7480_v11 = vld [vmem:[%s13126_s8 + $0x70] ss:$8 sps:$4 sm:$0xff]  }
 0x502   :  { %v4840_v36 = vadd.bf16 %v12671_v23, %v4770_v31 }
 0x503   :  { %v4841_v7 = vadd.bf16 %v12674_v57, %v4771_v63  ;;  %5620 = vmatpush1.bf16.msra.mxu1 %v7474_v6  ;;  %v7485_v63 = vld [vmem:[%s13126_s8 + $0x84] ss:$8 sps:$4 sm:$0xff]  }
 0x504   :  { %v4872_v25 = vmax.bf16 %v13349_v38, %v4840_v36  ;;  %5621 = vmatprep.subr.bf16.mxu1 %v7479_v2 }
 0x505   :  { %v4873_v55 = vmax.bf16 %v13349_v38, %v4841_v7  ;;  %v4645_v22 = vpop.f32.mrb[48].mxu1 }
 0x506   :  { %v4647_v20 = vpop.f32.mrb[49].mxu1 }
 0x507   :  { %5152 = vmatprep.mubr.bf16.mxu0 %v4873_v55  ;;  %v4649_v9 = vpop.f32.mrb[50].mxu1  ;;  %5622 = vmatpush1.bf16.msra.mxu1 %v7477_v13  ;;  %v7506_v13 = vld [vmem:[%s13126_s8 + $0xf4] ss:$8 sps:$4 sm:$0xff]  }
 0x508   :  { %5153 = vmatmul.mubr.bf16.gmra.mrb[44].mxu0 %v4872_v25  ;;  %v4772_v8 = vpack.c.bf16 %v4649_v9, %v4645_v22  ;;  %v4651_v19 = vpop.f32.mrb[51].mxu1  ;;  %5623 = vmatprep.subr.bf16.mxu1 %v7482_v54  ;;  %v7488_v9 = vld [vmem:[%s13126_s8 + $0x94] ss:$8 sps:$4 sm:$0xff]  }
 0x509   :  { %v4773_v30 = vpack.c.bf16 %v4651_v19, %v4647_v20 }
 0x50a   :  { %v4842_v5 = vadd.bf16 %v12671_v23, %v4772_v8 }
 0x50b   :  { %v4843_v44 = vadd.bf16 %v12674_v57, %v4773_v30  ;;  %5624 = vmatpush1.bf16.msra.mxu1 %v7480_v11 }
 0x50c   :  { %v4874_v1 = vmax.bf16 %v13349_v38, %v4842_v5  ;;  %5625 = vmatprep.subr.bf16.mxu1 %v7485_v63  ;;  %v7486_v5 = vld [vmem:[%s13126_s8 + $0x90] ss:$8 sps:$4 sm:$0xff]  }
 0x50d   :  { %v4655_v29 = vpop.f32.mrb[52].mxu1  ;;  %v4875_v61 = vmax.bf16 %v13349_v38, %v4843_v44  ;;  %v7491_v44 = vld [vmem:[%s13126_s8 + $0xa4] ss:$8 sps:$4 sm:$0xff]  }
 0x50e   :  { %v4657_v60 = vpop.f32.mrb[53].mxu1 }
 0x50f   :  { %5162 = vmatprep.mubr.bf16.mxu0 %v4875_v61  ;;  %v4659_v59 = vpop.f32.mrb[54].mxu1  ;;  %5626 = vmatpush1.bf16.msra.mxu1 %v7483_v62 }
 0x510   :  { %5163 = vmatmul.mubr.bf16.gmra.mrb[48].mxu0 %v4874_v1  ;;  %v4774_v58 = vpack.c.bf16 %v4659_v59, %v4655_v29  ;;  %v4661_v4 = vpop.f32.mrb[55].mxu1  ;;  %5627 = vmatprep.subr.bf16.mxu1 %v7488_v9 }
 0x511   :  { %v4775_v53 = vpack.c.bf16 %v4661_v4, %v4657_v60 }
 0x512   :  { %v4844_v51 = vadd.bf16 %v12671_v23, %v4774_v58  ;;  %v7489_v58 = vld [vmem:[%s13126_s8 + $0xa0] ss:$8 sps:$4 sm:$0xff]  }
 0x513   :  { %v4845_v52 = vadd.bf16 %v12674_v57, %v4775_v53  ;;  %5628 = vmatpush1.bf16.msra.mxu1 %v7486_v5 }
 0x514   :  { %v4876_v50 = vmax.bf16 %v13349_v38, %v4844_v51  ;;  %5629 = vmatprep.subr.bf16.mxu1 %v7491_v44  ;;  %v7494_v51 = vld [vmem:[%s13126_s8 + $0xb4] ss:$8 sps:$4 sm:$0xff]  }
 0x515   :  { %v4877_v10 = vmax.bf16 %v13349_v38, %v4845_v52  ;;  %v4665_v37 = vpop.f32.mrb[56].mxu1 }
 0x516   :  { %v4667_v48 = vpop.f32.mrb[57].mxu1 }
 0x517   :  { %5172 = vmatprep.mubr.bf16.mxu0 %v4877_v10  ;;  %v4669_v32 = vpop.f32.mrb[58].mxu1  ;;  %5630 = vmatpush1.bf16.msra.mxu1 %v7489_v58 }
 0x518   :  { %5173 = vmatmul.mubr.bf16.gmra.mrb[52].mxu0 %v4876_v50  ;;  %v4776_v3 = vpack.c.bf16 %v4669_v32, %v4665_v37  ;;  %v4671_v46 = vpop.f32.mrb[59].mxu1  ;;  %v7492_v50 = vld [vmem:[%s13126_s8 + $0xb0] ss:$8 sps:$4 sm:$0xff]   ;;  %5631 = vmatprep.subr.bf16.mxu1 %v7494_v51 }
 0x519   :  { %v4777_v34 = vpack.c.bf16 %v4671_v46, %v4667_v48  ;;  %v7497_v48 = vld [vmem:[%s13126_s8 + $0xc4] ss:$8 sps:$4 sm:$0xff]  }
 0x51a   :  { %v4846_v28 = vadd.bf16 %v12671_v23, %v4776_v3 }
 0x51b   :  { %v4847_v24 = vadd.bf16 %v12674_v57, %v4777_v34  ;;  %5632 = vmatpush1.bf16.msra.mxu1 %v7492_v50 }
 0x51c   :  { %v4878_v16 = vmax.bf16 %v13349_v38, %v4846_v28  ;;  %5633 = vmatprep.subr.bf16.mxu1 %v7497_v48 }
 0x51d   :  { %v4879_v15 = vmax.bf16 %v13349_v38, %v4847_v24  ;;  %v7495_v24 = vld [vmem:[%s13126_s8 + $0xc0] ss:$8 sps:$4 sm:$0xff]  }
 0x51f   :  { %5182 = vmatprep.mubr.bf16.mxu0 %v4879_v15  ;;  %5634 = vmatpush1.bf16.msra.mxu1 %v7495_v24 }
 0x520   :  { %5183 = vmatmul.mubr.bf16.gmra.mrb[56].mxu0 %v4878_v16  ;;  %5635 = vmatprep.subr.bf16.mxu1 %v7500_v27 }
 0x523   :  { %5636 = vmatpush1.bf16.msra.mxu1 %v7498_v47 }
 0x524   :  { %5637 = vmatprep.subr.bf16.mxu1 %v7503_v12 }
 0x548   :  { %v4675_v33 = vpop.f32.mrb[60].mxu1 }
 0x549   :  { %v4677_v26 = vpop.f32.mrb[61].mxu1 }
 0x54a   :  { %v4679_v41 = vpop.f32.mrb[62].mxu1 }
 0x54b   :  { %v4778_v45 = vpack.c.bf16 %v4679_v41, %v4675_v33  ;;  %v4681_v43 = vpop.f32.mrb[63].mxu1  ;;  %v7501_v33 = vld [vmem:[%s13126_s8 + $0xe0] ss:$8 sps:$4 sm:$0xff]  }
 0x54c   :  { %v4779_v0 = vpack.c.bf16 %v4681_v43, %v4677_v26  ;;  %5638 = vmatpush1.bf16.msra.mxu1 %v7501_v33 }
 0x54d   :  { %v4848_v56 = vadd.bf16 %v12671_v23, %v4778_v45  ;;  %5639 = vmatprep.subr.bf16.mxu1 %v7506_v13 }
 0x54e   :  { %v4849_v31 = vadd.bf16 %v12674_v57, %v4779_v0  ;;  %v7504_v0 = vld [vmem:[%s13126_s8 + $0xf0] ss:$8 sps:$4 sm:$0xff]  }
 0x54f   :  { %v4880_v17 = vmax.bf16 %v13349_v38, %v4848_v56 }
 0x550   :  { %v4881_v36 = vmax.bf16 %v13349_v38, %v4849_v31  ;;  %v4685_v7 = vpop.f32.mrb[64].mxu1  ;;  %5640 = vmatpush1.bf16.msra.mxu1 %v7504_v0 }
 0x551   :  { %v4687_v55 = vpop.f32.mrb[65].mxu1 }
 0x552   :  { %5192 = vmatprep.mubr.bf16.mxu0 %v4881_v36  ;;  %v4689_v22 = vpop.f32.mrb[66].mxu1 }
 0x553   :  { %5193 = vmatmul.mubr.bf16.gmra.mrb[60].mxu0 %v4880_v17  ;;  %v4780_v25 = vpack.c.bf16 %v4689_v22, %v4685_v7  ;;  %v4691_v20 = vpop.f32.mrb[67].mxu1 }
 0x554   :  { %v4781_v8 = vpack.c.bf16 %v4691_v20, %v4687_v55 }
 0x555   :  { %v4850_v19 = vadd.bf16 %v12671_v23, %v4780_v25 }
 0x556   :  { %v4851_v30 = vadd.bf16 %v12674_v57, %v4781_v8 }
 0x557   :  { %v4882_v1 = vmax.bf16 %v13349_v38, %v4850_v19 }
 0x558   :  { %v4695_v29 = vpop.f32.mrb[68].mxu1  ;;  %v4883_v61 = vmax.bf16 %v13349_v38, %v4851_v30 }
 0x559   :  { %v4697_v60 = vpop.f32.mrb[69].mxu1 }
 0x55a   :  { %5202 = vmatprep.mubr.bf16.mxu0 %v4883_v61  ;;  %v4699_v59 = vpop.f32.mrb[70].mxu1 }
 0x55b   :  { %5203 = vmatmul.mubr.bf16.gmra.mrb[64].mxu0 %v4882_v1  ;;  %v4782_v4 = vpack.c.bf16 %v4699_v59, %v4695_v29  ;;  %v4701_v53 = vpop.f32.mrb[71].mxu1 }
 0x55c   :  { %v4783_v52 = vpack.c.bf16 %v4701_v53, %v4697_v60 }
 0x55d   :  { %v4852_v10 = vadd.bf16 %v12671_v23, %v4782_v4 }
 0x55e   :  { %v4853_v37 = vadd.bf16 %v12674_v57, %v4783_v52 }
 0x55f   :  { %v4884_v46 = vmax.bf16 %v13349_v38, %v4852_v10 }
 0x560   :  { %v4885_v32 = vmax.bf16 %v13349_v38, %v4853_v37  ;;  %v4705_v3 = vpop.f32.mrb[72].mxu1 }
 0x561   :  { %v4707_v34 = vpop.f32.mrb[73].mxu1 }
 0x562   :  { %5212 = vmatprep.mubr.bf16.mxu0 %v4885_v32  ;;  %v4709_v28 = vpop.f32.mrb[74].mxu1  ;;  %v6811_v32 = vld.sshfl [vmem:[%s13127_s7] sm:$0x11 pattern:$0x75316420] }
 0x563   :  { %5213 = vmatmul.mubr.bf16.gmra.mrb[68].mxu0 %v4884_v46  ;;  %v4784_v15 = vpack.c.bf16 %v4709_v28, %v4705_v3  ;;  %v4711_v16 = vpop.f32.mrb[75].mxu1  ;;  %v5324_v3 = vcombine.high %v6811_v32, %v6811_v32  ;;  %v5331_v28 = vrot.slane %v6811_v32, %v12454_v39 }
 0x564   :  { %v4785_v42 = vpack.c.bf16 %v4711_v16, %v4707_v34 }
 0x565   :  { %v4854_v35 = vadd.bf16 %v12671_v23, %v4784_v15  ;;  %v5338_v15 = vrot.slane %v5324_v3, %v12454_v39 }
 0x566   :  { %v4855_v18 = vadd.bf16 %v12674_v57, %v4785_v42 }
 0x567   :  { %v4886_v21 = vmax.bf16 %v13349_v38, %v4854_v35  ;;  %v5347_v12 = vpack.i.b16 %v5338_v15, %v5338_v15 }
 0x568   :  { %v4715_v49 = vpop.f32.mrb[76].mxu1  ;;  %v4887_v40 = vmax.bf16 %v13349_v38, %v4855_v18  ;;  %v5340_v18 = vpack.i.b16 %v5331_v28, %v5331_v28 }
 0x569   :  { %v4717_v6 = vpop.f32.mrb[77].mxu1 }
 0x56a   :  { %5222 = vmatprep.mubr.bf16.mxu0 %v4887_v40  ;;  %v4719_v2 = vpop.f32.mrb[78].mxu1 }
 0x56b   :  { %5223 = vmatmul.mubr.bf16.gmra.mrb[72].mxu0 %v4886_v21  ;;  %v4786_v26 = vpack.c.bf16 %v4719_v2, %v4715_v49  ;;  %v4721_v41 = vpop.f32.mrb[79].mxu1  ;;  %v12842_v2 = vrot.slane %v5340_v18, %v12457_v14 }
 0x56c   :  { %v4787_v45 = vpack.c.bf16 %v4721_v41, %v4717_v6 }
 0x56d   :  { %v4856_v43 = vadd.bf16 %v12671_v23, %v4786_v26  ;;  %v12845_v26 = vrot.slane %v5347_v12, %v12457_v14 }
 0x56e   :  { %v4857_v54 = vadd.bf16 %v12674_v57, %v4787_v45 }
 0x56f   :  { %v4888_v11 = vmax.bf16 %v13349_v38, %v4856_v43 }
 0x570   :  { %v4889_v56 = vmax.bf16 %v13349_v38, %v4857_v54  ;;  %v4725_v31 = vpop.f32.mrb[80].mxu1 }
 0x571   :  { %v4727_v63 = vpop.f32.mrb[81].mxu1 }
 0x572   :  { %5232 = vmatprep.mubr.bf16.mxu0 %v4889_v56  ;;  %v4729_v36 = vpop.f32.mrb[82].mxu1 }
 0x573   :  { %5233 = vmatmul.mubr.bf16.gmra.mrb[76].mxu0 %v4888_v11  ;;  %v4788_v7 = vpack.c.bf16 %v4729_v36, %v4725_v31  ;;  %v4731_v17 = vpop.f32.mrb[83].mxu1 }
 0x574   :  { %v4789_v55 = vpack.c.bf16 %v4731_v17, %v4727_v63 }
 0x575   :  { %v4858_v22 = vadd.bf16 %v12671_v23, %v4788_v7 }
 0x576   :  { %v4859_v62 = vadd.bf16 %v12674_v57, %v4789_v55 }
 0x577   :  { %v4890_v20 = vmax.bf16 %v13349_v38, %v4858_v22 }
 0x578   :  { %v4891_v25 = vmax.bf16 %v13349_v38, %v4859_v62 }
 0x57a   :  { %5242 = vmatprep.mubr.bf16.mxu0 %v4891_v25 }
 0x57b   :  { %5243 = vmatmul.mubr.bf16.gmra.mrb[80].mxu0 %v4890_v20 }
 0x57d   :  { %v4735_v9 = vpop.f32.mrb[84].mxu1 }
 0x57e   :  { %v4737_v8 = vpop.f32.mrb[85].mxu1 }
 0x57f   :  { %v4739_v19 = vpop.f32.mrb[86].mxu1 }
 0x580   :  { %v4790_v30 = vpack.c.bf16 %v4739_v19, %v4735_v9  ;;  %v4741_v5 = vpop.f32.mrb[87].mxu1 }
 0x581   :  { %v4791_v44 = vpack.c.bf16 %v4741_v5, %v4737_v8 }
 0x582   :  { %v4860_v29 = vadd.bf16 %v12671_v23, %v4790_v30 }
 0x583   :  { %v4861_v61 = vadd.bf16 %v12674_v57, %v4791_v44 }
 0x584   :  { %v4892_v1 = vmax.bf16 %v13349_v38, %v4860_v29 }
 0x585   :  { %v4893_v60 = vmax.bf16 %v13349_v38, %v4861_v61 }
 0x587   :  { %5252 = vmatprep.mubr.bf16.mxu0 %v4893_v60 }
 0x588   :  { %5253 = vmatmul.mubr.bf16.gmra.mrb[84].mxu0 %v4892_v1 }
 0x5a0   :  { %v4745_v59 = vpop.f32.mrb[88].mxu1 }
 0x5a1   :  { %v4747_v58 = vpop.f32.mrb[89].mxu1 }
 0x5a2   :  { %v4749_v4 = vpop.f32.mrb[90].mxu1 }
 0x5a3   :  { %v4792_v53 = vpack.c.bf16 %v4749_v4, %v4745_v59  ;;  %v4751_v51 = vpop.f32.mrb[91].mxu1 }
 0x5a4   :  { %v4793_v52 = vpack.c.bf16 %v4751_v51, %v4747_v58 }
 0x5a5   :  { %v4862_v10 = vadd.bf16 %v12671_v23, %v4792_v53 }
 0x5a6   :  { %v4863_v37 = vadd.bf16 %v12674_v57, %v4793_v52  ;;  %v7507_v52 = vld [vmem:[%s13128_s10 + $0x40] sm:$0xff]  }
 0x5a7   :  { %v4894_v48 = vmax.bf16 %v13349_v38, %v4862_v10  ;;  %7053 = vmatprep.subr.bf16.mxu0 %v7507_v52 }
 0x5a8   :  { %v4895_v50 = vmax.bf16 %v13349_v38, %v4863_v37 }
 0x5aa   :  { %5262 = vmatprep.mubr.bf16.mxu0 %v4895_v50  ;;  %v7508_v50 = vld [vmem:[%s13128_s10] sm:$0xff]  }
 0x5ab   :  { %5263 = vmatmul.mubr.bf16.gmra.mrb[88].mxu0 %v4894_v48 }
 0x5ac   :  { %7054 = vmatpush3.bf16.msra.mxu0 %v7508_v50  ;;  %v7520_v50 = vld [vmem:[%s13128_s10 + $0x30] sm:$0xff]  }
 0x5bb   :  { %v4755_v46 = vpop.f32.mrb[92].mxu1 }
 0x5bc   :  { %v4757_v34 = vpop.f32.mrb[93].mxu1 }
 0x5bd   :  { %v4759_v24 = vpop.f32.mrb[94].mxu1 }
 0x5be   :  { %v4794_v16 = vpack.c.bf16 %v4759_v24, %v4755_v46  ;;  %v4761_v27 = vpop.f32.mrb[95].mxu1 }
 0x5bf   :  { %v4795_v42 = vpack.c.bf16 %v4761_v27, %v4757_v34 }
 0x5c0   :  { %v4864_v35 = vadd.bf16 %v12671_v23, %v4794_v16 }
 0x5c1   :  { %v4865_v47 = vadd.bf16 %v12674_v57, %v4795_v42 }
 0x5c2   :  { %v4896_v6 = vmax.bf16 %v13349_v38, %v4864_v35 }
 0x5c3   :  { %v4897_v49 = vmax.bf16 %v13349_v38, %v4865_v47  ;;  %v5124_v40 = vpop.f32.mrb[32].mxu0 }
 0x5c4   :  { %v5126_v21 = vpop.f32.mrb[33].mxu0 }
 0x5c5   :  { %5272 = vmatprep.mubr.bf16.mxu0 %v4897_v49  ;;  %v5128_v33 = vpop.f32.mrb[34].mxu0 }
 0x5c6   :  { %5273 = vmatmul.mubr.bf16.gmra.mrb[92].mxu0 %v4896_v6  ;;  %v5283_v23 = vpack.c.bf16 %v5128_v33, %v5124_v40  ;;  %v5130_v41 = vpop.f32.mrb[35].mxu0 }
 0x5c7   :  { %v5284_v13 = vpack.c.bf16 %v5130_v41, %v5126_v21 }
 0x5c8   :  { %v5353_v57 = vadd.bf16 %v12842_v2, %v5283_v23 }
 0x5c9   :  { %v5354_v45 = vadd.bf16 %v12845_v26, %v5284_v13 }
 0x5ca   :  { %v5385_v0 = vmax.bf16 %v13349_v38, %v5353_v57 }
 0x5cb   :  { %v5134_v43 = vpop.f32.mrb[36].mxu0  ;;  %v5386_v54 = vmax.bf16 %v13349_v38, %v5354_v45 }
 0x5cc   :  { %v5136_v56 = vpop.f32.mrb[37].mxu0 }
 0x5cd   :  { %5641 = vmatprep.mubr.bf16.mxu1 %v5386_v54  ;;  %v5138_v31 = vpop.f32.mrb[38].mxu0 }
 0x5ce   :  { %5642 = vmatmul.mubr.bf16.vlgmr.msra.gmra.mrb[96].mxu1 %v5385_v0  ;;  %v5285_v11 = vpack.c.bf16 %v5138_v31, %v5134_v43  ;;  %v5140_v63 = vpop.f32.mrb[39].mxu0 }
 0x5cf   :  { %v5286_v36 = vpack.c.bf16 %v5140_v63, %v5136_v56  ;;  %v7510_v63 = vld [vmem:[%s13128_s10 + $0x8] sm:$0xff]  }
 0x5d0   :  { %v5355_v7 = vadd.bf16 %v12842_v2, %v5285_v11  ;;  %v7509_v11 = vld [vmem:[%s13128_s10 + $0x48] sm:$0xff]  }
 0x5d1   :  { %v5356_v17 = vadd.bf16 %v12845_v26, %v5286_v36  ;;  %7055 = vmatprep.subr.bf16.mxu0 %v7509_v11  ;;  %v7511_v36 = vld [vmem:[%s13128_s10 + $0x50] sm:$0xff]  }
 0x5d2   :  { %v5387_v62 = vmax.bf16 %v13349_v38, %v5355_v7  ;;  %7056 = vmatpush3.bf16.msra.mxu0 %v7510_v63  ;;  %v7512_v7 = vld [vmem:[%s13128_s10 + $0x10] sm:$0xff]  }
 0x5d3   :  { %v5388_v55 = vmax.bf16 %v13349_v38, %v5356_v17  ;;  %v5144_v22 = vpop.f32.mrb[40].mxu0  ;;  %v7513_v17 = vld [vmem:[%s13128_s10 + $0x58] sm:$0xff]   ;;  %7057 = vmatprep.subr.bf16.mxu0 %v7511_v36 }
 0x5d4   :  { %v5146_v25 = vpop.f32.mrb[41].mxu0 }
 0x5d5   :  { %5651 = vmatprep.mubr.bf16.mxu1 %v5388_v55  ;;  %v5148_v20 = vpop.f32.mrb[42].mxu0 }
 0x5d6   :  { %5652 = vmatmul.mubr.bf16.gmra.mrb[100].mxu1 %v5387_v62  ;;  %v5287_v9 = vpack.c.bf16 %v5148_v20, %v5144_v22  ;;  %v5150_v8 = vpop.f32.mrb[43].mxu0  ;;  %7058 = vmatpush3.bf16.msra.mxu0 %v7512_v7  ;;  %v7514_v62 = vld [vmem:[%s13128_s10 + $0x18] sm:$0xff]   ;;  %v7515_v20 = vld [vmem:[%s13128_s10 + $0x60] sm:$0xff]  }
 0x5d7   :  { %v5288_v19 = vpack.c.bf16 %v5150_v8, %v5146_v25  ;;  %7059 = vmatprep.subr.bf16.mxu0 %v7513_v17 }
 0x5d8   :  { %v5357_v30 = vadd.bf16 %v12842_v2, %v5287_v9 }
 0x5d9   :  { %v5358_v5 = vadd.bf16 %v12845_v26, %v5288_v19 }
 0x5da   :  { %v5389_v60 = vmax.bf16 %v13349_v38, %v5357_v30  ;;  %7060 = vmatpush3.bf16.msra.mxu0 %v7514_v62 }
 0x5db   :  { %v5154_v44 = vpop.f32.mrb[44].mxu0  ;;  %v5390_v29 = vmax.bf16 %v13349_v38, %v5358_v5  ;;  %v7516_v5 = vld [vmem:[%s13128_s10 + $0x20] sm:$0xff]   ;;  %7061 = vmatprep.subr.bf16.mxu0 %v7515_v20 }
 0x5dc   :  { %v5156_v61 = vpop.f32.mrb[45].mxu0 }
 0x5dd   :  { %5661 = vmatprep.mubr.bf16.mxu1 %v5390_v29  ;;  %v5158_v1 = vpop.f32.mrb[46].mxu0  ;;  %v7517_v29 = vld [vmem:[%s13128_s10 + $0x68] sm:$0xff]  }
 0x5de   :  { %5662 = vmatmul.mubr.bf16.gmra.mrb[104].mxu1 %v5389_v60  ;;  %v5289_v59 = vpack.c.bf16 %v5158_v1, %v5154_v44  ;;  %v5160_v58 = vpop.f32.mrb[47].mxu0  ;;  %7062 = vmatpush3.bf16.msra.mxu0 %v7516_v5 }
 0x5df   :  { %v5290_v4 = vpack.c.bf16 %v5160_v58, %v5156_v61  ;;  %v7518_v58 = vld [vmem:[%s13128_s10 + $0x28] sm:$0xff]   ;;  %7063 = vmatprep.subr.bf16.mxu0 %v7517_v29 }
 0x5e0   :  { %v5359_v53 = vadd.bf16 %v12842_v2, %v5289_v59 }
 0x5e1   :  { %v5360_v51 = vadd.bf16 %v12845_v26, %v5290_v4 }
 0x5e2   :  { %v5391_v48 = vmax.bf16 %v13349_v38, %v5359_v53  ;;  %v7519_v53 = vld [vmem:[%s13128_s10 + $0x70] sm:$0xff]   ;;  %7064 = vmatpush3.bf16.msra.mxu0 %v7518_v58 }
 0x5e3   :  { %v5392_v10 = vmax.bf16 %v13349_v38, %v5360_v51  ;;  %v5164_v37 = vpop.f32.mrb[48].mxu0  ;;  %7065 = vmatprep.subr.bf16.mxu0 %v7519_v53 }
 0x5e4   :  { %v5166_v32 = vpop.f32.mrb[49].mxu0 }
 0x5e5   :  { %5671 = vmatprep.mubr.bf16.mxu1 %v5392_v10  ;;  %v5168_v3 = vpop.f32.mrb[50].mxu0 }
 0x5e6   :  { %5672 = vmatmul.mubr.bf16.gmra.mrb[108].mxu1 %v5391_v48  ;;  %v5291_v46 = vpack.c.bf16 %v5168_v3, %v5164_v37  ;;  %v5170_v34 = vpop.f32.mrb[51].mxu0  ;;  %7066 = vmatpush3.bf16.msra.mxu0 %v7520_v50 }
 0x5e7   :  { %v5292_v28 = vpack.c.bf16 %v5170_v34, %v5166_v32  ;;  %v7521_v32 = vld [vmem:[%s13128_s10 + $0x78] sm:$0xff]  }
 0x5e8   :  { %v5361_v24 = vadd.bf16 %v12842_v2, %v5291_v46  ;;  %7067 = vmatprep.subr.bf16.mxu0 %v7521_v32 }
 0x5e9   :  { %v5362_v15 = vadd.bf16 %v12845_v26, %v5292_v28 }
 0x5ea   :  { %v5393_v35 = vmax.bf16 %v13349_v38, %v5361_v24  ;;  %v7522_v24 = vld [vmem:[%s13128_s10 + $0x38] sm:$0xff]  }
 0x5eb   :  { %v5174_v16 = vpop.f32.mrb[52].mxu0  ;;  %v5394_v27 = vmax.bf16 %v13349_v38, %v5362_v15  ;;  %7068 = vmatpush3.bf16.msra.mxu0 %v7522_v24  ;;  %v6844_v24 = vld.sshfl [vmem:[%s13129_s9] sm:$0x11 pattern:$0x75316420] }
 0x5ec   :  { %v5176_v42 = vpop.f32.mrb[53].mxu0 }
 0x5ed   :  { %5681 = vmatprep.mubr.bf16.mxu1 %v5394_v27  ;;  %v5178_v18 = vpop.f32.mrb[54].mxu0 }
 0x5ee   :  { %5682 = vmatmul.mubr.bf16.gmra.mrb[112].mxu1 %v5393_v35  ;;  %v5293_v47 = vpack.c.bf16 %v5178_v18, %v5174_v16  ;;  %v5180_v12 = vpop.f32.mrb[55].mxu0 }
 0x5ef   :  { %v5294_v49 = vpack.c.bf16 %v5180_v12, %v5176_v42 }
 0x5f0   :  { %v5363_v40 = vadd.bf16 %v12842_v2, %v5293_v47 }
 0x5f1   :  { %v5364_v6 = vadd.bf16 %v12845_v26, %v5294_v49 }
 0x5f2   :  { %v5395_v23 = vmax.bf16 %v13349_v38, %v5363_v40 }
 0x5f3   :  { %v5396_v21 = vmax.bf16 %v13349_v38, %v5364_v6  ;;  %v5184_v33 = vpop.f32.mrb[56].mxu0 }
 0x5f4   :  { %v5186_v41 = vpop.f32.mrb[57].mxu0 }
 0x5f5   :  { %5691 = vmatprep.mubr.bf16.mxu1 %v5396_v21  ;;  %v5188_v13 = vpop.f32.mrb[58].mxu0 }
 0x5f6   :  { %5692 = vmatmul.mubr.bf16.gmra.mrb[116].mxu1 %v5395_v23  ;;  %v5295_v57 = vpack.c.bf16 %v5188_v13, %v5184_v33  ;;  %v5190_v45 = vpop.f32.mrb[59].mxu0 }
 0x5f7   :  { %v5296_v43 = vpack.c.bf16 %v5190_v45, %v5186_v41 }
 0x5f8   :  { %v5365_v54 = vadd.bf16 %v12842_v2, %v5295_v57 }
 0x5f9   :  { %v5366_v0 = vadd.bf16 %v12845_v26, %v5296_v43 }
 0x5fa   :  { %v5397_v31 = vmax.bf16 %v13349_v38, %v5365_v54 }
 0x5fb   :  { %v5398_v56 = vmax.bf16 %v13349_v38, %v5366_v0 }
 0x5fd   :  { %5701 = vmatprep.mubr.bf16.mxu1 %v5398_v56 }
 0x5fe   :  { %5702 = vmatmul.mubr.bf16.gmra.mrb[120].mxu1 %v5397_v31 }
 0x626   :  { %v5194_v55 = vpop.f32.mrb[60].mxu0 }
 0x627   :  { %v5196_v22 = vpop.f32.mrb[61].mxu0 }
 0x628   :  { %v5198_v25 = vpop.f32.mrb[62].mxu0 }
 0x629   :  { %v5297_v9 = vpack.c.bf16 %v5198_v25, %v5194_v55  ;;  %v5200_v8 = vpop.f32.mrb[63].mxu0 }
 0x62a   :  { %v5298_v19 = vpack.c.bf16 %v5200_v8, %v5196_v22 }
 0x62b   :  { %v5367_v30 = vadd.bf16 %v12842_v2, %v5297_v9 }
 0x62c   :  { %v5368_v44 = vadd.bf16 %v12845_v26, %v5298_v19 }
 0x62d   :  { %v5399_v1 = vmax.bf16 %v13349_v38, %v5367_v30 }
 0x62e   :  { %v5400_v61 = vmax.bf16 %v13349_v38, %v5368_v44  ;;  %v5204_v60 = vpop.f32.mrb[64].mxu0 }
 0x62f   :  { %v5206_v59 = vpop.f32.mrb[65].mxu0 }
 0x630   :  { %5711 = vmatprep.mubr.bf16.mxu1 %v5400_v61  ;;  %v5208_v4 = vpop.f32.mrb[66].mxu0 }
 0x631   :  { %5712 = vmatmul.mubr.bf16.gmra.mrb[124].mxu1 %v5399_v1  ;;  %v5299_v51 = vpack.c.bf16 %v5208_v4, %v5204_v60  ;;  %v5210_v52 = vpop.f32.mrb[67].mxu0 }
 0x632   :  { %v5300_v10 = vpack.c.bf16 %v5210_v52, %v5206_v59 }
 0x633   :  { %v5369_v37 = vadd.bf16 %v12842_v2, %v5299_v51 }
 0x634   :  { %v5370_v48 = vadd.bf16 %v12845_v26, %v5300_v10 }
 0x635   :  { %v5401_v28 = vmax.bf16 %v13349_v38, %v5369_v37 }
 0x636   :  { %v5214_v3 = vpop.f32.mrb[68].mxu0  ;;  %v5402_v46 = vmax.bf16 %v13349_v38, %v5370_v48 }
 0x637   :  { %v5216_v34 = vpop.f32.mrb[69].mxu0 }
 0x638   :  { %5721 = vmatprep.mubr.bf16.mxu1 %v5402_v46  ;;  %v5218_v15 = vpop.f32.mrb[70].mxu0 }
 0x639   :  { %5722 = vmatmul.mubr.bf16.gmra.mrb[128].mxu1 %v5401_v28  ;;  %v5301_v16 = vpack.c.bf16 %v5218_v15, %v5214_v3  ;;  %v5220_v27 = vpop.f32.mrb[71].mxu0  ;;  %v5843_v15 = vcombine.high %v6844_v24, %v6844_v24 }
 0x63a   :  { %v5302_v42 = vpack.c.bf16 %v5220_v27, %v5216_v34 }
 0x63b   :  { %v5371_v35 = vadd.bf16 %v12842_v2, %v5301_v16 }
 0x63c   :  { %v5372_v18 = vadd.bf16 %v12845_v26, %v5302_v42  ;;  %v5850_v42 = vrot.slane %v6844_v24, %v12454_v39 }
 0x63d   :  { %v5403_v49 = vmax.bf16 %v13349_v38, %v5371_v35 }
 0x63e   :  { %v5404_v47 = vmax.bf16 %v13349_v38, %v5372_v18  ;;  %v5224_v12 = vpop.f32.mrb[72].mxu0  ;;  %v5857_v18 = vrot.slane %v5843_v15, %v12454_v39 }
 0x63f   :  { %v5226_v40 = vpop.f32.mrb[73].mxu0 }
 0x640   :  { %5731 = vmatprep.mubr.bf16.mxu1 %v5404_v47  ;;  %v5228_v6 = vpop.f32.mrb[74].mxu0 }
 0x641   :  { %5732 = vmatmul.mubr.bf16.gmra.mrb[132].mxu1 %v5403_v49  ;;  %v5303_v21 = vpack.c.bf16 %v5228_v6, %v5224_v12  ;;  %v5230_v33 = vpop.f32.mrb[75].mxu0  ;;  %v5859_v6 = vpack.i.b16 %v5850_v42, %v5850_v42 }
 0x642   :  { %v5304_v23 = vpack.c.bf16 %v5230_v33, %v5226_v40  ;;  %v5866_v33 = vpack.i.b16 %v5857_v18, %v5857_v18 }
 0x643   :  { %v5373_v41 = vadd.bf16 %v12842_v2, %v5303_v21 }
 0x644   :  { %v5374_v13 = vadd.bf16 %v12845_v26, %v5304_v23 }
 0x645   :  { %v5405_v54 = vmax.bf16 %v13349_v38, %v5373_v41 }
 0x646   :  { %v5234_v57 = vpop.f32.mrb[76].mxu0  ;;  %v5406_v45 = vmax.bf16 %v13349_v38, %v5374_v13 }
 0x647   :  { %v5236_v43 = vpop.f32.mrb[77].mxu0 }
 0x648   :  { %5741 = vmatprep.mubr.bf16.mxu1 %v5406_v45  ;;  %v5238_v0 = vpop.f32.mrb[78].mxu0  ;;  %v12965_v45 = vrot.slane %v5859_v6, %v12457_v14 }
 0x649   :  { %5742 = vmatmul.mubr.bf16.gmra.mrb[136].mxu1 %v5405_v54  ;;  %v5305_v56 = vpack.c.bf16 %v5238_v0, %v5234_v57  ;;  %v5240_v31 = vpop.f32.mrb[79].mxu0 }
 0x64a   :  { %v5306_v11 = vpack.c.bf16 %v5240_v31, %v5236_v43  ;;  %v12968_v43 = vrot.slane %v5866_v33, %v12457_v14 }
 0x64b   :  { %v5375_v63 = vadd.bf16 %v12842_v2, %v5305_v56 }
 0x64c   :  { %v5376_v36 = vadd.bf16 %v12845_v26, %v5306_v11 }
 0x64d   :  { %v5407_v55 = vmax.bf16 %v13349_v38, %v5375_v63 }
 0x64e   :  { %v5408_v7 = vmax.bf16 %v13349_v38, %v5376_v36  ;;  %v5244_v17 = vpop.f32.mrb[80].mxu0 }
 0x64f   :  { %v5246_v22 = vpop.f32.mrb[81].mxu0 }
 0x650   :  { %5751 = vmatprep.mubr.bf16.mxu1 %v5408_v7  ;;  %v5248_v62 = vpop.f32.mrb[82].mxu0 }
 0x651   :  { %5752 = vmatmul.mubr.bf16.gmra.mrb[140].mxu1 %v5407_v55  ;;  %v5307_v25 = vpack.c.bf16 %v5248_v62, %v5244_v17  ;;  %v5250_v20 = vpop.f32.mrb[83].mxu0 }
 0x652   :  { %v5308_v9 = vpack.c.bf16 %v5250_v20, %v5246_v22 }
 0x653   :  { %v5377_v8 = vadd.bf16 %v12842_v2, %v5307_v25 }
 0x654   :  { %v5378_v19 = vadd.bf16 %v12845_v26, %v5308_v9 }
 0x655   :  { %v5409_v5 = vmax.bf16 %v13349_v38, %v5377_v8 }
 0x656   :  { %v5410_v30 = vmax.bf16 %v13349_v38, %v5378_v19 }
 0x658   :  { %5761 = vmatprep.mubr.bf16.mxu1 %v5410_v30 }
 0x659   :  { %5762 = vmatmul.mubr.bf16.gmra.mrb[144].mxu1 %v5409_v5 }
 0x65b   :  { %v5254_v44 = vpop.f32.mrb[84].mxu0 }
 0x65c   :  { %v5256_v29 = vpop.f32.mrb[85].mxu0 }
 0x65d   :  { %v5258_v61 = vpop.f32.mrb[86].mxu0 }
 0x65e   :  { %v5309_v60 = vpack.c.bf16 %v5258_v61, %v5254_v44  ;;  %v5260_v1 = vpop.f32.mrb[87].mxu0 }
 0x65f   :  { %v5310_v59 = vpack.c.bf16 %v5260_v1, %v5256_v29 }
 0x660   :  { %v5379_v58 = vadd.bf16 %v12842_v2, %v5309_v60 }
 0x661   :  { %v5380_v4 = vadd.bf16 %v12845_v26, %v5310_v59 }
 0x662   :  { %v5411_v51 = vmax.bf16 %v13349_v38, %v5379_v58 }
 0x663   :  { %v5412_v53 = vmax.bf16 %v13349_v38, %v5380_v4 }
 0x665   :  { %5771 = vmatprep.mubr.bf16.mxu1 %v5412_v53 }
 0x666   :  { %5772 = vmatmul.mubr.bf16.gmra.mrb[148].mxu1 %v5411_v51 }
 0x67e   :  { %v5264_v52 = vpop.f32.mrb[88].mxu0 }
 0x67f   :  { %v5266_v10 = vpop.f32.mrb[89].mxu0 }
 0x680   :  { %v5268_v37 = vpop.f32.mrb[90].mxu0 }
 0x681   :  { %v5311_v50 = vpack.c.bf16 %v5268_v37, %v5264_v52  ;;  %v5270_v48 = vpop.f32.mrb[91].mxu0 }
 0x682   :  { %v5312_v32 = vpack.c.bf16 %v5270_v48, %v5266_v10 }
 0x683   :  { %v5381_v3 = vadd.bf16 %v12842_v2, %v5311_v50 }
 0x684   :  { %v5382_v46 = vadd.bf16 %v12845_v26, %v5312_v32 }
 0x685   :  { %v5413_v28 = vmax.bf16 %v13349_v38, %v5381_v3 }
 0x686   :  { %v5414_v34 = vmax.bf16 %v13349_v38, %v5382_v46 }
 0x688   :  { %5781 = vmatprep.mubr.bf16.mxu1 %v5414_v34 }
 0x689   :  { %5782 = vmatmul.mubr.bf16.gmra.mrb[152].mxu1 %v5413_v28 }
 0x699   :  { %v5274_v16 = vpop.f32.mrb[92].mxu0 }
 0x69a   :  { %v5276_v27 = vpop.f32.mrb[93].mxu0 }
 0x69b   :  { %v5278_v35 = vpop.f32.mrb[94].mxu0 }
 0x69c   :  { %v5313_v47 = vpack.c.bf16 %v5278_v35, %v5274_v16  ;;  %v5280_v12 = vpop.f32.mrb[95].mxu0 }
 0x69d   :  { %v5314_v49 = vpack.c.bf16 %v5280_v12, %v5276_v27 }
 0x69e   :  { %v5383_v40 = vadd.bf16 %v12842_v2, %v5313_v47 }
 0x69f   :  { %v5384_v21 = vadd.bf16 %v12845_v26, %v5314_v49 }
 0x6a0   :  { %v5415_v13 = vmax.bf16 %v13349_v38, %v5383_v40 }
 0x6a1   :  { %v5416_v23 = vmax.bf16 %v13349_v38, %v5384_v21  ;;  %v5643_v41 = vpop.f32.mrb[96].mxu1 }
 0x6a2   :  { %v5645_v57 = vpop.f32.mrb[97].mxu1 }
 0x6a3   :  { %5791 = vmatprep.mubr.bf16.mxu1 %v5416_v23  ;;  %v5647_v39 = vpop.f32.mrb[98].mxu1 }
 0x6a4   :  { %5792 = vmatmul.mubr.bf16.gmra.mrb[156].mxu1 %v5415_v13  ;;  %v5802_v2 = vpack.c.bf16 %v5647_v39, %v5643_v41  ;;  %v5649_v54 = vpop.f32.mrb[99].mxu1 }
 0x6a5   :  { %v5803_v0 = vpack.c.bf16 %v5649_v54, %v5645_v57 }
 0x6a6   :  { %v5872_v26 = vadd.bf16 %v12965_v45, %v5802_v2 }
 0x6a7   :  { %v5873_v56 = vadd.bf16 %v12968_v43, %v5803_v0 }
 0x6a8   :  { %v5904_v63 = vmax.bf16 %v13349_v38, %v5872_v26 }
 0x6a9   :  { %v5653_v31 = vpop.f32.mrb[100].mxu1  ;;  %v5905_v11 = vmax.bf16 %v13349_v38, %v5873_v56 }
 0x6aa   :  { %v5655_v36 = vpop.f32.mrb[101].mxu1 }
 0x6ab   :  { %6103 = vmatprep.mubr.bf16.mxu0 %v5905_v11  ;;  %v5657_v7 = vpop.f32.mrb[102].mxu1 }
 0x6ac   :  { %6104 = vmatmul.mubr.bf16.vlgmr.msra.gmra.mrb[96].mxu0 %v5904_v63  ;;  %v5804_v17 = vpack.c.bf16 %v5657_v7, %v5653_v31  ;;  %v5659_v14 = vpop.f32.mrb[103].mxu1 }
 0x6ad   :  { %v5805_v55 = vpack.c.bf16 %v5659_v14, %v5655_v36 }
 0x6ae   :  { %v5874_v22 = vadd.bf16 %v12965_v45, %v5804_v17 }
 0x6af   :  { %v5875_v62 = vadd.bf16 %v12968_v43, %v5805_v55 }
 0x6b0   :  { %v5906_v9 = vmax.bf16 %v13349_v38, %v5874_v22 }
 0x6b1   :  { %v5907_v25 = vmax.bf16 %v13349_v38, %v5875_v62  ;;  %v5663_v20 = vpop.f32.mrb[104].mxu1 }
 0x6b2   :  { %v5665_v8 = vpop.f32.mrb[105].mxu1 }
 0x6b3   :  { %6111 = vmatprep.mubr.bf16.mxu0 %v5907_v25  ;;  %v5667_v19 = vpop.f32.mrb[106].mxu1 }
 0x6b4   :  { %6112 = vmatmul.mubr.bf16.gmra.mrb[100].mxu0 %v5906_v9  ;;  %v5806_v30 = vpack.c.bf16 %v5667_v19, %v5663_v20  ;;  %v5669_v5 = vpop.f32.mrb[107].mxu1 }
 0x6b5   :  { %v5807_v44 = vpack.c.bf16 %v5669_v5, %v5665_v8 }
 0x6b6   :  { %v5876_v29 = vadd.bf16 %v12965_v45, %v5806_v30 }
 0x6b7   :  { %v5877_v61 = vadd.bf16 %v12968_v43, %v5807_v44 }
 0x6b8   :  { %v5908_v58 = vmax.bf16 %v13349_v38, %v5876_v29 }
 0x6b9   :  { %v5673_v60 = vpop.f32.mrb[108].mxu1  ;;  %v5909_v1 = vmax.bf16 %v13349_v38, %v5877_v61 }
 0x6ba   :  { %v5675_v59 = vpop.f32.mrb[109].mxu1 }
 0x6bb   :  { %6119 = vmatprep.mubr.bf16.mxu0 %v5909_v1  ;;  %v5677_v4 = vpop.f32.mrb[110].mxu1 }
 0x6bc   :  { %6120 = vmatmul.mubr.bf16.gmra.mrb[104].mxu0 %v5908_v58  ;;  %v5808_v53 = vpack.c.bf16 %v5677_v4, %v5673_v60  ;;  %v5679_v51 = vpop.f32.mrb[111].mxu1 }
 0x6bd   :  { %v5809_v52 = vpack.c.bf16 %v5679_v51, %v5675_v59 }
 0x6be   :  { %v5878_v10 = vadd.bf16 %v12965_v45, %v5808_v53 }
 0x6bf   :  { %v5879_v37 = vadd.bf16 %v12968_v43, %v5809_v52 }
 0x6c0   :  { %v5910_v32 = vmax.bf16 %v13349_v38, %v5878_v10 }
 0x6c1   :  { %v5911_v50 = vmax.bf16 %v13349_v38, %v5879_v37  ;;  %v5683_v48 = vpop.f32.mrb[112].mxu1 }
 0x6c2   :  { %v5685_v3 = vpop.f32.mrb[113].mxu1 }
 0x6c3   :  { %6127 = vmatprep.mubr.bf16.mxu0 %v5911_v50  ;;  %v5687_v46 = vpop.f32.mrb[114].mxu1 }
 0x6c4   :  { %6128 = vmatmul.mubr.bf16.gmra.mrb[108].mxu0 %v5910_v32  ;;  %v5810_v34 = vpack.c.bf16 %v5687_v46, %v5683_v48  ;;  %v5689_v28 = vpop.f32.mrb[115].mxu1 }
 0x6c5   :  { %v5811_v24 = vpack.c.bf16 %v5689_v28, %v5685_v3 }
 0x6c6   :  { %v5880_v15 = vadd.bf16 %v12965_v45, %v5810_v34 }
 0x6c7   :  { %v5881_v16 = vadd.bf16 %v12968_v43, %v5811_v24 }
 0x6c8   :  { %v5912_v18 = vmax.bf16 %v13349_v38, %v5880_v15 }
 0x6c9   :  { %v5693_v27 = vpop.f32.mrb[116].mxu1  ;;  %v5913_v42 = vmax.bf16 %v13349_v38, %v5881_v16 }
 0x6ca   :  { %v5695_v35 = vpop.f32.mrb[117].mxu1 }
 0x6cb   :  { %6135 = vmatprep.mubr.bf16.mxu0 %v5913_v42  ;;  %v5697_v47 = vpop.f32.mrb[118].mxu1 }
 0x6cc   :  { %6136 = vmatmul.mubr.bf16.gmra.mrb[112].mxu0 %v5912_v18  ;;  %v5812_v12 = vpack.c.bf16 %v5697_v47, %v5693_v27  ;;  %v5699_v49 = vpop.f32.mrb[119].mxu1 }
 0x6cd   :  { %v5813_v40 = vpack.c.bf16 %v5699_v49, %v5695_v35 }
 0x6ce   :  { %v5882_v6 = vadd.bf16 %v12965_v45, %v5812_v12 }
 0x6cf   :  { %v5883_v21 = vadd.bf16 %v12968_v43, %v5813_v40 }
 0x6d0   :  { %v5914_v41 = vmax.bf16 %v13349_v38, %v5882_v6 }
 0x6d1   :  { %v5915_v33 = vmax.bf16 %v13349_v38, %v5883_v21  ;;  %v5703_v23 = vpop.f32.mrb[120].mxu1 }
 0x6d2   :  { %v5705_v13 = vpop.f32.mrb[121].mxu1 }
 0x6d3   :  { %6143 = vmatprep.mubr.bf16.mxu0 %v5915_v33  ;;  %v5707_v57 = vpop.f32.mrb[122].mxu1 }
 0x6d4   :  { %6144 = vmatmul.mubr.bf16.gmra.mrb[116].mxu0 %v5914_v41  ;;  %v5814_v39 = vpack.c.bf16 %v5707_v57, %v5703_v23  ;;  %v5709_v2 = vpop.f32.mrb[123].mxu1 }
 0x6d5   :  { %v5815_v54 = vpack.c.bf16 %v5709_v2, %v5705_v13 }
 0x6d6   :  { %v5884_v0 = vadd.bf16 %v12965_v45, %v5814_v39 }
 0x6d7   :  { %v5885_v26 = vadd.bf16 %v12968_v43, %v5815_v54 }
 0x6d8   :  { %v5916_v31 = vmax.bf16 %v13349_v38, %v5884_v0 }
 0x6d9   :  { %v5917_v56 = vmax.bf16 %v13349_v38, %v5885_v26 }
 0x6db   :  { %6151 = vmatprep.mubr.bf16.mxu0 %v5917_v56 }
 0x6dc   :  { %6152 = vmatmul.mubr.bf16.gmra.mrb[120].mxu0 %v5916_v31 }
 0x704   :  { %v5713_v11 = vpop.f32.mrb[124].mxu1 }
 0x705   :  { %v5715_v63 = vpop.f32.mrb[125].mxu1 }
 0x706   :  { %v5717_v36 = vpop.f32.mrb[126].mxu1 }
 0x707   :  { %v5816_v7 = vpack.c.bf16 %v5717_v36, %v5713_v11  ;;  %v5719_v17 = vpop.f32.mrb[127].mxu1 }
 0x708   :  { %v5817_v14 = vpack.c.bf16 %v5719_v17, %v5715_v63 }
 0x709   :  { %v5886_v55 = vadd.bf16 %v12965_v45, %v5816_v7 }
 0x70a   :  { %v5887_v22 = vadd.bf16 %v12968_v43, %v5817_v14 }
 0x70b   :  { %v5918_v20 = vmax.bf16 %v13349_v38, %v5886_v55 }
 0x70c   :  { %v5919_v62 = vmax.bf16 %v13349_v38, %v5887_v22  ;;  %v5723_v25 = vpop.f32.mrb[128].mxu1 }
 0x70d   :  { %v5725_v9 = vpop.f32.mrb[129].mxu1 }
 0x70e   :  { %6159 = vmatprep.mubr.bf16.mxu0 %v5919_v62  ;;  %v5727_v8 = vpop.f32.mrb[130].mxu1 }
 0x70f   :  { %6160 = vmatmul.mubr.bf16.gmra.mrb[124].mxu0 %v5918_v20  ;;  %v5818_v19 = vpack.c.bf16 %v5727_v8, %v5723_v25  ;;  %v5729_v30 = vpop.f32.mrb[131].mxu1 }
 0x710   :  { %v5819_v5 = vpack.c.bf16 %v5729_v30, %v5725_v9 }
 0x711   :  { %v5888_v44 = vadd.bf16 %v12965_v45, %v5818_v19 }
 0x712   :  { %v5889_v29 = vadd.bf16 %v12968_v43, %v5819_v5 }
 0x713   :  { %v5920_v59 = vmax.bf16 %v13349_v38, %v5888_v44 }
 0x714   :  { %v5733_v61 = vpop.f32.mrb[132].mxu1  ;;  %v5921_v60 = vmax.bf16 %v13349_v38, %v5889_v29 }
 0x715   :  { %v5735_v1 = vpop.f32.mrb[133].mxu1 }
 0x716   :  { %6167 = vmatprep.mubr.bf16.mxu0 %v5921_v60  ;;  %v5737_v58 = vpop.f32.mrb[134].mxu1 }
 0x717   :  { %6168 = vmatmul.mubr.bf16.gmra.mrb[128].mxu0 %v5920_v59  ;;  %v5820_v4 = vpack.c.bf16 %v5737_v58, %v5733_v61  ;;  %v5739_v53 = vpop.f32.mrb[135].mxu1 }
 0x718   :  { %v5821_v51 = vpack.c.bf16 %v5739_v53, %v5735_v1 }
 0x719   :  { %v5890_v52 = vadd.bf16 %v12965_v45, %v5820_v4 }
 0x71a   :  { %v5891_v10 = vadd.bf16 %v12968_v43, %v5821_v51 }
 0x71b   :  { %v5922_v48 = vmax.bf16 %v13349_v38, %v5890_v52 }
 0x71c   :  { %v5923_v37 = vmax.bf16 %v13349_v38, %v5891_v10  ;;  %v5743_v50 = vpop.f32.mrb[136].mxu1 }
 0x71d   :  { %v5745_v32 = vpop.f32.mrb[137].mxu1 }
 0x71e   :  { %6175 = vmatprep.mubr.bf16.mxu0 %v5923_v37  ;;  %v5747_v3 = vpop.f32.mrb[138].mxu1 }
 0x71f   :  { %6176 = vmatmul.mubr.bf16.gmra.mrb[132].mxu0 %v5922_v48  ;;  %v5822_v46 = vpack.c.bf16 %v5747_v3, %v5743_v50  ;;  %v5749_v34 = vpop.f32.mrb[139].mxu1  ;;  %v13037_v48 = vld [vmem:[%s13130_s11] ss:$0 sm:$0xff] }
 0x720   :  { %v5823_v28 = vpack.c.bf16 %v5749_v34, %v5745_v32 }
 0x721   :  { %v5892_v24 = vadd.bf16 %v12965_v45, %v5822_v46 }
 0x722   :  { %v5893_v15 = vadd.bf16 %v12968_v43, %v5823_v28 }
 0x723   :  { %v5924_v35 = vmax.bf16 %v13349_v38, %v5892_v24 }
 0x724   :  { %v5753_v16 = vpop.f32.mrb[140].mxu1  ;;  %v5925_v27 = vmax.bf16 %v13349_v38, %v5893_v15 }
 0x725   :  { %v5755_v42 = vpop.f32.mrb[141].mxu1 }
 0x726   :  { %6183 = vmatprep.mubr.bf16.mxu0 %v5925_v27  ;;  %v5757_v18 = vpop.f32.mrb[142].mxu1 }
 0x727   :  { %6184 = vmatmul.mubr.bf16.gmra.mrb[136].mxu0 %v5924_v35  ;;  %v5824_v47 = vpack.c.bf16 %v5757_v18, %v5753_v16  ;;  %v5759_v12 = vpop.f32.mrb[143].mxu1 }
 0x728   :  { %v5825_v49 = vpack.c.bf16 %v5759_v12, %v5755_v42 }
 0x729   :  { %v5894_v40 = vadd.bf16 %v12965_v45, %v5824_v47 }
 0x72a   :  { %v5895_v6 = vadd.bf16 %v12968_v43, %v5825_v49 }
 0x72b   :  { %v5926_v23 = vmax.bf16 %v13349_v38, %v5894_v40 }
 0x72c   :  { %v5927_v21 = vmax.bf16 %v13349_v38, %v5895_v6  ;;  %v5763_v33 = vpop.f32.mrb[144].mxu1 }
 0x72d   :  { %v5765_v41 = vpop.f32.mrb[145].mxu1 }
 0x72e   :  { %6191 = vmatprep.mubr.bf16.mxu0 %v5927_v21  ;;  %v5767_v13 = vpop.f32.mrb[146].mxu1 }
 0x72f   :  { %6192 = vmatmul.mubr.bf16.gmra.mrb[140].mxu0 %v5926_v23  ;;  %v5826_v57 = vpack.c.bf16 %v5767_v13, %v5763_v33  ;;  %v5769_v39 = vpop.f32.mrb[147].mxu1 }
 0x730   :  { %v5827_v2 = vpack.c.bf16 %v5769_v39, %v5765_v41 }
 0x731   :  { %v5896_v54 = vadd.bf16 %v12965_v45, %v5826_v57 }
 0x732   :  { %v5897_v0 = vadd.bf16 %v12968_v43, %v5827_v2 }
 0x733   :  { %v5928_v56 = vmax.bf16 %v13349_v38, %v5896_v54 }
 0x734   :  { %v5929_v26 = vmax.bf16 %v13349_v38, %v5897_v0 }
 0x736   :  { %6199 = vmatprep.mubr.bf16.mxu0 %v5929_v26 }
 0x737   :  { %6200 = vmatmul.mubr.bf16.gmra.mrb[144].mxu0 %v5928_v56 }
 0x739   :  { %v5773_v31 = vpop.f32.mrb[148].mxu1 }
 0x73a   :  { %v5775_v11 = vpop.f32.mrb[149].mxu1 }
 0x73b   :  { %v5777_v63 = vpop.f32.mrb[150].mxu1 }
 0x73c   :  { %v5828_v36 = vpack.c.bf16 %v5777_v63, %v5773_v31  ;;  %v5779_v7 = vpop.f32.mrb[151].mxu1 }
 0x73d   :  { %v5829_v17 = vpack.c.bf16 %v5779_v7, %v5775_v11 }
 0x73e   :  { %v5898_v14 = vadd.bf16 %v12965_v45, %v5828_v36 }
 0x73f   :  { %v5899_v55 = vadd.bf16 %v12968_v43, %v5829_v17 }
 0x740   :  { %v5930_v62 = vmax.bf16 %v13349_v38, %v5898_v14 }
 0x741   :  { %v5931_v22 = vmax.bf16 %v13349_v38, %v5899_v55 }
 0x743   :  { %6207 = vmatprep.mubr.bf16.mxu0 %v5931_v22 }
 0x744   :  { %6208 = vmatmul.mubr.bf16.gmra.mrb[148].mxu0 %v5930_v62 }
 0x75c   :  { %v5783_v25 = vpop.f32.mrb[152].mxu1 }
 0x75d   :  { %v5785_v20 = vpop.f32.mrb[153].mxu1 }
 0x75e   :  { %v5787_v9 = vpop.f32.mrb[154].mxu1 }
 0x75f   :  { %v5830_v8 = vpack.c.bf16 %v5787_v9, %v5783_v25  ;;  %v5789_v19 = vpop.f32.mrb[155].mxu1 }
 0x760   :  { %v5831_v30 = vpack.c.bf16 %v5789_v19, %v5785_v20 }
 0x761   :  { %v5900_v5 = vadd.bf16 %v12965_v45, %v5830_v8 }
 0x762   :  { %v5901_v44 = vadd.bf16 %v12968_v43, %v5831_v30 }
 0x763   :  { %v5932_v61 = vmax.bf16 %v13349_v38, %v5900_v5 }
 0x764   :  { %v5933_v29 = vmax.bf16 %v13349_v38, %v5901_v44 }
 0x766   :  { %6215 = vmatprep.mubr.bf16.mxu0 %v5933_v29 }
 0x767   :  { %6216 = vmatmul.mubr.bf16.gmra.mrb[152].mxu0 %v5932_v61 }
 0x777   :  { %v5793_v60 = vpop.f32.mrb[156].mxu1 }
 0x778   :  { %v5795_v1 = vpop.f32.mrb[157].mxu1 }
 0x779   :  { %v5797_v59 = vpop.f32.mrb[158].mxu1 }
 0x77a   :  { %v5832_v58 = vpack.c.bf16 %v5797_v59, %v5793_v60  ;;  %v5799_v4 = vpop.f32.mrb[159].mxu1 }
 0x77b   :  { %v5833_v53 = vpack.c.bf16 %v5799_v4, %v5795_v1 }
 0x77c   :  { %v5902_v51 = vadd.bf16 %v12965_v45, %v5832_v58 }
 0x77d   :  { %v5903_v52 = vadd.bf16 %v12968_v43, %v5833_v53 }
 0x77e   :  { %v5934_v50 = vmax.bf16 %v13349_v38, %v5902_v51 }
 0x77f   :  { %v5935_v10 = vmax.bf16 %v13349_v38, %v5903_v52  ;;  %v7069_v37 = vpop.f32.mrb[96].mxu0 }
 0x780   :  { %v7070_v32 = vpop.f32.mrb[97].mxu0 }
 0x781   :  { %6223 = vmatprep.mubr.bf16.mxu0 %v5935_v10  ;;  %v7071_v3 = vadd.f32 %v7070_v32, %v7069_v37  ;;  %v7072_v46 = vpop.f32.mrb[98].mxu0 }
 0x782   :  { %6224 = vmatmul.mubr.bf16.gmra.mrb[156].mxu0 %v5934_v50  ;;  %v7073_v34 = vpop.f32.mrb[99].mxu0 }
 0x783   :  { %v6106_v45 = vadd.f32 %v7071_v3, %v13037_v48  ;;  %v7074_v28 = vadd.f32 %v7073_v34, %v7072_v46 }
 0x785   :  { %v6862_v43 = vmul.f32 -1.442695, %v6106_v45  ;;  %v6109_v24 = vadd.f32 %v7074_v28, %v13037_v48 }
 0x787   :  { %7651 = vpow2.f32 %v6862_v43  ;;  %v6863_v15 = vmul.f32 -1.442695, %v6109_v24  ;;  %v7075_v38 = vpop.f32.mrb[100].mxu0 }
 0x788   :  { %v7076_v16 = vpop.f32.mrb[101].mxu0 }
 0x789   :  { %7653 = vpow2.f32 %v6863_v15  ;;  %v7077_v27 = vadd.f32 %v7076_v16, %v7075_v38  ;;  %v7078_v42 = vpop.f32.mrb[102].mxu0 }
 0x78a   :  { %v7079_v35 = vpop.f32.mrb[103].mxu0 }
 0x78b   :  { %v6114_v18 = vadd.f32 %v7077_v27, %v13037_v48  ;;  %v7080_v47 = vadd.f32 %v7079_v35, %v7078_v42 }
 0x78d   :  { %v6864_v12 = vmul.f32 -1.442695, %v6114_v18  ;;  %v6117_v49 = vadd.f32 %v7080_v47, %v13037_v48 }
 0x78f   :  { %7655 = vpow2.f32 %v6864_v12  ;;  %v6865_v40 = vmul.f32 -1.442695, %v6117_v49  ;;  %v7081_v6 = vpop.f32.mrb[104].mxu0 }
 0x790   :  { %v7082_v21 = vpop.f32.mrb[105].mxu0 }
 0x791   :  { %v7652_v33 = vpop.eup %7651  ;;  %7657 = vpow2.f32 %v6865_v40  ;;  %v7083_v23 = vadd.f32 %v7082_v21, %v7081_v6  ;;  %v7084_v41 = vpop.f32.mrb[106].mxu0 }
 0x792   :  { %v6328_v13 = vadd.f32 1.0, %v7652_v33  ;;  %v7085_v57 = vpop.f32.mrb[107].mxu0 }
 0x793   :  { %v7654_v39 = vpop.eup %7653  ;;  %v6122_v2 = vadd.f32 %v7083_v23, %v13037_v48  ;;  %v7086_v54 = vadd.f32 %v7085_v57, %v7084_v41 }
 0x794   :  { %v6329_v0 = vadd.f32 1.0, %v7654_v39  ;;  %7659 = vrcp.f32 %v6328_v13 }
 0x795   :  { %v6866_v26 = vmul.f32 -1.442695, %v6122_v2  ;;  %v6125_v56 = vadd.f32 %v7086_v54, %v13037_v48 }
 0x796   :  { %7661 = vrcp.f32 %v6329_v0 }
 0x797   :  { %7663 = vpow2.f32 %v6866_v26  ;;  %v6867_v31 = vmul.f32 -1.442695, %v6125_v56  ;;  %v7087_v11 = vpop.f32.mrb[108].mxu0 }
 0x798   :  { %v7088_v63 = vpop.f32.mrb[109].mxu0 }
 0x799   :  { %v7656_v36 = vpop.eup %7655  ;;  %7665 = vpow2.f32 %v6867_v31  ;;  %v7089_v7 = vadd.f32 %v7088_v63, %v7087_v11  ;;  %v7090_v17 = vpop.f32.mrb[110].mxu0 }
 0x79a   :  { %v6330_v14 = vadd.f32 1.0, %v7656_v36  ;;  %v7091_v55 = vpop.f32.mrb[111].mxu0 }
 0x79b   :  { %v7658_v22 = vpop.eup %7657  ;;  %v6130_v62 = vadd.f32 %v7089_v7, %v13037_v48  ;;  %v7092_v25 = vadd.f32 %v7091_v55, %v7090_v17 }
 0x79c   :  { %v6331_v20 = vadd.f32 1.0, %v7658_v22  ;;  %7667 = vrcp.f32 %v6330_v14 }
 0x79d   :  { %v6868_v9 = vmul.f32 -1.442695, %v6130_v62  ;;  %v6133_v8 = vadd.f32 %v7092_v25, %v13037_v48 }
 0x79e   :  { %7669 = vrcp.f32 %v6331_v20  ;;  %v7660_v19 = vpop.eup %7659 }
 0x79f   :  { %7671 = vpow2.f32 %v6868_v9  ;;  %v6869_v30 = vmul.f32 -1.442695, %v6133_v8  ;;  %v7093_v5 = vpop.f32.mrb[112].mxu0 }
 0x7a0   :  { %v7662_v44 = vpop.eup %7661  ;;  %v7094_v29 = vpop.f32.mrb[113].mxu0 }
 0x7a1   :  { %v7664_v61 = vpop.eup %7663  ;;  %v6961_v60 = vpack.c.bf16 %v7662_v44, %v7660_v19  ;;  %7673 = vpow2.f32 %v6869_v30  ;;  %v7095_v1 = vadd.f32 %v7094_v29, %v7093_v5  ;;  %v7096_v59 = vpop.f32.mrb[114].mxu0 }
 0x7a2   :  { %v6332_v58 = vadd.f32 1.0, %v7664_v61  ;;  %v7097_v4 = vpop.f32.mrb[115].mxu0 }
 0x7a3   :  { %v7666_v53 = vpop.eup %7665  ;;  %6962 = vst [vmem:[%s13131_s12] sm:$0xff] %v6961_v60   ;;  %v6138_v51 = vadd.f32 %v7095_v1, %v13037_v48  ;;  %v7098_v52 = vadd.f32 %v7097_v4, %v7096_v59 }
 0x7a4   :  { %v6333_v10 = vadd.f32 1.0, %v7666_v53  ;;  %7675 = vrcp.f32 %v6332_v58 }
 0x7a5   :  { %v6870_v37 = vmul.f32 -1.442695, %v6138_v51  ;;  %v6141_v50 = vadd.f32 %v7098_v52, %v13037_v48 }
 0x7a6   :  { %7677 = vrcp.f32 %v6333_v10  ;;  %v7668_v32 = vpop.eup %7667 }
 0x7a7   :  { %7679 = vpow2.f32 %v6870_v37  ;;  %v6871_v3 = vmul.f32 -1.442695, %v6141_v50  ;;  %v7099_v46 = vpop.f32.mrb[116].mxu0 }
 0x7a8   :  { %v7670_v34 = vpop.eup %7669  ;;  %v7100_v45 = vpop.f32.mrb[117].mxu0 }
 0x7a9   :  { %v7672_v28 = vpop.eup %7671  ;;  %v6966_v43 = vpack.c.bf16 %v7670_v34, %v7668_v32  ;;  %7681 = vpow2.f32 %v6871_v3  ;;  %v7101_v24 = vadd.f32 %v7100_v45, %v7099_v46  ;;  %v7102_v15 = vpop.f32.mrb[118].mxu0 }
 0x7aa   :  { %v6334_v38 = vadd.f32 1.0, %v7672_v28  ;;  %v7103_v16 = vpop.f32.mrb[119].mxu0 }
 0x7ab   :  { %v7674_v27 = vpop.eup %7673  ;;  %7038 = vst [vmem:[%s13131_s12 + $0x8] sm:$0xff] %v6966_v43   ;;  %v6146_v42 = vadd.f32 %v7101_v24, %v13037_v48  ;;  %v7104_v35 = vadd.f32 %v7103_v16, %v7102_v15 }
 0x7ac   :  { %v6335_v18 = vadd.f32 1.0, %v7674_v27  ;;  %7683 = vrcp.f32 %v6334_v38 }
 0x7ad   :  { %v6872_v47 = vmul.f32 -1.442695, %v6146_v42  ;;  %v6149_v12 = vadd.f32 %v7104_v35, %v13037_v48 }
 0x7ae   :  { %7685 = vrcp.f32 %v6335_v18  ;;  %v7676_v49 = vpop.eup %7675 }
 0x7af   :  { %7687 = vpow2.f32 %v6872_v47  ;;  %v6873_v40 = vmul.f32 -1.442695, %v6149_v12  ;;  %v7105_v6 = vpop.f32.mrb[120].mxu0 }
 0x7b0   :  { %v7678_v21 = vpop.eup %7677  ;;  %v7106_v33 = vpop.f32.mrb[121].mxu0 }
 0x7b1   :  { %v7680_v23 = vpop.eup %7679  ;;  %v6971_v41 = vpack.c.bf16 %v7678_v21, %v7676_v49  ;;  %7689 = vpow2.f32 %v6873_v40  ;;  %v7107_v13 = vadd.f32 %v7106_v33, %v7105_v6  ;;  %v7108_v57 = vpop.f32.mrb[122].mxu0 }
 0x7b2   :  { %v6336_v39 = vadd.f32 1.0, %v7680_v23  ;;  %v7109_v2 = vpop.f32.mrb[123].mxu0 }
 0x7b3   :  { %v7682_v54 = vpop.eup %7681  ;;  %7039 = vst [vmem:[%s13131_s12 + $0x10] sm:$0xff] %v6971_v41   ;;  %v6154_v0 = vadd.f32 %v7107_v13, %v13037_v48  ;;  %v7110_v26 = vadd.f32 %v7109_v2, %v7108_v57 }
 0x7b4   :  { %v6337_v56 = vadd.f32 1.0, %v7682_v54  ;;  %7691 = vrcp.f32 %v6336_v39 }
 0x7b5   :  { %v6874_v31 = vmul.f32 -1.442695, %v6154_v0  ;;  %v6157_v11 = vadd.f32 %v7110_v26, %v13037_v48 }
 0x7b6   :  { %7693 = vrcp.f32 %v6337_v56  ;;  %v7684_v63 = vpop.eup %7683 }
 0x7b7   :  { %7695 = vpow2.f32 %v6874_v31  ;;  %v6875_v36 = vmul.f32 -1.442695, %v6157_v11 }
 0x7b8   :  { %v7686_v7 = vpop.eup %7685 }
 0x7b9   :  { %v7688_v17 = vpop.eup %7687  ;;  %v6976_v14 = vpack.c.bf16 %v7686_v7, %v7684_v63  ;;  %7697 = vpow2.f32 %v6875_v36 }
 0x7ba   :  { %v6338_v55 = vadd.f32 1.0, %v7688_v17 }
 0x7bb   :  { %v7690_v22 = vpop.eup %7689  ;;  %7040 = vst [vmem:[%s13131_s12 + $0x18] sm:$0xff] %v6976_v14  }
 0x7bc   :  { %v6339_v62 = vadd.f32 1.0, %v7690_v22  ;;  %7699 = vrcp.f32 %v6338_v55 }
 0x7be   :  { %7701 = vrcp.f32 %v6339_v62  ;;  %v7692_v25 = vpop.eup %7691 }
 0x7c0   :  { %v7694_v20 = vpop.eup %7693 }
 0x7c1   :  { %v7696_v9 = vpop.eup %7695  ;;  %v6981_v8 = vpack.c.bf16 %v7694_v20, %v7692_v25 }
 0x7c2   :  { %v6340_v19 = vadd.f32 1.0, %v7696_v9 }
 0x7c3   :  { %v7698_v30 = vpop.eup %7697  ;;  %7041 = vst [vmem:[%s13131_s12 + $0x20] sm:$0xff] %v6981_v8  }
 0x7c4   :  { %v6341_v5 = vadd.f32 1.0, %v7698_v30  ;;  %7703 = vrcp.f32 %v6340_v19 }
 0x7c6   :  { %7705 = vrcp.f32 %v6341_v5  ;;  %v7700_v44 = vpop.eup %7699 }
 0x7c8   :  { %v7702_v29 = vpop.eup %7701 }
 0x7c9   :  { %v6986_v61 = vpack.c.bf16 %v7702_v29, %v7700_v44 }
 0x7cb   :  { %7042 = vst [vmem:[%s13131_s12 + $0x28] sm:$0xff] %v6986_v61  }
 0x7ce   :  { %v7704_v60 = vpop.eup %7703 }
 0x7d0   :  { %v7706_v1 = vpop.eup %7705 }
 0x7d1   :  { %v6991_v59 = vpack.c.bf16 %v7706_v1, %v7704_v60 }
 0x7d3   :  { %7043 = vst [vmem:[%s13131_s12 + $0x30] sm:$0xff] %v6991_v59  }
 0x7e2   :  { %v7111_v58 = vpop.f32.mrb[124].mxu0 }
 0x7e3   :  { %v7112_v4 = vpop.f32.mrb[125].mxu0 }
 0x7e4   :  { %v7113_v53 = vadd.f32 %v7112_v4, %v7111_v58  ;;  %v7114_v51 = vpop.f32.mrb[126].mxu0 }
 0x7e5   :  { %v7115_v52 = vpop.f32.mrb[127].mxu0 }
 0x7e6   :  { %v6162_v10 = vadd.f32 %v7113_v53, %v13037_v48  ;;  %v7116_v37 = vadd.f32 %v7115_v52, %v7114_v51 }
 0x7e8   :  { %v6876_v50 = vmul.f32 -1.442695, %v6162_v10  ;;  %v6165_v32 = vadd.f32 %v7116_v37, %v13037_v48 }
 0x7ea   :  { %7707 = vpow2.f32 %v6876_v50  ;;  %v6877_v3 = vmul.f32 -1.442695, %v6165_v32  ;;  %v7117_v46 = vpop.f32.mrb[128].mxu0 }
 0x7eb   :  { %v7118_v34 = vpop.f32.mrb[129].mxu0 }
 0x7ec   :  { %7709 = vpow2.f32 %v6877_v3  ;;  %v7119_v45 = vadd.f32 %v7118_v34, %v7117_v46  ;;  %v7120_v28 = vpop.f32.mrb[130].mxu0 }
 0x7ed   :  { %v7121_v43 = vpop.f32.mrb[131].mxu0 }
 0x7ee   :  { %v6170_v24 = vadd.f32 %v7119_v45, %v13037_v48  ;;  %v7122_v15 = vadd.f32 %v7121_v43, %v7120_v28 }
 0x7f0   :  { %v6878_v38 = vmul.f32 -1.442695, %v6170_v24  ;;  %v6173_v16 = vadd.f32 %v7122_v15, %v13037_v48 }
 0x7f2   :  { %7711 = vpow2.f32 %v6878_v38  ;;  %v6879_v27 = vmul.f32 -1.442695, %v6173_v16  ;;  %v7123_v42 = vpop.f32.mrb[132].mxu0 }
 0x7f3   :  { %v7124_v35 = vpop.f32.mrb[133].mxu0 }
 0x7f4   :  { %v7708_v18 = vpop.eup %7707  ;;  %7713 = vpow2.f32 %v6879_v27  ;;  %v7125_v47 = vadd.f32 %v7124_v35, %v7123_v42  ;;  %v7126_v12 = vpop.f32.mrb[134].mxu0 }
 0x7f5   :  { %v6342_v49 = vadd.f32 1.0, %v7708_v18  ;;  %v7127_v40 = vpop.f32.mrb[135].mxu0 }
 0x7f6   :  { %v7710_v6 = vpop.eup %7709  ;;  %v6178_v21 = vadd.f32 %v7125_v47, %v13037_v48  ;;  %v7128_v33 = vadd.f32 %v7127_v40, %v7126_v12 }
 0x7f7   :  { %v6343_v23 = vadd.f32 1.0, %v7710_v6  ;;  %7715 = vrcp.f32 %v6342_v49 }
 0x7f8   :  { %v6880_v41 = vmul.f32 -1.442695, %v6178_v21  ;;  %v6181_v13 = vadd.f32 %v7128_v33, %v13037_v48 }
 0x7f9   :  { %7717 = vrcp.f32 %v6343_v23 }
 0x7fa   :  { %7719 = vpow2.f32 %v6880_v41  ;;  %v6881_v57 = vmul.f32 -1.442695, %v6181_v13  ;;  %v7129_v39 = vpop.f32.mrb[136].mxu0 }
 0x7fb   :  { %v7130_v2 = vpop.f32.mrb[137].mxu0 }
 0x7fc   :  { %v7712_v54 = vpop.eup %7711  ;;  %7721 = vpow2.f32 %v6881_v57  ;;  %v7131_v0 = vadd.f32 %v7130_v2, %v7129_v39  ;;  %v7132_v26 = vpop.f32.mrb[138].mxu0 }
 0x7fd   :  { %v6344_v56 = vadd.f32 1.0, %v7712_v54  ;;  %v7133_v31 = vpop.f32.mrb[139].mxu0 }
 0x7fe   :  { %v7714_v11 = vpop.eup %7713  ;;  %v6186_v63 = vadd.f32 %v7131_v0, %v13037_v48  ;;  %v7134_v36 = vadd.f32 %v7133_v31, %v7132_v26 }
 0x7ff   :  { %v6345_v7 = vadd.f32 1.0, %v7714_v11  ;;  %7723 = vrcp.f32 %v6344_v56 }
 0x800   :  { %v6882_v17 = vmul.f32 -1.442695, %v6186_v63  ;;  %v6189_v14 = vadd.f32 %v7134_v36, %v13037_v48 }
 0x801   :  { %7725 = vrcp.f32 %v6345_v7  ;;  %v7716_v55 = vpop.eup %7715 }
 0x802   :  { %7727 = vpow2.f32 %v6882_v17  ;;  %v6883_v22 = vmul.f32 -1.442695, %v6189_v14  ;;  %v7135_v62 = vpop.f32.mrb[140].mxu0 }
 0x803   :  { %v7718_v25 = vpop.eup %7717  ;;  %v7136_v20 = vpop.f32.mrb[141].mxu0 }
 0x804   :  { %v7720_v9 = vpop.eup %7719  ;;  %v6996_v8 = vpack.c.bf16 %v7718_v25, %v7716_v55  ;;  %7729 = vpow2.f32 %v6883_v22  ;;  %v7137_v19 = vadd.f32 %v7136_v20, %v7135_v62  ;;  %v7138_v30 = vpop.f32.mrb[142].mxu0 }
 0x805   :  { %v6346_v5 = vadd.f32 1.0, %v7720_v9  ;;  %v7139_v44 = vpop.f32.mrb[143].mxu0 }
 0x806   :  { %v7722_v29 = vpop.eup %7721  ;;  %7044 = vst [vmem:[%s13131_s12 + $0x38] sm:$0xff] %v6996_v8   ;;  %v6194_v61 = vadd.f32 %v7137_v19, %v13037_v48  ;;  %v7140_v60 = vadd.f32 %v7139_v44, %v7138_v30 }
 0x807   :  { %v6347_v1 = vadd.f32 1.0, %v7722_v29  ;;  %7731 = vrcp.f32 %v6346_v5 }
 0x808   :  { %v6884_v59 = vmul.f32 -1.442695, %v6194_v61  ;;  %v6197_v58 = vadd.f32 %v7140_v60, %v13037_v48 }
 0x809   :  { %7733 = vrcp.f32 %v6347_v1  ;;  %v7724_v4 = vpop.eup %7723 }
 0x80a   :  { %7735 = vpow2.f32 %v6884_v59  ;;  %v6885_v53 = vmul.f32 -1.442695, %v6197_v58  ;;  %v7141_v51 = vpop.f32.mrb[144].mxu0 }
 0x80b   :  { %v7726_v52 = vpop.eup %7725  ;;  %v7142_v10 = vpop.f32.mrb[145].mxu0 }
 0x80c   :  { %v7728_v37 = vpop.eup %7727  ;;  %v7001_v50 = vpack.c.bf16 %v7726_v52, %v7724_v4  ;;  %7737 = vpow2.f32 %v6885_v53  ;;  %v7143_v32 = vadd.f32 %v7142_v10, %v7141_v51  ;;  %v7144_v3 = vpop.f32.mrb[146].mxu0 }
 0x80d   :  { %v6348_v46 = vadd.f32 1.0, %v7728_v37  ;;  %v7145_v34 = vpop.f32.mrb[147].mxu0 }
 0x80e   :  { %v7730_v45 = vpop.eup %7729  ;;  %7045 = vst [vmem:[%s13131_s12 + $0x40] sm:$0xff] %v7001_v50   ;;  %v6202_v28 = vadd.f32 %v7143_v32, %v13037_v48  ;;  %v7146_v43 = vadd.f32 %v7145_v34, %v7144_v3 }
 0x80f   :  { %v6349_v24 = vadd.f32 1.0, %v7730_v45  ;;  %7739 = vrcp.f32 %v6348_v46 }
 0x810   :  { %v6886_v15 = vmul.f32 -1.442695, %v6202_v28  ;;  %v6205_v38 = vadd.f32 %v7146_v43, %v13037_v48 }
 0x811   :  { %7741 = vrcp.f32 %v6349_v24  ;;  %v7732_v16 = vpop.eup %7731 }
 0x812   :  { %7743 = vpow2.f32 %v6886_v15  ;;  %v6887_v27 = vmul.f32 -1.442695, %v6205_v38 }
 0x813   :  { %v7734_v42 = vpop.eup %7733 }
 0x814   :  { %v7736_v35 = vpop.eup %7735  ;;  %v7006_v18 = vpack.c.bf16 %v7734_v42, %v7732_v16  ;;  %7745 = vpow2.f32 %v6887_v27 }
 0x815   :  { %v6350_v47 = vadd.f32 1.0, %v7736_v35 }
 0x816   :  { %v7738_v12 = vpop.eup %7737  ;;  %7046 = vst [vmem:[%s13131_s12 + $0x48] sm:$0xff] %v7006_v18  }
 0x817   :  { %v6351_v49 = vadd.f32 1.0, %v7738_v12  ;;  %v7147_v40 = vpop.f32.mrb[148].mxu0  ;;  %7747 = vrcp.f32 %v6350_v47 }
 0x818   :  { %v7148_v6 = vpop.f32.mrb[149].mxu0 }
 0x819   :  { %7749 = vrcp.f32 %v6351_v49  ;;  %v7149_v21 = vadd.f32 %v7148_v6, %v7147_v40  ;;  %v7150_v33 = vpop.f32.mrb[150].mxu0  ;;  %v7740_v23 = vpop.eup %7739 }
 0x81a   :  { %v7151_v41 = vpop.f32.mrb[151].mxu0 }
 0x81b   :  { %v7742_v13 = vpop.eup %7741  ;;  %v6210_v57 = vadd.f32 %v7149_v21, %v13037_v48  ;;  %v7152_v39 = vadd.f32 %v7151_v41, %v7150_v33 }
 0x81c   :  { %v7744_v2 = vpop.eup %7743  ;;  %v7011_v54 = vpack.c.bf16 %v7742_v13, %v7740_v23 }
 0x81d   :  { %v6352_v0 = vadd.f32 1.0, %v7744_v2  ;;  %v6888_v26 = vmul.f32 -1.442695, %v6210_v57  ;;  %v6213_v56 = vadd.f32 %v7152_v39, %v13037_v48 }
 0x81e   :  { %v7746_v31 = vpop.eup %7745  ;;  %7047 = vst [vmem:[%s13131_s12 + $0x50] sm:$0xff] %v7011_v54  }
 0x81f   :  { %7751 = vrcp.f32 %v6352_v0  ;;  %v6353_v11 = vadd.f32 1.0, %v7746_v31  ;;  %v6889_v63 = vmul.f32 -1.442695, %v6213_v56 }
 0x820   :  { %7753 = vpow2.f32 %v6888_v26 }
 0x821   :  { %7755 = vrcp.f32 %v6353_v11  ;;  %v7748_v36 = vpop.eup %7747 }
 0x822   :  { %7757 = vpow2.f32 %v6889_v63 }
 0x823   :  { %v7750_v7 = vpop.eup %7749 }
 0x824   :  { %v7016_v17 = vpack.c.bf16 %v7750_v7, %v7748_v36 }
 0x826   :  { %7048 = vst [vmem:[%s13131_s12 + $0x58] sm:$0xff] %v7016_v17  }
 0x829   :  { %v7752_v14 = vpop.eup %7751 }
 0x82a   :  { %v7754_v55 = vpop.eup %7753 }
 0x82b   :  { %v7756_v22 = vpop.eup %7755  ;;  %v6354_v62 = vadd.f32 1.0, %v7754_v55 }
 0x82c   :  { %v7758_v25 = vpop.eup %7757  ;;  %v7021_v20 = vpack.c.bf16 %v7756_v22, %v7752_v14 }
 0x82d   :  { %v6355_v9 = vadd.f32 1.0, %v7758_v25  ;;  %7759 = vrcp.f32 %v6354_v62 }
 0x82e   :  { %7049 = vst [vmem:[%s13131_s12 + $0x60] sm:$0xff] %v7021_v20  }
 0x82f   :  { %7761 = vrcp.f32 %v6355_v9 }
 0x837   :  { %v7760_v8 = vpop.eup %7759 }
 0x839   :  { %v7762_v19 = vpop.eup %7761 }
 0x83a   :  { %v7026_v30 = vpack.c.bf16 %v7762_v19, %v7760_v8  ;;  %v7153_v5 = vpop.f32.mrb[152].mxu0 }
 0x83b   :  { %v7154_v44 = vpop.f32.mrb[153].mxu0 }
 0x83c   :  { %7050 = vst [vmem:[%s13131_s12 + $0x68] sm:$0xff] %v7026_v30   ;;  %v7155_v29 = vadd.f32 %v7154_v44, %v7153_v5  ;;  %v7156_v61 = vpop.f32.mrb[154].mxu0 }
 0x83d   :  { %v7157_v60 = vpop.f32.mrb[155].mxu0 }
 0x83e   :  { %v6218_v1 = vadd.f32 %v7155_v29, %v13037_v48  ;;  %v7158_v59 = vadd.f32 %v7157_v60, %v7156_v61 }
 0x840   :  { %v6890_v58 = vmul.f32 -1.442695, %v6218_v1  ;;  %v6221_v4 = vadd.f32 %v7158_v59, %v13037_v48 }
 0x842   :  { %7763 = vpow2.f32 %v6890_v58  ;;  %v6891_v53 = vmul.f32 -1.442695, %v6221_v4 }
 0x844   :  { %7765 = vpow2.f32 %v6891_v53 }
 0x84c   :  { %v7764_v51 = vpop.eup %7763 }
 0x84d   :  { %v6356_v52 = vadd.f32 1.0, %v7764_v51 }
 0x84e   :  { %v7766_v10 = vpop.eup %7765 }
 0x84f   :  { %v6357_v37 = vadd.f32 1.0, %v7766_v10  ;;  %7767 = vrcp.f32 %v6356_v52 }
 0x851   :  { %7769 = vrcp.f32 %v6357_v37 }
 0x855   :  { %v7159_v50 = vpop.f32.mrb[156].mxu0 }
 0x856   :  { %v7160_v32 = vpop.f32.mrb[157].mxu0 }
 0x857   :  { %v7161_v3 = vadd.f32 %v7160_v32, %v7159_v50  ;;  %v7162_v46 = vpop.f32.mrb[158].mxu0 }
 0x858   :  { %v7163_v34 = vpop.f32.mrb[159].mxu0 }
 0x859   :  { %v6226_v45 = vadd.f32 %v7161_v3, %v13037_v48  ;;  %v7164_v28 = vadd.f32 %v7163_v34, %v7162_v46  ;;  %v7768_v43 = vpop.eup %7767 }
 0x85b   :  { %v7770_v24 = vpop.eup %7769  ;;  %v6892_v15 = vmul.f32 -1.442695, %v6226_v45  ;;  %v6229_v38 = vadd.f32 %v7164_v28, %v13037_v48 }
 0x85c   :  { %v7031_v16 = vpack.c.bf16 %v7770_v24, %v7768_v43 }
 0x85d   :  { %7771 = vpow2.f32 %v6892_v15  ;;  %v6893_v27 = vmul.f32 -1.442695, %v6229_v38 }
 0x85e   :  { %7051 = vst [vmem:[%s13131_s12 + $0x70] sm:$0xff] %v7031_v16  }
 0x85f   :  { %7773 = vpow2.f32 %v6893_v27 }
 0x867   :  { %v7772_v42 = vpop.eup %7771 }
 0x868   :  { %v6358_v35 = vadd.f32 1.0, %v7772_v42 }
 0x869   :  { %v7774_v18 = vpop.eup %7773 }
 0x86a   :  { %v6359_v47 = vadd.f32 1.0, %v7774_v18  ;;  %7775 = vrcp.f32 %v6358_v35 }
 0x86c   :  { %7777 = vrcp.f32 %v6359_v47 }
 0x874   :  { %v7776_v12 = vpop.eup %7775 }
 0x876   :  { %v7778_v49 = vpop.eup %7777 }
 0x877   :  { %v7036_v40 = vpack.c.bf16 %v7778_v49, %v7776_v12 }
 0x879   :  { %7052 = vst [vmem:[%s13131_s12 + $0x78] sm:$0xff] %v7036_v40  }

</bundles_post_ra>
